<compile_context>
chip_gen: v5e
topology: v5e:2x2
jax: 0.10.0
libtpu: 0.0.40
codegen_flags: <defaults>
</compile_context>

<pallas_src>
import jax
import jax.numpy as jnp
from jax.experimental import pallas as pl
from jax.experimental.pallas import tpu as pltpu


# -----------------------------------------------------------------------------
# In-kernel helpers
# -----------------------------------------------------------------------------
def _conv3x3_rows(inp_ref, w_ref, b_ref, r0, rows, w, cout):
    """3x3 conv (on a 1-px zero-padded input ref) + bias + ReLU.

    Computes `rows` output rows starting at output row r0, full width `w`.
      inp_ref: (h+2, w+2, cin) padded input (bf16 or f32)
      w_ref:   (3, 3, cin, cout) bf16
      b_ref:   (1, cout) f32
    Returns (rows*w, cout) f32, rows ordered (h, w).
    """
    cin = inp_ref.shape[-1]
    m = rows * w
    acc = jnp.zeros((m, cout), jnp.float32)
    for kh in range(3):
        for kw in range(3):
            patch = inp_ref[pl.ds(r0 + kh, rows), kw:kw + w, :]
            patch = patch.reshape(m, cin).astype(jnp.bfloat16)
            # Tight accumulating-dot chain -> in-place MXU (MRB) accumulation
            # on v7x; MRF + VPU adds on v5e/v6e.
            acc = acc + jnp.dot(patch, w_ref[kh, kw],
                                preferred_element_type=jnp.float32)
    return jnp.maximum(acc + b_ref[...], 0.0)


def _pool2x2(y, rows, w, cout, stage_ref):
    """2x2 / stride-2 max-pool of y = (rows*w, cout) f32, rows ordered (h, w).

    H-pairs: tile-granular major-dim split (w is a multiple of 8 rows, so each
    group is whole (8,128) tiles -> no relayout).  W-pairs: two sublane
    stride-2 loads from a VMEM staging buffer + jnp.maximum.
    Returns (rows//2 * w//2, cout) f32, rows ordered (ho, wo).
    """
    yh = y.reshape(rows // 2, 2, w, cout)
    hm = jnp.maximum(yh[:, 0], yh[:, 1]).reshape((rows // 2) * w, cout)
    stage_ref[...] = hm
    half = (rows // 2) * (w // 2)
    even = stage_ref[pl.ds(0, half, stride=2), :]
    odd = stage_ref[pl.ds(1, half, stride=2), :]
    return jnp.maximum(even, odd)


# -----------------------------------------------------------------------------
# Fused forward kernel: one grid step == one sample
# -----------------------------------------------------------------------------
def fused_cnn_kernel(xp_ref, w1_ref, b1_ref, w2_ref, b2_ref, w3_ref, b3_ref,
                     wf1_ref, bf1_ref, wf2_ref, bf2_ref, o_ref,
                     act1p_ref, act2p_ref, stage1_ref, stage2_ref, stage3_ref):
    # Zero the padded activation scratches each step: the interior is fully
    # overwritten below, only the 1-px halo must stay 0.  (Cheap, and safe
    # under megacore grid partitioning where a core may never run step 0.)
    act1p_ref[...] = jnp.zeros_like(act1p_ref)
    act2p_ref[...] = jnp.zeros_like(act2p_ref)

    # ---- conv1 (3 -> 32) + ReLU + pool: 32x32 -> 16x16, chunked over rows ----
    # 4 chunks of 8 output rows each keep the accumulator at (256, 32) f32
    # (32 vregs) instead of one (1024, 32) accumulator (128 vregs -> spills).
    def conv1_chunk(ci, carry):
        r0 = ci * 8
        y = _conv3x3_rows(xp_ref, w1_ref, b1_ref, r0, 8, 32, 32)   # (256, 32)
        pooled = _pool2x2(y, 8, 32, 32, stage1_ref)                # (64, 32)
        act1p_ref[pl.ds(1 + ci * 4, 4), 1:17, :] = pooled.reshape(4, 16, 32)
        return carry

    jax.lax.fori_loop(0, 4, conv1_chunk, 0)

    # ---- conv2 (32 -> 64) + ReLU + pool: 16x16 -> 8x8 (single chunk) ---------
    y = _conv3x3_rows(act1p_ref, w2_ref, b2_ref, 0, 16, 16, 64)    # (256, 64)
    pooled = _pool2x2(y, 16, 16, 64, stage2_ref)                   # (64, 64)
    act2p_ref[1:9, 1:9, :] = pooled.reshape(8, 8, 64)

    # ---- conv3 (64 -> 128) + ReLU + pool: 8x8 -> 4x4 (single chunk) ----------
    y = _conv3x3_rows(act2p_ref, w3_ref, b3_ref, 0, 8, 8, 128)     # (64, 128)
    act3 = _pool2x2(y, 8, 8, 128, stage3_ref)                      # (16, 128)

    # ---- fc1 + ReLU + (dropout = identity) + fc2 -----------------------------
    # act3 rows are the 16 spatial positions s = h*4 + w with channels in
    # lanes; wf1 was pre-permuted to (16, 128, 256) so the torch (C,H,W)
    # flatten needs no in-kernel relayout: fc1 == a 4x4 VALID conv = 16 K=128
    # accumulated taps (the ~0.5 MFLOP head is launch-overhead, not MXU, bound).
    a3 = act3.astype(jnp.bfloat16)
    hid = jnp.zeros((1, 256), jnp.float32)
    for s in range(16):
        hid = hid + jnp.dot(a3[s:s + 1, :], wf1_ref[s],
                            preferred_element_type=jnp.float32)
    hid = jnp.maximum(hid + bf1_ref[...], 0.0)
    # TODO(synk): training-mode dropout(p=0.5) would mask `hid` here.
    out = jnp.dot(hid.astype(jnp.bfloat16), wf2_ref[...],
                  preferred_element_type=jnp.float32) + bf2_ref[...]
    o_ref[...] = out.reshape(1, 1, -1).astype(o_ref.dtype)


# -----------------------------------------------------------------------------
# Wrapper
# -----------------------------------------------------------------------------
def basic_cnn_forward(x_nchw, params):
    """Equivalent of BasicCNN.forward (inference: dropout is identity).

    `params` must come from prepare_params() (bf16 weights, (16,128,256) wf1).
    """
    p = params
    n, cin, h, w = x_nchw.shape
    assert (cin, h, w) == (3, 32, 32), "BasicCNN's fc1 fixes the input to 3x32x32"
    num_classes = p["wf2"].shape[-1]

    x = jnp.transpose(x_nchw, (0, 2, 3, 1)).astype(jnp.bfloat16)   # NCHW -> NHWC
    # One-off 1-px halo pad on the tiny network input only (~14 KB HBM traffic
    # for N=2); all other halos / activations stay inside the fused kernel.
    xp = jnp.pad(x, ((0, 0), (1, 1), (1, 1), (0, 0)))

    out = pl.pallas_call(
        fused_cnn_kernel,
        out_shape=jax.ShapeDtypeStruct((n, 1, num_classes), jnp.float32),
        grid=(n,),
        in_specs=[
            pl.BlockSpec((None, 34, 34, 3), lambda i: (i, 0, 0, 0)),   # input
            pl.BlockSpec((3, 3, 3, 32), lambda i: (0, 0, 0, 0)),       # conv1 w
            pl.BlockSpec((1, 32), lambda i: (0, 0)),                   # conv1 b
            pl.BlockSpec((3, 3, 32, 64), lambda i: (0, 0, 0, 0)),      # conv2 w
            pl.BlockSpec((1, 64), lambda i: (0, 0)),                   # conv2 b
            pl.BlockSpec((3, 3, 64, 128), lambda i: (0, 0, 0, 0)),     # conv3 w
            pl.BlockSpec((1, 128), lambda i: (0, 0)),                  # conv3 b
            pl.BlockSpec((16, 128, 256), lambda i: (0, 0, 0)),         # fc1 w
            pl.BlockSpec((1, 256), lambda i: (0, 0)),                  # fc1 b
            pl.BlockSpec((256, num_classes), lambda i: (0, 0)),        # fc2 w
            pl.BlockSpec((1, num_classes), lambda i: (0, 0)),          # fc2 b
        ],
        out_specs=pl.BlockSpec((1, 1, num_classes), lambda i: (i, 0, 0)),
        scratch_shapes=[
            pltpu.VMEM((18, 18, 32), jnp.float32),    # conv2 input (1-px halo)
            pltpu.VMEM((10, 10, 64), jnp.float32),    # conv3 input (1-px halo)
            pltpu.VMEM((128, 32), jnp.float32),       # conv1 pool staging
            pltpu.VMEM((128, 64), jnp.float32),       # conv2 pool staging
            pltpu.VMEM((32, 128), jnp.float32),       # conv3 pool staging
        ],
        compiler_params=pltpu.CompilerParams(
            dimension_semantics=("parallel",),
            # Fused working set ~3 MiB (weights x2 pipeline buffers + scratch):
            # explicit limit that is safe on v7x (64 MiB physical) and raises
            # v5e's 16 MiB scoped default headroom.
            vmem_limit_bytes=32 * 1024 * 1024),
    )(xp, p["w1"], p["b1"], p["w2"], p["b2"], p["w3"], p["b3"],
      p["wf1"], p["bf1"], p["wf2"], p["bf2"])
    return out.reshape(n, num_classes)


# -----------------------------------------------------------------------------
# Parameters (shapes from BasicCNN.__init__) and pure-JAX reference
# -----------------------------------------------------------------------------
def init_params(key, num_classes):
    ks = jax.random.split(key, 10)
    f32 = jnp.float32
    rnd = lambda k, s, sc: sc * jax.random.normal(k, s, f32)
    return {
        "w1": rnd(ks[0], (3, 3, 3, 32), 0.10),   "b1": rnd(ks[1], (32,), 0.01),
        "w2": rnd(ks[2], (3, 3, 32, 64), 0.05),  "b2": rnd(ks[3], (64,), 0.01),
        "w3": rnd(ks[4], (3, 3, 64, 128), 0.05), "b3": rnd(ks[5], (128,), 0.01),
        "wf1": rnd(ks[6], (128 * 4 * 4, 256), 0.02), "bf1": rnd(ks[7], (256,), 0.01),
        "wf2": rnd(ks[8], (256, num_classes), 0.05), "bf2": rnd(ks[9], (num_classes,), 0.01),
    }


def prepare_params(raw, feat_hwc=(4, 4, 128)):
    """One-time prep: bf16 weight casts, (1,C) biases, wf1 re-layout.

    Torch flattens the (C, H, W) feature map; the kernel's conv3 output rows
    are the 16 spatial positions s = h*W + w with channels in lanes, so wf1 is
    re-laid-out to (H*W, C, 256): wf1_r[s, c, :] = wf1[c*H*W + s, :].
    """
    h, w, c = feat_hwc
    bf16, f32 = jnp.bfloat16, jnp.float32
    wf1_r = raw["wf1"].reshape(c, h * w, -1).transpose(1, 0, 2)   # (16, 128, 256)
    return {
        "w1": raw["w1"].astype(bf16), "b1": raw["b1"].reshape(1, -1).astype(f32),
        "w2": raw["w2"].astype(bf16), "b2": raw["b2"].reshape(1, -1).astype(f32),
        "w3": raw["w3"].astype(bf16), "b3": raw["b3"].reshape(1, -1).astype(f32),
        "wf1": wf1_r.astype(bf16), "bf1": raw["bf1"].reshape(1, -1).astype(f32),
        "wf2": raw["wf2"].astype(bf16), "bf2": raw["bf2"].reshape(1, -1).astype(f32),
    }


def reference_forward(x_nchw, raw):
    x = jnp.transpose(x_nchw, (0, 2, 3, 1))
    for w, b in [(raw["w1"], raw["b1"]),
                 (raw["w2"], raw["b2"]),
                 (raw["w3"], raw["b3"])]:
        y = jax.lax.conv_general_dilated(
            x, w, window_strides=(1, 1), padding="SAME",
            dimension_numbers=("NHWC", "HWIO", "NHWC"))
        y = jax.nn.relu(y + b)
        x = jax.lax.reduce_window(y, -jnp.inf, jax.lax.max,
                                  (1, 2, 2, 1), (1, 2, 2, 1), "VALID")
    n = x.shape[0]
    x = jnp.transpose(x, (0, 3, 1, 2)).reshape(n, -1)   # torch (C,H,W) flatten
    x = jax.nn.relu(x @ raw["wf1"] + raw["bf1"])
    x = x @ raw["wf2"] + raw["bf2"]
    return x


# -----------------------------------------------------------------------------
if __name__ == "__main__":
    num_classes = 10
    key = jax.random.PRNGKey(0)
    k_x, k_p = jax.random.split(key)

    # 32x32 input so that after three 2x2 pools the feature map is 128*4*4.
    x = jax.random.normal(k_x, (2, 3, 32, 32), jnp.float32)
    raw_params = init_params(k_p, num_classes)
    params = prepare_params(raw_params)

    out = jax.block_until_ready(basic_cnn_forward(x, params))
    assert out.shape == (2, num_classes), out.shape
    assert jnp.all(jnp.isfinite(out))

    ref = jax.block_until_ready(reference_forward(x, raw_params))
    assert jnp.allclose(out, ref, rtol=5e-2, atol=5e-2), (
        float(jnp.max(jnp.abs(out - ref))))

    print("KERNEL_OK")
</pallas_src>

<mosaic_0001>
module attributes {stable_mosaic.version = 11 : i64} {
  func.func @fused_cnn_kernel(%arg0: i32, %arg1: memref<1x34x34x3xbf16, #tpu.memory_space<vmem>>, %arg2: memref<3x3x3x32xbf16, #tpu.memory_space<vmem>>, %arg3: memref<1x32xf32, #tpu.memory_space<vmem>>, %arg4: memref<3x3x32x64xbf16, #tpu.memory_space<vmem>>, %arg5: memref<1x64xf32, #tpu.memory_space<vmem>>, %arg6: memref<3x3x64x128xbf16, #tpu.memory_space<vmem>>, %arg7: memref<1x128xf32, #tpu.memory_space<vmem>>, %arg8: memref<16x128x256xbf16, #tpu.memory_space<vmem>>, %arg9: memref<1x256xf32, #tpu.memory_space<vmem>>, %arg10: memref<256x10xbf16, #tpu.memory_space<vmem>>, %arg11: memref<1x10xf32, #tpu.memory_space<vmem>>, %arg12: memref<1x1x10xf32, #tpu.memory_space<vmem>>, %arg13: memref<18x18x32xf32, #tpu.memory_space<vmem>>, %arg14: memref<10x10x64xf32, #tpu.memory_space<vmem>>, %arg15: memref<128x32xf32, #tpu.memory_space<vmem>>, %arg16: memref<128x64xf32, #tpu.memory_space<vmem>>, %arg17: memref<32x128xf32, #tpu.memory_space<vmem>>) attributes {dimension_semantics = [#tpu.dimension_semantics<parallel>], iteration_bounds = array<i64: 2>, scalar_prefetch = 0 : i64, scratch_operands = 5 : i64, tpu.core_type = #tpu.core_type<tc>, window_params = [{transform_indices = @transform_0, window_bounds = array<i64: 1, 34, 34, 3>}, {pipeline_mode = #tpu.pipeline_mode<synchronous>, transform_indices = @transform_1, window_bounds = array<i64: 3, 3, 3, 32>}, {pipeline_mode = #tpu.pipeline_mode<synchronous>, transform_indices = @transform_2, window_bounds = array<i64: 1, 32>}, {pipeline_mode = #tpu.pipeline_mode<synchronous>, transform_indices = @transform_3, window_bounds = array<i64: 3, 3, 32, 64>}, {pipeline_mode = #tpu.pipeline_mode<synchronous>, transform_indices = @transform_4, window_bounds = array<i64: 1, 64>}, {pipeline_mode = #tpu.pipeline_mode<synchronous>, transform_indices = @transform_5, window_bounds = array<i64: 3, 3, 64, 128>}, {pipeline_mode = #tpu.pipeline_mode<synchronous>, transform_indices = @transform_6, window_bounds = array<i64: 1, 128>}, {pipeline_mode = #tpu.pipeline_mode<synchronous>, transform_indices = @transform_7, window_bounds = array<i64: 16, 128, 256>}, {pipeline_mode = #tpu.pipeline_mode<synchronous>, transform_indices = @transform_8, window_bounds = array<i64: 1, 256>}, {pipeline_mode = #tpu.pipeline_mode<synchronous>, transform_indices = @transform_9, window_bounds = array<i64: 256, 10>}, {pipeline_mode = #tpu.pipeline_mode<synchronous>, transform_indices = @transform_10, window_bounds = array<i64: 1, 10>}, {transform_indices = @transform_11, window_bounds = array<i64: 1, 1, 10>}]} {
    %cst = arith.constant 0.000000e+00 : f32
    %0 = vector.broadcast %cst : f32 to vector<18x18x32xf32>
    %c0 = arith.constant 0 : index
    %c0_0 = arith.constant 0 : index
    %c0_1 = arith.constant 0 : index
    %1 = vector.load %arg13[%c0, %c0_0, %c0_1] : memref<18x18x32xf32, #tpu.memory_space<vmem>>, vector<18x18x32xf32>
    tpu.vector_store %arg13[%c0, %c0_0, %c0_1], %0 {strides = array<i32>} : memref<18x18x32xf32, #tpu.memory_space<vmem>>, vector<18x18x32xf32>,
    %cst_2 = arith.constant 0.000000e+00 : f32
    %2 = vector.broadcast %cst_2 : f32 to vector<10x10x64xf32>
    %c0_3 = arith.constant 0 : index
    %c0_4 = arith.constant 0 : index
    %c0_5 = arith.constant 0 : index
    %3 = vector.load %arg14[%c0_3, %c0_4, %c0_5] : memref<10x10x64xf32, #tpu.memory_space<vmem>>, vector<10x10x64xf32>
    tpu.vector_store %arg14[%c0_3, %c0_4, %c0_5], %2 {strides = array<i32>} : memref<10x10x64xf32, #tpu.memory_space<vmem>>, vector<10x10x64xf32>,
    %c0_i32 = arith.constant 0 : i32
    %c4_i32 = arith.constant 4 : i32
    %4 = arith.addi %c0_i32, %c4_i32 : i32
    %c1_i32 = arith.constant 1 : i32
    scf.for %arg18 = %c0_i32 to %4 step %c1_i32  : i32 {
      %c8_i32 = arith.constant 8 : i32
      %260 = arith.muli %arg18, %c8_i32 : i32
      %cst_235 = arith.constant 0.000000e+00 : f32
      %261 = vector.broadcast %cst_235 : f32 to vector<256x32xf32>
      %c0_i32_236 = arith.constant 0 : i32
      %262 = arith.addi %260, %c0_i32_236 : i32
      %c0_237 = arith.constant 0 : index
      %263 = arith.index_cast %262 : i32 to index
      %c0_238 = arith.constant 0 : index
      %c0_239 = arith.constant 0 : index
      %264 = vector.load %arg1[%c0_237, %263, %c0_238, %c0_239] : memref<1x34x34x3xbf16, #tpu.memory_space<vmem>>, vector<1x8x32x3xbf16>
      %265 = vector.shape_cast %264 : vector<1x8x32x3xbf16> to vector<8x32x3xbf16>
      %266 = vector.shape_cast %265 : vector<8x32x3xbf16> to vector<256x3xbf16>
      %c0_240 = arith.constant 0 : index
      %c0_241 = arith.constant 0 : index
      %c0_242 = arith.constant 0 : index
      %c0_243 = arith.constant 0 : index
      %267 = vector.load %arg2[%c0_240, %c0_241, %c0_242, %c0_243] : memref<3x3x3x32xbf16, #tpu.memory_space<vmem>>, vector<1x1x3x32xbf16>
      %268 = vector.shape_cast %267 : vector<1x1x3x32xbf16> to vector<3x32xbf16>
      %cst_244 = arith.constant dense<0.000000e+00> : vector<256x32xf32>
      %269 = tpu.matmul %266, %268, %cst_244 {dimension_numbers = #tpu.dot_dimension_numbers<[1], [0], [0], [1], [0, 0, 1, 1], [], []>} : vector<256x3xbf16>, vector<3x32xbf16>, vector<256x32xf32> -> vector<256x32xf32>
      %270 = arith.addf %261, %269 : vector<256x32xf32>
      %c0_i32_245 = arith.constant 0 : i32
      %271 = arith.addi %260, %c0_i32_245 : i32
      %c0_246 = arith.constant 0 : index
      %272 = arith.index_cast %271 : i32 to index
      %c1_247 = arith.constant 1 : index
      %c0_248 = arith.constant 0 : index
      %273 = vector.load %arg1[%c0_246, %272, %c1_247, %c0_248] : memref<1x34x34x3xbf16, #tpu.memory_space<vmem>>, vector<1x8x32x3xbf16>
      %274 = vector.shape_cast %273 : vector<1x8x32x3xbf16> to vector<8x32x3xbf16>
      %275 = vector.shape_cast %274 : vector<8x32x3xbf16> to vector<256x3xbf16>
      %c0_249 = arith.constant 0 : index
      %c1_250 = arith.constant 1 : index
      %c0_251 = arith.constant 0 : index
      %c0_252 = arith.constant 0 : index
      %276 = vector.load %arg2[%c0_249, %c1_250, %c0_251, %c0_252] : memref<3x3x3x32xbf16, #tpu.memory_space<vmem>>, vector<1x1x3x32xbf16>
      %277 = vector.shape_cast %276 : vector<1x1x3x32xbf16> to vector<3x32xbf16>
      %cst_253 = arith.constant dense<0.000000e+00> : vector<256x32xf32>
      %278 = tpu.matmul %275, %277, %cst_253 {dimension_numbers = #tpu.dot_dimension_numbers<[1], [0], [0], [1], [0, 0, 1, 1], [], []>} : vector<256x3xbf16>, vector<3x32xbf16>, vector<256x32xf32> -> vector<256x32xf32>
      %279 = arith.addf %270, %278 : vector<256x32xf32>
      %c0_i32_254 = arith.constant 0 : i32
      %280 = arith.addi %260, %c0_i32_254 : i32
      %c0_255 = arith.constant 0 : index
      %281 = arith.index_cast %280 : i32 to index
      %c2_256 = arith.constant 2 : index
      %c0_257 = arith.constant 0 : index
      %282 = vector.load %arg1[%c0_255, %281, %c2_256, %c0_257] : memref<1x34x34x3xbf16, #tpu.memory_space<vmem>>, vector<1x8x32x3xbf16>
      %283 = vector.shape_cast %282 : vector<1x8x32x3xbf16> to vector<8x32x3xbf16>
      %284 = vector.shape_cast %283 : vector<8x32x3xbf16> to vector<256x3xbf16>
      %c0_258 = arith.constant 0 : index
      %c2_259 = arith.constant 2 : index
      %c0_260 = arith.constant 0 : index
      %c0_261 = arith.constant 0 : index
      %285 = vector.load %arg2[%c0_258, %c2_259, %c0_260, %c0_261] : memref<3x3x3x32xbf16, #tpu.memory_space<vmem>>, vector<1x1x3x32xbf16>
      %286 = vector.shape_cast %285 : vector<1x1x3x32xbf16> to vector<3x32xbf16>
      %cst_262 = arith.constant dense<0.000000e+00> : vector<256x32xf32>
      %287 = tpu.matmul %284, %286, %cst_262 {dimension_numbers = #tpu.dot_dimension_numbers<[1], [0], [0], [1], [0, 0, 1, 1], [], []>} : vector<256x3xbf16>, vector<3x32xbf16>, vector<256x32xf32> -> vector<256x32xf32>
      %288 = arith.addf %279, %287 : vector<256x32xf32>
      %c1_i32_263 = arith.constant 1 : i32
      %289 = arith.addi %260, %c1_i32_263 : i32
      %c0_264 = arith.constant 0 : index
      %290 = arith.index_cast %289 : i32 to index
      %c0_265 = arith.constant 0 : index
      %c0_266 = arith.constant 0 : index
      %291 = vector.load %arg1[%c0_264, %290, %c0_265, %c0_266] : memref<1x34x34x3xbf16, #tpu.memory_space<vmem>>, vector<1x8x32x3xbf16>
      %292 = vector.shape_cast %291 : vector<1x8x32x3xbf16> to vector<8x32x3xbf16>
      %293 = vector.shape_cast %292 : vector<8x32x3xbf16> to vector<256x3xbf16>
      %c1_267 = arith.constant 1 : index
      %c0_268 = arith.constant 0 : index
      %c0_269 = arith.constant 0 : index
      %c0_270 = arith.constant 0 : index
      %294 = vector.load %arg2[%c1_267, %c0_268, %c0_269, %c0_270] : memref<3x3x3x32xbf16, #tpu.memory_space<vmem>>, vector<1x1x3x32xbf16>
      %295 = vector.shape_cast %294 : vector<1x1x3x32xbf16> to vector<3x32xbf16>
      %cst_271 = arith.constant dense<0.000000e+00> : vector<256x32xf32>
      %296 = tpu.matmul %293, %295, %cst_271 {dimension_numbers = #tpu.dot_dimension_numbers<[1], [0], [0], [1], [0, 0, 1, 1], [], []>} : vector<256x3xbf16>, vector<3x32xbf16>, vector<256x32xf32> -> vector<256x32xf32>
      %297 = arith.addf %288, %296 : vector<256x32xf32>
      %c1_i32_272 = arith.constant 1 : i32
      %298 = arith.addi %260, %c1_i32_272 : i32
      %c0_273 = arith.constant 0 : index
      %299 = arith.index_cast %298 : i32 to index
      %c1_274 = arith.constant 1 : index
      %c0_275 = arith.constant 0 : index
      %300 = vector.load %arg1[%c0_273, %299, %c1_274, %c0_275] : memref<1x34x34x3xbf16, #tpu.memory_space<vmem>>, vector<1x8x32x3xbf16>
      %301 = vector.shape_cast %300 : vector<1x8x32x3xbf16> to vector<8x32x3xbf16>
      %302 = vector.shape_cast %301 : vector<8x32x3xbf16> to vector<256x3xbf16>
      %c1_276 = arith.constant 1 : index
      %c1_277 = arith.constant 1 : index
      %c0_278 = arith.constant 0 : index
      %c0_279 = arith.constant 0 : index
      %303 = vector.load %arg2[%c1_276, %c1_277, %c0_278, %c0_279] : memref<3x3x3x32xbf16, #tpu.memory_space<vmem>>, vector<1x1x3x32xbf16>
      %304 = vector.shape_cast %303 : vector<1x1x3x32xbf16> to vector<3x32xbf16>
      %cst_280 = arith.constant dense<0.000000e+00> : vector<256x32xf32>
      %305 = tpu.matmul %302, %304, %cst_280 {dimension_numbers = #tpu.dot_dimension_numbers<[1], [0], [0], [1], [0, 0, 1, 1], [], []>} : vector<256x3xbf16>, vector<3x32xbf16>, vector<256x32xf32> -> vector<256x32xf32>
      %306 = arith.addf %297, %305 : vector<256x32xf32>
      %c1_i32_281 = arith.constant 1 : i32
      %307 = arith.addi %260, %c1_i32_281 : i32
      %c0_282 = arith.constant 0 : index
      %308 = arith.index_cast %307 : i32 to index
      %c2_283 = arith.constant 2 : index
      %c0_284 = arith.constant 0 : index
      %309 = vector.load %arg1[%c0_282, %308, %c2_283, %c0_284] : memref<1x34x34x3xbf16, #tpu.memory_space<vmem>>, vector<1x8x32x3xbf16>
      %310 = vector.shape_cast %309 : vector<1x8x32x3xbf16> to vector<8x32x3xbf16>
      %311 = vector.shape_cast %310 : vector<8x32x3xbf16> to vector<256x3xbf16>
      %c1_285 = arith.constant 1 : index
      %c2_286 = arith.constant 2 : index
      %c0_287 = arith.constant 0 : index
      %c0_288 = arith.constant 0 : index
      %312 = vector.load %arg2[%c1_285, %c2_286, %c0_287, %c0_288] : memref<3x3x3x32xbf16, #tpu.memory_space<vmem>>, vector<1x1x3x32xbf16>
      %313 = vector.shape_cast %312 : vector<1x1x3x32xbf16> to vector<3x32xbf16>
      %cst_289 = arith.constant dense<0.000000e+00> : vector<256x32xf32>
      %314 = tpu.matmul %311, %313, %cst_289 {dimension_numbers = #tpu.dot_dimension_numbers<[1], [0], [0], [1], [0, 0, 1, 1], [], []>} : vector<256x3xbf16>, vector<3x32xbf16>, vector<256x32xf32> -> vector<256x32xf32>
      %315 = arith.addf %306, %314 : vector<256x32xf32>
      %c2_i32 = arith.constant 2 : i32
      %316 = arith.addi %260, %c2_i32 : i32
      %c0_290 = arith.constant 0 : index
      %317 = arith.index_cast %316 : i32 to index
      %c0_291 = arith.constant 0 : index
      %c0_292 = arith.constant 0 : index
      %318 = vector.load %arg1[%c0_290, %317, %c0_291, %c0_292] : memref<1x34x34x3xbf16, #tpu.memory_space<vmem>>, vector<1x8x32x3xbf16>
      %319 = vector.shape_cast %318 : vector<1x8x32x3xbf16> to vector<8x32x3xbf16>
      %320 = vector.shape_cast %319 : vector<8x32x3xbf16> to vector<256x3xbf16>
      %c2_293 = arith.constant 2 : index
      %c0_294 = arith.constant 0 : index
      %c0_295 = arith.constant 0 : index
      %c0_296 = arith.constant 0 : index
      %321 = vector.load %arg2[%c2_293, %c0_294, %c0_295, %c0_296] : memref<3x3x3x32xbf16, #tpu.memory_space<vmem>>, vector<1x1x3x32xbf16>
      %322 = vector.shape_cast %321 : vector<1x1x3x32xbf16> to vector<3x32xbf16>
      %cst_297 = arith.constant dense<0.000000e+00> : vector<256x32xf32>
      %323 = tpu.matmul %320, %322, %cst_297 {dimension_numbers = #tpu.dot_dimension_numbers<[1], [0], [0], [1], [0, 0, 1, 1], [], []>} : vector<256x3xbf16>, vector<3x32xbf16>, vector<256x32xf32> -> vector<256x32xf32>
      %324 = arith.addf %315, %323 : vector<256x32xf32>
      %c2_i32_298 = arith.constant 2 : i32
      %325 = arith.addi %260, %c2_i32_298 : i32
      %c0_299 = arith.constant 0 : index
      %326 = arith.index_cast %325 : i32 to index
      %c1_300 = arith.constant 1 : index
      %c0_301 = arith.constant 0 : index
      %327 = vector.load %arg1[%c0_299, %326, %c1_300, %c0_301] : memref<1x34x34x3xbf16, #tpu.memory_space<vmem>>, vector<1x8x32x3xbf16>
      %328 = vector.shape_cast %327 : vector<1x8x32x3xbf16> to vector<8x32x3xbf16>
      %329 = vector.shape_cast %328 : vector<8x32x3xbf16> to vector<256x3xbf16>
      %c2_302 = arith.constant 2 : index
      %c1_303 = arith.constant 1 : index
      %c0_304 = arith.constant 0 : index
      %c0_305 = arith.constant 0 : index
      %330 = vector.load %arg2[%c2_302, %c1_303, %c0_304, %c0_305] : memref<3x3x3x32xbf16, #tpu.memory_space<vmem>>, vector<1x1x3x32xbf16>
      %331 = vector.shape_cast %330 : vector<1x1x3x32xbf16> to vector<3x32xbf16>
      %cst_306 = arith.constant dense<0.000000e+00> : vector<256x32xf32>
      %332 = tpu.matmul %329, %331, %cst_306 {dimension_numbers = #tpu.dot_dimension_numbers<[1], [0], [0], [1], [0, 0, 1, 1], [], []>} : vector<256x3xbf16>, vector<3x32xbf16>, vector<256x32xf32> -> vector<256x32xf32>
      %333 = arith.addf %324, %332 : vector<256x32xf32>
      %c2_i32_307 = arith.constant 2 : i32
      %334 = arith.addi %260, %c2_i32_307 : i32
      %c0_308 = arith.constant 0 : index
      %335 = arith.index_cast %334 : i32 to index
      %c2_309 = arith.constant 2 : index
      %c0_310 = arith.constant 0 : index
      %336 = vector.load %arg1[%c0_308, %335, %c2_309, %c0_310] : memref<1x34x34x3xbf16, #tpu.memory_space<vmem>>, vector<1x8x32x3xbf16>
      %337 = vector.shape_cast %336 : vector<1x8x32x3xbf16> to vector<8x32x3xbf16>
      %338 = vector.shape_cast %337 : vector<8x32x3xbf16> to vector<256x3xbf16>
      %c2_311 = arith.constant 2 : index
      %c2_312 = arith.constant 2 : index
      %c0_313 = arith.constant 0 : index
      %c0_314 = arith.constant 0 : index
      %339 = vector.load %arg2[%c2_311, %c2_312, %c0_313, %c0_314] : memref<3x3x3x32xbf16, #tpu.memory_space<vmem>>, vector<1x1x3x32xbf16>
      %340 = vector.shape_cast %339 : vector<1x1x3x32xbf16> to vector<3x32xbf16>
      %cst_315 = arith.constant dense<0.000000e+00> : vector<256x32xf32>
      %341 = tpu.matmul %338, %340, %cst_315 {dimension_numbers = #tpu.dot_dimension_numbers<[1], [0], [0], [1], [0, 0, 1, 1], [], []>} : vector<256x3xbf16>, vector<3x32xbf16>, vector<256x32xf32> -> vector<256x32xf32>
      %342 = arith.addf %333, %341 : vector<256x32xf32>
      %c0_316 = arith.constant 0 : index
      %c0_317 = arith.constant 0 : index
      %343 = vector.load %arg3[%c0_316, %c0_317] : memref<1x32xf32, #tpu.memory_space<vmem>>, vector<1x32xf32>
      %344 = vector.broadcast %343 : vector<1x32xf32> to vector<256x32xf32>
      %345 = arith.addf %342, %344 : vector<256x32xf32>
      %cst_318 = arith.constant 0.000000e+00 : f32
      %346 = vector.broadcast %cst_318 : f32 to vector<256x32xf32>
      %347 = arith.maximumf %345, %346 : vector<256x32xf32>
      %348 = vector.shape_cast %347 : vector<256x32xf32> to vector<4x2x32x32xf32>
      %349 = vector.extract_strided_slice %348 {offsets = [0, 0, 0, 0], sizes = [4, 1, 32, 32], strides = [1, 1, 1, 1]} : vector<4x2x32x32xf32> to vector<4x1x32x32xf32>
      %350 = vector.shape_cast %349 : vector<4x1x32x32xf32> to vector<4x32x32xf32>
      %351 = vector.extract_strided_slice %348 {offsets = [0, 1, 0, 0], sizes = [4, 1, 32, 32], strides = [1, 1, 1, 1]} : vector<4x2x32x32xf32> to vector<4x1x32x32xf32>
      %352 = vector.shape_cast %351 : vector<4x1x32x32xf32> to vector<4x32x32xf32>
      %353 = arith.maximumf %350, %352 : vector<4x32x32xf32>
      %354 = vector.shape_cast %353 : vector<4x32x32xf32> to vector<128x32xf32>
      %c0_319 = arith.constant 0 : index
      %c0_320 = arith.constant 0 : index
      %355 = vector.load %arg15[%c0_319, %c0_320] : memref<128x32xf32, #tpu.memory_space<vmem>>, vector<128x32xf32>
      tpu.vector_store %arg15[%c0_319, %c0_320], %354 {strides = array<i32>} : memref<128x32xf32, #tpu.memory_space<vmem>>, vector<128x32xf32>,
      %c0_321 = arith.constant 0 : index
      %c0_322 = arith.constant 0 : index
      %356 = tpu.strided_load %arg15[%c0_321, %c0_322] {strides = array<i32: 2, 1>} : memref<128x32xf32, #tpu.memory_space<vmem>>, vector<64x32xf32>
      %c1_323 = arith.constant 1 : index
      %c0_324 = arith.constant 0 : index
      %357 = tpu.strided_load %arg15[%c1_323, %c0_324] {strides = array<i32: 2, 1>} : memref<128x32xf32, #tpu.memory_space<vmem>>, vector<64x32xf32>
      %358 = arith.maximumf %356, %357 : vector<64x32xf32>
      %359 = vector.shape_cast %358 : vector<64x32xf32> to vector<4x16x32xf32>
      %c4_i32_325 = arith.constant 4 : i32
      %360 = arith.muli %arg18, %c4_i32_325 : i32
      %c1_i32_326 = arith.constant 1 : i32
      %361 = arith.addi %c1_i32_326, %360 : i32
      %362 = arith.index_cast %361 : i32 to index
      %c1_327 = arith.constant 1 : index
      %c0_328 = arith.constant 0 : index
      %363 = vector.load %arg13[%362, %c1_327, %c0_328] : memref<18x18x32xf32, #tpu.memory_space<vmem>>, vector<4x16x32xf32>
      tpu.vector_store %arg13[%362, %c1_327, %c0_328], %359 {strides = array<i32>} : memref<18x18x32xf32, #tpu.memory_space<vmem>>, vector<4x16x32xf32>,
    }
    %c4_i32_6 = arith.constant 4 : i32
    %cst_7 = arith.constant 0.000000e+00 : f32
    %5 = vector.broadcast %cst_7 : f32 to vector<256x64xf32>
    %c0_8 = arith.constant 0 : index
    %c0_9 = arith.constant 0 : index
    %c0_10 = arith.constant 0 : index
    %6 = vector.load %arg13[%c0_8, %c0_9, %c0_10] : memref<18x18x32xf32, #tpu.memory_space<vmem>>, vector<16x16x32xf32>
    %7 = vector.shape_cast %6 : vector<16x16x32xf32> to vector<256x32xf32>
    %8 = arith.truncf %7 : vector<256x32xf32> to vector<256x32xbf16>
    %c0_11 = arith.constant 0 : index
    %c0_12 = arith.constant 0 : index
    %c0_13 = arith.constant 0 : index
    %c0_14 = arith.constant 0 : index
    %9 = vector.load %arg4[%c0_11, %c0_12, %c0_13, %c0_14] : memref<3x3x32x64xbf16, #tpu.memory_space<vmem>>, vector<1x1x32x64xbf16>
    %10 = vector.shape_cast %9 : vector<1x1x32x64xbf16> to vector<32x64xbf16>
    %cst_15 = arith.constant dense<0.000000e+00> : vector<256x64xf32>
    %11 = tpu.matmul %8, %10, %cst_15 {dimension_numbers = #tpu.dot_dimension_numbers<[1], [0], [0], [1], [0, 0, 1, 1], [], []>} : vector<256x32xbf16>, vector<32x64xbf16>, vector<256x64xf32> -> vector<256x64xf32>
    %12 = arith.addf %5, %11 : vector<256x64xf32>
    %c0_16 = arith.constant 0 : index
    %c1 = arith.constant 1 : index
    %c0_17 = arith.constant 0 : index
    %13 = vector.load %arg13[%c0_16, %c1, %c0_17] : memref<18x18x32xf32, #tpu.memory_space<vmem>>, vector<16x16x32xf32>
    %14 = vector.shape_cast %13 : vector<16x16x32xf32> to vector<256x32xf32>
    %15 = arith.truncf %14 : vector<256x32xf32> to vector<256x32xbf16>
    %c0_18 = arith.constant 0 : index
    %c1_19 = arith.constant 1 : index
    %c0_20 = arith.constant 0 : index
    %c0_21 = arith.constant 0 : index
    %16 = vector.load %arg4[%c0_18, %c1_19, %c0_20, %c0_21] : memref<3x3x32x64xbf16, #tpu.memory_space<vmem>>, vector<1x1x32x64xbf16>
    %17 = vector.shape_cast %16 : vector<1x1x32x64xbf16> to vector<32x64xbf16>
    %cst_22 = arith.constant dense<0.000000e+00> : vector<256x64xf32>
    %18 = tpu.matmul %15, %17, %cst_22 {dimension_numbers = #tpu.dot_dimension_numbers<[1], [0], [0], [1], [0, 0, 1, 1], [], []>} : vector<256x32xbf16>, vector<32x64xbf16>, vector<256x64xf32> -> vector<256x64xf32>
    %19 = arith.addf %12, %18 : vector<256x64xf32>
    %c0_23 = arith.constant 0 : index
    %c2 = arith.constant 2 : index
    %c0_24 = arith.constant 0 : index
    %20 = vector.load %arg13[%c0_23, %c2, %c0_24] : memref<18x18x32xf32, #tpu.memory_space<vmem>>, vector<16x16x32xf32>
    %21 = vector.shape_cast %20 : vector<16x16x32xf32> to vector<256x32xf32>
    %22 = arith.truncf %21 : vector<256x32xf32> to vector<256x32xbf16>
    %c0_25 = arith.constant 0 : index
    %c2_26 = arith.constant 2 : index
    %c0_27 = arith.constant 0 : index
    %c0_28 = arith.constant 0 : index
    %23 = vector.load %arg4[%c0_25, %c2_26, %c0_27, %c0_28] : memref<3x3x32x64xbf16, #tpu.memory_space<vmem>>, vector<1x1x32x64xbf16>
    %24 = vector.shape_cast %23 : vector<1x1x32x64xbf16> to vector<32x64xbf16>
    %cst_29 = arith.constant dense<0.000000e+00> : vector<256x64xf32>
    %25 = tpu.matmul %22, %24, %cst_29 {dimension_numbers = #tpu.dot_dimension_numbers<[1], [0], [0], [1], [0, 0, 1, 1], [], []>} : vector<256x32xbf16>, vector<32x64xbf16>, vector<256x64xf32> -> vector<256x64xf32>
    %26 = arith.addf %19, %25 : vector<256x64xf32>
    %c1_30 = arith.constant 1 : index
    %c0_31 = arith.constant 0 : index
    %c0_32 = arith.constant 0 : index
    %27 = vector.load %arg13[%c1_30, %c0_31, %c0_32] : memref<18x18x32xf32, #tpu.memory_space<vmem>>, vector<16x16x32xf32>
    %28 = vector.shape_cast %27 : vector<16x16x32xf32> to vector<256x32xf32>
    %29 = arith.truncf %28 : vector<256x32xf32> to vector<256x32xbf16>
    %c1_33 = arith.constant 1 : index
    %c0_34 = arith.constant 0 : index
    %c0_35 = arith.constant 0 : index
    %c0_36 = arith.constant 0 : index
    %30 = vector.load %arg4[%c1_33, %c0_34, %c0_35, %c0_36] : memref<3x3x32x64xbf16, #tpu.memory_space<vmem>>, vector<1x1x32x64xbf16>
    %31 = vector.shape_cast %30 : vector<1x1x32x64xbf16> to vector<32x64xbf16>
    %cst_37 = arith.constant dense<0.000000e+00> : vector<256x64xf32>
    %32 = tpu.matmul %29, %31, %cst_37 {dimension_numbers = #tpu.dot_dimension_numbers<[1], [0], [0], [1], [0, 0, 1, 1], [], []>} : vector<256x32xbf16>, vector<32x64xbf16>, vector<256x64xf32> -> vector<256x64xf32>
    %33 = arith.addf %26, %32 : vector<256x64xf32>
    %c1_38 = arith.constant 1 : index
    %c1_39 = arith.constant 1 : index
    %c0_40 = arith.constant 0 : index
    %34 = vector.load %arg13[%c1_38, %c1_39, %c0_40] : memref<18x18x32xf32, #tpu.memory_space<vmem>>, vector<16x16x32xf32>
    %35 = vector.shape_cast %34 : vector<16x16x32xf32> to vector<256x32xf32>
    %36 = arith.truncf %35 : vector<256x32xf32> to vector<256x32xbf16>
    %c1_41 = arith.constant 1 : index
    %c1_42 = arith.constant 1 : index
    %c0_43 = arith.constant 0 : index
    %c0_44 = arith.constant 0 : index
    %37 = vector.load %arg4[%c1_41, %c1_42, %c0_43, %c0_44] : memref<3x3x32x64xbf16, #tpu.memory_space<vmem>>, vector<1x1x32x64xbf16>
    %38 = vector.shape_cast %37 : vector<1x1x32x64xbf16> to vector<32x64xbf16>
    %cst_45 = arith.constant dense<0.000000e+00> : vector<256x64xf32>
    %39 = tpu.matmul %36, %38, %cst_45 {dimension_numbers = #tpu.dot_dimension_numbers<[1], [0], [0], [1], [0, 0, 1, 1], [], []>} : vector<256x32xbf16>, vector<32x64xbf16>, vector<256x64xf32> -> vector<256x64xf32>
    %40 = arith.addf %33, %39 : vector<256x64xf32>
    %c1_46 = arith.constant 1 : index
    %c2_47 = arith.constant 2 : index
    %c0_48 = arith.constant 0 : index
    %41 = vector.load %arg13[%c1_46, %c2_47, %c0_48] : memref<18x18x32xf32, #tpu.memory_space<vmem>>, vector<16x16x32xf32>
    %42 = vector.shape_cast %41 : vector<16x16x32xf32> to vector<256x32xf32>
    %43 = arith.truncf %42 : vector<256x32xf32> to vector<256x32xbf16>
    %c1_49 = arith.constant 1 : index
    %c2_50 = arith.constant 2 : index
    %c0_51 = arith.constant 0 : index
    %c0_52 = arith.constant 0 : index
    %44 = vector.load %arg4[%c1_49, %c2_50, %c0_51, %c0_52] : memref<3x3x32x64xbf16, #tpu.memory_space<vmem>>, vector<1x1x32x64xbf16>
    %45 = vector.shape_cast %44 : vector<1x1x32x64xbf16> to vector<32x64xbf16>
    %cst_53 = arith.constant dense<0.000000e+00> : vector<256x64xf32>
    %46 = tpu.matmul %43, %45, %cst_53 {dimension_numbers = #tpu.dot_dimension_numbers<[1], [0], [0], [1], [0, 0, 1, 1], [], []>} : vector<256x32xbf16>, vector<32x64xbf16>, vector<256x64xf32> -> vector<256x64xf32>
    %47 = arith.addf %40, %46 : vector<256x64xf32>
    %c2_54 = arith.constant 2 : index
    %c0_55 = arith.constant 0 : index
    %c0_56 = arith.constant 0 : index
    %48 = vector.load %arg13[%c2_54, %c0_55, %c0_56] : memref<18x18x32xf32, #tpu.memory_space<vmem>>, vector<16x16x32xf32>
    %49 = vector.shape_cast %48 : vector<16x16x32xf32> to vector<256x32xf32>
    %50 = arith.truncf %49 : vector<256x32xf32> to vector<256x32xbf16>
    %c2_57 = arith.constant 2 : index
    %c0_58 = arith.constant 0 : index
    %c0_59 = arith.constant 0 : index
    %c0_60 = arith.constant 0 : index
    %51 = vector.load %arg4[%c2_57, %c0_58, %c0_59, %c0_60] : memref<3x3x32x64xbf16, #tpu.memory_space<vmem>>, vector<1x1x32x64xbf16>
    %52 = vector.shape_cast %51 : vector<1x1x32x64xbf16> to vector<32x64xbf16>
    %cst_61 = arith.constant dense<0.000000e+00> : vector<256x64xf32>
    %53 = tpu.matmul %50, %52, %cst_61 {dimension_numbers = #tpu.dot_dimension_numbers<[1], [0], [0], [1], [0, 0, 1, 1], [], []>} : vector<256x32xbf16>, vector<32x64xbf16>, vector<256x64xf32> -> vector<256x64xf32>
    %54 = arith.addf %47, %53 : vector<256x64xf32>
    %c2_62 = arith.constant 2 : index
    %c1_63 = arith.constant 1 : index
    %c0_64 = arith.constant 0 : index
    %55 = vector.load %arg13[%c2_62, %c1_63, %c0_64] : memref<18x18x32xf32, #tpu.memory_space<vmem>>, vector<16x16x32xf32>
    %56 = vector.shape_cast %55 : vector<16x16x32xf32> to vector<256x32xf32>
    %57 = arith.truncf %56 : vector<256x32xf32> to vector<256x32xbf16>
    %c2_65 = arith.constant 2 : index
    %c1_66 = arith.constant 1 : index
    %c0_67 = arith.constant 0 : index
    %c0_68 = arith.constant 0 : index
    %58 = vector.load %arg4[%c2_65, %c1_66, %c0_67, %c0_68] : memref<3x3x32x64xbf16, #tpu.memory_space<vmem>>, vector<1x1x32x64xbf16>
    %59 = vector.shape_cast %58 : vector<1x1x32x64xbf16> to vector<32x64xbf16>
    %cst_69 = arith.constant dense<0.000000e+00> : vector<256x64xf32>
    %60 = tpu.matmul %57, %59, %cst_69 {dimension_numbers = #tpu.dot_dimension_numbers<[1], [0], [0], [1], [0, 0, 1, 1], [], []>} : vector<256x32xbf16>, vector<32x64xbf16>, vector<256x64xf32> -> vector<256x64xf32>
    %61 = arith.addf %54, %60 : vector<256x64xf32>
    %c2_70 = arith.constant 2 : index
    %c2_71 = arith.constant 2 : index
    %c0_72 = arith.constant 0 : index
    %62 = vector.load %arg13[%c2_70, %c2_71, %c0_72] : memref<18x18x32xf32, #tpu.memory_space<vmem>>, vector<16x16x32xf32>
    %63 = vector.shape_cast %62 : vector<16x16x32xf32> to vector<256x32xf32>
    %64 = arith.truncf %63 : vector<256x32xf32> to vector<256x32xbf16>
    %c2_73 = arith.constant 2 : index
    %c2_74 = arith.constant 2 : index
    %c0_75 = arith.constant 0 : index
    %c0_76 = arith.constant 0 : index
    %65 = vector.load %arg4[%c2_73, %c2_74, %c0_75, %c0_76] : memref<3x3x32x64xbf16, #tpu.memory_space<vmem>>, vector<1x1x32x64xbf16>
    %66 = vector.shape_cast %65 : vector<1x1x32x64xbf16> to vector<32x64xbf16>
    %cst_77 = arith.constant dense<0.000000e+00> : vector<256x64xf32>
    %67 = tpu.matmul %64, %66, %cst_77 {dimension_numbers = #tpu.dot_dimension_numbers<[1], [0], [0], [1], [0, 0, 1, 1], [], []>} : vector<256x32xbf16>, vector<32x64xbf16>, vector<256x64xf32> -> vector<256x64xf32>
    %68 = arith.addf %61, %67 : vector<256x64xf32>
    %c0_78 = arith.constant 0 : index
    %c0_79 = arith.constant 0 : index
    %69 = vector.load %arg5[%c0_78, %c0_79] : memref<1x64xf32, #tpu.memory_space<vmem>>, vector<1x64xf32>
    %70 = vector.broadcast %69 : vector<1x64xf32> to vector<256x64xf32>
    %71 = arith.addf %68, %70 : vector<256x64xf32>
    %cst_80 = arith.constant 0.000000e+00 : f32
    %72 = vector.broadcast %cst_80 : f32 to vector<256x64xf32>
    %73 = arith.maximumf %71, %72 : vector<256x64xf32>
    %74 = vector.shape_cast %73 : vector<256x64xf32> to vector<8x2x16x64xf32>
    %75 = vector.extract_strided_slice %74 {offsets = [0, 0, 0, 0], sizes = [8, 1, 16, 64], strides = [1, 1, 1, 1]} : vector<8x2x16x64xf32> to vector<8x1x16x64xf32>
    %76 = vector.shape_cast %75 : vector<8x1x16x64xf32> to vector<8x16x64xf32>
    %77 = vector.extract_strided_slice %74 {offsets = [0, 1, 0, 0], sizes = [8, 1, 16, 64], strides = [1, 1, 1, 1]} : vector<8x2x16x64xf32> to vector<8x1x16x64xf32>
    %78 = vector.shape_cast %77 : vector<8x1x16x64xf32> to vector<8x16x64xf32>
    %79 = arith.maximumf %76, %78 : vector<8x16x64xf32>
    %80 = vector.shape_cast %79 : vector<8x16x64xf32> to vector<128x64xf32>
    %c0_81 = arith.constant 0 : index
    %c0_82 = arith.constant 0 : index
    %81 = vector.load %arg16[%c0_81, %c0_82] : memref<128x64xf32, #tpu.memory_space<vmem>>, vector<128x64xf32>
    tpu.vector_store %arg16[%c0_81, %c0_82], %80 {strides = array<i32>} : memref<128x64xf32, #tpu.memory_space<vmem>>, vector<128x64xf32>,
    %c0_83 = arith.constant 0 : index
    %c0_84 = arith.constant 0 : index
    %82 = tpu.strided_load %arg16[%c0_83, %c0_84] {strides = array<i32: 2, 1>} : memref<128x64xf32, #tpu.memory_space<vmem>>, vector<64x64xf32>
    %c1_85 = arith.constant 1 : index
    %c0_86 = arith.constant 0 : index
    %83 = tpu.strided_load %arg16[%c1_85, %c0_86] {strides = array<i32: 2, 1>} : memref<128x64xf32, #tpu.memory_space<vmem>>, vector<64x64xf32>
    %84 = arith.maximumf %82, %83 : vector<64x64xf32>
    %85 = vector.shape_cast %84 : vector<64x64xf32> to vector<8x8x64xf32>
    %c1_87 = arith.constant 1 : index
    %c1_88 = arith.constant 1 : index
    %c0_89 = arith.constant 0 : index
    %86 = vector.load %arg14[%c1_87, %c1_88, %c0_89] : memref<10x10x64xf32, #tpu.memory_space<vmem>>, vector<8x8x64xf32>
    tpu.vector_store %arg14[%c1_87, %c1_88, %c0_89], %85 {strides = array<i32>} : memref<10x10x64xf32, #tpu.memory_space<vmem>>, vector<8x8x64xf32>,
    %cst_90 = arith.constant 0.000000e+00 : f32
    %87 = vector.broadcast %cst_90 : f32 to vector<64x128xf32>
    %c0_91 = arith.constant 0 : index
    %c0_92 = arith.constant 0 : index
    %c0_93 = arith.constant 0 : index
    %88 = vector.load %arg14[%c0_91, %c0_92, %c0_93] : memref<10x10x64xf32, #tpu.memory_space<vmem>>, vector<8x8x64xf32>
    %89 = vector.shape_cast %88 : vector<8x8x64xf32> to vector<64x64xf32>
    %90 = arith.truncf %89 : vector<64x64xf32> to vector<64x64xbf16>
    %c0_94 = arith.constant 0 : index
    %c0_95 = arith.constant 0 : index
    %c0_96 = arith.constant 0 : index
    %c0_97 = arith.constant 0 : index
    %91 = vector.load %arg6[%c0_94, %c0_95, %c0_96, %c0_97] : memref<3x3x64x128xbf16, #tpu.memory_space<vmem>>, vector<1x1x64x128xbf16>
    %92 = vector.shape_cast %91 : vector<1x1x64x128xbf16> to vector<64x128xbf16>
    %cst_98 = arith.constant dense<0.000000e+00> : vector<64x128xf32>
    %93 = tpu.matmul %90, %92, %cst_98 {dimension_numbers = #tpu.dot_dimension_numbers<[1], [0], [0], [1], [0, 0, 1, 1], [], []>} : vector<64x64xbf16>, vector<64x128xbf16>, vector<64x128xf32> -> vector<64x128xf32>
    %94 = arith.addf %87, %93 : vector<64x128xf32>
    %c0_99 = arith.constant 0 : index
    %c1_100 = arith.constant 1 : index
    %c0_101 = arith.constant 0 : index
    %95 = vector.load %arg14[%c0_99, %c1_100, %c0_101] : memref<10x10x64xf32, #tpu.memory_space<vmem>>, vector<8x8x64xf32>
    %96 = vector.shape_cast %95 : vector<8x8x64xf32> to vector<64x64xf32>
    %97 = arith.truncf %96 : vector<64x64xf32> to vector<64x64xbf16>
    %c0_102 = arith.constant 0 : index
    %c1_103 = arith.constant 1 : index
    %c0_104 = arith.constant 0 : index
    %c0_105 = arith.constant 0 : index
    %98 = vector.load %arg6[%c0_102, %c1_103, %c0_104, %c0_105] : memref<3x3x64x128xbf16, #tpu.memory_space<vmem>>, vector<1x1x64x128xbf16>
    %99 = vector.shape_cast %98 : vector<1x1x64x128xbf16> to vector<64x128xbf16>
    %cst_106 = arith.constant dense<0.000000e+00> : vector<64x128xf32>
    %100 = tpu.matmul %97, %99, %cst_106 {dimension_numbers = #tpu.dot_dimension_numbers<[1], [0], [0], [1], [0, 0, 1, 1], [], []>} : vector<64x64xbf16>, vector<64x128xbf16>, vector<64x128xf32> -> vector<64x128xf32>
    %101 = arith.addf %94, %100 : vector<64x128xf32>
    %c0_107 = arith.constant 0 : index
    %c2_108 = arith.constant 2 : index
    %c0_109 = arith.constant 0 : index
    %102 = vector.load %arg14[%c0_107, %c2_108, %c0_109] : memref<10x10x64xf32, #tpu.memory_space<vmem>>, vector<8x8x64xf32>
    %103 = vector.shape_cast %102 : vector<8x8x64xf32> to vector<64x64xf32>
    %104 = arith.truncf %103 : vector<64x64xf32> to vector<64x64xbf16>
    %c0_110 = arith.constant 0 : index
    %c2_111 = arith.constant 2 : index
    %c0_112 = arith.constant 0 : index
    %c0_113 = arith.constant 0 : index
    %105 = vector.load %arg6[%c0_110, %c2_111, %c0_112, %c0_113] : memref<3x3x64x128xbf16, #tpu.memory_space<vmem>>, vector<1x1x64x128xbf16>
    %106 = vector.shape_cast %105 : vector<1x1x64x128xbf16> to vector<64x128xbf16>
    %cst_114 = arith.constant dense<0.000000e+00> : vector<64x128xf32>
    %107 = tpu.matmul %104, %106, %cst_114 {dimension_numbers = #tpu.dot_dimension_numbers<[1], [0], [0], [1], [0, 0, 1, 1], [], []>} : vector<64x64xbf16>, vector<64x128xbf16>, vector<64x128xf32> -> vector<64x128xf32>
    %108 = arith.addf %101, %107 : vector<64x128xf32>
    %c1_115 = arith.constant 1 : index
    %c0_116 = arith.constant 0 : index
    %c0_117 = arith.constant 0 : index
    %109 = vector.load %arg14[%c1_115, %c0_116, %c0_117] : memref<10x10x64xf32, #tpu.memory_space<vmem>>, vector<8x8x64xf32>
    %110 = vector.shape_cast %109 : vector<8x8x64xf32> to vector<64x64xf32>
    %111 = arith.truncf %110 : vector<64x64xf32> to vector<64x64xbf16>
    %c1_118 = arith.constant 1 : index
    %c0_119 = arith.constant 0 : index
    %c0_120 = arith.constant 0 : index
    %c0_121 = arith.constant 0 : index
    %112 = vector.load %arg6[%c1_118, %c0_119, %c0_120, %c0_121] : memref<3x3x64x128xbf16, #tpu.memory_space<vmem>>, vector<1x1x64x128xbf16>
    %113 = vector.shape_cast %112 : vector<1x1x64x128xbf16> to vector<64x128xbf16>
    %cst_122 = arith.constant dense<0.000000e+00> : vector<64x128xf32>
    %114 = tpu.matmul %111, %113, %cst_122 {dimension_numbers = #tpu.dot_dimension_numbers<[1], [0], [0], [1], [0, 0, 1, 1], [], []>} : vector<64x64xbf16>, vector<64x128xbf16>, vector<64x128xf32> -> vector<64x128xf32>
    %115 = arith.addf %108, %114 : vector<64x128xf32>
    %c1_123 = arith.constant 1 : index
    %c1_124 = arith.constant 1 : index
    %c0_125 = arith.constant 0 : index
    %116 = vector.load %arg14[%c1_123, %c1_124, %c0_125] : memref<10x10x64xf32, #tpu.memory_space<vmem>>, vector<8x8x64xf32>
    %117 = vector.shape_cast %116 : vector<8x8x64xf32> to vector<64x64xf32>
    %118 = arith.truncf %117 : vector<64x64xf32> to vector<64x64xbf16>
    %c1_126 = arith.constant 1 : index
    %c1_127 = arith.constant 1 : index
    %c0_128 = arith.constant 0 : index
    %c0_129 = arith.constant 0 : index
    %119 = vector.load %arg6[%c1_126, %c1_127, %c0_128, %c0_129] : memref<3x3x64x128xbf16, #tpu.memory_space<vmem>>, vector<1x1x64x128xbf16>
    %120 = vector.shape_cast %119 : vector<1x1x64x128xbf16> to vector<64x128xbf16>
    %cst_130 = arith.constant dense<0.000000e+00> : vector<64x128xf32>
    %121 = tpu.matmul %118, %120, %cst_130 {dimension_numbers = #tpu.dot_dimension_numbers<[1], [0], [0], [1], [0, 0, 1, 1], [], []>} : vector<64x64xbf16>, vector<64x128xbf16>, vector<64x128xf32> -> vector<64x128xf32>
    %122 = arith.addf %115, %121 : vector<64x128xf32>
    %c1_131 = arith.constant 1 : index
    %c2_132 = arith.constant 2 : index
    %c0_133 = arith.constant 0 : index
    %123 = vector.load %arg14[%c1_131, %c2_132, %c0_133] : memref<10x10x64xf32, #tpu.memory_space<vmem>>, vector<8x8x64xf32>
    %124 = vector.shape_cast %123 : vector<8x8x64xf32> to vector<64x64xf32>
    %125 = arith.truncf %124 : vector<64x64xf32> to vector<64x64xbf16>
    %c1_134 = arith.constant 1 : index
    %c2_135 = arith.constant 2 : index
    %c0_136 = arith.constant 0 : index
    %c0_137 = arith.constant 0 : index
    %126 = vector.load %arg6[%c1_134, %c2_135, %c0_136, %c0_137] : memref<3x3x64x128xbf16, #tpu.memory_space<vmem>>, vector<1x1x64x128xbf16>
    %127 = vector.shape_cast %126 : vector<1x1x64x128xbf16> to vector<64x128xbf16>
    %cst_138 = arith.constant dense<0.000000e+00> : vector<64x128xf32>
    %128 = tpu.matmul %125, %127, %cst_138 {dimension_numbers = #tpu.dot_dimension_numbers<[1], [0], [0], [1], [0, 0, 1, 1], [], []>} : vector<64x64xbf16>, vector<64x128xbf16>, vector<64x128xf32> -> vector<64x128xf32>
    %129 = arith.addf %122, %128 : vector<64x128xf32>
    %c2_139 = arith.constant 2 : index
    %c0_140 = arith.constant 0 : index
    %c0_141 = arith.constant 0 : index
    %130 = vector.load %arg14[%c2_139, %c0_140, %c0_141] : memref<10x10x64xf32, #tpu.memory_space<vmem>>, vector<8x8x64xf32>
    %131 = vector.shape_cast %130 : vector<8x8x64xf32> to vector<64x64xf32>
    %132 = arith.truncf %131 : vector<64x64xf32> to vector<64x64xbf16>
    %c2_142 = arith.constant 2 : index
    %c0_143 = arith.constant 0 : index
    %c0_144 = arith.constant 0 : index
    %c0_145 = arith.constant 0 : index
    %133 = vector.load %arg6[%c2_142, %c0_143, %c0_144, %c0_145] : memref<3x3x64x128xbf16, #tpu.memory_space<vmem>>, vector<1x1x64x128xbf16>
    %134 = vector.shape_cast %133 : vector<1x1x64x128xbf16> to vector<64x128xbf16>
    %cst_146 = arith.constant dense<0.000000e+00> : vector<64x128xf32>
    %135 = tpu.matmul %132, %134, %cst_146 {dimension_numbers = #tpu.dot_dimension_numbers<[1], [0], [0], [1], [0, 0, 1, 1], [], []>} : vector<64x64xbf16>, vector<64x128xbf16>, vector<64x128xf32> -> vector<64x128xf32>
    %136 = arith.addf %129, %135 : vector<64x128xf32>
    %c2_147 = arith.constant 2 : index
    %c1_148 = arith.constant 1 : index
    %c0_149 = arith.constant 0 : index
    %137 = vector.load %arg14[%c2_147, %c1_148, %c0_149] : memref<10x10x64xf32, #tpu.memory_space<vmem>>, vector<8x8x64xf32>
    %138 = vector.shape_cast %137 : vector<8x8x64xf32> to vector<64x64xf32>
    %139 = arith.truncf %138 : vector<64x64xf32> to vector<64x64xbf16>
    %c2_150 = arith.constant 2 : index
    %c1_151 = arith.constant 1 : index
    %c0_152 = arith.constant 0 : index
    %c0_153 = arith.constant 0 : index
    %140 = vector.load %arg6[%c2_150, %c1_151, %c0_152, %c0_153] : memref<3x3x64x128xbf16, #tpu.memory_space<vmem>>, vector<1x1x64x128xbf16>
    %141 = vector.shape_cast %140 : vector<1x1x64x128xbf16> to vector<64x128xbf16>
    %cst_154 = arith.constant dense<0.000000e+00> : vector<64x128xf32>
    %142 = tpu.matmul %139, %141, %cst_154 {dimension_numbers = #tpu.dot_dimension_numbers<[1], [0], [0], [1], [0, 0, 1, 1], [], []>} : vector<64x64xbf16>, vector<64x128xbf16>, vector<64x128xf32> -> vector<64x128xf32>
    %143 = arith.addf %136, %142 : vector<64x128xf32>
    %c2_155 = arith.constant 2 : index
    %c2_156 = arith.constant 2 : index
    %c0_157 = arith.constant 0 : index
    %144 = vector.load %arg14[%c2_155, %c2_156, %c0_157] : memref<10x10x64xf32, #tpu.memory_space<vmem>>, vector<8x8x64xf32>
    %145 = vector.shape_cast %144 : vector<8x8x64xf32> to vector<64x64xf32>
    %146 = arith.truncf %145 : vector<64x64xf32> to vector<64x64xbf16>
    %c2_158 = arith.constant 2 : index
    %c2_159 = arith.constant 2 : index
    %c0_160 = arith.constant 0 : index
    %c0_161 = arith.constant 0 : index
    %147 = vector.load %arg6[%c2_158, %c2_159, %c0_160, %c0_161] : memref<3x3x64x128xbf16, #tpu.memory_space<vmem>>, vector<1x1x64x128xbf16>
    %148 = vector.shape_cast %147 : vector<1x1x64x128xbf16> to vector<64x128xbf16>
    %cst_162 = arith.constant dense<0.000000e+00> : vector<64x128xf32>
    %149 = tpu.matmul %146, %148, %cst_162 {dimension_numbers = #tpu.dot_dimension_numbers<[1], [0], [0], [1], [0, 0, 1, 1], [], []>} : vector<64x64xbf16>, vector<64x128xbf16>, vector<64x128xf32> -> vector<64x128xf32>
    %150 = arith.addf %143, %149 : vector<64x128xf32>
    %c0_163 = arith.constant 0 : index
    %c0_164 = arith.constant 0 : index
    %151 = vector.load %arg7[%c0_163, %c0_164] : memref<1x128xf32, #tpu.memory_space<vmem>>, vector<1x128xf32>
    %152 = vector.broadcast %151 : vector<1x128xf32> to vector<64x128xf32>
    %153 = arith.addf %150, %152 : vector<64x128xf32>
    %cst_165 = arith.constant 0.000000e+00 : f32
    %154 = vector.broadcast %cst_165 : f32 to vector<64x128xf32>
    %155 = arith.maximumf %153, %154 : vector<64x128xf32>
    %156 = vector.shape_cast %155 : vector<64x128xf32> to vector<4x2x8x128xf32>
    %157 = vector.extract_strided_slice %156 {offsets = [0, 0, 0, 0], sizes = [4, 1, 8, 128], strides = [1, 1, 1, 1]} : vector<4x2x8x128xf32> to vector<4x1x8x128xf32>
    %158 = vector.shape_cast %157 : vector<4x1x8x128xf32> to vector<4x8x128xf32>
    %159 = vector.extract_strided_slice %156 {offsets = [0, 1, 0, 0], sizes = [4, 1, 8, 128], strides = [1, 1, 1, 1]} : vector<4x2x8x128xf32> to vector<4x1x8x128xf32>
    %160 = vector.shape_cast %159 : vector<4x1x8x128xf32> to vector<4x8x128xf32>
    %161 = arith.maximumf %158, %160 : vector<4x8x128xf32>
    %162 = vector.shape_cast %161 : vector<4x8x128xf32> to vector<32x128xf32>
    %c0_166 = arith.constant 0 : index
    %c0_167 = arith.constant 0 : index
    %163 = vector.load %arg17[%c0_166, %c0_167] : memref<32x128xf32, #tpu.memory_space<vmem>>, vector<32x128xf32>
    tpu.vector_store %arg17[%c0_166, %c0_167], %162 {strides = array<i32>} : memref<32x128xf32, #tpu.memory_space<vmem>>, vector<32x128xf32>,
    %c0_168 = arith.constant 0 : index
    %c0_169 = arith.constant 0 : index
    %164 = tpu.strided_load %arg17[%c0_168, %c0_169] {strides = array<i32: 2, 1>} : memref<32x128xf32, #tpu.memory_space<vmem>>, vector<16x128xf32>
    %c1_170 = arith.constant 1 : index
    %c0_171 = arith.constant 0 : index
    %165 = tpu.strided_load %arg17[%c1_170, %c0_171] {strides = array<i32: 2, 1>} : memref<32x128xf32, #tpu.memory_space<vmem>>, vector<16x128xf32>
    %166 = arith.maximumf %164, %165 : vector<16x128xf32>
    %167 = arith.truncf %166 : vector<16x128xf32> to vector<16x128xbf16>
    %cst_172 = arith.constant 0.000000e+00 : f32
    %168 = vector.broadcast %cst_172 : f32 to vector<1x256xf32>
    %169 = vector.extract_strided_slice %167 {offsets = [0, 0], sizes = [1, 128], strides = [1, 1]} : vector<16x128xbf16> to vector<1x128xbf16>
    %c0_173 = arith.constant 0 : index
    %c0_174 = arith.constant 0 : index
    %c0_175 = arith.constant 0 : index
    %170 = vector.load %arg8[%c0_173, %c0_174, %c0_175] : memref<16x128x256xbf16, #tpu.memory_space<vmem>>, vector<1x128x256xbf16>
    %171 = vector.shape_cast %170 : vector<1x128x256xbf16> to vector<128x256xbf16>
    %cst_176 = arith.constant dense<0.000000e+00> : vector<1x256xf32>
    %172 = tpu.matmul %169, %171, %cst_176 {dimension_numbers = #tpu.dot_dimension_numbers<[1], [0], [0], [1], [0, 0, 1, 1], [], []>} : vector<1x128xbf16>, vector<128x256xbf16>, vector<1x256xf32> -> vector<1x256xf32>
    %173 = arith.addf %168, %172 : vector<1x256xf32>
    %174 = vector.extract_strided_slice %167 {offsets = [1, 0], sizes = [1, 128], strides = [1, 1]} : vector<16x128xbf16> to vector<1x128xbf16>
    %c1_177 = arith.constant 1 : index
    %c0_178 = arith.constant 0 : index
    %c0_179 = arith.constant 0 : index
    %175 = vector.load %arg8[%c1_177, %c0_178, %c0_179] : memref<16x128x256xbf16, #tpu.memory_space<vmem>>, vector<1x128x256xbf16>
    %176 = vector.shape_cast %175 : vector<1x128x256xbf16> to vector<128x256xbf16>
    %cst_180 = arith.constant dense<0.000000e+00> : vector<1x256xf32>
    %177 = tpu.matmul %174, %176, %cst_180 {dimension_numbers = #tpu.dot_dimension_numbers<[1], [0], [0], [1], [0, 0, 1, 1], [], []>} : vector<1x128xbf16>, vector<128x256xbf16>, vector<1x256xf32> -> vector<1x256xf32>
    %178 = arith.addf %173, %177 : vector<1x256xf32>
    %179 = vector.extract_strided_slice %167 {offsets = [2, 0], sizes = [1, 128], strides = [1, 1]} : vector<16x128xbf16> to vector<1x128xbf16>
    %c2_181 = arith.constant 2 : index
    %c0_182 = arith.constant 0 : index
    %c0_183 = arith.constant 0 : index
    %180 = vector.load %arg8[%c2_181, %c0_182, %c0_183] : memref<16x128x256xbf16, #tpu.memory_space<vmem>>, vector<1x128x256xbf16>
    %181 = vector.shape_cast %180 : vector<1x128x256xbf16> to vector<128x256xbf16>
    %cst_184 = arith.constant dense<0.000000e+00> : vector<1x256xf32>
    %182 = tpu.matmul %179, %181, %cst_184 {dimension_numbers = #tpu.dot_dimension_numbers<[1], [0], [0], [1], [0, 0, 1, 1], [], []>} : vector<1x128xbf16>, vector<128x256xbf16>, vector<1x256xf32> -> vector<1x256xf32>
    %183 = arith.addf %178, %182 : vector<1x256xf32>
    %184 = vector.extract_strided_slice %167 {offsets = [3, 0], sizes = [1, 128], strides = [1, 1]} : vector<16x128xbf16> to vector<1x128xbf16>
    %c3 = arith.constant 3 : index
    %c0_185 = arith.constant 0 : index
    %c0_186 = arith.constant 0 : index
    %185 = vector.load %arg8[%c3, %c0_185, %c0_186] : memref<16x128x256xbf16, #tpu.memory_space<vmem>>, vector<1x128x256xbf16>
    %186 = vector.shape_cast %185 : vector<1x128x256xbf16> to vector<128x256xbf16>
    %cst_187 = arith.constant dense<0.000000e+00> : vector<1x256xf32>
    %187 = tpu.matmul %184, %186, %cst_187 {dimension_numbers = #tpu.dot_dimension_numbers<[1], [0], [0], [1], [0, 0, 1, 1], [], []>} : vector<1x128xbf16>, vector<128x256xbf16>, vector<1x256xf32> -> vector<1x256xf32>
    %188 = arith.addf %183, %187 : vector<1x256xf32>
    %189 = vector.extract_strided_slice %167 {offsets = [4, 0], sizes = [1, 128], strides = [1, 1]} : vector<16x128xbf16> to vector<1x128xbf16>
    %c4 = arith.constant 4 : index
    %c0_188 = arith.constant 0 : index
    %c0_189 = arith.constant 0 : index
    %190 = vector.load %arg8[%c4, %c0_188, %c0_189] : memref<16x128x256xbf16, #tpu.memory_space<vmem>>, vector<1x128x256xbf16>
    %191 = vector.shape_cast %190 : vector<1x128x256xbf16> to vector<128x256xbf16>
    %cst_190 = arith.constant dense<0.000000e+00> : vector<1x256xf32>
    %192 = tpu.matmul %189, %191, %cst_190 {dimension_numbers = #tpu.dot_dimension_numbers<[1], [0], [0], [1], [0, 0, 1, 1], [], []>} : vector<1x128xbf16>, vector<128x256xbf16>, vector<1x256xf32> -> vector<1x256xf32>
    %193 = arith.addf %188, %192 : vector<1x256xf32>
    %194 = vector.extract_strided_slice %167 {offsets = [5, 0], sizes = [1, 128], strides = [1, 1]} : vector<16x128xbf16> to vector<1x128xbf16>
    %c5 = arith.constant 5 : index
    %c0_191 = arith.constant 0 : index
    %c0_192 = arith.constant 0 : index
    %195 = vector.load %arg8[%c5, %c0_191, %c0_192] : memref<16x128x256xbf16, #tpu.memory_space<vmem>>, vector<1x128x256xbf16>
    %196 = vector.shape_cast %195 : vector<1x128x256xbf16> to vector<128x256xbf16>
    %cst_193 = arith.constant dense<0.000000e+00> : vector<1x256xf32>
    %197 = tpu.matmul %194, %196, %cst_193 {dimension_numbers = #tpu.dot_dimension_numbers<[1], [0], [0], [1], [0, 0, 1, 1], [], []>} : vector<1x128xbf16>, vector<128x256xbf16>, vector<1x256xf32> -> vector<1x256xf32>
    %198 = arith.addf %193, %197 : vector<1x256xf32>
    %199 = vector.extract_strided_slice %167 {offsets = [6, 0], sizes = [1, 128], strides = [1, 1]} : vector<16x128xbf16> to vector<1x128xbf16>
    %c6 = arith.constant 6 : index
    %c0_194 = arith.constant 0 : index
    %c0_195 = arith.constant 0 : index
    %200 = vector.load %arg8[%c6, %c0_194, %c0_195] : memref<16x128x256xbf16, #tpu.memory_space<vmem>>, vector<1x128x256xbf16>
    %201 = vector.shape_cast %200 : vector<1x128x256xbf16> to vector<128x256xbf16>
    %cst_196 = arith.constant dense<0.000000e+00> : vector<1x256xf32>
    %202 = tpu.matmul %199, %201, %cst_196 {dimension_numbers = #tpu.dot_dimension_numbers<[1], [0], [0], [1], [0, 0, 1, 1], [], []>} : vector<1x128xbf16>, vector<128x256xbf16>, vector<1x256xf32> -> vector<1x256xf32>
    %203 = arith.addf %198, %202 : vector<1x256xf32>
    %204 = vector.extract_strided_slice %167 {offsets = [7, 0], sizes = [1, 128], strides = [1, 1]} : vector<16x128xbf16> to vector<1x128xbf16>
    %c7 = arith.constant 7 : index
    %c0_197 = arith.constant 0 : index
    %c0_198 = arith.constant 0 : index
    %205 = vector.load %arg8[%c7, %c0_197, %c0_198] : memref<16x128x256xbf16, #tpu.memory_space<vmem>>, vector<1x128x256xbf16>
    %206 = vector.shape_cast %205 : vector<1x128x256xbf16> to vector<128x256xbf16>
    %cst_199 = arith.constant dense<0.000000e+00> : vector<1x256xf32>
    %207 = tpu.matmul %204, %206, %cst_199 {dimension_numbers = #tpu.dot_dimension_numbers<[1], [0], [0], [1], [0, 0, 1, 1], [], []>} : vector<1x128xbf16>, vector<128x256xbf16>, vector<1x256xf32> -> vector<1x256xf32>
    %208 = arith.addf %203, %207 : vector<1x256xf32>
    %209 = vector.extract_strided_slice %167 {offsets = [8, 0], sizes = [1, 128], strides = [1, 1]} : vector<16x128xbf16> to vector<1x128xbf16>
    %c8 = arith.constant 8 : index
    %c0_200 = arith.constant 0 : index
    %c0_201 = arith.constant 0 : index
    %210 = vector.load %arg8[%c8, %c0_200, %c0_201] : memref<16x128x256xbf16, #tpu.memory_space<vmem>>, vector<1x128x256xbf16>
    %211 = vector.shape_cast %210 : vector<1x128x256xbf16> to vector<128x256xbf16>
    %cst_202 = arith.constant dense<0.000000e+00> : vector<1x256xf32>
    %212 = tpu.matmul %209, %211, %cst_202 {dimension_numbers = #tpu.dot_dimension_numbers<[1], [0], [0], [1], [0, 0, 1, 1], [], []>} : vector<1x128xbf16>, vector<128x256xbf16>, vector<1x256xf32> -> vector<1x256xf32>
    %213 = arith.addf %208, %212 : vector<1x256xf32>
    %214 = vector.extract_strided_slice %167 {offsets = [9, 0], sizes = [1, 128], strides = [1, 1]} : vector<16x128xbf16> to vector<1x128xbf16>
    %c9 = arith.constant 9 : index
    %c0_203 = arith.constant 0 : index
    %c0_204 = arith.constant 0 : index
    %215 = vector.load %arg8[%c9, %c0_203, %c0_204] : memref<16x128x256xbf16, #tpu.memory_space<vmem>>, vector<1x128x256xbf16>
    %216 = vector.shape_cast %215 : vector<1x128x256xbf16> to vector<128x256xbf16>
    %cst_205 = arith.constant dense<0.000000e+00> : vector<1x256xf32>
    %217 = tpu.matmul %214, %216, %cst_205 {dimension_numbers = #tpu.dot_dimension_numbers<[1], [0], [0], [1], [0, 0, 1, 1], [], []>} : vector<1x128xbf16>, vector<128x256xbf16>, vector<1x256xf32> -> vector<1x256xf32>
    %218 = arith.addf %213, %217 : vector<1x256xf32>
    %219 = vector.extract_strided_slice %167 {offsets = [10, 0], sizes = [1, 128], strides = [1, 1]} : vector<16x128xbf16> to vector<1x128xbf16>
    %c10 = arith.constant 10 : index
    %c0_206 = arith.constant 0 : index
    %c0_207 = arith.constant 0 : index
    %220 = vector.load %arg8[%c10, %c0_206, %c0_207] : memref<16x128x256xbf16, #tpu.memory_space<vmem>>, vector<1x128x256xbf16>
    %221 = vector.shape_cast %220 : vector<1x128x256xbf16> to vector<128x256xbf16>
    %cst_208 = arith.constant dense<0.000000e+00> : vector<1x256xf32>
    %222 = tpu.matmul %219, %221, %cst_208 {dimension_numbers = #tpu.dot_dimension_numbers<[1], [0], [0], [1], [0, 0, 1, 1], [], []>} : vector<1x128xbf16>, vector<128x256xbf16>, vector<1x256xf32> -> vector<1x256xf32>
    %223 = arith.addf %218, %222 : vector<1x256xf32>
    %224 = vector.extract_strided_slice %167 {offsets = [11, 0], sizes = [1, 128], strides = [1, 1]} : vector<16x128xbf16> to vector<1x128xbf16>
    %c11 = arith.constant 11 : index
    %c0_209 = arith.constant 0 : index
    %c0_210 = arith.constant 0 : index
    %225 = vector.load %arg8[%c11, %c0_209, %c0_210] : memref<16x128x256xbf16, #tpu.memory_space<vmem>>, vector<1x128x256xbf16>
    %226 = vector.shape_cast %225 : vector<1x128x256xbf16> to vector<128x256xbf16>
    %cst_211 = arith.constant dense<0.000000e+00> : vector<1x256xf32>
    %227 = tpu.matmul %224, %226, %cst_211 {dimension_numbers = #tpu.dot_dimension_numbers<[1], [0], [0], [1], [0, 0, 1, 1], [], []>} : vector<1x128xbf16>, vector<128x256xbf16>, vector<1x256xf32> -> vector<1x256xf32>
    %228 = arith.addf %223, %227 : vector<1x256xf32>
    %229 = vector.extract_strided_slice %167 {offsets = [12, 0], sizes = [1, 128], strides = [1, 1]} : vector<16x128xbf16> to vector<1x128xbf16>
    %c12 = arith.constant 12 : index
    %c0_212 = arith.constant 0 : index
    %c0_213 = arith.constant 0 : index
    %230 = vector.load %arg8[%c12, %c0_212, %c0_213] : memref<16x128x256xbf16, #tpu.memory_space<vmem>>, vector<1x128x256xbf16>
    %231 = vector.shape_cast %230 : vector<1x128x256xbf16> to vector<128x256xbf16>
    %cst_214 = arith.constant dense<0.000000e+00> : vector<1x256xf32>
    %232 = tpu.matmul %229, %231, %cst_214 {dimension_numbers = #tpu.dot_dimension_numbers<[1], [0], [0], [1], [0, 0, 1, 1], [], []>} : vector<1x128xbf16>, vector<128x256xbf16>, vector<1x256xf32> -> vector<1x256xf32>
    %233 = arith.addf %228, %232 : vector<1x256xf32>
    %234 = vector.extract_strided_slice %167 {offsets = [13, 0], sizes = [1, 128], strides = [1, 1]} : vector<16x128xbf16> to vector<1x128xbf16>
    %c13 = arith.constant 13 : index
    %c0_215 = arith.constant 0 : index
    %c0_216 = arith.constant 0 : index
    %235 = vector.load %arg8[%c13, %c0_215, %c0_216] : memref<16x128x256xbf16, #tpu.memory_space<vmem>>, vector<1x128x256xbf16>
    %236 = vector.shape_cast %235 : vector<1x128x256xbf16> to vector<128x256xbf16>
    %cst_217 = arith.constant dense<0.000000e+00> : vector<1x256xf32>
    %237 = tpu.matmul %234, %236, %cst_217 {dimension_numbers = #tpu.dot_dimension_numbers<[1], [0], [0], [1], [0, 0, 1, 1], [], []>} : vector<1x128xbf16>, vector<128x256xbf16>, vector<1x256xf32> -> vector<1x256xf32>
    %238 = arith.addf %233, %237 : vector<1x256xf32>
    %239 = vector.extract_strided_slice %167 {offsets = [14, 0], sizes = [1, 128], strides = [1, 1]} : vector<16x128xbf16> to vector<1x128xbf16>
    %c14 = arith.constant 14 : index
    %c0_218 = arith.constant 0 : index
    %c0_219 = arith.constant 0 : index
    %240 = vector.load %arg8[%c14, %c0_218, %c0_219] : memref<16x128x256xbf16, #tpu.memory_space<vmem>>, vector<1x128x256xbf16>
    %241 = vector.shape_cast %240 : vector<1x128x256xbf16> to vector<128x256xbf16>
    %cst_220 = arith.constant dense<0.000000e+00> : vector<1x256xf32>
    %242 = tpu.matmul %239, %241, %cst_220 {dimension_numbers = #tpu.dot_dimension_numbers<[1], [0], [0], [1], [0, 0, 1, 1], [], []>} : vector<1x128xbf16>, vector<128x256xbf16>, vector<1x256xf32> -> vector<1x256xf32>
    %243 = arith.addf %238, %242 : vector<1x256xf32>
    %244 = vector.extract_strided_slice %167 {offsets = [15, 0], sizes = [1, 128], strides = [1, 1]} : vector<16x128xbf16> to vector<1x128xbf16>
    %c15 = arith.constant 15 : index
    %c0_221 = arith.constant 0 : index
    %c0_222 = arith.constant 0 : index
    %245 = vector.load %arg8[%c15, %c0_221, %c0_222] : memref<16x128x256xbf16, #tpu.memory_space<vmem>>, vector<1x128x256xbf16>
    %246 = vector.shape_cast %245 : vector<1x128x256xbf16> to vector<128x256xbf16>
    %cst_223 = arith.constant dense<0.000000e+00> : vector<1x256xf32>
    %247 = tpu.matmul %244, %246, %cst_223 {dimension_numbers = #tpu.dot_dimension_numbers<[1], [0], [0], [1], [0, 0, 1, 1], [], []>} : vector<1x128xbf16>, vector<128x256xbf16>, vector<1x256xf32> -> vector<1x256xf32>
    %248 = arith.addf %243, %247 : vector<1x256xf32>
    %c0_224 = arith.constant 0 : index
    %c0_225 = arith.constant 0 : index
    %249 = vector.load %arg9[%c0_224, %c0_225] : memref<1x256xf32, #tpu.memory_space<vmem>>, vector<1x256xf32>
    %250 = arith.addf %248, %249 : vector<1x256xf32>
    %cst_226 = arith.constant 0.000000e+00 : f32
    %251 = vector.broadcast %cst_226 : f32 to vector<1x256xf32>
    %252 = arith.maximumf %250, %251 : vector<1x256xf32>
    %253 = arith.truncf %252 : vector<1x256xf32> to vector<1x256xbf16>
    %c0_227 = arith.constant 0 : index
    %c0_228 = arith.constant 0 : index
    %254 = vector.load %arg10[%c0_227, %c0_228] : memref<256x10xbf16, #tpu.memory_space<vmem>>, vector<256x10xbf16>
    %cst_229 = arith.constant dense<0.000000e+00> : vector<1x10xf32>
    %255 = tpu.matmul %253, %254, %cst_229 {dimension_numbers = #tpu.dot_dimension_numbers<[1], [0], [0], [1], [0, 0, 1, 1], [], []>} : vector<1x256xbf16>, vector<256x10xbf16>, vector<1x10xf32> -> vector<1x10xf32>
    %c0_230 = arith.constant 0 : index
    %c0_231 = arith.constant 0 : index
    %256 = vector.load %arg11[%c0_230, %c0_231] : memref<1x10xf32, #tpu.memory_space<vmem>>, vector<1x10xf32>
    %257 = arith.addf %255, %256 : vector<1x10xf32>
    %258 = vector.shape_cast %257 : vector<1x10xf32> to vector<1x1x10xf32>
    %c0_232 = arith.constant 0 : index
    %c0_233 = arith.constant 0 : index
    %c0_234 = arith.constant 0 : index
    %259 = vector.load %arg12[%c0_232, %c0_233, %c0_234] : memref<1x1x10xf32, #tpu.memory_space<vmem>>, vector<1x1x10xf32>
    tpu.vector_store %arg12[%c0_232, %c0_233, %c0_234], %258 {strides = array<i32>} : memref<1x1x10xf32, #tpu.memory_space<vmem>>, vector<1x1x10xf32>,
    return
  }
  func.func @transform_0(%arg0: i32) -> (i32, i32, i32, i32) {
    %c0_i32 = arith.constant 0 : i32
    %c0_i32_0 = arith.constant 0 : i32
    %c0_i32_1 = arith.constant 0 : i32
    %c0_i32_2 = arith.constant 0 : i32
    return %arg0, %c0_i32, %c0_i32_0, %c0_i32_1 : i32, i32, i32, i32
  }
  func.func @transform_1(%arg0: i32) -> (i32, i32, i32, i32) {
    %c0_i32 = arith.constant 0 : i32
    %c0_i32_0 = arith.constant 0 : i32
    %c0_i32_1 = arith.constant 0 : i32
    %c0_i32_2 = arith.constant 0 : i32
    %c0_i32_3 = arith.constant 0 : i32
    return %c0_i32, %c0_i32_0, %c0_i32_1, %c0_i32_2 : i32, i32, i32, i32
  }
  func.func @transform_2(%arg0: i32) -> (i32, i32) {
    %c0_i32 = arith.constant 0 : i32
    %c0_i32_0 = arith.constant 0 : i32
    %c0_i32_1 = arith.constant 0 : i32
    return %c0_i32, %c0_i32_0 : i32, i32
  }
  func.func @transform_3(%arg0: i32) -> (i32, i32, i32, i32) {
    %c0_i32 = arith.constant 0 : i32
    %c0_i32_0 = arith.constant 0 : i32
    %c0_i32_1 = arith.constant 0 : i32
    %c0_i32_2 = arith.constant 0 : i32
    %c0_i32_3 = arith.constant 0 : i32
    return %c0_i32, %c0_i32_0, %c0_i32_1, %c0_i32_2 : i32, i32, i32, i32
  }
  func.func @transform_4(%arg0: i32) -> (i32, i32) {
    %c0_i32 = arith.constant 0 : i32
    %c0_i32_0 = arith.constant 0 : i32
    %c0_i32_1 = arith.constant 0 : i32
    return %c0_i32, %c0_i32_0 : i32, i32
  }
  func.func @transform_5(%arg0: i32) -> (i32, i32, i32, i32) {
    %c0_i32 = arith.constant 0 : i32
    %c0_i32_0 = arith.constant 0 : i32
    %c0_i32_1 = arith.constant 0 : i32
    %c0_i32_2 = arith.constant 0 : i32
    %c0_i32_3 = arith.constant 0 : i32
    return %c0_i32, %c0_i32_0, %c0_i32_1, %c0_i32_2 : i32, i32, i32, i32
  }
  func.func @transform_6(%arg0: i32) -> (i32, i32) {
    %c0_i32 = arith.constant 0 : i32
    %c0_i32_0 = arith.constant 0 : i32
    %c0_i32_1 = arith.constant 0 : i32
    return %c0_i32, %c0_i32_0 : i32, i32
  }
  func.func @transform_7(%arg0: i32) -> (i32, i32, i32) {
    %c0_i32 = arith.constant 0 : i32
    %c0_i32_0 = arith.constant 0 : i32
    %c0_i32_1 = arith.constant 0 : i32
    %c0_i32_2 = arith.constant 0 : i32
    return %c0_i32, %c0_i32_0, %c0_i32_1 : i32, i32, i32
  }
  func.func @transform_8(%arg0: i32) -> (i32, i32) {
    %c0_i32 = arith.constant 0 : i32
    %c0_i32_0 = arith.constant 0 : i32
    %c0_i32_1 = arith.constant 0 : i32
    return %c0_i32, %c0_i32_0 : i32, i32
  }
  func.func @transform_9(%arg0: i32) -> (i32, i32) {
    %c0_i32 = arith.constant 0 : i32
    %c0_i32_0 = arith.constant 0 : i32
    %c0_i32_1 = arith.constant 0 : i32
    return %c0_i32, %c0_i32_0 : i32, i32
  }
  func.func @transform_10(%arg0: i32) -> (i32, i32) {
    %c0_i32 = arith.constant 0 : i32
    %c0_i32_0 = arith.constant 0 : i32
    %c0_i32_1 = arith.constant 0 : i32
    return %c0_i32, %c0_i32_0 : i32, i32
  }
  func.func @transform_11(%arg0: i32) -> (i32, i32, i32) {
    %c0_i32 = arith.constant 0 : i32
    %c0_i32_0 = arith.constant 0 : i32
    %c0_i32_1 = arith.constant 0 : i32
    return %arg0, %c0_i32, %c0_i32_0 : i32, i32, i32
  }
}

</mosaic_0001>

<bundles_post_ra>
// kernel: tpu_custom_call.1
= control target key start
LH: loop header
LB: loop body
LE: loop exit
PB: predicated region body
PF: predicated region fallthrough
CT: control target
= control target key end

     0   :  { %s15693_s0 = inlined_call_operand.vmem [shape: bf16[2,34,34,3], index: 0, kind: input, shape index: {}]   ;;  %s15694_s1 = inlined_call_operand.vmem [shape: bf16[3,3,3,32], index: 1, kind: input, shape index: {}]   ;;  %s15695_s2 = inlined_call_operand.vmem [shape: f32[1,32], index: 2, kind: input, shape index: {}]   ;;  %s15696_s3 = inlined_call_operand.vmem [shape: bf16[3,3,32,64], index: 3, kind: input, shape index: {}]   ;;  %s15697_s4 = inlined_call_operand.vmem [shape: f32[1,64], index: 4, kind: input, shape index: {}]   ;;  %s15698_s5 = inlined_call_operand.vmem [shape: bf16[3,3,64,128], index: 5, kind: input, shape index: {}]   ;;  %s15699_s6 = inlined_call_operand.vmem [shape: f32[1,128], index: 6, kind: input, shape index: {}]   ;;  %s15700_s7 = inlined_call_operand.hbm [shape: bf16[16,128,256], index: 7, kind: input, shape index: {}]   ;;  %s15701_s8 = inlined_call_operand.vmem [shape: f32[1,256], index: 8, kind: input, shape index: {}]   ;;  %s15702_s9 = inlined_call_operand.vmem [shape: bf16[256,10], index: 9, kind: input, shape index: {}]   ;;  %s15703_s10 = inlined_call_operand.vmem [shape: f32[1,10], index: 10, kind: input, shape index: {}]   ;;  %s15704_s11 = inlined_call_operand.hbm [shape: f32[2,1,10], index: 11, kind: output, shape index: {}]  }
   0x1   :  { %15717 = sst [smem:[#allocation40_spill]] %s15693_s0 }
   0x2   :  { %15718 = sst [smem:[#allocation41_spill]] %s15694_s1 }
   0x3   :  { %15719 = sst [smem:[#allocation42_spill]] %s15700_s7 }
   0x4   :  { %16 = vsyncpa [#allocation8], 0 }
   0x5   :  { %17 = vsyncpa [#allocation9], 0 }
   0x6   :  { %19 = vsyncpa [#allocation9 + $0x1], 0  ;;  %s12521_s17 = smov 0   ;;  %s12523_s18 = smov 0  }
   0x7   :  { %s12525_s19 = smov 0   ;;  %s12527_s20 = smov 0  }
   0x8 LB: > { %s12542_s21 = sadd.s32 4294967295, %s12450_s20   ;;  %s9722_s22 = sadd.s32 4294967294, %s12450_s20   ;;  %s12450_s20 = sphi %s12527_s20, %s15822_s20   ;;  %s12446_s19 = sphi %s12525_s19, %s15821_s19   ;;  %s12442_s18 = sphi %s12523_s18, %s15820_s18   ;;  %s12438_s17 = sphi %s12521_s17, %s15819_s17  }
   0x9   : > { %s12546_s23 = sadd.s32 1, %s12450_s20   ;;  %s268_s24 = sadd.s32 1, %s12446_s19 }
   0xa   : > { %s265_s25 = ssub.s32 %s12450_s20, %s12546_s23  ;;  %p278_p0 = scmp.ne.s32.totalorder %s12446_s19, %s12442_s18 }
   0xb   : > { %p266_p1 = scmp.eq.s32.totalorder %s265_s25, 0  ;;  %p279_p2 = scmp.eq.s32.totalorder %s12542_s21, 1 }
   0xc   : > { %p284_p3 = scmp.ne.s32.totalorder %s12442_s18, %s12438_s17  ;;  %p285_p4 = scmp.eq.s32.totalorder %s9722_s22, 1 }
   0xd   : > { %s12557_s26 = scalar_select %p266_p1, %s12446_s19, %s268_s24  }
   0xe   : > { %p12559_p5 = por %p279_p2, %p278_p0  ;;  %p12563_p6 = por %p285_p4, %p284_p3 }
   0xf   : > { %p9723_p7 = scmp.ge.s32.totalorder %s12450_s20, 1  ;;  %p292_p8 = scmp.lt.s32.totalorder %s12450_s20, 3 }
  0x10   : > { %p12249_p9 = scmp.eq.s32.totalorder %s12542_s21, 0  ;;  %s15722_s7 = sld [smem:[#allocation42_spill]] }
  0x11   : > { %p293_p10 = pnand %p9723_p7, %p292_p8  ;;  %s12456_s13 = smov [#allocation7]  }
  0x12   : > { %s323_s14 = sshll.u32 %s12456_s13, 4  ;;  %s12457_s15 = smov 128   ;;  %s324_s14 = int_to_ptr.vmem [resolvable:$true] %s323_s14 }
  0x13   : > { %p12241_p11 = pneg %p293_p10  ;;  %s12458_s16 = smov 8  }
  0x14   : > { %356 = sbr.rel (%p293_p10) target bundleno = 2509 (0x9cd), region = 64 }
  0x15   : > { %p12242_p12 = pnand %p12249_p9, %p12241_p11 }
  0x16   : > { %s321_s12 = sshll.u32 %s15722_s7, 4  ;;  %s322_s12 = int_to_ptr.hbm [resolvable:$true] %s321_s12 }
  0x17   : > { %12244 = dma.hbm_to_vmem [thread:$0]  (!%p12242_p12), %s322_s12, 32768, %s324_s14, [#allocation8], %s12457_s15, %s12457_s15, %s12458_s16  }
  0x19   : > { %12429 = dma.done.wait (%p12249_p9), [#allocation8], 32768  }
  0x1a   : > { %12431 = vsyncadd (%p12249_p9), [#allocation8], 4294934528  ;;  %s15705_s22 = sand.u32 1, %s12442_s18   ;;  %p396_p13 = scmp.lt.s32.totalorder %s12542_s21, 1  ;;  %vm402_vm0 = vcmask 261120   ;;  %v12459_v0 = vmov 0.0  }
  0x1b   : > { %403 = vst.msk [vmem:[#allocation2] sm:$0xff] %vm402_vm0, %v12459_v0  ;;  %s15723_s0 = sld [smem:[#allocation40_spill]]  ;;  %vm405_vm1 = vcmask 254976   ;;  %vm458_vm2 = vcmask 523264   ;;  %vm460_vm3 = vcmask 517120   ;;  %s12727_s13 = scalar_lea.vmem [#allocation10], %s15705_s22 }
  0x1c   : > { %s397_s24 = scalar_select %p396_p13, %s12542_s21, 1  ;;  %404 = vst.msk [vmem:[#allocation2 + $0x8] sm:$0xff] %vm402_vm0, %v12459_v0 }
  0x1d   : > { %407 = vst.msk [vmem:[#allocation2 + $0x18] sm:$0xff] %vm402_vm0, %v12459_v0  ;;  %s12729_s14 = smov 0  }
  0x1e   : > { %s12234_s25 = smul.u32 680, %s397_s24  ;;  %408 = vst.msk [vmem:[#allocation2 + $0x20] sm:$0xff] %vm402_vm0, %v12459_v0 }
  0x1f   : > { %410 = vst.msk [vmem:[#allocation2 + $0x30] sm:$0xff] %vm402_vm0, %v12459_v0 }
  0x20   : > { %411 = vst.msk [vmem:[#allocation2 + $0x38] sm:$0xff] %vm402_vm0, %v12459_v0 }
  0x21   : > { %s12595_s12 = scalar_lea.vmem %s15723_s0, %s12234_s25  ;;  %413 = vst.msk [vmem:[#allocation2 + $0x48] sm:$0xff] %vm402_vm0, %v12459_v0 }
  0x22   : > { %414 = vst.msk [vmem:[#allocation2 + $0x50] sm:$0xff] %vm402_vm0, %v12459_v0 }
  0x23   : > { %416 = vst.msk [vmem:[#allocation2 + $0x60] sm:$0xff] %vm402_vm0, %v12459_v0 }
  0x24   : > { %417 = vst.msk [vmem:[#allocation2 + $0x68] sm:$0xff] %vm402_vm0, %v12459_v0 }
  0x25   : > { %419 = vst.msk [vmem:[#allocation2 + $0x78] sm:$0xff] %vm402_vm0, %v12459_v0 }
  0x26   : > { %420 = vst.msk [vmem:[#allocation2 + $0x80] sm:$0xff] %vm402_vm0, %v12459_v0 }
  0x27   : > { %422 = vst.msk [vmem:[#allocation2 + $0x90] sm:$0xff] %vm402_vm0, %v12459_v0 }
  0x28   : > { %423 = vst.msk [vmem:[#allocation2 + $0x98] sm:$0xff] %vm402_vm0, %v12459_v0 }
  0x29   : > { %425 = vst.msk [vmem:[#allocation2 + $0xa8] sm:$0xff] %vm402_vm0, %v12459_v0 }
  0x2a   : > { %426 = vst.msk [vmem:[#allocation2 + $0xb0] sm:$0xff] %vm402_vm0, %v12459_v0 }
  0x2b   : > { %428 = vst.msk [vmem:[#allocation2 + $0xc0] sm:$0xff] %vm402_vm0, %v12459_v0 }
  0x2c   : > { %429 = vst.msk [vmem:[#allocation2 + $0xc8] sm:$0xff] %vm402_vm0, %v12459_v0 }
  0x2d   : > { %431 = vst.msk [vmem:[#allocation2 + $0xd8] sm:$0xff] %vm402_vm0, %v12459_v0 }
  0x2e   : > { %432 = vst.msk [vmem:[#allocation2 + $0xe0] sm:$0xff] %vm402_vm0, %v12459_v0 }
  0x2f   : > { %434 = vst.msk [vmem:[#allocation2 + $0xf0] sm:$0xff] %vm402_vm0, %v12459_v0 }
  0x30   : > { %435 = vst.msk [vmem:[#allocation2 + $0xf8] sm:$0xff] %vm402_vm0, %v12459_v0 }
  0x31   : > { %437 = vst.msk [vmem:[#allocation2 + $0x108] sm:$0xff] %vm402_vm0, %v12459_v0 }
  0x32   : > { %438 = vst.msk [vmem:[#allocation2 + $0x110] sm:$0xff] %vm402_vm0, %v12459_v0 }
  0x33   : > { %440 = vst.msk [vmem:[#allocation2 + $0x120] sm:$0xff] %vm402_vm0, %v12459_v0 }
  0x34   : > { %441 = vst.msk [vmem:[#allocation2 + $0x128] sm:$0xff] %vm402_vm0, %v12459_v0 }
  0x35   : > { %443 = vst.msk [vmem:[#allocation2 + $0x138] sm:$0xff] %vm402_vm0, %v12459_v0 }
  0x36   : > { %444 = vst.msk [vmem:[#allocation2 + $0x140] sm:$0xff] %vm402_vm0, %v12459_v0 }
  0x37   : > { %446 = vst.msk [vmem:[#allocation2 + $0x150] sm:$0xff] %vm402_vm0, %v12459_v0 }
  0x38   : > { %447 = vst.msk [vmem:[#allocation2 + $0x158] sm:$0xff] %vm402_vm0, %v12459_v0 }
  0x39   : > { %449 = vst.msk [vmem:[#allocation2 + $0x168] sm:$0xff] %vm402_vm0, %v12459_v0 }
  0x3a   : > { %450 = vst.msk [vmem:[#allocation2 + $0x170] sm:$0xff] %vm402_vm0, %v12459_v0 }
  0x3b   : > { %452 = vst.msk [vmem:[#allocation2 + $0x180] sm:$0xff] %vm402_vm0, %v12459_v0 }
  0x3c   : > { %453 = vst.msk [vmem:[#allocation2 + $0x188] sm:$0xff] %vm402_vm0, %v12459_v0 }
  0x3d   : > { %455 = vst.msk [vmem:[#allocation2 + $0x198] sm:$0xff] %vm402_vm0, %v12459_v0 }
  0x3e   : > { %456 = vst.msk [vmem:[#allocation2 + $0x1a0] sm:$0xff] %vm402_vm0, %v12459_v0 }
  0x3f   : > { %406 = vst.msk [vmem:[#allocation2 + $0x10] sm:$0x3] %vm405_vm1, %v12459_v0 }
  0x40   : > { %409 = vst.msk [vmem:[#allocation2 + $0x28] sm:$0x3] %vm405_vm1, %v12459_v0 }
  0x41   : > { %412 = vst.msk [vmem:[#allocation2 + $0x40] sm:$0x3] %vm405_vm1, %v12459_v0 }
  0x42   : > { %415 = vst.msk [vmem:[#allocation2 + $0x58] sm:$0x3] %vm405_vm1, %v12459_v0 }
  0x43   : > { %418 = vst.msk [vmem:[#allocation2 + $0x70] sm:$0x3] %vm405_vm1, %v12459_v0 }
  0x44   : > { %421 = vst.msk [vmem:[#allocation2 + $0x88] sm:$0x3] %vm405_vm1, %v12459_v0 }
  0x45   : > { %424 = vst.msk [vmem:[#allocation2 + $0xa0] sm:$0x3] %vm405_vm1, %v12459_v0 }
  0x46   : > { %427 = vst.msk [vmem:[#allocation2 + $0xb8] sm:$0x3] %vm405_vm1, %v12459_v0 }
  0x47   : > { %430 = vst.msk [vmem:[#allocation2 + $0xd0] sm:$0x3] %vm405_vm1, %v12459_v0 }
  0x48   : > { %433 = vst.msk [vmem:[#allocation2 + $0xe8] sm:$0x3] %vm405_vm1, %v12459_v0 }
  0x49   : > { %436 = vst.msk [vmem:[#allocation2 + $0x100] sm:$0x3] %vm405_vm1, %v12459_v0 }
  0x4a   : > { %439 = vst.msk [vmem:[#allocation2 + $0x118] sm:$0x3] %vm405_vm1, %v12459_v0 }
  0x4b   : > { %442 = vst.msk [vmem:[#allocation2 + $0x130] sm:$0x3] %vm405_vm1, %v12459_v0 }
  0x4c   : > { %445 = vst.msk [vmem:[#allocation2 + $0x148] sm:$0x3] %vm405_vm1, %v12459_v0 }
  0x4d   : > { %448 = vst.msk [vmem:[#allocation2 + $0x160] sm:$0x3] %vm405_vm1, %v12459_v0 }
  0x4e   : > { %451 = vst.msk [vmem:[#allocation2 + $0x178] sm:$0x3] %vm405_vm1, %v12459_v0 }
  0x4f   : > { %454 = vst.msk [vmem:[#allocation2 + $0x190] sm:$0x3] %vm405_vm1, %v12459_v0 }
  0x50   : > { %457 = vst.msk [vmem:[#allocation2 + $0x1a8] sm:$0x3] %vm405_vm1, %v12459_v0 }
  0x51   : > { %459 = vst.msk [vmem:[#allocation3] sm:$0xff] %vm458_vm2, %v12459_v0 }
  0x52   : > { %462 = vst.msk [vmem:[#allocation3 + $0x10] sm:$0xff] %vm458_vm2, %v12459_v0 }
  0x53   : > { %464 = vst.msk [vmem:[#allocation3 + $0x20] sm:$0xff] %vm458_vm2, %v12459_v0 }
  0x54   : > { %466 = vst.msk [vmem:[#allocation3 + $0x30] sm:$0xff] %vm458_vm2, %v12459_v0 }
  0x55   : > { %468 = vst.msk [vmem:[#allocation3 + $0x40] sm:$0xff] %vm458_vm2, %v12459_v0 }
  0x56   : > { %470 = vst.msk [vmem:[#allocation3 + $0x50] sm:$0xff] %vm458_vm2, %v12459_v0 }
  0x57   : > { %472 = vst.msk [vmem:[#allocation3 + $0x60] sm:$0xff] %vm458_vm2, %v12459_v0 }
  0x58   : > { %474 = vst.msk [vmem:[#allocation3 + $0x70] sm:$0xff] %vm458_vm2, %v12459_v0 }
  0x59   : > { %476 = vst.msk [vmem:[#allocation3 + $0x80] sm:$0xff] %vm458_vm2, %v12459_v0 }
  0x5a   : > { %478 = vst.msk [vmem:[#allocation3 + $0x90] sm:$0xff] %vm458_vm2, %v12459_v0 }
  0x5b   : > { %461 = vst.msk [vmem:[#allocation3 + $0x8] sm:$0x3] %vm460_vm3, %v12459_v0 }
  0x5c   : > { %463 = vst.msk [vmem:[#allocation3 + $0x18] sm:$0x3] %vm460_vm3, %v12459_v0 }
  0x5d   : > { %465 = vst.msk [vmem:[#allocation3 + $0x28] sm:$0x3] %vm460_vm3, %v12459_v0 }
  0x5e   : > { %467 = vst.msk [vmem:[#allocation3 + $0x38] sm:$0x3] %vm460_vm3, %v12459_v0 }
  0x5f   : > { %469 = vst.msk [vmem:[#allocation3 + $0x48] sm:$0x3] %vm460_vm3, %v12459_v0 }
  0x60   : > { %471 = vst.msk [vmem:[#allocation3 + $0x58] sm:$0x3] %vm460_vm3, %v12459_v0 }
  0x61   : > { %473 = vst.msk [vmem:[#allocation3 + $0x68] sm:$0x3] %vm460_vm3, %v12459_v0 }
  0x62   : > { %475 = vst.msk [vmem:[#allocation3 + $0x78] sm:$0x3] %vm460_vm3, %v12459_v0 }
  0x63   : > { %477 = vst.msk [vmem:[#allocation3 + $0x88] sm:$0x3] %vm460_vm3, %v12459_v0 }
  0x64   : > { %479 = vst.msk [vmem:[#allocation3 + $0x98] sm:$0x3] %vm460_vm3, %v12459_v0 }
  0x65 LB: >> { %s15724_s1 = sld [smem:[#allocation41_spill]]  ;;  %vm985_vm4 = vcmask 1040384   ;;  %vm986_vm5 = vcmask 1041408   ;;  %v12460_v2 = vmov 65535   ;;  %s11856_s24 = smul.u32 160, %s12454_s14  ;;  %vm936_vm8 = vcmask 23552   ;;  %s12454_s14 = sphi %s12729_s14, %s485_s14  }
  0x66   : >> { %v987_v3 = vsel %vm985_vm4, 4294967295, %v12460_v2  ;;  %vm531_vm6 = vsmask.f32 3328  ;;  %vm532_vm7 = vsmask.f32 7440  ;;  %vm1325_vm10 = vcmask 1042432  }
  0x67   : >> { %v12737_v4 = vsel %vm986_vm5, %v987_v3, 0  ;;  %s12756_s25 = scalar_lea.vmem %s12595_s12, %s11856_s24  ;;  %vm12782_vm9 = vmor %vm531_vm6, %vm532_vm7  ;;  %vm1326_vm11 = vcmask 1046532   ;;  %s10265_s22 = smul.u32 96, %s12454_s14 }
  0x68   : >> { %v498_v14 = vld [vmem:[%s12756_s25 + $0x28] sm:$0xf]  ;;  %v12762_v15 = vld [vmem:[%s12756_s25 + $0x2c] sm:$0xf]  ;;  %v12765_v16 = vld [vmem:[%s12756_s25 + $0x30] sm:$0xf] }
  0x69   : >> { %v623_v17 = vshrl.u32 %v498_v14, 16  ;;  %v626_v18 = vshll.u32 %v498_v14, 16  ;;  %v632_v19 = vshll.u32 %v12762_v15, 16  ;;  %v636_v20 = vshrl.u32 %v12762_v15, 16  ;;  %v506_v21 = vld [vmem:[%s12756_s25 + $0x50] sm:$0xf]  ;;  %vm12993_vm12 = vmor %vm1325_vm10, %vm1326_vm11 }
  0x6a   : >> { %v642_v22 = vshll.u32 %v12765_v16, 16  ;;  %v507_v23 = vld [vmem:[%s12756_s25 + $0x54] sm:$0xf]  ;;  %v12773_v24 = vld [vmem:[%s12756_s25 + $0x58] sm:$0xf]  ;;  %v711_v25 = vshrl.u32 %v506_v21, 16 }
  0x6b   : >> { %v9732_v1 = vld [vmem:[%s15724_s1 + $0x2] sm:$0x3]  ;;  %v9837_v5 = vld [vmem:[%s15724_s1 + $0x4] sm:$0x3]  ;;  %v9888_v6 = vld [vmem:[%s15724_s1 + $0x6] sm:$0x3] }
  0x6c   : >> { %v990_v7 = vand.u32 %v9732_v1, %v12737_v4  ;;  %v1531_v8 = vand.u32 %v9837_v5, %v12737_v4  ;;  %v1821_v9 = vand.u32 %v9888_v6, %v12737_v4  ;;  %v522_v10 = vld [vmem:[%s15724_s1] sm:$0x3]  ;;  %v10009_v11 = vld [vmem:[%s15724_s1 + $0x8] sm:$0x3]  ;;  %v625_v26 = vrot.slane %v623_v17, 4  ;;  %s14054_s24 = scalar_lea.vmem [#allocation2], %s10265_s22 }
  0x6d   : >> { %v1210_v12 = vand.u32 %v12737_v4, %v522_v10  ;;  %v2435_v13 = vand.u32 %v10009_v11, %v12737_v4  ;;  %v628_v27 = vrot.slane %v626_v18, 5  ;;  %v634_v28 = vrot.slane %v632_v19, 5  ;;  %v514_v30 = vld [vmem:[%s12756_s25 + $0x78] sm:$0xf]  ;;  %v515_v39 = vld [vmem:[%s12756_s25 + $0x7c] sm:$0xf] }
  0x6e   : >> { %12231 = vmatpush.bf16.msra.mxu1 %v990_v7  ;;  %12232 = vmatpush.bf16.msra.mxu2 %v990_v7  ;;  %v638_v29 = vrot.slane %v636_v20, 4  ;;  %v12776_v31 = vrot.slane %v642_v22, 5  ;;  %v713_v32 = vrot.slane %v711_v25, 4  ;;  %v714_v33 = vshll.u32 %v506_v21, 16  ;;  %v12789_v50 = vld [vmem:[%s12756_s25 + $0x80] sm:$0xf] }
  0x6f   : >> { %12233 = vmatpush.bf16.msra.mxu3 %v990_v7  ;;  %999 = vmatpush.bf16.msra.mxu0 %v990_v7  ;;  %v720_v34 = vshll.u32 %v507_v23, 16  ;;  %v629_v35 = vor.u32 %v628_v27, %v625_v26  ;;  %v724_v37 = vshrl.u32 %v507_v23, 16  ;;  %v730_v38 = vshll.u32 %v12773_v24, 16  ;;  %v490_v58 = vld [vmem:[%s12756_s25] sm:$0xf]  ;;  %s485_s14 = sadd.s32 1, %s12454_s14  }
  0x70   : >> { %v639_v36 = vor.u32 %v638_v29, %v634_v28  ;;  %v716_v41 = vrot.slane %v714_v33, 5  ;;  %v799_v43 = vshrl.u32 %v514_v30, 16  ;;  %v802_v44 = vshll.u32 %v514_v30, 16  ;;  %v12801_v7 = vld [vmem:[%s12756_s25 + $0x4] sm:$0xf]  ;;  %p482_p0 = scmp.ge.s32.totalorder %s485_s14, 4  }
  0x71   : >> { %v722_v42 = vrot.slane %v720_v34, 5  ;;  %v630_v45 = vrot.slane %v629_v35, 4  ;;  %v726_v47 = vrot.slane %v724_v37, 4  ;;  %v12786_v48 = vrot.slane %v730_v38, 5  ;;  %v12815_v20 = vld [vmem:[%s12756_s25 + $0x34] sm:$0xf] }
  0x72   : >> { %1540 = vmatpush.bf16.msrb.mxu2 %v1531_v8  ;;  %1219 = vmatpush.bf16.msrb.mxu1 %v1210_v12  ;;  %v640_v46 = vrot.slane %v639_v36, 4  ;;  %v717_v49 = vor.u32 %v716_v41, %v713_v32  ;;  %v801_v51 = vrot.slane %v799_v43, 4  ;;  %v804_v52 = vrot.slane %v802_v44, 5  ;;  %v12821_v29 = vld [vmem:[%s12756_s25 + $0x38] sm:$0x1]  ;;  %s15818_s29 = sand.u32 (%p482_p0), 1, %s12442_s18  }
  0x73   : >> { %1830 = vmatpush.bf16.msrb.mxu3 %v1821_v9  ;;  %2444 = vmatpush.bf16.msrb.mxu0 %v2435_v13  ;;  %v808_v53 = vshll.u32 %v515_v39, 16  ;;  %v635_v54 = vsel %vm12782_vm9, %v630_v45, %v634_v28  ;;  %v727_v56 = vor.u32 %v726_v47, %v722_v42  ;;  %v812_v57 = vshrl.u32 %v515_v39, 16  ;;  %v12809_v13 = vld [vmem:[%s12756_s25 + $0x8] sm:$0xf]  ;;  %v509_v41 = vld [vmem:[%s12756_s25 + $0x5c] sm:$0xf] }
  0x74   : >> { %v645_v55 = vsel %vm12782_vm9, %v640_v46, %v12776_v31  ;;  %v896_v59 = vunpack.c.l.b16 %v635_v54  ;;  %v718_v61 = vrot.slane %v717_v49, 4  ;;  %v805_v62 = vor.u32 %v804_v52, %v801_v51  ;;  %s9624_s12 = scalar_lea.sflag (%p482_p0), [#allocation9], %s15818_s29  ;;  %s12400_s16 = scalar_lea.hbm (%p482_p0), %s15704_s11, 2 }
  0x75   : >> { %v897_v60 = vunpack.c.l.b16 %v645_v55  ;;  %v728_v63 = vrot.slane %v727_v56, 4  ;;  %v810_v0 = vrot.slane %v808_v53, 5  ;;  %v814_v1 = vrot.slane %v812_v57, 4  ;;  %v527_v57 = vld [vmem:[%s12756_s25 + $0x60] sm:$0x1] }
  0x76   : >> { %v818_v2 = vshll.u32 %v12789_v50, 16  ;;  %v723_v5 = vsel %vm12782_vm9, %v718_v61, %v722_v42  ;;  %v806_v6 = vrot.slane %v805_v62, 4  ;;  %v535_v8 = vshrl.u32 %v490_v58, 16 }
  0x77   : >> { %v924_v3 = vpack.c.b16 %v897_v60, %v896_v59  ;;  %v733_v9 = vsel %vm12782_vm9, %v728_v63, %v12786_v48  ;;  %v904_v10 = vunpack.c.l.b16 %v723_v5  ;;  %v815_v11 = vor.u32 %v814_v1, %v810_v0 }
  0x78   : >> { %v12806_v12 = vrot.slane %v818_v2, 5  ;;  %v905_v14 = vunpack.c.l.b16 %v733_v9  ;;  %v811_v17 = vsel %vm12782_vm9, %v806_v6, %v810_v0  ;;  %v537_v18 = vrot.slane %v535_v8, 4  ;;  %v517_v2 = vld [vmem:[%s12756_s25 + $0x84] sm:$0xf] }
  0x79   : >> { %9737 = vmatmul.msk.bf16.vlgmr.msra.gmra.mxu1 %vm936_vm8, %v924_v3  ;;  %v538_v19 = vshll.u32 %v490_v58, 16  ;;  %v816_v21 = vrot.slane %v815_v11, 4  ;;  %v912_v22 = vunpack.c.l.b16 %v811_v17  ;;  %v544_v23 = vshll.u32 %v12801_v7, 16  ;;  %v529_v11 = vld [vmem:[%s12756_s25 + $0x88] sm:$0x1] }
  0x7a   : >> { %v548_v25 = vshrl.u32 %v12801_v7, 16  ;;  %v928_v26 = vpack.c.b16 %v905_v14, %v904_v10  ;;  %v554_v28 = vshll.u32 %v12809_v13, 16  ;;  %v646_v30 = vshrl.u32 %v12765_v16, 16 }
  0x7b   : >> { %v540_v27 = vrot.slane %v538_v19, 5  ;;  %v821_v32 = vsel %vm12782_vm9, %v816_v21, %v12806_v12  ;;  %v546_v33 = vrot.slane %v544_v23, 5  ;;  %v652_v35 = vshll.u32 %v12815_v20, 16 }
  0x7c   : >> { %v550_v34 = vrot.slane %v548_v25, 4  ;;  %9741 = vmatmul.msk.bf16.vlgmr.msra.gmra.mxu2 %vm936_vm8, %v928_v26  ;;  %v913_v36 = vunpack.c.l.b16 %v821_v32  ;;  %v12829_v38 = vrot.slane %v554_v28, 5  ;;  %v648_v39 = vrot.slane %v646_v30, 4  ;;  %v12855_v26 = vld [vmem:[%s12756_s25 + $0xc] sm:$0xf] }
  0x7d   : >> { %v541_v37 = vor.u32 %v540_v27, %v537_v18  ;;  %v654_v43 = vrot.slane %v652_v35, 5  ;;  %v656_v16 = vshrl.u32 %v12815_v20, 16  ;;  %v662_v44 = vshll.u32 %v12821_v29, 16  ;;  %v12858_v32 = vld [vmem:[%s12756_s25 + $0x10] sm:$0x1] }
  0x7e   : >> { %v551_v42 = vor.u32 %v550_v34, %v546_v33  ;;  %v932_v45 = vpack.c.b16 %v913_v36, %v912_v22  ;;  %v649_v47 = vor.u32 %v648_v39, %v12776_v31  ;;  %v734_v49 = vshrl.u32 %v12773_v24, 16  ;;  %v502_v36 = vld [vmem:[%s12756_s25 + $0x3c] sm:$0xf] }
  0x7f   : >> { %v542_v46 = vrot.slane %v541_v37, 4  ;;  %v658_v52 = vrot.slane %v656_v16, 4  ;;  %v664_v53 = vrot.slane %v662_v44, 5  ;;  %v740_v54 = vshll.u32 %v509_v41, 16 }
  0x80   : >> { %v552_v51 = vrot.slane %v551_v42, 4  ;;  %9745 = vmatmul.msk.bf16.vlgmr.msra.gmra.mxu3 %vm936_vm8, %v932_v45  ;;  %v650_v56 = vrot.slane %v649_v47, 4  ;;  %v736_v58 = vrot.slane %v734_v49, 4  ;;  %v744_v59 = vshrl.u32 %v509_v41, 16 }
  0x81   : >> { %v547_v55 = vsel %vm12782_vm9, %v542_v46, %v546_v33  ;;  %v659_v60 = vor.u32 %v658_v52, %v654_v43  ;;  %v742_v61 = vrot.slane %v740_v54, 5  ;;  %v750_v6 = vshll.u32 %v527_v57, 16  ;;  %v12870_v46 = vld [vmem:[%s12756_s25 + $0x40] sm:$0xf]  ;;  %v510_v57 = vld [vmem:[%s12756_s25 + $0x64] sm:$0xf] }
  0x82   : >> { %v557_v31 = vsel %vm12782_vm9, %v552_v51, %v12829_v38  ;;  %v888_v24 = vunpack.c.l.b16 %v547_v55  ;;  %v655_v63 = vsel %vm12782_vm9, %v650_v56, %v654_v43  ;;  %v737_v0 = vor.u32 %v736_v58, %v12786_v48  ;;  %v12873_v51 = vld [vmem:[%s12756_s25 + $0x44] sm:$0xf] }
  0x83   : >> { %v889_v62 = vunpack.c.l.b16 %v557_v31  ;;  %v746_v1 = vrot.slane %v744_v59, 4  ;;  %v660_v3 = vrot.slane %v659_v60, 4  ;;  %v898_v5 = vunpack.c.l.b16 %v655_v63 }
  0x84   : >> { %v738_v9 = vrot.slane %v737_v0, 4  ;;  %v822_v14 = vshrl.u32 %v12789_v50, 16  ;;  %v752_v18 = vrot.slane %v750_v6, 5  ;;  %v828_v19 = vshll.u32 %v517_v2, 16 }
  0x85   : >> { %v920_v8 = vpack.c.b16 %v889_v62, %v888_v24  ;;  %v747_v10 = vor.u32 %v746_v1, %v742_v61  ;;  %v665_v17 = vsel %vm12782_vm9, %v660_v3, %v664_v53  ;;  %v832_v48 = vshrl.u32 %v517_v2, 16  ;;  %v511_v3 = vld [vmem:[%s12756_s25 + $0x68] sm:$0xf] }
  0x86   : >> { %v899_v21 = vunpack.c.l.b16 %v665_v17  ;;  %v743_v22 = vsel %vm12782_vm9, %v738_v9, %v742_v61  ;;  %v824_v25 = vrot.slane %v822_v14, 4  ;;  %v830_v28 = vrot.slane %v828_v19, 5 }
  0x87   : >> { %9733 = vmatmul.msk.bf16.vlgmr.msra.gmra.mxu0 %vm936_vm8, %v920_v8  ;;  %v748_v23 = vrot.slane %v747_v10, 4  ;;  %v906_v27 = vunpack.c.l.b16 %v743_v22  ;;  %v834_v50 = vrot.slane %v832_v48, 4  ;;  %v838_v30 = vshll.u32 %v529_v11, 16  ;;  %v518_v11 = vld [vmem:[%s12756_s25 + $0x8c] sm:$0xf] }
  0x88   : >> { %v925_v33 = vpack.c.b16 %v899_v21, %v898_v5  ;;  %v825_v35 = vor.u32 %v824_v25, %v12806_v12  ;;  %v558_v42 = vshrl.u32 %v12809_v13, 16  ;;  %v564_v16 = vshll.u32 %v12855_v26, 16 }
  0x89   : >> { %v753_v34 = vsel %vm12782_vm9, %v748_v23, %v752_v18  ;;  %v835_v39 = vor.u32 %v834_v50, %v830_v28  ;;  %v840_v41 = vrot.slane %v838_v30, 5  ;;  %v568_v44 = vshrl.u32 %v12855_v26, 16  ;;  %v12892_v18 = vld [vmem:[%s12756_s25 + $0x6c] sm:$0xf] }
  0x8a   : >> { %v907_v37 = vunpack.c.l.b16 %v753_v34  ;;  %9738 = vmatmul.msk.bf16.gmra.mxu1 %vm936_vm8, %v925_v33  ;;  %v826_v43 = vrot.slane %v825_v35, 4  ;;  %v574_v45 = vshll.u32 %v12858_v32, 16  ;;  %v560_v49 = vrot.slane %v558_v42, 4  ;;  %v519_v42 = vld [vmem:[%s12756_s25 + $0x90] sm:$0xf] }
  0x8b   : >> { %v836_v12 = vrot.slane %v835_v39, 4  ;;  %v667_v52 = vshrl.u32 %v502_v36, 16  ;;  %v566_v54 = vrot.slane %v564_v16, 5  ;;  %v570_v55 = vrot.slane %v568_v44, 4 }
  0x8c   : >> { %v929_v47 = vpack.c.b16 %v907_v37, %v906_v27  ;;  %v831_v53 = vsel %vm12782_vm9, %v826_v43, %v830_v28  ;;  %v576_v56 = vrot.slane %v574_v45, 5  ;;  %v561_v31 = vor.u32 %v560_v49, %v12829_v38  ;;  %v12904_v45 = vld [vmem:[%s12756_s25 + $0x94] sm:$0xf] }
  0x8d   : >> { %v841_v58 = vsel %vm12782_vm9, %v836_v12, %v840_v41  ;;  %v914_v59 = vunpack.c.l.b16 %v831_v53  ;;  %v669_v24 = vrot.slane %v667_v52, 4  ;;  %v571_v61 = vor.u32 %v570_v55, %v566_v54  ;;  %v494_v12 = vld [vmem:[%s12756_s25 + $0x14] sm:$0xf] }
  0x8e   : >> { %9742 = vmatmul.msk.bf16.gmra.mxu2 %vm936_vm8, %v929_v47  ;;  %v915_v60 = vunpack.c.l.b16 %v841_v58  ;;  %v670_v62 = vshll.u32 %v502_v36, 16  ;;  %v676_v63 = vshll.u32 %v12870_v46, 16  ;;  %v562_v0 = vrot.slane %v561_v31, 4 }
  0x8f   : >> { %v680_v1 = vshrl.u32 %v12870_v46, 16  ;;  %v686_v2 = vshll.u32 %v12873_v51, 16  ;;  %v755_v5 = vshrl.u32 %v510_v57, 16  ;;  %v572_v8 = vrot.slane %v571_v61, 4 }
  0x90   : >> { %v933_v6 = vpack.c.b16 %v915_v60, %v914_v59  ;;  %v672_v9 = vrot.slane %v670_v62, 5  ;;  %v678_v10 = vrot.slane %v676_v63, 5  ;;  %v567_v38 = vsel %vm12782_vm9, %v562_v0, %v566_v54 }
  0x91   : >> { %v682_v14 = vrot.slane %v680_v1, 4  ;;  %v12889_v17 = vrot.slane %v686_v2, 5  ;;  %v757_v19 = vrot.slane %v755_v5, 4  ;;  %v577_v48 = vsel %vm12782_vm9, %v572_v8, %v576_v56  ;;  %v12915_v1 = vld [vmem:[%s12756_s25 + $0x18] sm:$0xf] }
  0x92   : >> { %9746 = vmatmul.msk.bf16.gmra.mxu3 %vm936_vm8, %v933_v6  ;;  %v890_v21 = vunpack.c.l.b16 %v567_v38  ;;  %v673_v22 = vor.u32 %v672_v9, %v669_v24  ;;  %v758_v23 = vshll.u32 %v510_v57, 16  ;;  %v891_v25 = vunpack.c.l.b16 %v577_v48  ;;  %v12918_v2 = vld [vmem:[%s12756_s25 + $0x1c] sm:$0xf] }
  0x93   : >> { %v683_v27 = vor.u32 %v682_v14, %v678_v10  ;;  %v764_v28 = vshll.u32 %v511_v3, 16  ;;  %v768_v50 = vshrl.u32 %v511_v3, 16  ;;  %v774_v34 = vshll.u32 %v12892_v18, 16 }
  0x94   : >> { %v674_v30 = vrot.slane %v673_v22, 4  ;;  %v760_v33 = vrot.slane %v758_v23, 5  ;;  %v843_v35 = vshrl.u32 %v518_v11, 16  ;;  %v921_v36 = vpack.c.b16 %v891_v25, %v890_v21 }
  0x95   : >> { %v684_v37 = vrot.slane %v683_v27, 4  ;;  %v766_v39 = vrot.slane %v764_v28, 5  ;;  %v770_v41 = vrot.slane %v768_v50, 4  ;;  %v12901_v44 = vrot.slane %v774_v34, 5  ;;  %v12930_v27 = vld [vmem:[%s12756_s25 + $0x48] sm:$0xf] }
  0x96   : >> { %v679_v43 = vsel %vm12782_vm9, %v674_v30, %v678_v10  ;;  %v761_v16 = vor.u32 %v760_v33, %v757_v19  ;;  %v845_v47 = vrot.slane %v843_v35, 4  ;;  %v846_v54 = vshll.u32 %v518_v11, 16  ;;  %v12938_v35 = vld [vmem:[%s12756_s25 + $0x4c] sm:$0x1] }
  0x97   : >> { %9734 = vmatmul.msk.bf16.gmra.mxu0 %vm936_vm8, %v921_v36  ;;  %v689_v49 = vsel %vm12782_vm9, %v684_v37, %v12889_v17  ;;  %v900_v52 = vunpack.c.l.b16 %v679_v43  ;;  %v771_v53 = vor.u32 %v770_v41, %v766_v39  ;;  %v852_v57 = vshll.u32 %v519_v42, 16 }
  0x98   : >> { %v901_v55 = vunpack.c.l.b16 %v689_v49  ;;  %v762_v56 = vrot.slane %v761_v16, 4  ;;  %v856_v58 = vshrl.u32 %v519_v42, 16  ;;  %v848_v31 = vrot.slane %v846_v54, 5 }
  0x99   : >> { %v772_v59 = vrot.slane %v771_v53, 4  ;;  %v862_v24 = vshll.u32 %v12904_v45, 16  ;;  %v579_v60 = vshrl.u32 %v494_v12, 16  ;;  %v854_v63 = vrot.slane %v852_v57, 5  ;;  %v513_v53 = vld [vmem:[%s12756_s25 + $0x70] sm:$0xf] }
  0x9a   : >> { %v926_v61 = vpack.c.b16 %v901_v55, %v900_v52  ;;  %v767_v62 = vsel %vm12782_vm9, %v762_v56, %v766_v39  ;;  %v858_v0 = vrot.slane %v856_v58, 4  ;;  %v849_v6 = vor.u32 %v848_v31, %v845_v47 }
  0x9b   : >> { %v777_v3 = vsel %vm12782_vm9, %v772_v59, %v12901_v44  ;;  %v908_v5 = vunpack.c.l.b16 %v767_v62  ;;  %v12923_v8 = vrot.slane %v862_v24, 5  ;;  %v581_v11 = vrot.slane %v579_v60, 4  ;;  %v528_v60 = vld [vmem:[%s12756_s25 + $0x74] sm:$0x1] }
  0x9c   : >> { %9739 = vmatmul.msk.bf16.gmra.mxu1 %vm936_vm8, %v926_v61  ;;  %v909_v9 = vunpack.c.l.b16 %v777_v3  ;;  %v859_v10 = vor.u32 %v858_v0, %v854_v63  ;;  %v582_v38 = vshll.u32 %v494_v12, 16  ;;  %v850_v14 = vrot.slane %v849_v6, 4 }
  0x9d   : >> { %v588_v19 = vshll.u32 %v12915_v1, 16  ;;  %v592_v48 = vshrl.u32 %v12915_v1, 16  ;;  %v598_v21 = vshll.u32 %v12918_v2, 16  ;;  %v690_v28 = vshrl.u32 %v12873_v51, 16 }
  0x9e   : >> { %v930_v22 = vpack.c.b16 %v909_v9, %v908_v5  ;;  %v860_v23 = vrot.slane %v859_v10, 4  ;;  %v584_v25 = vrot.slane %v582_v38, 5  ;;  %v855_v50 = vsel %vm12782_vm9, %v850_v14, %v854_v63  ;;  %v521_v9 = vld [vmem:[%s12756_s25 + $0x98] sm:$0xf] }
  0x9f   : >> { %v590_v30 = vrot.slane %v588_v19, 5  ;;  %v594_v33 = vrot.slane %v592_v48, 4  ;;  %v12935_v34 = vrot.slane %v598_v21, 5  ;;  %v916_v37 = vunpack.c.l.b16 %v855_v50 }
  0xa0   : >> { %9743 = vmatmul.msk.bf16.gmra.mxu2 %vm936_vm8, %v930_v22  ;;  %v865_v36 = vsel %vm12782_vm9, %v860_v23, %v12923_v8  ;;  %v585_v39 = vor.u32 %v584_v25, %v581_v11  ;;  %v692_v41 = vrot.slane %v690_v28, 4  ;;  %v696_v16 = vshll.u32 %v12930_v27, 16  ;;  %v530_v22 = vld [vmem:[%s12756_s25 + $0x9c] sm:$0x1] }
  0xa1   : >> { %v917_v42 = vunpack.c.l.b16 %v865_v36  ;;  %v595_v43 = vor.u32 %v594_v33, %v590_v30  ;;  %v700_v47 = vshrl.u32 %v12930_v27, 16  ;;  %v706_v52 = vshll.u32 %v12938_v35, 16 }
  0xa2   : >> { %v586_v12 = vrot.slane %v585_v39, 4  ;;  %v693_v49 = vor.u32 %v692_v41, %v12889_v17  ;;  %v778_v54 = vshrl.u32 %v12892_v18, 16  ;;  %v698_v57 = vrot.slane %v696_v16, 5 }
  0xa3   : >> { %v934_v55 = vpack.c.b16 %v917_v42, %v916_v37  ;;  %v596_v56 = vrot.slane %v595_v43, 4  ;;  %v702_v58 = vrot.slane %v700_v47, 4  ;;  %v708_v24 = vrot.slane %v706_v52, 5  ;;  %v12969_v37 = vld [vmem:[%s12756_s25 + $0x20] sm:$0xf] }
  0xa4   : >> { %v591_v59 = vsel %vm12782_vm9, %v586_v12, %v590_v30  ;;  %v694_v31 = vrot.slane %v693_v49, 4  ;;  %v780_v61 = vrot.slane %v778_v54, 4  ;;  %v784_v63 = vshll.u32 %v513_v53, 16  ;;  %v12972_v43 = vld [vmem:[%s12756_s25 + $0x24] sm:$0x1] }
  0xa5   : >> { %9747 = vmatmul.msk.bf16.gmra.mxu3 %vm936_vm8, %v934_v55  ;;  %v601_v17 = vsel %vm12782_vm9, %v596_v56, %v12935_v34  ;;  %v892_v18 = vunpack.c.l.b16 %v591_v59  ;;  %v703_v62 = vor.u32 %v702_v58, %v698_v57  ;;  %v788_v6 = vshrl.u32 %v513_v53, 16 }
  0xa6   : >> { %v893_v0 = vunpack.c.l.b16 %v601_v17  ;;  %v699_v3 = vsel %vm12782_vm9, %v694_v31, %v698_v57  ;;  %v781_v5 = vor.u32 %v780_v61, %v12901_v44  ;;  %v786_v11 = vrot.slane %v784_v63, 5 }
  0xa7   : >> { %v704_v10 = vrot.slane %v703_v62, 4  ;;  %v794_v38 = vshll.u32 %v528_v60, 16  ;;  %v902_v19 = vunpack.c.l.b16 %v699_v3  ;;  %v790_v21 = vrot.slane %v788_v6, 4  ;;  %v1301_v60 = vld [vmem:[%s12756_s25] sm:$0xe] }
  0xa8   : >> { %v922_v14 = vpack.c.b16 %v893_v0, %v892_v18  ;;  %v782_v48 = vrot.slane %v781_v5, 4  ;;  %v866_v28 = vshrl.u32 %v12904_v45, 16  ;;  %v872_v50 = vshll.u32 %v521_v9, 16  ;;  %v10093_v3 = vld [vmem:[%s15724_s1 + $0xc] sm:$0x3] }
  0xa9   : >> { %v709_v23 = vsel %vm12782_vm9, %v704_v10, %v708_v24  ;;  %v796_v25 = vrot.slane %v794_v38, 5  ;;  %v791_v33 = vor.u32 %v790_v21, %v786_v11  ;;  %v876_v36 = vshrl.u32 %v521_v9, 16  ;;  %v9969_v5 = vld [vmem:[%s12756_s25 + $0x14] sm:$0xf] }
  0xaa   : >> { %9735 = vmatmul.msk.bf16.gmra.mxu0 %vm936_vm8, %v922_v14  ;;  %v903_v44 = vunpack.c.l.b16 %v709_v23  ;;  %v787_v30 = vsel %vm12782_vm9, %v782_v48, %v786_v11  ;;  %v868_v39 = vrot.slane %v866_v28, 4  ;;  %v874_v41 = vrot.slane %v872_v50, 5  ;;  %v9970_v23 = vld [vmem:[%s12756_s25 + $0x18] sm:$0xf] }
  0xab   : >> { %v882_v42 = vshll.u32 %v530_v22, 16  ;;  %v792_v47 = vrot.slane %v791_v33, 4  ;;  %v910_v45 = vunpack.c.l.b16 %v787_v30  ;;  %v878_v12 = vrot.slane %v876_v36, 4  ;;  %v9971_v33 = vld [vmem:[%s12756_s25 + $0x1c] sm:$0xf] }
  0xac   : >> { %v927_v16 = vpack.c.b16 %v903_v44, %v902_v19  ;;  %v869_v49 = vor.u32 %v868_v39, %v12923_v8  ;;  %v602_v53 = vshrl.u32 %v12918_v2, 16  ;;  %v608_v54 = vshll.u32 %v12969_v37, 16 }
  0xad   : >> { %v884_v52 = vrot.slane %v882_v42, 5  ;;  %v797_v55 = vsel %vm12782_vm9, %v792_v47, %v796_v25  ;;  %v879_v56 = vor.u32 %v878_v12, %v874_v41  ;;  %v612_v57 = vshrl.u32 %v12969_v37, 16 }
  0xae   : >> { %9740 = vmatmul.msk.bf16.gmra.mxu1 %vm936_vm8, %v927_v16  ;;  %v618_v58 = vshll.u32 %v12972_v43, 16  ;;  %v911_v59 = vunpack.c.l.b16 %v797_v55  ;;  %v870_v31 = vrot.slane %v869_v49, 4  ;;  %v604_v24 = vrot.slane %v602_v53, 4  ;;  %v10247_v53 = vld [vmem:[%s15724_s1 + $0x10] sm:$0x3] }
  0xaf   : >> { %v610_v8 = vrot.slane %v608_v54, 5  ;;  %v880_v61 = vrot.slane %v879_v56, 4  ;;  %v614_v17 = vrot.slane %v612_v57, 4  ;;  %v9829_v11 = vrot.slane %v1301_v60, 9  ;;  %v11857_v57 = vld [vmem:[%s12756_s25] sm:$0xff] }
  0xb0   : >> { %v620_v18 = vrot.slane %v618_v58, 5  ;;  %v931_v62 = vpack.c.b16 %v911_v59, %v910_v45  ;;  %v875_v63 = vsel %vm12782_vm9, %v870_v31, %v874_v41  ;;  %v605_v0 = vor.u32 %v604_v24, %v12935_v34  ;;  %v10214_v45 = vld [vmem:[%s15724_s1 + $0xe] sm:$0x3] }
  0xb1   : >> { %v885_v6 = vsel %vm12782_vm9, %v880_v61, %v884_v52  ;;  %v918_v9 = vunpack.c.l.b16 %v875_v63  ;;  %v615_v10 = vor.u32 %v614_v17, %v610_v8  ;;  %v1330_v19 = vrot.slane %v12801_v7, 5  ;;  %v10042_v52 = vld [vmem:[%s15724_s1 + $0xa] sm:$0x3]  ;;  %s9632_s1 = scalar_lea.hbm (%p482_p0), %s15704_s11, %s12542_s21 }
  0xb2   : >> { %9744 = vmatmul.msk.bf16.gmra.mxu2 %vm936_vm8, %v931_v62  ;;  %v919_v38 = vunpack.c.l.b16 %v885_v6  ;;  %v606_v14 = vrot.slane %v605_v0, 4  ;;  %v1333_v48 = vrot.slane %v12809_v13, 5  ;;  %v3099_v22 = vand.u32 %v10093_v3, %v12737_v4  ;;  %v9972_v62 = vld [vmem:[%s12756_s25 + $0x20] sm:$0xf] }
  0xb3   : >> { %v616_v21 = vrot.slane %v615_v10, 4  ;;  %v1985_v25 = vshrl.u32 %v9969_v5, 16  ;;  %v1988_v28 = vshll.u32 %v9969_v5, 16  ;;  %v1332_v30 = vrot.slane %v1330_v19, 4 }
  0xb4   : >> { %v935_v50 = vpack.c.b16 %v919_v38, %v918_v9  ;;  %v611_v44 = vsel %vm12782_vm9, %v606_v14, %v610_v8  ;;  %v1331_v7 = vsel %vm12993_vm12, %v9829_v11, %v1330_v19  ;;  %3108 = vmatpush.bf16.msra.mxu2 %v3099_v22  ;;  %v1994_v47 = vshll.u32 %v9970_v23, 16  ;;  %v11873_v11 = vld [vmem:[%s12756_s25 + $0x14] sm:$0xff] }
  0xb5   : >> { %v621_v36 = vsel %vm12782_vm9, %v616_v21, %v620_v18  ;;  %v894_v39 = vunpack.c.l.b16 %v611_v44  ;;  %v1987_v13 = vrot.slane %v1985_v25, 4  ;;  %v1334_v42 = vsel %vm12993_vm12, %v1332_v30, %v1333_v48 }
  0xb6   : >> { %9748 = vmatmul.msk.bf16.gmra.mxu3 %vm936_vm8, %v935_v50  ;;  %v895_v41 = vunpack.c.l.b16 %v621_v36  ;;  %v1990_v16 = vrot.slane %v1988_v28, 5  ;;  %v1998_v12 = vshrl.u32 %v9970_v23, 16  ;;  %v2004_v49 = vshll.u32 %v9971_v33, 16  ;;  %v11858_v36 = vld [vmem:[%s12756_s25 + $0x8] sm:$0xff] }
  0xb7   : >> { %v1996_v56 = vrot.slane %v1994_v47, 5  ;;  %v1434_v58 = vunpack.c.l.b16 %v1331_v7  ;;  %v1435_v59 = vunpack.c.l.b16 %v1334_v42  ;;  %v3713_v8 = vand.u32 %v10214_v45, %v12737_v4  ;;  %v9975_v47 = vld [vmem:[%s12756_s25 + $0x2c] sm:$0xf] }
  0xb8   : >> { %v923_v54 = vpack.c.b16 %v895_v41, %v894_v39  ;;  %v1991_v55 = vor.u32 %v1990_v16, %v1987_v13  ;;  %v2000_v31 = vrot.slane %v1998_v12, 4  ;;  %v2809_v60 = vand.u32 %v10042_v52, %v12737_v4  ;;  %v9974_v16 = vld [vmem:[%s12756_s25 + $0x28] sm:$0xf]  ;;  %v1302_v12 = vld [vmem:[%s12756_s25 + $0x14] sm:$0xe] }
  0xb9   : >> { %v4087_v61 = vand.u32 %v10247_v53, %v12737_v4  ;;  %v2006_v18 = vrot.slane %v2004_v49, 5  ;;  %3722 = vmatpush.bf16.msra.mxu3 %v3713_v8  ;;  %v1466_v0 = vpack.c.b16 %v1435_v59, %v1434_v58  ;;  %v1336_v5 = vrot.slane %v12855_v26, 5  ;;  %v9973_v26 = vld [vmem:[%s12756_s25 + $0x24] sm:$0x1]  ;;  %v11874_v59 = vld [vmem:[%s12756_s25 + $0x1c] sm:$0xff] }
  0xba   : >> { %9736 = vmatmul.msk.bf16.gmra.mxu0 %vm936_vm8, %v923_v54  ;;  %v1992_v24 = vrot.slane %v1991_v55, 4  ;;  %v2001_v17 = vor.u32 %v2000_v31, %v1996_v56  ;;  %2818 = vmatpush.bf16.msra.mxu1 %v2809_v60  ;;  %v2008_v6 = vshrl.u32 %v9971_v33, 16  ;;  %v2014_v9 = vshll.u32 %v9972_v62, 16 }
  0xbb   : >> { %4096 = vmatpush.bf16.msra.mxu0 %v4087_v61  ;;  %v2018_v10 = vshrl.u32 %v9972_v62, 16  ;;  %v1335_v19 = vrot.slane %v1333_v48, 4  ;;  %v1339_v21 = vrot.slane %v12858_v32, 5  ;;  %v1338_v22 = vrot.slane %v1336_v5, 4  ;;  %v9976_v62 = vld [vmem:[%s12756_s25 + $0x30] sm:$0xf] }
  0xbc   : >> { %v2002_v63 = vrot.slane %v2001_v17, 4  ;;  %v1997_v3 = vsel %vm12782_vm9, %v1992_v24, %v1996_v56  ;;  %v2010_v23 = vrot.slane %v2008_v6, 4  ;;  %v2016_v25 = vrot.slane %v2014_v9, 5  ;;  %v11859_v9 = vld [vmem:[%s12756_s25 + $0x14] sm:$0xff] }
  0xbd   : >> { %v2338_v38 = vunpack.c.l.b16 %v1997_v3  ;;  %v2020_v28 = vrot.slane %v2018_v10, 4  ;;  %v1337_v44 = vsel %vm12993_vm12, %v1335_v19, %v1336_v5  ;;  %v1340_v30 = vsel %vm12993_vm12, %v1338_v22, %v1339_v21  ;;  %v9977_v19 = vld [vmem:[%s12756_s25 + $0x34] sm:$0xf] }
  0xbe   : >> { %9813 = vmatmul.msk.bf16.vlgmr.msrb.gmra.mxu1 %vm936_vm8, %v11857_v57  ;;  %v2007_v4 = vsel %vm12782_vm9, %v2002_v63, %v2006_v18  ;;  %v2011_v48 = vor.u32 %v2010_v23, %v2006_v18  ;;  %v2024_v32 = vshll.u32 %v9973_v26, 16  ;;  %v1436_v39 = vunpack.c.l.b16 %v1337_v44 }
  0xbf   : >> { %v2339_v14 = vunpack.c.l.b16 %v2007_v4  ;;  %v2021_v33 = vor.u32 %v2020_v28, %v2016_v25  ;;  %v1437_v7 = vunpack.c.l.b16 %v1340_v30  ;;  %v1343_v49 = vrot.slane %v12915_v1, 5 }
  0xc0   : >> { %v2012_v13 = vrot.slane %v2011_v48, 4  ;;  %v2026_v42 = vrot.slane %v2024_v32, 5  ;;  %v2029_v52 = vshrl.u32 %v9974_v16, 16  ;;  %v2032_v53 = vshll.u32 %v9974_v16, 16  ;;  %v11875_v48 = vld [vmem:[%s12756_s25 + $0x28] sm:$0xff] }
  0xc1   : >> { %v2370_v50 = vpack.c.b16 %v2339_v14, %v2338_v38  ;;  %v2022_v41 = vrot.slane %v2021_v33, 4  ;;  %v1467_v45 = vpack.c.b16 %v1437_v7, %v1436_v39  ;;  %v2038_v56 = vshll.u32 %v9975_v47, 16 }
  0xc2   : >> { %9838 = vmatmul.msk.bf16.vlgmr.msrb.gmra.mxu2 %vm936_vm8, %v1466_v0  ;;  %v2017_v54 = vsel %vm12782_vm9, %v2012_v13, %v2016_v25  ;;  %v2042_v57 = vshrl.u32 %v9975_v47, 16  ;;  %v9830_v58 = vrot.slane %v1302_v12, 9  ;;  %v2031_v8 = vrot.slane %v2029_v52, 4 }
  0xc3   : >> { %v2027_v55 = vsel %vm12782_vm9, %v2022_v41, %v2026_v42  ;;  %v2340_v31 = vunpack.c.l.b16 %v2017_v54  ;;  %v2034_v1 = vrot.slane %v2032_v53, 5  ;;  %v1345_v60 = vrot.slane %v1343_v49, 4 }
  0xc4   : >> { %v2341_v24 = vunpack.c.l.b16 %v2027_v55  ;;  %v1346_v61 = vrot.slane %v12918_v2, 5  ;;  %v2040_v17 = vrot.slane %v2038_v56, 5  ;;  %v2044_v18 = vrot.slane %v2042_v57, 4  ;;  %v9979_v56 = vld [vmem:[%s12756_s25 + $0x3c] sm:$0xf] }
  0xc5   : >> { %v2035_v0 = vor.u32 %v2034_v1, %v2031_v8  ;;  %v1344_v3 = vsel %vm12993_vm12, %v9830_v58, %v1343_v49  ;;  %v2048_v6 = vshll.u32 %v9976_v62, 16  ;;  %v1349_v23 = vrot.slane %v12969_v37, 5  ;;  %v9978_v37 = vld [vmem:[%s12756_s25 + $0x38] sm:$0x1]  ;;  %v11860_v49 = vld [vmem:[%s12756_s25 + $0x1c] sm:$0xff] }
  0xc6   : >> { %9953 = vmatmul.msk.bf16.vlgmr.msrb.gmra.mxu3 %vm936_vm8, %v11873_v11  ;;  %v2371_v63 = vpack.c.b16 %v2341_v24, %v2340_v31  ;;  %v1347_v5 = vsel %vm12993_vm12, %v1345_v60, %v1346_v61  ;;  %v2045_v4 = vor.u32 %v2044_v18, %v2040_v17  ;;  %v1438_v2 = vunpack.c.l.b16 %v1344_v3  ;;  %v9980_v57 = vld [vmem:[%s12756_s25 + $0x40] sm:$0xf] }
  0xc7   : >> { %v1439_v10 = vunpack.c.l.b16 %v1347_v5  ;;  %v2036_v11 = vrot.slane %v2035_v0, 4  ;;  %v2050_v14 = vrot.slane %v2048_v6, 5  ;;  %v2052_v25 = vshrl.u32 %v9976_v62, 16  ;;  %v11876_v62 = vld [vmem:[%s12756_s25 + $0x30] sm:$0xff] }
  0xc8   : >> { %v2046_v38 = vrot.slane %v2045_v4, 4  ;;  %v2058_v26 = vshll.u32 %v9977_v19, 16  ;;  %v1348_v30 = vrot.slane %v1346_v61, 4  ;;  %v1351_v32 = vrot.slane %v1349_v23, 4 }
  0xc9   : >> { %v1468_v21 = vpack.c.b16 %v1439_v10, %v1438_v2  ;;  %v2041_v22 = vsel %vm12782_vm9, %v2036_v11, %v2040_v17  ;;  %v2054_v39 = vrot.slane %v2052_v25, 4  ;;  %v2068_v12 = vshll.u32 %v9978_v37, 16  ;;  %v1303_v17 = vld [vmem:[%s12756_s25 + $0x28] sm:$0xe] }
  0xca   : >> { %10010 = vmatmul.msk.bf16.vlgmr.msrb.gmra.mxu0 %vm936_vm8, %v2370_v50  ;;  %v2051_v28 = vsel %vm12782_vm9, %v2046_v38, %v2050_v14  ;;  %v2062_v50 = vshrl.u32 %v9977_v19, 16  ;;  %v2342_v44 = vunpack.c.l.b16 %v2041_v22  ;;  %v2060_v7 = vrot.slane %v2058_v26, 5  ;;  %v11861_v25 = vld [vmem:[%s12756_s25 + $0x28] sm:$0xff] }
  0xcb   : >> { %v2343_v33 = vunpack.c.l.b16 %v2051_v28  ;;  %v1350_v42 = vsel %vm12993_vm12, %v1348_v30, %v1349_v23  ;;  %v2055_v47 = vor.u32 %v2054_v39, %v2050_v14  ;;  %v2070_v55 = vrot.slane %v2068_v12, 5 }
  0xcc   : >> { %v2064_v13 = vrot.slane %v2062_v50, 4  ;;  %v2073_v31 = vshrl.u32 %v9979_v56, 16  ;;  %v2076_v24 = vshll.u32 %v9979_v56, 16  ;;  %v2082_v8 = vshll.u32 %v9980_v57, 16 }
  0xcd   : >> { %v2372_v41 = vpack.c.b16 %v2343_v33, %v2342_v44  ;;  %v2056_v53 = vrot.slane %v2055_v47, 4  ;;  %v1356_v60 = vrot.slane %v12762_v15, 5  ;;  %v2086_v61 = vshrl.u32 %v9980_v57, 16  ;;  %v9981_v15 = vld [vmem:[%s12756_s25 + $0x44] sm:$0xf] }
  0xce   : >> { %9814 = vmatmul.msk.bf16.gmra.mxu1 %vm936_vm8, %v11858_v36  ;;  %v1352_v36 = vrot.slane %v12972_v43, 5  ;;  %v1440_v43 = vunpack.c.l.b16 %v1350_v42  ;;  %v2075_v0 = vrot.slane %v2073_v31, 4  ;;  %v2078_v3 = vrot.slane %v2076_v24, 5  ;;  %v9983_v57 = vld [vmem:[%s12756_s25 + $0x4c] sm:$0x1] }
  0xcf   : >> { %v2084_v5 = vrot.slane %v2082_v8, 5  ;;  %v9831_v4 = vrot.slane %v1303_v17, 9  ;;  %v1358_v6 = vrot.slane %v1356_v60, 4  ;;  %v2088_v10 = vrot.slane %v2086_v61, 4 }
  0xd0   : >> { %v1353_v16 = vsel %vm12993_vm12, %v1351_v32, %v1352_v36  ;;  %v2079_v14 = vor.u32 %v2078_v3, %v2075_v0  ;;  %v2092_v23 = vshll.u32 %v9981_v15, 16  ;;  %v2096_v32 = vshrl.u32 %v9981_v15, 16 }
  0xd1   : >> { %v1441_v52 = vunpack.c.l.b16 %v1353_v16  ;;  %v1357_v19 = vsel %vm12993_vm12, %v9831_v4, %v1356_v60  ;;  %v2089_v22 = vor.u32 %v2088_v10, %v2084_v5  ;;  %v11862_v60 = vld [vmem:[%s12756_s25 + $0x30] sm:$0xff]  ;;  %vm9621_vm13 = vcmask (%p482_p0), 73728  }
  0xd2   : >> { %9839 = vmatmul.msk.bf16.gmra.mxu2 %vm936_vm8, %v1467_v45  ;;  %v2065_v45 = vor.u32 %v2064_v13, %v2060_v7  ;;  %v1442_v28 = vunpack.c.l.b16 %v1357_v19  ;;  %v2080_v50 = vrot.slane %v2079_v14, 4  ;;  %v2094_v30 = vrot.slane %v2092_v23, 5  ;;  %v9985_v4 = vld [vmem:[%s12756_s25 + $0x54] sm:$0xf]  ;;  %v1304_v23 = vld [vmem:[%s12756_s25 + $0x3c] sm:$0xe] }
  0xd3   : >> { %v1469_v58 = vpack.c.b16 %v1441_v52, %v1440_v43  ;;  %v2090_v44 = vrot.slane %v2089_v22, 4  ;;  %v2098_v16 = vrot.slane %v2096_v32, 4  ;;  %v2130_v22 = vshrl.u32 %v9985_v4, 16 }
  0xd4   : >> { %v2066_v54 = vrot.slane %v2065_v45, 4  ;;  %v2085_v13 = vsel %vm12782_vm9, %v2080_v50, %v2084_v5  ;;  %v11877_v45 = vld [vmem:[%s12756_s25 + $0x3c] sm:$0xff]  ;;  %v9984_v5 = vld [vmem:[%s12756_s25 + $0x50] sm:$0xf]  ;;  %v9832_v32 = vrot.slane %v1304_v23, 9 }
  0xd5   : >> { %v2095_v37 = vsel %vm12782_vm9, %v2090_v44, %v2094_v30  ;;  %v2346_v12 = vunpack.c.l.b16 %v2085_v13  ;;  %v2117_v10 = vshrl.u32 %v9984_v5, 16  ;;  %v2120_v15 = vshll.u32 %v9984_v5, 16  ;;  %v9988_v23 = vld [vmem:[%s12756_s25 + $0x60] sm:$0x1] }
  0xd6   : >> { %9954 = vmatmul.msk.bf16.gmra.mxu3 %vm936_vm8, %v11874_v59  ;;  %v2061_v59 = vsel %vm12782_vm9, %v2056_v53, %v2060_v7  ;;  %v2071_v1 = vsel %vm12782_vm9, %v2066_v54, %v2070_v55  ;;  %v1365_v55 = vrot.slane %v12821_v29, 5  ;;  %v2112_v29 = vshll.u32 %v9983_v57, 16 }
  0xd7   : >> { %v2344_v18 = vunpack.c.l.b16 %v2061_v59  ;;  %v2119_v50 = vrot.slane %v2117_v10, 4  ;;  %v2122_v44 = vrot.slane %v2120_v15, 5  ;;  %v2132_v13 = vrot.slane %v2130_v22, 4 }
  0xd8   : >> { %v2114_v3 = vrot.slane %v2112_v29, 5 }
  0xda   : >> { %10011 = vmatmul.msk.bf16.gmra.mxu0 %vm936_vm8, %v2371_v63  ;;  %v2345_v63 = vunpack.c.l.b16 %v2071_v1 }
  0xdc   : >> { %v2373_v38 = vpack.c.b16 %v2345_v63, %v2344_v18 }
  0xde   : >> { %9815 = vmatmul.msk.bf16.gmra.mxu1 %vm936_vm8, %v11859_v9  ;;  %v12298_v9 = vld [vmem:[%s12756_s25 + $0x30] sm:$0xf] }
  0xdf   : >> { %v1359_v2 = vrot.slane %v12298_v9, 5 }
  0xe1   : >> { %v1361_v53 = vrot.slane %v1359_v2, 4 }
  0xe2   : >> { %9840 = vmatmul.msk.bf16.gmra.mxu2 %vm936_vm8, %v1468_v21  ;;  %v1360_v21 = vsel %vm12993_vm12, %v1358_v6, %v1359_v2 }
  0xe3   : >> { %v1443_v26 = vunpack.c.l.b16 %v1360_v21  ;;  %v1369_v21 = vrot.slane %v12870_v46, 5 }
  0xe5   : >> { %v1470_v36 = vpack.c.b16 %v1443_v26, %v1442_v28  ;;  %v11878_v28 = vld [vmem:[%s12756_s25 + $0x44] sm:$0xff] }
  0xe6   : >> { %9955 = vmatmul.msk.bf16.gmra.mxu3 %vm936_vm8, %v11875_v48  ;;  %v9982_v48 = vld [vmem:[%s12756_s25 + $0x48] sm:$0xf] }
  0xe7   : >> { %v2102_v7 = vshll.u32 %v9982_v48, 16  ;;  %v2106_v42 = vshrl.u32 %v9982_v48, 16 }
  0xe9   : >> { %v2104_v52 = vrot.slane %v2102_v7, 5  ;;  %v2108_v56 = vrot.slane %v2106_v42, 4  ;;  %v1372_v7 = vrot.slane %v12873_v51, 5  ;;  %v2123_v42 = vor.u32 %v2122_v44, %v2119_v50 }
  0xea   : >> { %10012 = vmatmul.msk.bf16.gmra.mxu0 %vm936_vm8, %v2372_v41  ;;  %v1362_v41 = vrot.slane %v12815_v20, 5  ;;  %v2099_v20 = vor.u32 %v2098_v16, %v2094_v30  ;;  %v1370_v16 = vsel %vm12993_vm12, %v9832_v32, %v1369_v21  ;;  %v11864_v32 = vld [vmem:[%s12756_s25 + $0x44] sm:$0xff] }
  0xeb   : >> { %v2109_v1 = vor.u32 %v2108_v56, %v2104_v52  ;;  %v2124_v56 = vrot.slane %v2123_v42, 4 }
  0xec   : >> { %v1364_v54 = vrot.slane %v1362_v41, 4  ;;  %v1363_v24 = vsel %vm12993_vm12, %v1361_v53, %v1362_v41  ;;  %v2100_v61 = vrot.slane %v2099_v20, 4  ;;  %v11863_v53 = vld [vmem:[%s12756_s25 + $0x3c] sm:$0xff] }
  0xed   : >> { %v2110_v0 = vrot.slane %v2109_v1, 4 }
  0xee   : >> { %9816 = vmatmul.msk.bf16.gmra.mxu1 %vm936_vm8, %v11860_v49  ;;  %v2347_v49 = vunpack.c.l.b16 %v2095_v37  ;;  %v1366_v8 = vsel %vm12993_vm12, %v1364_v54, %v1365_v55  ;;  %v2105_v6 = vsel %vm12782_vm9, %v2100_v61, %v2104_v52  ;;  %v9986_v37 = vld [vmem:[%s12756_s25 + $0x58] sm:$0xf]  ;;  %v1446_v54 = vunpack.c.l.b16 %v1370_v16 }
  0xef   : >> { %v1445_v63 = vunpack.c.l.b16 %v1366_v8  ;;  %v2115_v14 = vsel %vm12782_vm9, %v2110_v0, %v2114_v3  ;;  %v2140_v1 = vshrl.u32 %v9986_v37, 16 }
  0xf0   : >> { %v2349_v26 = vunpack.c.l.b16 %v2115_v14 }
  0xf1   : >> { %v2142_v5 = vrot.slane %v2140_v1, 4  ;;  %v12299_v1 = vld [vmem:[%s12756_s25 + $0x54] sm:$0xf] }
  0xf2   : >> { %9841 = vmatmul.msk.bf16.gmra.mxu2 %vm936_vm8, %v1469_v58  ;;  %v2374_v58 = vpack.c.b16 %v2347_v49, %v2346_v12  ;;  %v2136_v49 = vshll.u32 %v9986_v37, 16 }
  0xf4   : >> { %v2138_v20 = vrot.slane %v2136_v49, 5 }
  0xf6   : >> { %v13093_v11 = vpop.f32.mrf.mxu1  ;;  %9956 = vmatmul.msk.bf16.gmra.mxu3 %vm936_vm8, %v11876_v62  ;;  %v1444_v62 = vunpack.c.l.b16 %v1363_v24 }
  0xf8   : >> { %v1471_v9 = vpack.c.b16 %v1445_v63, %v1444_v62  ;;  %v1375_v63 = vrot.slane %v12930_v27, 5  ;;  %v2143_v27 = vor.u32 %v2142_v5, %v2138_v20 }
  0xfa   : >> { %10013 = vmatmul.msk.bf16.gmra.mxu0 %vm936_vm8, %v2373_v38  ;;  %v2126_v38 = vshll.u32 %v9985_v4, 16  ;;  %v11879_v4 = vld [vmem:[%s12756_s25 + $0x50] sm:$0xff]  ;;  %v1377_v14 = vrot.slane %v1375_v63, 4 }
  0xfc   : >> { %v2128_v30 = vrot.slane %v2126_v38, 5  ;;  %v1374_v38 = vrot.slane %v1372_v7, 4 }
  0xfe   : >> { %v13104_v33 = vpop.f32.mrf.mxu1  ;;  %9817 = vmatmul.msk.bf16.gmra.mxu1 %vm936_vm8, %v11861_v25  ;;  %v2348_v25 = vunpack.c.l.b16 %v2105_v6  ;;  %v2133_v12 = vor.u32 %v2132_v13, %v2128_v30  ;;  %v2129_v61 = vsel %vm12782_vm9, %v2124_v56, %v2128_v30  ;;  %v1376_v50 = vsel %vm12993_vm12, %v1374_v38, %v1375_v63  ;;  %v11880_v63 = vld [vmem:[%s12756_s25 + $0x58] sm:$0xff] }
  0xff   : >> { %v13107_v39 = vpop.f32.mrf.mxu2  ;;  %v2350_v6 = vunpack.c.l.b16 %v2129_v61  ;;  %v1448_v13 = vunpack.c.l.b16 %v1376_v50  ;;  %v1305_v61 = vld [vmem:[%s12756_s25 + $0x50] sm:$0xe] }
 0x100   : >> { %v2375_v41 = vpack.c.b16 %v2349_v26, %v2348_v25  ;;  %v2134_v57 = vrot.slane %v2133_v12, 4  ;;  %v9990_v12 = vld [vmem:[%s12756_s25 + $0x68] sm:$0xf] }
 0x102   : >> { %9842 = vmatmul.msk.bf16.gmra.mxu2 %vm936_vm8, %v1470_v36  ;;  %v1371_v36 = vrot.slane %v1369_v21, 4  ;;  %v2139_v62 = vsel %vm12782_vm9, %v2134_v57, %v2138_v20  ;;  %v1378_v21 = vrot.slane %v12938_v35, 5  ;;  %v2156_v35 = vshll.u32 %v9988_v23, 16  ;;  %v9991_v23 = vld [vmem:[%s12756_s25 + $0x6c] sm:$0xf] }
 0x103   : >> { %v13118_v43 = vpop.f32.mrf.mxu3  ;;  %v2170_v57 = vshll.u32 %v9990_v12, 16 }
 0x104   : >> { %v13114_v47 = vpop.f32.mrf.mxu0  ;;  %v1379_v44 = vsel %vm12993_vm12, %v1377_v14, %v1378_v21  ;;  %v2158_v16 = vrot.slane %v2156_v35, 5  ;;  %v12300_v14 = vld [vmem:[%s12756_s25 + $0x58] sm:$0xf] }
 0x105   : >> { %v1449_v37 = vunpack.c.l.b16 %v1379_v44  ;;  %v1385_v21 = vrot.slane %v12300_v14, 5 }
 0x106   : >> { %9957 = vmatmul.msk.bf16.gmra.mxu3 %vm936_vm8, %v11877_v45  ;;  %v1373_v45 = vsel %vm12993_vm12, %v1371_v36, %v1372_v7  ;;  %v2144_v36 = vrot.slane %v2143_v27, 4 }
 0x107   : >> { %v13123_v59 = vpop.f32.mrf.mxu2  ;;  %v13125_v31 = vpop.f32.mrf.mxu1  ;;  %v1447_v55 = vunpack.c.l.b16 %v1373_v45  ;;  %v9989_v45 = vld [vmem:[%s12756_s25 + $0x64] sm:$0xf] }
 0x108   : >> { %v2164_v56 = vshll.u32 %v9989_v45, 16 }
 0x109   : >> { %v1472_v29 = vpack.c.b16 %v1447_v55, %v1446_v54  ;;  %v1473_v54 = vpack.c.b16 %v1449_v37, %v1448_v13  ;;  %v2161_v55 = vshrl.u32 %v9989_v45, 16  ;;  %v11865_v37 = vld [vmem:[%s12756_s25 + $0x50] sm:$0xff] }
 0x10a   : >> { %10014 = vmatmul.msk.bf16.gmra.mxu0 %vm936_vm8, %v2374_v58  ;;  %v9987_v58 = vld [vmem:[%s12756_s25 + $0x5c] sm:$0xf] }
 0x10b   : >> { %v13135_v18 = vpop.f32.mrf.mxu3  ;;  %v2150_v0 = vshrl.u32 %v9987_v58, 16 }
 0x10c   : >> { %v13133_v17 = vpop.f32.mrf.mxu0 }
 0x10d   : >> { %v2152_v22 = vrot.slane %v2150_v0, 4 }
 0x10e   : >> { %9818 = vmatmul.msk.bf16.gmra.mxu1 %vm936_vm8, %v11862_v60  ;;  %v2146_v60 = vshll.u32 %v9987_v58, 16 }
 0x10f   : >> { %v13142_v2 = vpop.f32.mrf.mxu1 }
 0x110   : >> { %v2148_v15 = vrot.slane %v2146_v60, 5  ;;  %v2174_v60 = vshrl.u32 %v9990_v12, 16  ;;  %v9992_v12 = vld [vmem:[%s12756_s25 + $0x70] sm:$0xf] }
 0x111   : >> { %v13146_v19 = vpop.f32.mrf.mxu2 }
 0x112   : >> { %9843 = vmatmul.msk.bf16.gmra.mxu2 %vm936_vm8, %v1471_v9  ;;  %v2351_v9 = vunpack.c.l.b16 %v2139_v62  ;;  %v2153_v30 = vor.u32 %v2152_v22, %v2148_v15  ;;  %v2149_v49 = vsel %vm12782_vm9, %v2144_v36, %v2148_v15  ;;  %v9833_v15 = vrot.slane %v1305_v61, 9  ;;  %v12301_v61 = vld [vmem:[%s12756_s25 + $0x5c] sm:$0xf] }
 0x113   : >> { %v2352_v62 = vunpack.c.l.b16 %v2149_v49  ;;  %v2176_v22 = vrot.slane %v2174_v60, 4  ;;  %v2180_v36 = vshll.u32 %v9991_v23, 16 }
 0x114   : >> { %v13152_v48 = vpop.f32.mrf.mxu0  ;;  %v2154_v42 = vrot.slane %v2153_v30, 4 }
 0x115   : >> { %v13155_v46 = vpop.f32.mrf.mxu3 }
 0x116   : >> { %9958 = vmatmul.msk.bf16.gmra.mxu3 %vm936_vm8, %v11878_v28  ;;  %v2376_v28 = vpack.c.b16 %v2351_v9, %v2350_v6  ;;  %v2159_v58 = vsel %vm12782_vm9, %v2154_v42, %v2158_v16  ;;  %v2166_v6 = vrot.slane %v2164_v56, 5  ;;  %v2172_v9 = vrot.slane %v2170_v57, 5 }
 0x117   : >> { %v2353_v0 = vunpack.c.l.b16 %v2159_v58  ;;  %v2182_v56 = vrot.slane %v2180_v36, 5  ;;  %v2184_v57 = vshrl.u32 %v9991_v23, 16  ;;  %v11881_v23 = vld [vmem:[%s12756_s25 + $0x64] sm:$0xff] }
 0x119   : >> { %v13163_v52 = vpop.f32.mrf.mxu2  ;;  %v13165_v51 = vpop.f32.mrf.mxu1 }
 0x11a   : >> { %10015 = vmatmul.msk.bf16.gmra.mxu0 %vm936_vm8, %v2375_v41 }
 0x11c   : >> { %v13170_v24 = vpop.f32.mrf.mxu0 }
 0x11d   : >> { %v13172_v8 = vpop.f32.mrf.mxu3 }
 0x11e   : >> { %9819 = vmatmul.msk.bf16.gmra.mxu1 %vm936_vm8, %v11863_v53 }
 0x121   : >> { %v13180_v3 = vpop.f32.mrf.mxu1 }
 0x122   : >> { %9844 = vmatmul.msk.bf16.gmra.mxu2 %vm936_vm8, %v1472_v29  ;;  %v1382_v29 = vrot.slane %v12299_v1, 5  ;;  %v2190_v1 = vshll.u32 %v9992_v12, 16 }
 0x123   : >> { %v13184_v10 = vpop.f32.mrf.mxu2 }
 0x124   : >> { %v1384_v38 = vrot.slane %v1382_v29, 4  ;;  %v1383_v30 = vsel %vm12993_vm12, %v9833_v15, %v1382_v29  ;;  %v2194_v29 = vshrl.u32 %v9992_v12, 16  ;;  %v2192_v14 = vrot.slane %v2190_v1, 5 }
 0x125   : >> { %v1450_v16 = vunpack.c.l.b16 %v1383_v30 }
 0x126   : >> { %9959 = vmatmul.msk.bf16.gmra.mxu3 %vm936_vm8, %v11879_v4  ;;  %v2163_v4 = vrot.slane %v2161_v55, 4  ;;  %v1386_v35 = vsel %vm12993_vm12, %v1384_v38, %v1385_v21 }
 0x127   : >> { %v13188_v25 = vpop.f32.mrf.mxu0  ;;  %v1451_v45 = vunpack.c.l.b16 %v1386_v35  ;;  %v1387_v35 = vrot.slane %v1385_v21, 4 }
 0x128   : >> { %v13191_v26 = vpop.f32.mrf.mxu3  ;;  %v2167_v50 = vor.u32 %v2166_v6, %v2163_v4  ;;  %v2186_v4 = vrot.slane %v2184_v57, 4  ;;  %v12302_v6 = vld [vmem:[%s12756_s25 + $0x60] sm:$0x1] }
 0x129   : >> { %v1474_v60 = vpack.c.b16 %v1451_v45, %v1450_v16  ;;  %v1391_v15 = vrot.slane %v12302_v6, 5 }
 0x12a   : >> { %10016 = vmatmul.msk.bf16.gmra.mxu0 %vm936_vm8, %v2376_v28  ;;  %v2377_v28 = vpack.c.b16 %v2353_v0, %v2352_v62  ;;  %v1388_v62 = vrot.slane %v12301_v61, 5 }
 0x12b   : >> { %v13199_v7 = vpop.f32.mrf.mxu1  ;;  %v13201_v41 = vpop.f32.mrf.mxu2 }
 0x12e   : >> { %9820 = vmatmul.msk.bf16.gmra.mxu1 %vm936_vm8, %v11864_v32  ;;  %v2177_v32 = vor.u32 %v2176_v22, %v2172_v9  ;;  %v2196_v22 = vrot.slane %v2194_v29, 4 }
 0x12f   : >> { %v13208_v53 = vpop.f32.mrf.mxu0 }
 0x130   : >> { %v13210_v20 = vpop.f32.mrf.mxu3  ;;  %v2178_v55 = vrot.slane %v2177_v32, 4  ;;  %v1390_v32 = vrot.slane %v1388_v62, 4  ;;  %v2197_v16 = vor.u32 %v2196_v22, %v2192_v14 }
 0x132   : >> { %9845 = vmatmul.msk.bf16.gmra.mxu2 %vm936_vm8, %v1473_v54  ;;  %v2168_v54 = vrot.slane %v2167_v50, 4  ;;  %v2183_v0 = vsel %vm12782_vm9, %v2178_v55, %v2182_v56  ;;  %v1389_v55 = vsel %vm12993_vm12, %v1387_v35, %v1388_v62  ;;  %v1392_v21 = vsel %vm12993_vm12, %v1390_v32, %v1391_v15  ;;  %v9995_v62 = vld [vmem:[%s12756_s25 + $0x7c] sm:$0xf] }
 0x133   : >> { %v13218_v5 = vpop.f32.mrf.mxu1  ;;  %v2355_v50 = vunpack.c.l.b16 %v2183_v0  ;;  %v2198_v61 = vrot.slane %v2197_v16, 4 }
 0x135   : >> { %v13222_v27 = vpop.f32.mrf.mxu2 }
 0x136   : >> { %9960 = vmatmul.msk.bf16.gmra.mxu3 %vm936_vm8, %v11880_v63 }
 0x137   : >> { %v13225_v44 = vpop.f32.mrf.mxu0 }
 0x139   : >> { %v13231_v13 = vpop.f32.mrf.mxu3 }
 0x13a   : >> { %10017 = vmatmul.msk.bf16.gmra.mxu0 %vm936_vm8, %v2377_v28 }
 0x13b   : >> { %v1221_v42 = vpop.f32.mrf.mxu1 }
 0x13c   : >> { %v1222_v49 = vadd.f32 %v1221_v42, %v13114_v47  ;;  %v2173_v47 = vsel %vm12782_vm9, %v2168_v54, %v2172_v9  ;;  %v9993_v9 = vld [vmem:[%s12756_s25 + $0x74] sm:$0x1] }
 0x13d   : >> { %v13237_v58 = vpop.f32.mrf.mxu2  ;;  %v2354_v28 = vunpack.c.l.b16 %v2173_v47  ;;  %v2200_v45 = vshll.u32 %v9993_v9, 16  ;;  %v2214_v9 = vshll.u32 %v9995_v62, 16 }
 0x13e   : >> { %9821 = vmatmul.msk.bf16.gmra.mxu1 %vm936_vm8, %v11865_v37  ;;  %v2187_v37 = vor.u32 %v2186_v4, %v2182_v56  ;;  %v1452_v56 = vunpack.c.l.b16 %v1389_v55 }
 0x13f   : >> { %v13241_v63 = vpop.f32.mrf.mxu0  ;;  %v2378_v12 = vpack.c.b16 %v2355_v50, %v2354_v28  ;;  %v2202_v47 = vrot.slane %v2200_v45, 5  ;;  %v1306_v45 = vld [vmem:[%s12756_s25 + $0x64] sm:$0xe] }
 0x140   : >> { %v2188_v1 = vrot.slane %v2187_v37, 4 }
 0x141   : >> { %v13248_v38 = vpop.f32.mrf.mxu3  ;;  %v2203_v50 = vsel %vm12782_vm9, %v2198_v61, %v2202_v47  ;;  %v12304_v47 = vld [vmem:[%s12756_s25 + $0x6c] sm:$0xf] }
 0x142   : >> { %9846 = vmatmul.msk.bf16.gmra.mxu2 %vm936_vm8, %v1474_v60  ;;  %v1453_v60 = vunpack.c.l.b16 %v1392_v21  ;;  %v2193_v28 = vsel %vm12782_vm9, %v2188_v1, %v2192_v14  ;;  %v2357_v55 = vunpack.c.l.b16 %v2203_v50 }
 0x143   : >> { %v1223_v30 = vpop.f32.mrf.mxu1 }
 0x144   : >> { %v1224_v36 = vadd.f32 %v1223_v30, %v13133_v17  ;;  %v11866_v17 = vld [vmem:[%s12756_s25 + $0x58] sm:$0xff] }
 0x145   : >> { %v1542_v42 = vpop.f32.mrf.mxu2 }
 0x146   : >> { %9961 = vmatmul.msk.bf16.gmra.mxu3 %vm936_vm8, %v11881_v23  ;;  %v1622_v54 = vadd.f32 %v1542_v42, %v1222_v49  ;;  %v9994_v49 = vld [vmem:[%s12756_s25 + $0x78] sm:$0xf]  ;;  %v1475_v23 = vpack.c.b16 %v1453_v60, %v1452_v56  ;;  %v12303_v42 = vld [vmem:[%s12756_s25 + $0x68] sm:$0xf]  ;;  %v9834_v60 = vrot.slane %v1306_v45, 9 }
 0x147   : >> { %v2446_v57 = vpop.f32.mrf.mxu0  ;;  %v2205_v30 = vshrl.u32 %v9994_v49, 16  ;;  %v2208_v32 = vshll.u32 %v9994_v49, 16  ;;  %v1395_v16 = vrot.slane %v12303_v42, 5  ;;  %v9997_v42 = vld [vmem:[%s12756_s25 + $0x84] sm:$0xf] }
 0x149   : >> { %v1832_v29 = vpop.f32.mrf.mxu3  ;;  %v2207_v21 = vrot.slane %v2205_v30, 4  ;;  %v1397_v61 = vrot.slane %v1395_v16, 4  ;;  %v1396_v30 = vsel %vm12993_vm12, %v9834_v60, %v1395_v16 }
 0x14a   : >> { %10018 = vmatmul.msk.bf16.gmra.mxu0 %vm936_vm8, %v2378_v12  ;;  %v1912_v0 = vadd.f32 %v1832_v29, %v1622_v54  ;;  %v2356_v54 = vunpack.c.l.b16 %v2193_v28  ;;  %v2210_v29 = vrot.slane %v2208_v32, 5 }
 0x14b   : >> { %v1226_v4 = vpop.f32.mrf.mxu1 }
 0x14c   : >> { %v1227_v6 = vadd.f32 %v1226_v4, %v13152_v48  ;;  %v13264_v22 = vadd.f32 %v2446_v57, %v1912_v0  ;;  %v2218_v48 = vshrl.u32 %v9995_v62, 16  ;;  %v11882_v57 = vld [vmem:[%s12756_s25 + $0x6c] sm:$0xff]  ;;  %v1398_v0 = vrot.slane %v12304_v47, 5  ;;  %v9996_v4 = vld [vmem:[%s12756_s25 + $0x80] sm:$0xf] }
 0x14d   : >> { %v1544_v15 = vpop.f32.mrf.mxu2  ;;  %v2211_v28 = vor.u32 %v2210_v29, %v2207_v21  ;;  %v2224_v32 = vshll.u32 %v9996_v4, 16 }
 0x14e   : >> { %9822 = vmatmul.msk.bf16.gmra.mxu1 %vm936_vm8, %v11866_v17  ;;  %v1623_v35 = vadd.f32 %v1544_v15, %v1224_v36  ;;  %v2216_v36 = vrot.slane %v2214_v9, 5  ;;  %v2220_v17 = vrot.slane %v2218_v48, 4  ;;  %v2379_v15 = vpack.c.b16 %v2357_v55, %v2356_v54  ;;  %v11867_v48 = vld [vmem:[%s12756_s25 + $0x64] sm:$0xff] }
 0x14f   : >> { %v2448_v37 = vpop.f32.mrf.mxu0  ;;  %v2212_v55 = vrot.slane %v2211_v28, 4  ;;  %v2226_v16 = vrot.slane %v2224_v32, 5 }
 0x151   : >> { %v1834_v12 = vpop.f32.mrf.mxu3 }
 0x152   : >> { %v1913_v14 = vadd.f32 %v1834_v12, %v1623_v35  ;;  %9847 = vmatmul.msk.bf16.gmra.mxu2 %vm936_vm8, %v1475_v23  ;;  %v2221_v35 = vor.u32 %v2220_v17, %v2216_v36  ;;  %v1454_v12 = vunpack.c.l.b16 %v1396_v30 }
 0x153   : >> { %v1228_v1 = vpop.f32.mrf.mxu1 }
 0x154   : >> { %v1229_v56 = vadd.f32 %v1228_v1, %v13170_v24  ;;  %v13278_v62 = vadd.f32 %v2448_v37, %v1913_v14  ;;  %v1399_v24 = vsel %vm12993_vm12, %v1397_v61, %v1398_v0  ;;  %v2222_v21 = vrot.slane %v2221_v35, 4 }
 0x155   : >> { %v1547_v49 = vpop.f32.mrf.mxu2  ;;  %v1455_v54 = vunpack.c.l.b16 %v1399_v24  ;;  %v2228_v14 = vshrl.u32 %v9996_v4, 16  ;;  %v2238_v1 = vshrl.u32 %v9997_v42, 16  ;;  %v12305_v4 = vld [vmem:[%s12756_s25 + $0x70] sm:$0xf]  ;;  %v9998_v24 = vld [vmem:[%s12756_s25 + $0x88] sm:$0x1] }
 0x156   : >> { %9962 = vmatmul.msk.bf16.gmra.mxu3 %vm936_vm8, %v11882_v57  ;;  %v1624_v23 = vadd.f32 %v1547_v49, %v1227_v6  ;;  %v2234_v57 = vshll.u32 %v9997_v42, 16  ;;  %v2227_v49 = vsel %vm12782_vm9, %v2222_v21, %v2226_v16  ;;  %v12306_v42 = vld [vmem:[%s12756_s25 + $0x74] sm:$0x1]  ;;  %v2244_v21 = vshll.u32 %v9998_v24, 16  ;;  %v10000_v24 = vld [vmem:[%s12756_s25 + $0x90] sm:$0xf] }
 0x157   : >> { %v2451_v50 = vpop.f32.mrf.mxu0  ;;  %v1476_v61 = vpack.c.b16 %v1455_v54, %v1454_v12 }
 0x158   : >> { %v2236_v28 = vrot.slane %v2234_v57, 5 }
 0x159   : >> { %v1837_v9 = vpop.f32.mrf.mxu3 }
 0x15a   : >> { %10019 = vmatmul.msk.bf16.gmra.mxu0 %vm936_vm8, %v2379_v15  ;;  %v1914_v37 = vadd.f32 %v1837_v9, %v1624_v23  ;;  %v1401_v15 = vrot.slane %v12305_v4, 5  ;;  %v2230_v23 = vrot.slane %v2228_v14, 4  ;;  %v2359_v9 = vunpack.c.l.b16 %v2227_v49  ;;  %v11868_v4 = vld [vmem:[%s12756_s25 + $0x6c] sm:$0xff] }
 0x15b   : >> { %v1231_v45 = vpop.f32.mrf.mxu1 }
 0x15c   : >> { %v1232_v6 = vadd.f32 %v1231_v45, %v13188_v25  ;;  %v13289_v29 = vadd.f32 %v2451_v50, %v1914_v37  ;;  %v2217_v25 = vsel %vm12782_vm9, %v2212_v55, %v2216_v36  ;;  %v2240_v50 = vrot.slane %v2238_v1, 4 }
 0x15d   : >> { %v1549_v17 = vpop.f32.mrf.mxu2  ;;  %v2358_v32 = vunpack.c.l.b16 %v2217_v25  ;;  %v1404_v37 = vrot.slane %v12306_v42, 5  ;;  %v1400_v45 = vrot.slane %v1398_v0, 4  ;;  %v1403_v12 = vrot.slane %v1401_v15, 4 }
 0x15e   : >> { %9823 = vmatmul.msk.bf16.gmra.mxu1 %vm936_vm8, %v11867_v48  ;;  %v1625_v60 = vadd.f32 %v1549_v17, %v1229_v56  ;;  %v11883_v56 = vld [vmem:[%s12756_s25 + $0x78] sm:$0xff]  ;;  %v2231_v54 = vor.u32 %v2230_v23, %v2226_v16  ;;  %v2241_v55 = vor.u32 %v2240_v50, %v2236_v28  ;;  %v2246_v25 = vrot.slane %v2244_v21, 5 }
 0x15f   : >> { %v2453_v47 = vpop.f32.mrf.mxu0  ;;  %v2380_v1 = vpack.c.b16 %v2359_v9, %v2358_v32 }
 0x160   : >> { %v2232_v0 = vrot.slane %v2231_v54, 4  ;;  %v2242_v16 = vrot.slane %v2241_v55, 4  ;;  %v12307_v55 = vld [vmem:[%s12756_s25 + $0x7c] sm:$0xf] }
 0x161   : >> { %v1839_v30 = vpop.f32.mrf.mxu3 }
 0x162   : >> { %v1915_v35 = vadd.f32 %v1839_v30, %v1625_v60  ;;  %9848 = vmatmul.msk.bf16.gmra.mxu2 %vm936_vm8, %v1476_v61  ;;  %v1402_v61 = vsel %vm12993_vm12, %v1400_v45, %v1401_v15  ;;  %v2262_v45 = vshrl.u32 %v10000_v24, 16 }
 0x163   : >> { %v1233_v48 = vpop.f32.mrf.mxu1  ;;  %v1456_v50 = vunpack.c.l.b16 %v1402_v61 }
 0x164   : >> { %v1234_v36 = vadd.f32 %v1233_v48, %v13208_v53  ;;  %v13302_v57 = vadd.f32 %v2453_v47, %v1915_v35  ;;  %v1405_v53 = vsel %vm12993_vm12, %v1403_v12, %v1404_v37  ;;  %v2237_v35 = vsel %vm12782_vm9, %v2232_v0, %v2236_v28  ;;  %v1307_v28 = vld [vmem:[%s12756_s25 + $0x78] sm:$0xe] }
 0x165   : >> { %v1552_v14 = vpop.f32.mrf.mxu2  ;;  %v1457_v30 = vunpack.c.l.b16 %v1405_v53  ;;  %v2258_v37 = vshll.u32 %v10000_v24, 16  ;;  %v2264_v0 = vrot.slane %v2262_v45, 4 }
 0x166   : >> { %9963 = vmatmul.msk.bf16.gmra.mxu3 %vm936_vm8, %v11883_v56  ;;  %v1626_v17 = vadd.f32 %v1552_v14, %v1232_v6  ;;  %v9999_v6 = vld [vmem:[%s12756_s25 + $0x8c] sm:$0xf]  ;;  %v2247_v56 = vsel %vm12782_vm9, %v2242_v16, %v2246_v25  ;;  %v2360_v14 = vunpack.c.l.b16 %v2237_v35  ;;  %v11884_v25 = vld [vmem:[%s12756_s25 + $0x80] sm:$0xff] }
 0x167   : >> { %v2456_v60 = vpop.f32.mrf.mxu0  ;;  %v2249_v48 = vshrl.u32 %v9999_v6, 16  ;;  %v2252_v42 = vshll.u32 %v9999_v6, 16  ;;  %v1477_v54 = vpack.c.b16 %v1457_v30, %v1456_v50  ;;  %v2260_v53 = vrot.slane %v2258_v37, 5  ;;  %v10001_v30 = vld [vmem:[%s12756_s25 + $0x94] sm:$0xf] }
 0x168   : >> { %v2268_v45 = vshll.u32 %v10001_v30, 16 }
 0x169   : >> { %v1842_v49 = vpop.f32.mrf.mxu3  ;;  %v2254_v61 = vrot.slane %v2252_v42, 5 }
 0x16a   : >> { %10020 = vmatmul.msk.bf16.gmra.mxu0 %vm936_vm8, %v2380_v1  ;;  %v1916_v47 = vadd.f32 %v1842_v49, %v1626_v17  ;;  %v2361_v1 = vunpack.c.l.b16 %v2247_v56  ;;  %v2265_v56 = vor.u32 %v2264_v0, %v2260_v53 }
 0x16b   : >> { %v1236_v23 = vpop.f32.mrf.mxu1 }
 0x16c   : >> { %v1237_v15 = vadd.f32 %v1236_v23, %v13225_v44  ;;  %v13318_v32 = vadd.f32 %v2456_v60, %v1916_v47  ;;  %v1408_v44 = vrot.slane %v12307_v55, 5  ;;  %v2251_v60 = vrot.slane %v2249_v48, 4  ;;  %v12308_v47 = vld [vmem:[%s12756_s25 + $0x80] sm:$0xf] }
 0x16d   : >> { %v1554_v9 = vpop.f32.mrf.mxu2  ;;  %v1411_v23 = vrot.slane %v12308_v47, 5  ;;  %v2381_v6 = vpack.c.b16 %v2361_v1, %v2360_v14 }
 0x16e   : >> { %9824 = vmatmul.msk.bf16.gmra.mxu1 %vm936_vm8, %v11868_v4  ;;  %v1627_v12 = vadd.f32 %v1554_v9, %v1234_v36  ;;  %v9835_v36 = vrot.slane %v1307_v28, 9  ;;  %v1410_v4 = vrot.slane %v1408_v44, 4  ;;  %v2255_v35 = vor.u32 %v2254_v61, %v2251_v60  ;;  %v10002_v60 = vld [vmem:[%s12756_s25 + $0x98] sm:$0xf] }
 0x16f   : >> { %v2458_v21 = vpop.f32.mrf.mxu0  ;;  %v2282_v47 = vshrl.u32 %v10002_v60, 16 }
 0x170   : >> { %v1409_v42 = vsel %vm12993_vm12, %v9835_v36, %v1408_v44  ;;  %v1412_v37 = vsel %vm12993_vm12, %v1410_v4, %v1411_v23  ;;  %v2256_v14 = vrot.slane %v2255_v35, 4  ;;  %v2278_v4 = vshll.u32 %v10002_v60, 16 }
 0x171   : >> { %v1844_v17 = vpop.f32.mrf.mxu3  ;;  %v1458_v55 = vunpack.c.l.b16 %v1409_v42  ;;  %v1459_v28 = vunpack.c.l.b16 %v1412_v37 }
 0x172   : >> { %v1917_v16 = vadd.f32 %v1844_v17, %v1627_v12  ;;  %9849 = vmatmul.msk.bf16.gmra.mxu2 %vm936_vm8, %v1477_v54  ;;  %v11869_v54 = vld [vmem:[%s12756_s25 + $0x78] sm:$0xff]  ;;  %v2266_v17 = vrot.slane %v2265_v56, 4 }
 0x173   : >> { %v1238_v49 = vpop.f32.mrf.mxu1  ;;  %v1478_v0 = vpack.c.b16 %v1459_v28, %v1458_v55 }
 0x174   : >> { %v1239_v50 = vadd.f32 %v1238_v49, %v13241_v63  ;;  %v13328_v9 = vadd.f32 %v2458_v21, %v1917_v16  ;;  %v2261_v16 = vsel %vm12782_vm9, %v2256_v14, %v2260_v53  ;;  %v11885_v53 = vld [vmem:[%s12756_s25 + $0x8c] sm:$0xff]  ;;  %v10003_v14 = vld [vmem:[%s12756_s25 + $0x9c] sm:$0x1] }
 0x175   : >> { %v1557_v24 = vpop.f32.mrf.mxu2 }
 0x176   : >> { %9964 = vmatmul.msk.bf16.gmra.mxu3 %vm936_vm8, %v11884_v25  ;;  %v1628_v48 = vadd.f32 %v1557_v24, %v1237_v15  ;;  %v2270_v15 = vrot.slane %v2268_v45, 5  ;;  %v2272_v25 = vshrl.u32 %v10001_v30, 16  ;;  %v12309_v24 = vld [vmem:[%s12756_s25 + $0x84] sm:$0xf] }
 0x177   : >> { %v2461_v12 = vpop.f32.mrf.mxu0  ;;  %v1414_v35 = vrot.slane %v12309_v24, 5 }
 0x178   : >> { %v2271_v36 = vsel %vm12782_vm9, %v2266_v17, %v2270_v15  ;;  %v2274_v37 = vrot.slane %v2272_v25, 4 }
 0x179   : >> { %v1847_v63 = vpop.f32.mrf.mxu3  ;;  %v2363_v42 = vunpack.c.l.b16 %v2271_v36  ;;  %v1416_v28 = vrot.slane %v1414_v35, 4 }
 0x17a   : >> { %10021 = vmatmul.msk.bf16.gmra.mxu0 %vm936_vm8, %v2381_v6  ;;  %v1918_v21 = vadd.f32 %v1847_v63, %v1628_v48  ;;  %v2362_v48 = vunpack.c.l.b16 %v2261_v16  ;;  %v2284_v63 = vrot.slane %v2282_v47, 4 }
 0x17b   : >> { %v1241_v1 = vpop.f32.mrf.mxu1 }
 0x17c   : >> { %v13338_v61 = vadd.f32 %v2461_v12, %v1918_v21  ;;  %v2280_v12 = vrot.slane %v2278_v4, 5  ;;  %v1242_v21 = vadd.f32 %v1241_v1, %v13093_v11  ;;  %v2382_v17 = vpack.c.b16 %v2363_v42, %v2362_v48  ;;  %v11870_v1 = vld [vmem:[%s12756_s25 + $0x80] sm:$0xff] }
 0x17d   : >> { %v1559_v44 = vpop.f32.mrf.mxu2 }
 0x17e   : >> { %9825 = vmatmul.msk.bf16.gmra.mxu1 %vm936_vm8, %v11869_v54  ;;  %v1629_v49 = vadd.f32 %v1559_v44, %v1239_v50  ;;  %v1413_v50 = vrot.slane %v1411_v23, 4  ;;  %v12310_v54 = vld [vmem:[%s12756_s25 + $0x88] sm:$0x1]  ;;  %v2275_v44 = vor.u32 %v2274_v37, %v2270_v15  ;;  %v2285_v25 = vor.u32 %v2284_v63, %v2280_v12  ;;  %v10004_v15 = vld [vmem:[%s12756_s25 + $0xa0] sm:$0xf] }
 0x17f   : >> { %v2463_v6 = vpop.f32.mrf.mxu0  ;;  %v1417_v55 = vrot.slane %v12310_v54, 5  ;;  %v10005_v37 = vld [vmem:[%s12756_s25 + $0xa4] sm:$0xf] }
 0x180   : >> { %v1415_v23 = vsel %vm12993_vm12, %v1413_v50, %v1414_v35  ;;  %v2276_v24 = vrot.slane %v2275_v44, 4  ;;  %v2286_v42 = vrot.slane %v2285_v25, 4  ;;  %v2296_v50 = vshll.u32 %v10004_v15, 16  ;;  %v12311_v44 = vld [vmem:[%s12756_s25 + $0x90] sm:$0xf] }
 0x181   : >> { %v1849_v56 = vpop.f32.mrf.mxu3  ;;  %v1418_v4 = vsel %vm12993_vm12, %v1416_v28, %v1417_v55  ;;  %v1460_v47 = vunpack.c.l.b16 %v1415_v23  ;;  %v2302_v28 = vshll.u32 %v10005_v37, 16 }
 0x182   : >> { %v1919_v45 = vadd.f32 %v1849_v56, %v1629_v49  ;;  %9850 = vmatmul.msk.bf16.gmra.mxu2 %vm936_vm8, %v1478_v0  ;;  %v2288_v49 = vshll.u32 %v10003_v14, 16  ;;  %v1461_v48 = vunpack.c.l.b16 %v1418_v4  ;;  %v2281_v55 = vsel %vm12782_vm9, %v2276_v24, %v2280_v12 }
 0x183   : >> { %v1243_v30 = vpop.f32.mrf.mxu1  ;;  %v2306_v14 = vshrl.u32 %v10005_v37, 16  ;;  %v2298_v25 = vrot.slane %v2296_v50, 5  ;;  %v2304_v12 = vrot.slane %v2302_v28, 5 }
 0x184   : >> { %v13351_v16 = vadd.f32 %v2463_v6, %v1919_v45  ;;  %v2290_v35 = vrot.slane %v2288_v49, 5  ;;  %v1244_v45 = vadd.f32 %v1243_v30, %v13104_v33  ;;  %v1421_v33 = vrot.slane %v12311_v44, 5  ;;  %v11871_v44 = vld [vmem:[%s12756_s25 + $0x8c] sm:$0xff] }
 0x185   : >> { %v1562_v60 = vpop.f32.mrf.mxu2 }
 0x186   : >> { %9965 = vmatmul.msk.bf16.gmra.mxu3 %vm936_vm8, %v11885_v53  ;;  %v1630_v0 = vadd.f32 %v1562_v60, %v1242_v21  ;;  %v2293_v53 = vshrl.u32 %v10004_v15, 16  ;;  %v2291_v60 = vsel %vm12782_vm9, %v2286_v42, %v2290_v35  ;;  %v10006_v35 = vld [vmem:[%s12756_s25 + $0xa8] sm:$0xf] }
 0x187   : >> { %v2466_v36 = vpop.f32.mrf.mxu0  ;;  %v2365_v4 = vunpack.c.l.b16 %v2291_v60 }
 0x188   : >> { %v2295_v23 = vrot.slane %v2293_v53, 4 }
 0x189   : >> { %v1852_v11 = vpop.f32.mrf.mxu3 }
 0x18a   : >> { %10022 = vmatmul.msk.bf16.gmra.mxu0 %vm936_vm8, %v2382_v17  ;;  %v1920_v6 = vadd.f32 %v1852_v11, %v1630_v0  ;;  %v1479_v17 = vpack.c.b16 %v1461_v48, %v1460_v47  ;;  %v1308_v0 = vld [vmem:[%s12756_s25 + $0x8c] sm:$0xe]  ;;  %v2308_v11 = vrot.slane %v2306_v14, 4  ;;  %v11886_v47 = vld [vmem:[%s12756_s25 + $0x94] sm:$0xff] }
 0x18b   : >> { %v1246_v56 = vpop.f32.mrf.mxu1  ;;  %v9836_v15 = vrot.slane %v1308_v0, 9  ;;  %v12312_v48 = vld [vmem:[%s12756_s25 + $0x94] sm:$0xf] }
 0x18c   : >> { %v13363_v63 = vadd.f32 %v2466_v36, %v1920_v6  ;;  %v2364_v36 = vunpack.c.l.b16 %v2281_v55  ;;  %v1423_v6 = vrot.slane %v1421_v33, 4  ;;  %v1424_v42 = vrot.slane %v12312_v48, 5 }
 0x18d   : >> { %v1564_v54 = vpop.f32.mrf.mxu2  ;;  %v1247_v37 = vadd.f32 %v1246_v56, %v13125_v31  ;;  %v2309_v50 = vor.u32 %v2308_v11, %v2304_v12 }
 0x18e   : >> { %9826 = vmatmul.msk.bf16.gmra.mxu1 %vm936_vm8, %v11870_v1  ;;  %v1631_v21 = vadd.f32 %v1564_v54, %v1244_v45  ;;  %v2299_v45 = vor.u32 %v2298_v25, %v2295_v23  ;;  %v2312_v54 = vshll.u32 %v10006_v35, 16  ;;  %v2383_v28 = vpack.c.b16 %v2365_v4, %v2364_v36  ;;  %v12313_v4 = vld [vmem:[%s12756_s25 + $0x18] sm:$0xf] }
 0x18f   : >> { %v2468_v30 = vpop.f32.mrf.mxu0  ;;  %v2608_v11 = vrot.slane %v12313_v4, 5 }
 0x190   : >> { %v2300_v31 = vrot.slane %v2299_v45, 4  ;;  %v13385_v25 = vrot.slane %v2312_v54, 5 }
 0x191   : >> { %v1854_v49 = vpop.f32.mrf.mxu3 }
 0x192   : >> { %v1921_v1 = vadd.f32 %v1854_v49, %v1631_v21  ;;  %9851 = vmatmul.msk.bf16.gmra.mxu2 %vm936_vm8, %v1479_v17  ;;  %v1422_v21 = vsel %vm12993_vm12, %v9836_v15, %v1421_v33  ;;  %v1425_v17 = vsel %vm12993_vm12, %v1423_v6, %v1424_v42  ;;  %v10007_v33 = vld [vmem:[%s12756_s25 + $0xac] sm:$0xf]  ;;  %v2305_v48 = vsel %vm12782_vm9, %v2300_v31, %v2304_v12 }
 0x193   : >> { %v1248_v24 = vpop.f32.mrf.mxu1  ;;  %v1462_v0 = vunpack.c.l.b16 %v1422_v21  ;;  %v1463_v23 = vunpack.c.l.b16 %v1425_v17  ;;  %v2326_v54 = vshrl.u32 %v10007_v33, 16  ;;  %v12315_v21 = vld [vmem:[%s12756_s25 + $0x98] sm:$0xf] }
 0x194   : >> { %v13377_v55 = vadd.f32 %v2468_v30, %v1921_v1  ;;  %v2310_v30 = vrot.slane %v2309_v50, 4  ;;  %v1249_v1 = vadd.f32 %v1248_v24, %v13142_v2  ;;  %v2322_v50 = vshll.u32 %v10007_v33, 16  ;;  %v13400_v24 = vld [vmem:[%s12756_s25 + $0x1c] sm:$0xf] }
 0x195   : >> { %v1567_v53 = vpop.f32.mrf.mxu2  ;;  %v1480_v6 = vpack.c.b16 %v1463_v23, %v1462_v0  ;;  %v2610_v2 = vrot.slane %v2608_v11, 4  ;;  %v1427_v17 = vrot.slane %v12315_v21, 5 }
 0x196   : >> { %9966 = vmatmul.msk.bf16.gmra.mxu3 %vm936_vm8, %v11886_v47  ;;  %v1632_v14 = vadd.f32 %v1567_v53, %v1247_v37  ;;  %v2315_v37 = vsel %vm12782_vm9, %v2310_v30, %v13385_v25  ;;  %v2316_v53 = vshrl.u32 %v10006_v35, 16  ;;  %v11887_v30 = vld [vmem:[%s12756_s25 + $0xa0] sm:$0xff]  ;;  %v13408_v33 = vrot.slane %v2322_v50, 5 }
 0x197   : >> { %v2471_v60 = vpop.f32.mrf.mxu0  ;;  %v2367_v0 = vunpack.c.l.b16 %v2315_v37  ;;  %v1429_v21 = vrot.slane %v1427_v17, 4  ;;  %v10008_v37 = vld [vmem:[%s12756_s25 + $0xb0] sm:$0x1] }
 0x198   : >> { %v2318_v4 = vrot.slane %v2316_v53, 4 }
 0x199   : >> { %v1857_v56 = vpop.f32.mrf.mxu3 }
 0x19a   : >> { %10023 = vmatmul.msk.bf16.gmra.mxu0 %vm936_vm8, %v2383_v28  ;;  %v1922_v49 = vadd.f32 %v1857_v56, %v1632_v14  ;;  %v15706_v28 = vrot.slane %v13400_v24, 5  ;;  %v12316_v56 = vld [vmem:[%s12756_s25 + $0x9c] sm:$0x1] }
 0x19b   : >> { %v1251_v36 = vpop.f32.mrf.mxu1  ;;  %v1430_v12 = vrot.slane %v12316_v56, 5 }
 0x19c   : >> { %v13391_v47 = vadd.f32 %v2471_v60, %v1922_v49  ;;  %v10026_v60 = vld [vmem:[%s12756_s25 + $0x14] sm:$0xe] }
 0x19d   : >> { %v1569_v15 = vpop.f32.mrf.mxu2  ;;  %v10034_v23 = vrot.slane %v10026_v60, 9 }
 0x19e   : >> { %15729 = vst [vmem:[#allocation13_spill] sm:$0xff] %v13391_v47  ;;  %9827 = vmatmul.msk.bf16.gmra.mxu1 %vm936_vm8, %v11871_v44  ;;  %v1633_v45 = vadd.f32 %v1569_v15, %v1249_v1  ;;  %v2366_v44 = vunpack.c.l.b16 %v2305_v48  ;;  %v2328_v1 = vrot.slane %v2326_v54, 4  ;;  %v1426_v15 = vrot.slane %v1424_v42, 4  ;;  %v10174_v54 = vld [vmem:[%s12756_s25 + $0x28] sm:$0xf] }
 0x19f   : >> { %v2473_v14 = vpop.f32.mrf.mxu0  ;;  %v2609_v56 = vsel %vm12993_vm12, %v10034_v23, %v2608_v11  ;;  %v2612_v48 = vsel %vm12993_vm12, %v2610_v2, %v15706_v28  ;;  %v13424_v23 = vld [vmem:[%s12756_s25 + $0x2c] sm:$0xf] }
 0x1a0   : >> { %v2713_v60 = vunpack.c.l.b16 %v2612_v48  ;;  %v2384_v53 = vpack.c.b16 %v2367_v0, %v2366_v44  ;;  %v2329_v44 = vor.u32 %v2328_v1, %v13408_v33  ;;  %v2332_v0 = vshll.u32 %v10008_v37, 16 }
 0x1a1   : >> { %v1859_v31 = vpop.f32.mrf.mxu3 }
 0x1a2   : >> { %v1923_v35 = vadd.f32 %v1859_v31, %v1633_v45  ;;  %9852 = vmatmul.msk.bf16.gmra.mxu2 %vm936_vm8, %v1480_v6  ;;  %v1252_v6 = vadd.f32 %v1251_v36, %v13165_v51  ;;  %v2712_v45 = vunpack.c.l.b16 %v2609_v56  ;;  %v2319_v31 = vor.u32 %v2318_v4, %v13385_v25  ;;  %v11872_v25 = vld [vmem:[%s12756_s25 + $0x94] sm:$0xff] }
 0x1a3   : >> { %v1253_v49 = vpop.f32.mrf.mxu1  ;;  %v1428_v51 = vsel %vm12993_vm12, %v1426_v15, %v1427_v17  ;;  %v1431_v36 = vsel %vm12993_vm12, %v1429_v21, %v1430_v12  ;;  %v3266_v56 = vshll.u32 %v10174_v54, 16  ;;  %v3272_v4 = vshll.u32 %v13424_v23, 16 }
 0x1a4   : >> { %v13421_v11 = vpack.c.b16 %v2713_v60, %v2712_v45  ;;  %v13426_v47 = vadd.f32 %v2473_v14, %v1923_v35  ;;  %v1464_v17 = vunpack.c.l.b16 %v1428_v51  ;;  %v1465_v15 = vunpack.c.l.b16 %v1431_v36  ;;  %v13442_v51 = vld [vmem:[%s12756_s25 + $0x30] sm:$0xf] }
 0x1a5   : >> { %v1572_v50 = vpop.f32.mrf.mxu2  ;;  %v2320_v12 = vrot.slane %v2319_v31, 4  ;;  %v2330_v21 = vrot.slane %v2329_v44, 4  ;;  %v2334_v1 = vrot.slane %v2332_v0, 5  ;;  %v1254_v37 = vadd.f32 %v1253_v49, %v13180_v3  ;;  %v12317_v31 = vld [vmem:[%s12756_s25 + $0x24] sm:$0x1] }
 0x1a6   : >> { %9967 = vmatmul.msk.bf16.gmra.mxu3 %vm936_vm8, %v11887_v30  ;;  %v1634_v42 = vadd.f32 %v1572_v50, %v1252_v6  ;;  %v3263_v30 = vshrl.u32 %v10174_v54, 16  ;;  %v3276_v6 = vshrl.u32 %v13424_v23, 16  ;;  %v3268_v60 = vrot.slane %v3266_v56, 5 }
 0x1a7   : >> { %v2476_v2 = vpop.f32.mrf.mxu0  ;;  %v1481_v28 = vpack.c.b16 %v1465_v15, %v1464_v17  ;;  %v2617_v36 = vrot.slane %v12317_v31, 5  ;;  %v2325_v3 = vsel %vm12782_vm9, %v2320_v12, %v13408_v33  ;;  %v2335_v49 = vsel %vm12782_vm9, %v2330_v21, %v2334_v1 }
 0x1a8   : >> { %v3265_v45 = vrot.slane %v3263_v30, 4  ;;  %v2369_v33 = vunpack.c.l.b16 %v2335_v49 }
 0x1a9   : >> { %v1862_v48 = vpop.f32.mrf.mxu3 }
 0x1aa   : >> { %10024 = vmatmul.msk.bf16.gmra.mxu0 %vm936_vm8, %v2384_v53  ;;  %v1924_v14 = vadd.f32 %v1862_v48, %v1634_v42  ;;  %v3274_v53 = vrot.slane %v3272_v4, 5  ;;  %v3278_v42 = vrot.slane %v3276_v6, 4  ;;  %v3269_v30 = vor.u32 %v3268_v60, %v3265_v45 }
 0x1ab   : >> { %v1256_v35 = vpop.f32.mrf.mxu1  ;;  %v3282_v4 = vshll.u32 %v13442_v51, 16  ;;  %v15730_v6 = vrot.slane %v13400_v24, 5 }
 0x1ac   : >> { %v13438_v50 = vadd.f32 %v2476_v2, %v1924_v14  ;;  %v12318_v2 = vld [vmem:[%s12756_s25 + $0x20] sm:$0xf]  ;;  %v1257_v45 = vadd.f32 %v1256_v35, %v13199_v7  ;;  %v3270_v24 = vrot.slane %v3269_v30, 4 }
 0x1ad   : >> { %v1574_v54 = vpop.f32.mrf.mxu2  ;;  %v2614_v0 = vrot.slane %v12318_v2, 5  ;;  %v2613_v14 = vrot.slane %v15730_v6, 4 }
 0x1ae   : >> { %9828 = vmatmul.msk.bf16.gmra.mxu1 %vm936_vm8, %v11872_v25  ;;  %v1635_v48 = vadd.f32 %v1574_v54, %v1254_v37  ;;  %v3279_v25 = vor.u32 %v3278_v42, %v3274_v53  ;;  %v11888_v37 = vld [vmem:[%s12756_s25 + $0xa8] sm:$0xff]  ;;  %v2368_v54 = vunpack.c.l.b16 %v2325_v3  ;;  %v3886_v3 = vrot.slane %v13424_v23, 5 }
 0x1af   : >> { %v2478_v44 = vpop.f32.mrf.mxu0  ;;  %v2616_v17 = vrot.slane %v2614_v0, 4  ;;  %v2615_v21 = vsel %vm12993_vm12, %v2613_v14, %v2614_v0  ;;  %v13469_v14 = vld [vmem:[%s12756_s25 + $0x34] sm:$0xf]  ;;  %v3275_v7 = vsel %vm12782_vm9, %v3270_v24, %v3274_v53 }
 0x1b0   : >> { %v2714_v60 = vunpack.c.l.b16 %v2615_v21  ;;  %v3280_v31 = vrot.slane %v3279_v25, 4  ;;  %v2385_v49 = vpack.c.b16 %v2369_v33, %v2368_v54  ;;  %v3888_v25 = vrot.slane %v3886_v3, 4 }
 0x1b1   : >> { %v1864_v56 = vpop.f32.mrf.mxu3  ;;  %v2618_v1 = vsel %vm12993_vm12, %v2616_v17, %v2617_v36  ;;  %v3296_v53 = vshrl.u32 %v13469_v14, 16 }
 0x1b2   : >> { %v1925_v15 = vadd.f32 %v1864_v56, %v1635_v48  ;;  %9853 = vmatmul.msk.bf16.gmra.mxu2 %vm936_vm8, %v1481_v28  ;;  %v2715_v42 = vunpack.c.l.b16 %v2618_v1  ;;  %v3284_v28 = vrot.slane %v3282_v4, 5  ;;  %v10231_v56 = vld [vmem:[%s12756_s25 + $0x28] sm:$0xe]  ;;  %v3286_v4 = vshrl.u32 %v13442_v51, 16 }
 0x1b3   : >> { %v1258_v12 = vpop.f32.mrf.mxu1  ;;  %v10239_v23 = vrot.slane %v10231_v56, 9  ;;  %v3616_v1 = vunpack.c.l.b16 %v3275_v7 }
 0x1b4   : >> { %v13464_v0 = vpack.c.b16 %v2715_v42, %v2714_v60  ;;  %v13466_v6 = vadd.f32 %v2478_v44, %v1925_v15  ;;  %v3285_v30 = vsel %vm12782_vm9, %v3280_v31, %v3284_v28  ;;  %v3889_v15 = vrot.slane %v13442_v51, 5  ;;  %v11889_v42 = vld [vmem:[%s12756_s25 + $0x28] sm:$0xff] }
 0x1b5   : >> { %v1577_v48 = vpop.f32.mrf.mxu2  ;;  %v1259_v54 = vadd.f32 %v1258_v12, %v13218_v5  ;;  %v3887_v24 = vsel %vm12993_vm12, %v10239_v23, %v3886_v3  ;;  %v3288_v60 = vrot.slane %v3286_v4, 4  ;;  %v3298_v5 = vrot.slane %v3296_v53, 4 }
 0x1b6   : >> { %9968 = vmatmul.msk.bf16.gmra.mxu3 %vm936_vm8, %v11888_v37  ;;  %v1636_v2 = vadd.f32 %v1577_v48, %v1257_v45  ;;  %v3292_v37 = vshll.u32 %v13469_v14, 16  ;;  %v3617_v45 = vunpack.c.l.b16 %v3285_v30  ;;  %v3890_v48 = vsel %vm12993_vm12, %v3888_v25, %v3889_v15  ;;  %v10179_v25 = vld [vmem:[%s12756_s25 + $0x3c] sm:$0xf] }
 0x1b7   : >> { %v2481_v36 = vpop.f32.mrf.mxu0  ;;  %v3990_v56 = vunpack.c.l.b16 %v3887_v24 }
 0x1b8   : >> { %v3294_v31 = vrot.slane %v3292_v37, 5  ;;  %v3648_v3 = vpack.c.b16 %v3617_v45, %v3616_v1  ;;  %v3892_v45 = vrot.slane %v13469_v14, 5  ;;  %v12319_v14 = vld [vmem:[%s12756_s25 + $0x2c] sm:$0xf] }
 0x1b9   : >> { %v1867_v35 = vpop.f32.mrf.mxu3 }
 0x1ba   : >> { %10025 = vmatmul.msk.bf16.gmra.mxu0 %vm936_vm8, %v2385_v49  ;;  %v1926_v17 = vadd.f32 %v1867_v35, %v1636_v2  ;;  %v10178_v49 = vld [vmem:[%s12756_s25 + $0x38] sm:$0x1]  ;;  %v3299_v30 = vor.u32 %v3298_v5, %v3294_v31  ;;  %v3891_v5 = vrot.slane %v3889_v15, 4 }
 0x1bb   : >> { %v1261_v44 = vpop.f32.mrf.mxu1  ;;  %v3302_v23 = vshll.u32 %v10178_v49, 16 }
 0x1bc   : >> { %v13481_v33 = vadd.f32 %v2481_v36, %v1926_v17  ;;  %v3289_v36 = vor.u32 %v3288_v60, %v3284_v28  ;;  %v1262_v4 = vadd.f32 %v1261_v44, %v13107_v39  ;;  %v3300_v24 = vrot.slane %v3299_v30, 4  ;;  %v10027_v30 = vld [vmem:[%s12756_s25 + $0x28] sm:$0xe] }
 0x1bd   : >> { %v1579_v21 = vpop.f32.mrf.mxu2  ;;  %v3304_v28 = vrot.slane %v3302_v23, 5  ;;  %v3310_v39 = vshll.u32 %v10179_v25, 16 }
 0x1be   : >> { %10043 = vmatmul.msk.bf16.vlgmr.msra.gmra.mxu1 %vm936_vm8, %v13421_v11  ;;  %v1637_v51 = vadd.f32 %v1579_v21, %v1259_v54  ;;  %v3991_v11 = vunpack.c.l.b16 %v3890_v48  ;;  %v3290_v53 = vrot.slane %v3289_v36, 4  ;;  %v13495_v54 = vld [vmem:[%s12756_s25 + $0x40] sm:$0xf]  ;;  %v2621_v36 = vrot.slane %v12319_v14, 5 }
 0x1bf   : >> { %v2483_v12 = vpop.f32.mrf.mxu0  ;;  %v3316_v44 = vshll.u32 %v13495_v54, 16  ;;  %v3312_v15 = vrot.slane %v3310_v39, 5  ;;  %v10035_v39 = vrot.slane %v10027_v30, 9 }
 0x1c0   : >> { %v4022_v17 = vpack.c.b16 %v3991_v11, %v3990_v56  ;;  %v3305_v11 = vsel %vm12782_vm9, %v3300_v24, %v3304_v28  ;;  %v3893_v24 = vsel %vm12993_vm12, %v3891_v5, %v3892_v45 }
 0x1c1   : >> { %v1869_v2 = vpop.f32.mrf.mxu3 }
 0x1c2   : >> { %v1927_v7 = vadd.f32 %v1869_v2, %v1637_v51  ;;  %10158 = vmatmul.msk.bf16.vlgmr.msra.gmra.mxu2 %vm936_vm8, %v11889_v42  ;;  %v3307_v51 = vshrl.u32 %v10179_v25, 16  ;;  %v3320_v42 = vshrl.u32 %v13495_v54, 16  ;;  %v3318_v25 = vrot.slane %v3316_v44, 5 }
 0x1c3   : >> { %v1263_v35 = vpop.f32.mrf.mxu1 }
 0x1c4   : >> { %v13498_v60 = vadd.f32 %v2483_v12, %v1927_v7  ;;  %v3295_v12 = vsel %vm12782_vm9, %v3290_v53, %v3294_v31  ;;  %v3894_v7 = vrot.slane %v3892_v45, 4  ;;  %v3309_v23 = vrot.slane %v3307_v51, 4  ;;  %v11890_v51 = vld [vmem:[%s12756_s25 + $0x30] sm:$0xff] }
 0x1c5   : >> { %v1582_v37 = vpop.f32.mrf.mxu2  ;;  %v3618_v53 = vunpack.c.l.b16 %v3295_v12  ;;  %v3992_v45 = vunpack.c.l.b16 %v3893_v24  ;;  %v10232_v24 = vld [vmem:[%s12756_s25 + $0x3c] sm:$0xe] }
 0x1c6   : >> { %10215 = vmatmul.msk.bf16.vlgmr.msra.gmra.mxu3 %vm936_vm8, %v3648_v3  ;;  %v1638_v21 = vadd.f32 %v1582_v37, %v1262_v4  ;;  %v3895_v3 = vrot.slane %v10178_v49, 5  ;;  %v1264_v4 = vadd.f32 %v1263_v35, %v13123_v59  ;;  %v13518_v49 = vld [vmem:[%s12756_s25 + $0x44] sm:$0xf]  ;;  %v12320_v59 = vld [vmem:[%s12756_s25 + $0x30] sm:$0xf] }
 0x1c7   : >> { %v2486_v1 = vpop.f32.mrf.mxu0  ;;  %v2624_v35 = vrot.slane %v12320_v59, 5  ;;  %v3899_v59 = vrot.slane %v13495_v54, 5 }
 0x1c9   : >> { %v1872_v48 = vpop.f32.mrf.mxu3 }
 0x1ca   : >> { %10248 = vmatmul.msk.bf16.vlgmr.msra.gmra.mxu0 %vm936_vm8, %v4022_v17  ;;  %v1928_v2 = vadd.f32 %v1872_v48, %v1638_v21  ;;  %v3322_v17 = vrot.slane %v3320_v42, 4  ;;  %v3619_v21 = vunpack.c.l.b16 %v3305_v11  ;;  %v2623_v48 = vrot.slane %v2621_v36, 4 }
 0x1cb   : >> { %v1266_v56 = vpop.f32.mrf.mxu1  ;;  %v3313_v42 = vor.u32 %v3312_v15, %v3309_v23 }
 0x1cc   : >> { %v13511_v37 = vadd.f32 %v2486_v1, %v1928_v2  ;;  %v3896_v1 = vsel %vm12993_vm12, %v3894_v7, %v3895_v3  ;;  %v3323_v2 = vor.u32 %v3322_v17, %v3318_v25  ;;  %v3649_v11 = vpack.c.b16 %v3619_v21, %v3618_v53 }
 0x1cd   : >> { %v1584_v31 = vpop.f32.mrf.mxu2  ;;  %v3993_v14 = vunpack.c.l.b16 %v3896_v1  ;;  %v2625_v7 = vsel %vm12993_vm12, %v2623_v48, %v2624_v35  ;;  %v1267_v3 = vadd.f32 %v1266_v56, %v13146_v19  ;;  %v3314_v23 = vrot.slane %v3313_v42, 4 }
 0x1ce   : >> { %10044 = vmatmul.msk.bf16.gmra.mxu1 %vm936_vm8, %v13464_v0  ;;  %v1639_v28 = vadd.f32 %v1584_v31, %v1264_v4  ;;  %v3326_v0 = vshll.u32 %v13518_v49, 16  ;;  %v2622_v4 = vsel %vm12993_vm12, %v10035_v39, %v2621_v36  ;;  %v3324_v15 = vrot.slane %v3323_v2, 4  ;;  %v13537_v36 = vld [vmem:[%s12756_s25 + $0x48] sm:$0xf] }
 0x1cf   : >> { %v2488_v44 = vpop.f32.mrf.mxu0  ;;  %v2716_v53 = vunpack.c.l.b16 %v2622_v4  ;;  %v2717_v21 = vunpack.c.l.b16 %v2625_v7  ;;  %v3319_v56 = vsel %vm12782_vm9, %v3314_v23, %v3318_v25  ;;  %v10240_v1 = vrot.slane %v10232_v24, 9  ;;  %v12322_v4 = vld [vmem:[%s12756_s25 + $0x38] sm:$0x1] }
 0x1d0   : >> { %v13531_v17 = vrot.slane %v3326_v0, 5  ;;  %v3330_v0 = vshrl.u32 %v13518_v49, 16  ;;  %v3336_v54 = vshll.u32 %v13537_v36, 16  ;;  %v3902_v25 = vrot.slane %v13518_v49, 5 }
 0x1d1   : >> { %v1874_v12 = vpop.f32.mrf.mxu3  ;;  %v2746_v2 = vpack.c.b16 %v2717_v21, %v2716_v53  ;;  %v2630_v7 = vrot.slane %v12322_v4, 5  ;;  %v3620_v23 = vunpack.c.l.b16 %v3319_v56  ;;  %v3900_v21 = vsel %vm12993_vm12, %v10240_v1, %v3899_v59 }
 0x1d2   : >> { %v1929_v5 = vadd.f32 %v1874_v12, %v1639_v28  ;;  %10159 = vmatmul.msk.bf16.gmra.mxu2 %vm936_vm8, %v11890_v51  ;;  %v4023_v28 = vpack.c.b16 %v3993_v14, %v3992_v45  ;;  %v3329_v48 = vsel %vm12782_vm9, %v3324_v15, %v13531_v17  ;;  %v3340_v12 = vshrl.u32 %v13537_v36, 16 }
 0x1d3   : >> { %v1268_v30 = vpop.f32.mrf.mxu1  ;;  %v3901_v45 = vrot.slane %v3899_v59, 4  ;;  %v3621_v15 = vunpack.c.l.b16 %v3329_v48  ;;  %v3332_v24 = vrot.slane %v3330_v0, 4  ;;  %v3338_v49 = vrot.slane %v3336_v54, 5 }
 0x1d4   : >> { %v13539_v39 = vadd.f32 %v2488_v44, %v1929_v5  ;;  %v12321_v5 = vld [vmem:[%s12756_s25 + $0x34] sm:$0xf] }
 0x1d5   : >> { %v1587_v31 = vpop.f32.mrf.mxu2  ;;  %v2627_v14 = vrot.slane %v12321_v5, 5  ;;  %v3903_v5 = vsel %vm12993_vm12, %v3901_v45, %v3902_v25  ;;  %v3650_v48 = vpack.c.b16 %v3621_v15, %v3620_v23  ;;  %v3333_v59 = vor.u32 %v3332_v24, %v13531_v17  ;;  %v10184_v23 = vld [vmem:[%s12756_s25 + $0x50] sm:$0xf] }
 0x1d6   : >> { %10216 = vmatmul.msk.bf16.gmra.mxu3 %vm936_vm8, %v3649_v11  ;;  %v1640_v51 = vadd.f32 %v1587_v31, %v1267_v3  ;;  %v1269_v3 = vadd.f32 %v1268_v30, %v13163_v52  ;;  %v2626_v52 = vrot.slane %v2624_v35, 4  ;;  %v3995_v4 = vunpack.c.l.b16 %v3903_v5 }
 0x1d7   : >> { %v2491_v19 = vpop.f32.mrf.mxu0  ;;  %v2629_v30 = vrot.slane %v2627_v14, 4  ;;  %v3334_v24 = vrot.slane %v3333_v59, 4  ;;  %v3904_v59 = vrot.slane %v3902_v25, 4 }
 0x1d8   : >> { %v2628_v35 = vsel %vm12993_vm12, %v2626_v52, %v2627_v14  ;;  %v3905_v52 = vrot.slane %v13537_v36, 5 }
 0x1d9   : >> { %v1877_v42 = vpop.f32.mrf.mxu3 }
 0x1da   : >> { %10249 = vmatmul.msk.bf16.gmra.mxu0 %vm936_vm8, %v4023_v28  ;;  %v1930_v44 = vadd.f32 %v1877_v42, %v1640_v51  ;;  %v3342_v28 = vrot.slane %v3340_v12, 4  ;;  %v11891_v42 = vld [vmem:[%s12756_s25 + $0x3c] sm:$0xff]  ;;  %v2631_v12 = vsel %vm12993_vm12, %v2629_v30, %v2630_v7 }
 0x1db   : >> { %v1271_v11 = vpop.f32.mrf.mxu1  ;;  %v2719_v17 = vunpack.c.l.b16 %v2631_v12  ;;  %v3907_v12 = vrot.slane %v3905_v52, 4 }
 0x1dc   : >> { %v13554_v31 = vadd.f32 %v2491_v19, %v1930_v44  ;;  %v13563_v19 = vld [vmem:[%s12756_s25 + $0x4c] sm:$0x1]  ;;  %v3343_v1 = vor.u32 %v3342_v28, %v3338_v49  ;;  %v13575_v28 = vld [vmem:[%s12756_s25 + $0x54] sm:$0xf] }
 0x1dd   : >> { %v1589_v53 = vpop.f32.mrf.mxu2  ;;  %v3346_v45 = vshll.u32 %v13563_v19, 16  ;;  %v3360_v30 = vshll.u32 %v13575_v28, 16 }
 0x1de   : >> { %10045 = vmatmul.msk.bf16.gmra.mxu1 %vm936_vm8, %v2746_v2  ;;  %v1641_v51 = vadd.f32 %v1589_v53, %v1269_v3  ;;  %v3994_v2 = vunpack.c.l.b16 %v3900_v21  ;;  %v1272_v3 = vadd.f32 %v1271_v11, %v13184_v10  ;;  %v2718_v21 = vunpack.c.l.b16 %v2628_v35 }
 0x1df   : >> { %v2493_v56 = vpop.f32.mrf.mxu0  ;;  %v3348_v14 = vrot.slane %v3346_v45, 5  ;;  %v3351_v10 = vshrl.u32 %v10184_v23, 16  ;;  %v3354_v11 = vshll.u32 %v10184_v23, 16  ;;  %v3908_v45 = vrot.slane %v13563_v19, 5 }
 0x1e0   : >> { %v4024_v15 = vpack.c.b16 %v3995_v4, %v3994_v2  ;;  %v2747_v4 = vpack.c.b16 %v2719_v17, %v2718_v21 }
 0x1e1   : >> { %v1879_v44 = vpop.f32.mrf.mxu3  ;;  %v3353_v23 = vrot.slane %v3351_v10, 4  ;;  %v3356_v25 = vrot.slane %v3354_v11, 5  ;;  %v11892_v10 = vld [vmem:[%s12756_s25 + $0x44] sm:$0xff] }
 0x1e2   : >> { %v1931_v0 = vadd.f32 %v1879_v44, %v1641_v51  ;;  %10160 = vmatmul.msk.bf16.gmra.mxu2 %vm936_vm8, %v11891_v42  ;;  %v3344_v42 = vrot.slane %v3343_v1, 4  ;;  %v3364_v44 = vshrl.u32 %v13575_v28, 16 }
 0x1e3   : >> { %v1273_v54 = vpop.f32.mrf.mxu1 }
 0x1e4   : >> { %v13578_v5 = vadd.f32 %v2493_v56, %v1931_v0  ;;  %v3339_v56 = vsel %vm12782_vm9, %v3334_v24, %v3338_v49  ;;  %v3349_v36 = vsel %vm12782_vm9, %v3344_v42, %v3348_v14  ;;  %v12323_v0 = vld [vmem:[%s12756_s25 + $0x40] sm:$0xf]  ;;  %v3366_v21 = vrot.slane %v3364_v44, 4  ;;  %v13598_v14 = vld [vmem:[%s12756_s25 + $0x58] sm:$0xf] }
 0x1e5   : >> { %v1592_v53 = vpop.f32.mrf.mxu2  ;;  %v2634_v35 = vrot.slane %v12323_v0, 5  ;;  %v3622_v24 = vunpack.c.l.b16 %v3339_v56  ;;  %v3906_v42 = vsel %vm12993_vm12, %v3904_v59, %v3905_v52  ;;  %v12324_v0 = vld [vmem:[%s12756_s25 + $0x44] sm:$0xf] }
 0x1e6   : >> { %10217 = vmatmul.msk.bf16.gmra.mxu3 %vm936_vm8, %v3650_v48  ;;  %v1642_v51 = vadd.f32 %v1592_v53, %v1272_v3  ;;  %v10028_v3 = vld [vmem:[%s12756_s25 + $0x3c] sm:$0xe]  ;;  %v3362_v53 = vrot.slane %v3360_v30, 5  ;;  %v3357_v30 = vor.u32 %v3356_v25, %v3353_v23  ;;  %v3996_v52 = vunpack.c.l.b16 %v3906_v42  ;;  %v10233_v42 = vld [vmem:[%s12756_s25 + $0x50] sm:$0xe] }
 0x1e7   : >> { %v2496_v7 = vpop.f32.mrf.mxu0  ;;  %v2636_v11 = vrot.slane %v2634_v35, 4 }
 0x1e8   : >> { %v3367_v44 = vor.u32 %v3366_v21, %v3362_v53  ;;  %v3358_v23 = vrot.slane %v3357_v30, 4 }
 0x1e9   : >> { %v1882_v2 = vpop.f32.mrf.mxu3 }
 0x1ea   : >> { %10250 = vmatmul.msk.bf16.gmra.mxu0 %vm936_vm8, %v4024_v15  ;;  %v1932_v48 = vadd.f32 %v1882_v2, %v1642_v51  ;;  %v1274_v15 = vadd.f32 %v1273_v54, %v13201_v41  ;;  %v3623_v51 = vunpack.c.l.b16 %v3349_v36  ;;  %v10036_v2 = vrot.slane %v10028_v3, 9 }
 0x1eb   : >> { %v1276_v1 = vpop.f32.mrf.mxu1  ;;  %v2637_v41 = vrot.slane %v12324_v0, 5  ;;  %v3368_v25 = vrot.slane %v3367_v44, 4  ;;  %v3912_v0 = vrot.slane %v13575_v28, 5 }
 0x1ec   : >> { %v13592_v17 = vadd.f32 %v2496_v7, %v1932_v48  ;;  %v3909_v7 = vsel %vm12993_vm12, %v3907_v12, %v3908_v45  ;;  %v3651_v56 = vpack.c.b16 %v3623_v51, %v3622_v24  ;;  %v1277_v45 = vadd.f32 %v1276_v1, %v13222_v27 }
 0x1ed   : >> { %v1594_v49 = vpop.f32.mrf.mxu2  ;;  %v3997_v36 = vunpack.c.l.b16 %v3909_v7  ;;  %v2638_v12 = vsel %vm12993_vm12, %v2636_v11, %v2637_v41  ;;  %v3363_v1 = vsel %vm12782_vm9, %v3358_v23, %v3362_v53  ;;  %v10241_v7 = vrot.slane %v10233_v42, 9 }
 0x1ee   : >> { %10046 = vmatmul.msk.bf16.gmra.mxu1 %vm936_vm8, %v2747_v4  ;;  %v1643_v19 = vadd.f32 %v1594_v49, %v1274_v15  ;;  %v3370_v4 = vshll.u32 %v13598_v14, 16  ;;  %v2635_v15 = vsel %vm12993_vm12, %v10036_v2, %v2634_v35  ;;  %v2721_v51 = vunpack.c.l.b16 %v2638_v12  ;;  %v13617_v35 = vld [vmem:[%s12756_s25 + $0x5c] sm:$0xf] }
 0x1ef   : >> { %v2498_v54 = vpop.f32.mrf.mxu0  ;;  %v2720_v24 = vunpack.c.l.b16 %v2635_v15  ;;  %v3380_v28 = vshll.u32 %v13617_v35, 16  ;;  %v3915_v53 = vrot.slane %v13598_v14, 5  ;;  %v12326_v15 = vld [vmem:[%s12756_s25 + $0x4c] sm:$0x1]  ;;  %v3624_v23 = vunpack.c.l.b16 %v3363_v1 }
 0x1f0   : >> { %v13611_v21 = vrot.slane %v3370_v4, 5  ;;  %v3374_v4 = vshrl.u32 %v13598_v14, 16  ;;  %v2643_v12 = vrot.slane %v12326_v15, 5 }
 0x1f1   : >> { %v1884_v48 = vpop.f32.mrf.mxu3  ;;  %v2748_v44 = vpack.c.b16 %v2721_v51, %v2720_v24  ;;  %v3913_v51 = vsel %vm12993_vm12, %v10241_v7, %v3912_v0  ;;  %v3382_v14 = vrot.slane %v3380_v28, 5 }
 0x1f2   : >> { %v1933_v59 = vadd.f32 %v1884_v48, %v1643_v19  ;;  %10161 = vmatmul.msk.bf16.gmra.mxu2 %vm936_vm8, %v11892_v10  ;;  %v4025_v19 = vpack.c.b16 %v3997_v36, %v3996_v52  ;;  %v3373_v11 = vsel %vm12782_vm9, %v3368_v25, %v13611_v21  ;;  %v3384_v48 = vshrl.u32 %v13617_v35, 16 }
 0x1f3   : >> { %v1278_v3 = vpop.f32.mrf.mxu1  ;;  %v3914_v52 = vrot.slane %v3912_v0, 4  ;;  %v3625_v25 = vunpack.c.l.b16 %v3373_v11  ;;  %v3376_v42 = vrot.slane %v3374_v4, 4 }
 0x1f4   : >> { %v13619_v2 = vadd.f32 %v2498_v54, %v1933_v59  ;;  %v12325_v59 = vld [vmem:[%s12756_s25 + $0x48] sm:$0xf] }
 0x1f5   : >> { %v1597_v49 = vpop.f32.mrf.mxu2  ;;  %v2640_v36 = vrot.slane %v12325_v59, 5  ;;  %v3916_v59 = vsel %vm12993_vm12, %v3914_v52, %v3915_v53  ;;  %v3652_v11 = vpack.c.b16 %v3625_v25, %v3624_v23  ;;  %v3377_v0 = vor.u32 %v3376_v42, %v13611_v21  ;;  %v10189_v23 = vld [vmem:[%s12756_s25 + $0x64] sm:$0xf] }
 0x1f6   : >> { %10218 = vmatmul.msk.bf16.gmra.mxu3 %vm936_vm8, %v3651_v56  ;;  %v1644_v10 = vadd.f32 %v1597_v49, %v1277_v45  ;;  %v1279_v45 = vadd.f32 %v1278_v3, %v13237_v58  ;;  %v2639_v58 = vrot.slane %v2637_v41, 4  ;;  %v3999_v15 = vunpack.c.l.b16 %v3916_v59 }
 0x1f7   : >> { %v2501_v27 = vpop.f32.mrf.mxu0  ;;  %v2642_v3 = vrot.slane %v2640_v36, 4  ;;  %v3378_v42 = vrot.slane %v3377_v0, 4  ;;  %v3917_v0 = vrot.slane %v3915_v53, 4 }
 0x1f8   : >> { %v2641_v41 = vsel %vm12993_vm12, %v2639_v58, %v2640_v36  ;;  %v3918_v58 = vrot.slane %v13617_v35, 5 }
 0x1f9   : >> { %v1887_v30 = vpop.f32.mrf.mxu3 }
 0x1fa   : >> { %10251 = vmatmul.msk.bf16.gmra.mxu0 %vm936_vm8, %v4025_v19  ;;  %v1934_v54 = vadd.f32 %v1887_v30, %v1644_v10  ;;  %v3386_v19 = vrot.slane %v3384_v48, 4  ;;  %v11893_v30 = vld [vmem:[%s12756_s25 + $0x50] sm:$0xff]  ;;  %v2644_v48 = vsel %vm12993_vm12, %v2642_v3, %v2643_v12 }
 0x1fb   : >> { %v1281_v56 = vpop.f32.mrf.mxu1  ;;  %v2723_v21 = vunpack.c.l.b16 %v2644_v48  ;;  %v3920_v48 = vrot.slane %v3918_v58, 4 }
 0x1fc   : >> { %v13634_v49 = vadd.f32 %v2501_v27, %v1934_v54  ;;  %v13643_v27 = vld [vmem:[%s12756_s25 + $0x60] sm:$0x1]  ;;  %v3387_v7 = vor.u32 %v3386_v19, %v3382_v14  ;;  %v13655_v19 = vld [vmem:[%s12756_s25 + $0x68] sm:$0xf] }
 0x1fd   : >> { %v1599_v24 = vpop.f32.mrf.mxu2  ;;  %v3390_v52 = vshll.u32 %v13643_v27, 16  ;;  %v3404_v3 = vshll.u32 %v13655_v19, 16 }
 0x1fe   : >> { %10047 = vmatmul.msk.bf16.gmra.mxu1 %vm936_vm8, %v2748_v44  ;;  %v1645_v10 = vadd.f32 %v1599_v24, %v1279_v45  ;;  %v3998_v44 = vunpack.c.l.b16 %v3913_v51  ;;  %v1282_v45 = vadd.f32 %v1281_v56, %v13118_v43  ;;  %v2722_v51 = vunpack.c.l.b16 %v2641_v41 }
 0x1ff   : >> { %v2503_v1 = vpop.f32.mrf.mxu0  ;;  %v3392_v36 = vrot.slane %v3390_v52, 5  ;;  %v3395_v43 = vshrl.u32 %v10189_v23, 16  ;;  %v3398_v56 = vshll.u32 %v10189_v23, 16  ;;  %v3921_v52 = vrot.slane %v13643_v27, 5 }
 0x200   : >> { %v4026_v25 = vpack.c.b16 %v3999_v15, %v3998_v44  ;;  %v2749_v15 = vpack.c.b16 %v2723_v21, %v2722_v51 }
 0x201   : >> { %v1889_v54 = vpop.f32.mrf.mxu3  ;;  %v3397_v23 = vrot.slane %v3395_v43, 4  ;;  %v3400_v53 = vrot.slane %v3398_v56, 5  ;;  %v11894_v43 = vld [vmem:[%s12756_s25 + $0x58] sm:$0xff] }
 0x202   : >> { %v1935_v4 = vadd.f32 %v1889_v54, %v1645_v10  ;;  %10162 = vmatmul.msk.bf16.gmra.mxu2 %vm936_vm8, %v11893_v30  ;;  %v3388_v30 = vrot.slane %v3387_v7, 4  ;;  %v3408_v54 = vshrl.u32 %v13655_v19, 16 }
 0x203   : >> { %v1283_v28 = vpop.f32.mrf.mxu1 }
 0x204   : >> { %v13658_v59 = vadd.f32 %v2503_v1, %v1935_v4  ;;  %v3383_v1 = vsel %vm12782_vm9, %v3378_v42, %v3382_v14  ;;  %v3393_v35 = vsel %vm12782_vm9, %v3388_v30, %v3392_v36  ;;  %v12327_v4 = vld [vmem:[%s12756_s25 + $0x54] sm:$0xf]  ;;  %v3410_v51 = vrot.slane %v3408_v54, 4  ;;  %v13678_v36 = vld [vmem:[%s12756_s25 + $0x6c] sm:$0xf] }
 0x205   : >> { %v1602_v24 = vpop.f32.mrf.mxu2  ;;  %v2647_v41 = vrot.slane %v12327_v4, 5  ;;  %v3626_v42 = vunpack.c.l.b16 %v3383_v1  ;;  %v3919_v30 = vsel %vm12993_vm12, %v3917_v0, %v3918_v58  ;;  %v12328_v4 = vld [vmem:[%s12756_s25 + $0x58] sm:$0xf] }
 0x206   : >> { %10219 = vmatmul.msk.bf16.gmra.mxu3 %vm936_vm8, %v3652_v11  ;;  %v1646_v10 = vadd.f32 %v1602_v24, %v1282_v45  ;;  %15731 = vst [vmem:[#allocation14_spill] sm:$0xff] %v13658_v59  ;;  %v10029_v45 = vld [vmem:[%s12756_s25 + $0x50] sm:$0xe]  ;;  %v3406_v24 = vrot.slane %v3404_v3, 5  ;;  %v3401_v3 = vor.u32 %v3400_v53, %v3397_v23  ;;  %v4000_v58 = vunpack.c.l.b16 %v3919_v30  ;;  %v10234_v30 = vld [vmem:[%s12756_s25 + $0x64] sm:$0xe] }
 0x207   : >> { %v2506_v12 = vpop.f32.mrf.mxu0  ;;  %v2649_v56 = vrot.slane %v2647_v41, 4 }
 0x208   : >> { %v3411_v54 = vor.u32 %v3410_v51, %v3406_v24  ;;  %v3402_v23 = vrot.slane %v3401_v3, 4 }
 0x209   : >> { %v1892_v44 = vpop.f32.mrf.mxu3 }
 0x20a   : >> { %10252 = vmatmul.msk.bf16.gmra.mxu0 %vm936_vm8, %v4026_v25  ;;  %v1936_v11 = vadd.f32 %v1892_v44, %v1646_v10  ;;  %v1284_v25 = vadd.f32 %v1283_v28, %v13135_v18  ;;  %v3627_v10 = vunpack.c.l.b16 %v3393_v35  ;;  %v10037_v44 = vrot.slane %v10029_v45, 9 }
 0x20b   : >> { %v1286_v7 = vpop.f32.mrf.mxu1  ;;  %v2650_v18 = vrot.slane %v12328_v4, 5  ;;  %v3412_v53 = vrot.slane %v3411_v54, 4  ;;  %v3925_v4 = vrot.slane %v13655_v19, 5 }
 0x20c   : >> { %v13672_v21 = vadd.f32 %v2506_v12, %v1936_v11  ;;  %v3922_v12 = vsel %vm12993_vm12, %v3920_v48, %v3921_v52  ;;  %v3653_v1 = vpack.c.b16 %v3627_v10, %v3626_v42  ;;  %v1287_v52 = vadd.f32 %v1286_v7, %v13155_v46 }
 0x20d   : >> { %v1604_v14 = vpop.f32.mrf.mxu2  ;;  %v4001_v35 = vunpack.c.l.b16 %v3922_v12  ;;  %v2651_v48 = vsel %vm12993_vm12, %v2649_v56, %v2650_v18  ;;  %v3407_v7 = vsel %vm12782_vm9, %v3402_v23, %v3406_v24  ;;  %v10242_v12 = vrot.slane %v10234_v30, 9 }
 0x20e   : >> { %15732 = vst [vmem:[#allocation15_spill] sm:$0xff] %v13672_v21  ;;  %10048 = vmatmul.msk.bf16.gmra.mxu1 %vm936_vm8, %v2749_v15  ;;  %v1647_v27 = vadd.f32 %v1604_v14, %v1284_v25  ;;  %v3414_v15 = vshll.u32 %v13678_v36, 16  ;;  %v2648_v25 = vsel %vm12993_vm12, %v10037_v44, %v2647_v41  ;;  %v2725_v10 = vunpack.c.l.b16 %v2651_v48  ;;  %v13697_v41 = vld [vmem:[%s12756_s25 + $0x70] sm:$0xf]  ;;  %v13907_v21 = vld [vmem:[%s12756_s25 + $0x9c] sm:$0x1] }
 0x20f   : >> { %v2508_v28 = vpop.f32.mrf.mxu0  ;;  %v2724_v42 = vunpack.c.l.b16 %v2648_v25  ;;  %v3424_v19 = vshll.u32 %v13697_v41, 16  ;;  %v3928_v24 = vrot.slane %v13678_v36, 5  ;;  %v12330_v25 = vld [vmem:[%s12756_s25 + $0x60] sm:$0x1]  ;;  %v3628_v23 = vunpack.c.l.b16 %v3407_v7 }
 0x210   : >> { %v13691_v51 = vrot.slane %v3414_v15, 5  ;;  %v3418_v15 = vshrl.u32 %v13678_v36, 16  ;;  %v2656_v48 = vrot.slane %v12330_v25, 5 }
 0x211   : >> { %v1894_v11 = vpop.f32.mrf.mxu3  ;;  %v2750_v54 = vpack.c.b16 %v2725_v10, %v2724_v42  ;;  %v3926_v10 = vsel %vm12993_vm12, %v10242_v12, %v3925_v4  ;;  %v3426_v36 = vrot.slane %v3424_v19, 5 }
 0x212   : >> { %v1937_v0 = vadd.f32 %v1894_v11, %v1647_v27  ;;  %10163 = vmatmul.msk.bf16.gmra.mxu2 %vm936_vm8, %v11894_v43  ;;  %v4027_v27 = vpack.c.b16 %v4001_v35, %v4000_v58  ;;  %v3417_v56 = vsel %vm12782_vm9, %v3412_v53, %v13691_v51  ;;  %v3428_v11 = vshrl.u32 %v13697_v41, 16 }
 0x213   : >> { %v1288_v45 = vpop.f32.mrf.mxu1  ;;  %v3927_v58 = vrot.slane %v3925_v4, 4  ;;  %v3629_v53 = vunpack.c.l.b16 %v3417_v56  ;;  %v3420_v30 = vrot.slane %v3418_v15, 4 }
 0x214   : >> { %v13699_v44 = vadd.f32 %v2508_v28, %v1937_v0  ;;  %v12329_v0 = vld [vmem:[%s12756_s25 + $0x5c] sm:$0xf] }
 0x215   : >> { %v1607_v14 = vpop.f32.mrf.mxu2  ;;  %v2653_v35 = vrot.slane %v12329_v0, 5  ;;  %v3929_v0 = vsel %vm12993_vm12, %v3927_v58, %v3928_v24  ;;  %v3654_v56 = vpack.c.b16 %v3629_v53, %v3628_v23  ;;  %v3421_v4 = vor.u32 %v3420_v30, %v13691_v51  ;;  %v10194_v23 = vld [vmem:[%s12756_s25 + $0x78] sm:$0xf] }
 0x216   : >> { %10220 = vmatmul.msk.bf16.gmra.mxu3 %vm936_vm8, %v3653_v1  ;;  %v1648_v43 = vadd.f32 %v1607_v14, %v1287_v52  ;;  %15733 = vst [vmem:[#allocation16_spill] sm:$0xff] %v13699_v44  ;;  %v1289_v52 = vadd.f32 %v1288_v45, %v13172_v8  ;;  %v2652_v8 = vrot.slane %v2650_v18, 4  ;;  %v4003_v25 = vunpack.c.l.b16 %v3929_v0 }
 0x217   : >> { %v2511_v46 = vpop.f32.mrf.mxu0  ;;  %v2655_v45 = vrot.slane %v2653_v35, 4  ;;  %v3422_v30 = vrot.slane %v3421_v4, 4  ;;  %v3930_v4 = vrot.slane %v3928_v24, 4 }
 0x218   : >> { %v2654_v18 = vsel %vm12993_vm12, %v2652_v8, %v2653_v35  ;;  %v3931_v8 = vrot.slane %v13697_v41, 5 }
 0x219   : >> { %v1897_v3 = vpop.f32.mrf.mxu3 }
 0x21a   : >> { %10253 = vmatmul.msk.bf16.gmra.mxu0 %vm936_vm8, %v4027_v27  ;;  %v1938_v28 = vadd.f32 %v1897_v3, %v1648_v43  ;;  %v3430_v27 = vrot.slane %v3428_v11, 4  ;;  %v11895_v3 = vld [vmem:[%s12756_s25 + $0x64] sm:$0xff]  ;;  %v2657_v11 = vsel %vm12993_vm12, %v2655_v45, %v2656_v48 }
 0x21b   : >> { %v1291_v1 = vpop.f32.mrf.mxu1  ;;  %v2727_v51 = vunpack.c.l.b16 %v2657_v11  ;;  %v3933_v11 = vrot.slane %v3931_v8, 4 }
 0x21c   : >> { %v13714_v14 = vadd.f32 %v2511_v46, %v1938_v28  ;;  %v13723_v46 = vld [vmem:[%s12756_s25 + $0x74] sm:$0x1]  ;;  %v3431_v12 = vor.u32 %v3430_v27, %v3426_v36  ;;  %v13735_v27 = vld [vmem:[%s12756_s25 + $0x7c] sm:$0xf] }
 0x21d   : >> { %v1609_v42 = vpop.f32.mrf.mxu2  ;;  %v3434_v58 = vshll.u32 %v13723_v46, 16  ;;  %v3448_v45 = vshll.u32 %v13735_v27, 16 }
 0x21e   : >> { %15734 = vst [vmem:[#allocation17_spill] sm:$0xff] %v13714_v14  ;;  %10049 = vmatmul.msk.bf16.gmra.mxu1 %vm936_vm8, %v2750_v54  ;;  %v1649_v43 = vadd.f32 %v1609_v42, %v1289_v52  ;;  %v4002_v54 = vunpack.c.l.b16 %v3926_v10  ;;  %v1292_v52 = vadd.f32 %v1291_v1, %v13191_v26  ;;  %v2726_v10 = vunpack.c.l.b16 %v2654_v18 }
 0x21f   : >> { %v2513_v7 = vpop.f32.mrf.mxu0  ;;  %v3436_v35 = vrot.slane %v3434_v58, 5  ;;  %v3439_v26 = vshrl.u32 %v10194_v23, 16  ;;  %v3442_v1 = vshll.u32 %v10194_v23, 16  ;;  %v3934_v58 = vrot.slane %v13723_v46, 5 }
 0x220   : >> { %v4028_v53 = vpack.c.b16 %v4003_v25, %v4002_v54  ;;  %v2751_v25 = vpack.c.b16 %v2727_v51, %v2726_v10 }
 0x221   : >> { %v1899_v28 = vpop.f32.mrf.mxu3  ;;  %v3441_v23 = vrot.slane %v3439_v26, 4  ;;  %v3444_v24 = vrot.slane %v3442_v1, 5  ;;  %v11896_v26 = vld [vmem:[%s12756_s25 + $0x6c] sm:$0xff] }
 0x222   : >> { %v1939_v15 = vadd.f32 %v1899_v28, %v1649_v43  ;;  %10164 = vmatmul.msk.bf16.gmra.mxu2 %vm936_vm8, %v11895_v3  ;;  %v3432_v3 = vrot.slane %v3431_v12, 4  ;;  %v3452_v28 = vshrl.u32 %v13735_v27, 16 }
 0x223   : >> { %v1293_v19 = vpop.f32.mrf.mxu1 }
 0x224   : >> { %v13738_v0 = vadd.f32 %v2513_v7, %v1939_v15  ;;  %v3427_v7 = vsel %vm12782_vm9, %v3422_v30, %v3426_v36  ;;  %v3437_v41 = vsel %vm12782_vm9, %v3432_v3, %v3436_v35  ;;  %v12331_v15 = vld [vmem:[%s12756_s25 + $0x68] sm:$0xf]  ;;  %v3454_v10 = vrot.slane %v3452_v28, 4  ;;  %v13758_v35 = vld [vmem:[%s12756_s25 + $0x80] sm:$0xf] }
 0x225   : >> { %v1612_v42 = vpop.f32.mrf.mxu2  ;;  %v2660_v18 = vrot.slane %v12331_v15, 5  ;;  %v3630_v30 = vunpack.c.l.b16 %v3427_v7  ;;  %v3932_v3 = vsel %vm12993_vm12, %v3930_v4, %v3931_v8  ;;  %v12332_v15 = vld [vmem:[%s12756_s25 + $0x6c] sm:$0xf] }
 0x226   : >> { %10221 = vmatmul.msk.bf16.gmra.mxu3 %vm936_vm8, %v3654_v56  ;;  %v1650_v43 = vadd.f32 %v1612_v42, %v1292_v52  ;;  %15735 = vst [vmem:[#allocation18_spill] sm:$0xff] %v13738_v0  ;;  %v10030_v52 = vld [vmem:[%s12756_s25 + $0x64] sm:$0xe]  ;;  %v3450_v42 = vrot.slane %v3448_v45, 5  ;;  %v3445_v45 = vor.u32 %v3444_v24, %v3441_v23  ;;  %v4004_v8 = vunpack.c.l.b16 %v3932_v3 }
 0x227   : >> { %v2516_v48 = vpop.f32.mrf.mxu0  ;;  %v2662_v1 = vrot.slane %v2660_v18, 4 }
 0x228   : >> { %v3455_v28 = vor.u32 %v3454_v10, %v3450_v42 }
 0x229   : >> { %v1902_v54 = vpop.f32.mrf.mxu3 }
 0x22a   : >> { %10254 = vmatmul.msk.bf16.gmra.mxu0 %vm936_vm8, %v4028_v53  ;;  %v1940_v56 = vadd.f32 %v1902_v54, %v1650_v43  ;;  %v1294_v53 = vadd.f32 %v1293_v19, %v13210_v20  ;;  %v3631_v43 = vunpack.c.l.b16 %v3437_v41  ;;  %v10038_v54 = vrot.slane %v10030_v52, 9 }
 0x22b   : >> { %v1296_v12 = vpop.f32.mrf.mxu1  ;;  %v2663_v20 = vrot.slane %v12332_v15, 5  ;;  %v3456_v24 = vrot.slane %v3455_v28, 4 }
 0x22c   : >> { %v13752_v51 = vadd.f32 %v2516_v48, %v1940_v56  ;;  %v3935_v48 = vsel %vm12993_vm12, %v3933_v11, %v3934_v58  ;;  %v3655_v7 = vpack.c.b16 %v3631_v43, %v3630_v30  ;;  %v3446_v58 = vrot.slane %v3445_v45, 4 }
 0x22d   : >> { %v1614_v36 = vpop.f32.mrf.mxu2  ;;  %v4005_v41 = vunpack.c.l.b16 %v3935_v48  ;;  %v2664_v11 = vsel %vm12993_vm12, %v2662_v1, %v2663_v20  ;;  %v1297_v23 = vadd.f32 %v1296_v12, %v13231_v13  ;;  %v3941_v45 = vrot.slane %v13758_v35, 5 }
 0x22e   : >> { %15736 = vst [vmem:[#allocation19_spill] sm:$0xff] %v13752_v51  ;;  %10050 = vmatmul.msk.bf16.gmra.mxu1 %vm936_vm8, %v2751_v25  ;;  %v1651_v46 = vadd.f32 %v1614_v36, %v1294_v53  ;;  %v3458_v25 = vshll.u32 %v13758_v35, 16  ;;  %v2661_v53 = vsel %vm12993_vm12, %v10038_v54, %v2660_v18  ;;  %v3938_v36 = vrot.slane %v13735_v27, 5  ;;  %v13777_v18 = vld [vmem:[%s12756_s25 + $0x84] sm:$0xf] }
 0x22f   : >> { %v2518_v19 = vpop.f32.mrf.mxu0  ;;  %v2728_v43 = vunpack.c.l.b16 %v2661_v53  ;;  %v2729_v3 = vunpack.c.l.b16 %v2664_v11  ;;  %v3451_v13 = vsel %vm12782_vm9, %v3446_v58, %v3450_v42 }
 0x230   : >> { %v13771_v10 = vrot.slane %v3458_v25, 5  ;;  %v3940_v48 = vrot.slane %v3938_v36, 4  ;;  %v3632_v53 = vunpack.c.l.b16 %v3451_v13 }
 0x231   : >> { %v1904_v56 = vpop.f32.mrf.mxu3  ;;  %v2752_v25 = vpack.c.b16 %v2729_v3, %v2728_v43 }
 0x232   : >> { %v1941_v4 = vadd.f32 %v1904_v56, %v1651_v46  ;;  %10165 = vmatmul.msk.bf16.gmra.mxu2 %vm936_vm8, %v11896_v26  ;;  %v10235_v46 = vld [vmem:[%s12756_s25 + $0x78] sm:$0xe]  ;;  %v4029_v26 = vpack.c.b16 %v4005_v41, %v4004_v8  ;;  %v3461_v27 = vsel %vm12782_vm9, %v3456_v24, %v13771_v10  ;;  %v3462_v56 = vshrl.u32 %v13758_v35, 16 }
 0x233   : >> { %v1298_v52 = vpop.f32.mrf.mxu1  ;;  %v10243_v12 = vrot.slane %v10235_v46, 9  ;;  %v3633_v58 = vunpack.c.l.b16 %v3461_v27  ;;  %v3942_v43 = vsel %vm12993_vm12, %v3940_v48, %v3941_v45  ;;  %v12334_v27 = vld [vmem:[%s12756_s25 + $0x74] sm:$0x1] }
 0x234   : >> { %v13779_v54 = vadd.f32 %v2518_v19, %v1941_v4  ;;  %v3472_v19 = vshrl.u32 %v13777_v18, 16  ;;  %v12333_v4 = vld [vmem:[%s12756_s25 + $0x70] sm:$0xf]  ;;  %v1299_v11 = vadd.f32 %v1298_v52, %v13248_v38  ;;  %v3464_v3 = vrot.slane %v3462_v56, 4  ;;  %v11897_v38 = vld [vmem:[%s12756_s25 + $0x78] sm:$0xff] }
 0x235   : >> { %v1617_v30 = vpop.f32.mrf.mxu2  ;;  %v2666_v41 = vrot.slane %v12333_v4, 5  ;;  %v2665_v52 = vrot.slane %v2663_v20, 4  ;;  %v4007_v4 = vunpack.c.l.b16 %v3942_v43  ;;  %v10199_v43 = vld [vmem:[%s12756_s25 + $0x8c] sm:$0xf] }
 0x236   : >> { %10222 = vmatmul.msk.bf16.gmra.mxu3 %vm936_vm8, %v3655_v7  ;;  %v1652_v15 = vadd.f32 %v1617_v30, %v1297_v23  ;;  %15737 = vst [vmem:[#allocation20_spill] sm:$0xff] %v13779_v54  ;;  %v3468_v7 = vshll.u32 %v13777_v18, 16  ;;  %v3939_v23 = vsel %vm12993_vm12, %v10243_v12, %v3938_v36  ;;  %v3656_v12 = vpack.c.b16 %v3633_v58, %v3632_v53 }
 0x237   : >> { %v2521_v1 = vpop.f32.mrf.mxu0  ;;  %v2668_v13 = vrot.slane %v2666_v41, 4  ;;  %v3465_v0 = vor.u32 %v3464_v3, %v13771_v10  ;;  %v2667_v20 = vsel %vm12993_vm12, %v2665_v52, %v2666_v41  ;;  %v13819_v10 = vld [vmem:[%s12756_s25 + $0x90] sm:$0xf]  ;;  %v3944_v52 = vrot.slane %v13777_v18, 5 }
 0x238   : >> { %v3470_v46 = vrot.slane %v3468_v7, 5 }
 0x239   : >> { %v1907_v28 = vpop.f32.mrf.mxu3  ;;  %v3466_v3 = vrot.slane %v3465_v0, 4 }
 0x23a   : >> { %10255 = vmatmul.msk.bf16.gmra.mxu0 %vm936_vm8, %v4029_v26  ;;  %v1942_v8 = vadd.f32 %v1907_v28, %v1652_v15  ;;  %v3474_v26 = vrot.slane %v3472_v19, 4  ;;  %v2669_v28 = vrot.slane %v12334_v27, 5  ;;  %v3486_v27 = vshll.u32 %v10199_v43, 16 }
 0x23b   : >> { %v13791_v42 = vpop.f32.mrf.mxu1 }
 0x23c   : >> { %v13797_v24 = vadd.f32 %v2521_v1, %v1942_v8  ;;  %v10198_v1 = vld [vmem:[%s12756_s25 + $0x88] sm:$0x1]  ;;  %v3475_v48 = vor.u32 %v3474_v26, %v3470_v46  ;;  %v2670_v19 = vsel %vm12993_vm12, %v2668_v13, %v2669_v28  ;;  %v3483_v13 = vshrl.u32 %v10199_v43, 16 }
 0x23d   : >> { %v1619_v30 = vpop.f32.mrf.mxu2  ;;  %v3478_v53 = vshll.u32 %v10198_v1, 16  ;;  %v3492_v28 = vshll.u32 %v13819_v10, 16 }
 0x23e   : >> { %15738 = vst [vmem:[#allocation21_spill] sm:$0xff] %v13797_v24  ;;  %10051 = vmatmul.msk.bf16.gmra.mxu1 %vm936_vm8, %v2752_v25  ;;  %v1653_v15 = vadd.f32 %v1619_v30, %v1299_v11  ;;  %v4006_v25 = vunpack.c.l.b16 %v3939_v23  ;;  %v2730_v23 = vunpack.c.l.b16 %v2667_v20  ;;  %v2731_v30 = vunpack.c.l.b16 %v2670_v19 }
 0x23f   : >> { %v2523_v36 = vpop.f32.mrf.mxu0  ;;  %v3476_v26 = vrot.slane %v3475_v48, 4  ;;  %v3946_v20 = vrot.slane %v3944_v52, 4  ;;  %v3947_v19 = vrot.slane %v10198_v1, 5 }
 0x240   : >> { %v4030_v11 = vpack.c.b16 %v4007_v4, %v4006_v25  ;;  %v12335_v4 = vld [vmem:[%s12756_s25 + $0x7c] sm:$0xf] }
 0x241   : >> { %v1909_v8 = vpop.f32.mrf.mxu3  ;;  %v2673_v48 = vrot.slane %v12335_v4, 5 }
 0x242   : >> { %v1943_v56 = vadd.f32 %v1909_v8, %v1653_v15  ;;  %10166 = vmatmul.msk.bf16.gmra.mxu2 %vm936_vm8, %v11897_v38  ;;  %v3480_v15 = vrot.slane %v3478_v53, 5  ;;  %v3496_v8 = vshrl.u32 %v13819_v10, 16  ;;  %v10031_v53 = vld [vmem:[%s12756_s25 + $0x78] sm:$0xe] }
 0x243   : >> { %v13809_v7 = vpop.f32.mrf.mxu1  ;;  %v10039_v4 = vrot.slane %v10031_v53, 9  ;;  %v2675_v35 = vrot.slane %v2673_v48, 4 }
 0x244   : >> { %v13822_v38 = vadd.f32 %v2523_v36, %v1943_v56  ;;  %v3471_v36 = vsel %vm12782_vm9, %v3466_v3, %v3470_v46  ;;  %v3481_v18 = vsel %vm12782_vm9, %v3476_v26, %v3480_v15  ;;  %v3943_v56 = vrot.slane %v3941_v45, 4  ;;  %v13846_v26 = vld [vmem:[%s12756_s25 + $0x94] sm:$0xf]  ;;  %v11898_v15 = vld [vmem:[%s12756_s25 + $0x80] sm:$0xff] }
 0x245   : >> { %v13815_v58 = vpop.f32.mrf.mxu2  ;;  %v3498_v43 = vrot.slane %v3496_v8, 4  ;;  %v3634_v46 = vunpack.c.l.b16 %v3471_v36  ;;  %v3635_v3 = vunpack.c.l.b16 %v3481_v18  ;;  %v12336_v45 = vld [vmem:[%s12756_s25 + $0x80] sm:$0xf]  ;;  %v3502_v8 = vshll.u32 %v13846_v26, 16 }
 0x246   : >> { %10223 = vmatmul.msk.bf16.gmra.mxu3 %vm936_vm8, %v3656_v12  ;;  %15739 = vst [vmem:[#allocation22_spill] sm:$0xff] %v13822_v38  ;;  %v2753_v12 = vpack.c.b16 %v2731_v30, %v2730_v23  ;;  %v3488_v23 = vrot.slane %v3486_v27, 5  ;;  %v3494_v30 = vrot.slane %v3492_v28, 5  ;;  %v2676_v24 = vrot.slane %v12336_v45, 5 }
 0x247   : >> { %v13824_v41 = vpop.f32.mrf.mxu0  ;;  %v3945_v1 = vsel %vm12993_vm12, %v3943_v56, %v3944_v52  ;;  %v3657_v36 = vpack.c.b16 %v3635_v3, %v3634_v46  ;;  %v2674_v52 = vsel %vm12993_vm12, %v10039_v4, %v2673_v48  ;;  %v10236_v3 = vld [vmem:[%s12756_s25 + $0x8c] sm:$0xe] }
 0x248   : >> { %v3499_v28 = vor.u32 %v3498_v43, %v3494_v30  ;;  %v4008_v18 = vunpack.c.l.b16 %v3945_v1  ;;  %v2677_v56 = vsel %vm12993_vm12, %v2675_v35, %v2676_v24  ;;  %v2732_v43 = vunpack.c.l.b16 %v2674_v52 }
 0x249   : >> { %v13829_v25 = vpop.f32.mrf.mxu3  ;;  %v2733_v46 = vunpack.c.l.b16 %v2677_v56  ;;  %v12337_v56 = vld [vmem:[%s12756_s25 + $0x84] sm:$0xf] }
 0x24a   : >> { %10256 = vmatmul.msk.bf16.gmra.mxu0 %vm936_vm8, %v4030_v11  ;;  %v3485_v11 = vrot.slane %v3483_v13, 4  ;;  %v3948_v13 = vsel %vm12993_vm12, %v3946_v20, %v3947_v19  ;;  %v3500_v19 = vrot.slane %v3499_v28, 4  ;;  %v3506_v28 = vshrl.u32 %v13846_v26, 16 }
 0x24b   : >> { %v13832_v0 = vpop.f32.mrf.mxu1  ;;  %v4009_v53 = vunpack.c.l.b16 %v3948_v13  ;;  %v13872_v13 = vld [vmem:[%s12756_s25 + $0x98] sm:$0xf] }
 0x24c   : >> { %v3489_v27 = vor.u32 %v3488_v23, %v3485_v11  ;;  %v3504_v11 = vrot.slane %v3502_v8, 5 }
 0x24d   : >> { %v13842_v38 = vpop.f32.mrf.mxu2  ;;  %v4031_v1 = vpack.c.b16 %v4009_v53, %v4008_v18  ;;  %v3512_v18 = vshll.u32 %v13872_v13, 16 }
 0x24e   : >> { %10052 = vmatmul.msk.bf16.gmra.mxu1 %vm936_vm8, %v2753_v12  ;;  %v3490_v20 = vrot.slane %v3489_v27, 4  ;;  %v3505_v35 = vsel %vm12782_vm9, %v3500_v19, %v3504_v11  ;;  %v10244_v27 = vrot.slane %v10236_v3, 9  ;;  %v2900_v19 = vadd.f32 %v13791_v42, %v13264_v22  ;;  %v11899_v22 = vld [vmem:[%s12756_s25 + $0x8c] sm:$0xff] }
 0x24f   : >> { %v13850_v14 = vpop.f32.mrf.mxu0  ;;  %v13900_v51 = vrot.slane %v3512_v18, 5  ;;  %v2678_v42 = vrot.slane %v2676_v24, 4 }
 0x250   : >> { %v3495_v4 = vsel %vm12782_vm9, %v3490_v20, %v3494_v30  ;;  %v2679_v30 = vrot.slane %v12337_v56, 5  ;;  %v3516_v20 = vshrl.u32 %v13872_v13, 16  ;;  %v15740_v56 = vrot.slane %v13846_v26, 5 }
 0x251   : >> { %v13857_v12 = vpop.f32.mrf.mxu3  ;;  %v3636_v3 = vunpack.c.l.b16 %v3495_v4 }
 0x252   : >> { %10167 = vmatmul.msk.bf16.gmra.mxu2 %vm936_vm8, %v11898_v15  ;;  %v3951_v15 = vrot.slane %v13819_v10, 5  ;;  %v2754_v10 = vpack.c.b16 %v2733_v46, %v2732_v43  ;;  %v3637_v43 = vunpack.c.l.b16 %v3505_v35  ;;  %v3508_v46 = vrot.slane %v3506_v28, 4  ;;  %v12338_v35 = vld [vmem:[%s12756_s25 + $0x88] sm:$0x1] }
 0x253   : >> { %v13860_v45 = vpop.f32.mrf.mxu1  ;;  %v2681_v4 = vrot.slane %v2679_v30, 4  ;;  %v2682_v28 = vrot.slane %v12338_v35, 5  ;;  %v2680_v35 = vsel %vm12993_vm12, %v2678_v42, %v2679_v30  ;;  %v3957_v30 = vrot.slane %v13872_v13, 5 }
 0x254   : >> { %v3953_v52 = vrot.slane %v3951_v15, 4  ;;  %v3658_v18 = vpack.c.b16 %v3637_v43, %v3636_v3  ;;  %v10204_v3 = vld [vmem:[%s12756_s25 + $0xa0] sm:$0xf] }
 0x255   : >> { %v13866_v23 = vpop.f32.mrf.mxu2  ;;  %v2683_v59 = vsel %vm12993_vm12, %v2681_v4, %v2682_v28  ;;  %v13932_v4 = vld [vmem:[%s15695_s2] ss:$0 sm:$0xff] }
 0x256   : >> { %10224 = vmatmul.msk.bf16.gmra.mxu3 %vm936_vm8, %v3657_v36  ;;  %v3190_v36 = vadd.f32 %v13815_v58, %v2900_v19  ;;  %v3955_v44 = vsel %vm12993_vm12, %v3953_v52, %v15740_v56  ;;  %v3518_v58 = vrot.slane %v3516_v20, 4 }
 0x257   : >> { %v13874_v48 = vpop.f32.mrf.mxu0  ;;  %v4011_v56 = vunpack.c.l.b16 %v3955_v44  ;;  %v13925_v44 = vld [vmem:[%s12756_s25 + $0xa4] sm:$0xf] }
 0x258   : >> { %v3540_v13 = vshrl.u32 %v13925_v44, 16 }
 0x259   : >> { %v13881_v8 = vpop.f32.mrf.mxu3 }
 0x25a   : >> { %10257 = vmatmul.msk.bf16.gmra.mxu0 %vm936_vm8, %v4031_v1  ;;  %v3952_v1 = vsel %vm12993_vm12, %v10244_v27, %v3951_v15  ;;  %v2901_v15 = vadd.f32 %v13809_v7, %v13278_v62  ;;  %v3509_v27 = vor.u32 %v3508_v46, %v3504_v11  ;;  %v3519_v62 = vor.u32 %v3518_v58, %v13900_v51 }
 0x25b   : >> { %v2830_v53 = vpop.f32.mrf.mxu1  ;;  %v4010_v24 = vunpack.c.l.b16 %v3952_v1  ;;  %v3522_v7 = vshll.u32 %v13907_v21, 16  ;;  %v2734_v1 = vunpack.c.l.b16 %v2680_v35  ;;  %v3527_v58 = vshrl.u32 %v10204_v3, 16 }
 0x25c   : >> { %v2904_v11 = vadd.f32 %v2830_v53, %v13318_v32 }
 0x25d   : >> { %v13891_v54 = vpop.f32.mrf.mxu2  ;;  %v4032_v43 = vpack.c.b16 %v4011_v56, %v4010_v24  ;;  %v3524_v53 = vrot.slane %v3522_v7, 5  ;;  %v15741_v56 = vrot.slane %v13846_v26, 5  ;;  %v3960_v7 = vrot.slane %v13907_v21, 5 }
 0x25e   : >> { %10053 = vmatmul.msk.bf16.gmra.mxu1 %vm936_vm8, %v2754_v10  ;;  %v3804_v10 = vadd.f32 %v13829_v25, %v3190_v36  ;;  %v3191_v25 = vadd.f32 %v13842_v38, %v2901_v15  ;;  %v3510_v36 = vrot.slane %v3509_v27, 4  ;;  %v3520_v38 = vrot.slane %v3519_v62, 4 }
 0x25f   : >> { %v13904_v19 = vpop.f32.mrf.mxu0  ;;  %v3530_v15 = vshll.u32 %v10204_v3, 16  ;;  %v2902_v27 = vadd.f32 %v13832_v0, %v13289_v29  ;;  %v3956_v35 = vrot.slane %v15741_v56, 4  ;;  %v3959_v62 = vrot.slane %v3957_v30, 4  ;;  %v10032_v0 = vld [vmem:[%s12756_s25 + $0x8c] sm:$0xe] }
 0x260   : >> { %v4178_v42 = vadd.f32 %v13824_v41, %v3804_v10  ;;  %v3805_v41 = vadd.f32 %v13857_v12, %v3191_v25  ;;  %v3515_v10 = vsel %vm12782_vm9, %v3510_v36, %v13900_v51  ;;  %v3525_v29 = vsel %vm12782_vm9, %v3520_v38, %v3524_v53  ;;  %v12339_v51 = vld [vmem:[%s12756_s25 + $0x90] sm:$0xf] }
 0x261   : >> { %v13912_v52 = vpop.f32.mrf.mxu3  ;;  %v2686_v36 = vrot.slane %v12339_v51, 5  ;;  %v3529_v3 = vrot.slane %v3527_v58, 4  ;;  %v3639_v38 = vunpack.c.l.b16 %v3525_v29  ;;  %v3958_v53 = vsel %vm12993_vm12, %v3956_v35, %v3957_v30 }
 0x262   : >> { %10168 = vmatmul.msk.bf16.gmra.mxu2 %vm936_vm8, %v11899_v22  ;;  %v2735_v22 = vunpack.c.l.b16 %v2683_v59  ;;  %v3536_v59 = vshll.u32 %v13925_v44, 16  ;;  %v4179_v21 = vadd.f32 %v13850_v14, %v3805_v41  ;;  %v3961_v58 = vsel %vm12993_vm12, %v3959_v62, %v3960_v7 }
 0x263   : >> { %v2832_v20 = vpop.f32.mrf.mxu1  ;;  %v3192_v41 = vadd.f32 %v13866_v23, %v2902_v27  ;;  %v4013_v51 = vunpack.c.l.b16 %v3961_v58 }
 0x264   : >> { %v2755_v24 = vpack.c.b16 %v2735_v22, %v2734_v1  ;;  %v13952_v26 = vrot.slane %v3536_v59, 5  ;;  %v3542_v1 = vrot.slane %v3540_v13, 4  ;;  %v2688_v13 = vrot.slane %v2686_v36, 4 }
 0x265   : >> { %v3120_v46 = vpop.f32.mrf.mxu2  ;;  %v4215_v7 = vadd.f32 %v13932_v4, %v4179_v21 }
 0x266   : >> { %10225 = vmatmul.msk.bf16.gmra.mxu3 %vm936_vm8, %v3658_v18  ;;  %v3194_v32 = vadd.f32 %v3120_v46, %v2904_v11  ;;  %v4214_v11 = vadd.f32 %v13932_v4, %v4178_v42  ;;  %v3532_v46 = vrot.slane %v3530_v15, 5  ;;  %v3638_v42 = vunpack.c.l.b16 %v3515_v10 }
 0x267   : >> { %v4108_v28 = vpop.f32.mrf.mxu0  ;;  %v10040_v15 = vrot.slane %v10032_v0, 9  ;;  %v3543_v56 = vor.u32 %v3542_v1, %v13952_v26  ;;  %v4012_v0 = vunpack.c.l.b16 %v3958_v53 }
 0x268   : >> { %v4246_v35 = vmax.f32 %v4214_v11, 0.0  ;;  %v3659_v29 = vpack.c.b16 %v3639_v38, %v3638_v42  ;;  %v3964_v38 = vrot.slane %v13925_v44, 5 }
 0x269   : >> { %v3734_v18 = vpop.f32.mrf.mxu3  ;;  %v2687_v27 = vsel %vm12993_vm12, %v10040_v15, %v2686_v36  ;;  %v3544_v1 = vrot.slane %v3543_v56, 4  ;;  %v2903_v36 = vadd.f32 %v13860_v45, %v13302_v57 }
 0x26a   : >> { %10258 = vmatmul.msk.bf16.gmra.mxu0 %vm936_vm8, %v4032_v43  ;;  %v3808_v12 = vadd.f32 %v3734_v18, %v3194_v32  ;;  %v2905_v43 = vadd.f32 %v2832_v20, %v13328_v9  ;;  %v13957_v32 = vld [vmem:[%s12756_s25 + $0xa8] sm:$0xf]  ;;  %v13967_v9 = vld [vmem:[%s12756_s25 + $0x94] sm:$0xf]  ;;  %v2736_v58 = vunpack.c.l.b16 %v2687_v27  ;;  %v3966_v56 = vrot.slane %v3964_v38, 4 }
 0x26b   : >> { %v2835_v25 = vpop.f32.mrf.mxu1  ;;  %v2689_v20 = vrot.slane %v13967_v9, 5  ;;  %v3546_v30 = vshll.u32 %v13957_v32, 16  ;;  %v3193_v44 = vadd.f32 %v13891_v54, %v2903_v36 }
 0x26c   : >> { %v4182_v22 = vadd.f32 %v4108_v28, %v3808_v12  ;;  %v11900_v28 = vld [vmem:[%s12756_s25 + $0x94] sm:$0xff] }
 0x26d   : >> { %v3122_v18 = vpop.f32.mrf.mxu2  ;;  %v2690_v11 = vsel %vm12993_vm12, %v2688_v13, %v2689_v20  ;;  %v13982_v21 = vrot.slane %v3546_v30, 5  ;;  %v3550_v30 = vshrl.u32 %v13957_v32, 16  ;;  %v2691_v36 = vrot.slane %v2689_v20, 4 }
 0x26e   : >> { %10054 = vmatmul.msk.bf16.gmra.mxu1 %vm936_vm8, %v2755_v24  ;;  %v4218_v59 = vadd.f32 %v13932_v4, %v4182_v22  ;;  %v3195_v14 = vadd.f32 %v3122_v18, %v2905_v43  ;;  %v3533_v24 = vor.u32 %v3532_v46, %v3529_v3  ;;  %v3806_v3 = vadd.f32 %v13881_v8, %v3192_v41  ;;  %v13993_v41 = vld [vmem:[%s12756_s25 + $0xac] sm:$0xf] }
 0x26f   : >> { %v4110_v10 = vpop.f32.mrf.mxu0  ;;  %v2906_v18 = vadd.f32 %v2835_v25, %v13338_v61  ;;  %v2737_v15 = vunpack.c.l.b16 %v2690_v11  ;;  %v4247_v8 = vmax.f32 %v4215_v7, 0.0  ;;  %v3549_v45 = vsel %vm12782_vm9, %v3544_v1, %v13982_v21 }
 0x270   : >> { %v4250_v62 = vmax.f32 %v4218_v59, 0.0  ;;  %v3534_v46 = vrot.slane %v3533_v24, 4  ;;  %v10237_v59 = vld [vmem:[%s12756_s25 + $0xa0] sm:$0xe]  ;;  %v4180_v61 = vadd.f32 %v13874_v48, %v3806_v3  ;;  %v3967_v48 = vrot.slane %v13957_v32, 5 }
 0x271   : >> { %v3736_v12 = vpop.f32.mrf.mxu3  ;;  %v10245_v24 = vrot.slane %v10237_v59, 9  ;;  %v3556_v54 = vshll.u32 %v13993_v41, 16  ;;  %v3560_v7 = vshrl.u32 %v13993_v41, 16  ;;  %v3641_v11 = vunpack.c.l.b16 %v3549_v45  ;;  %v12342_v59 = vld [vmem:[%s12756_s25 + $0x9c] sm:$0x1] }
 0x272   : >> { %v4278_v22 = vmax.f32 %v4246_v35, %v4250_v62  ;;  %v3809_v43 = vadd.f32 %v3736_v12, %v3195_v14  ;;  %10169 = vmatmul.msk.bf16.gmra.mxu2 %vm936_vm8, %v11900_v28  ;;  %v4033_v28 = vpack.c.b16 %v4013_v51, %v4012_v0  ;;  %v3539_v57 = vsel %vm12782_vm9, %v3534_v46, %v13952_v26  ;;  %v12341_v0 = vld [vmem:[%s12756_s25 + $0x98] sm:$0xf]  ;;  %v12344_v32 = vld [vmem:[%s12756_s25 + $0xa8] sm:$0xf] }
 0x273   : >> { %v2837_v23 = vpop.f32.mrf.mxu1  ;;  %v2756_v62 = vpack.c.b16 %v2737_v15, %v2736_v58  ;;  %v2692_v51 = vrot.slane %v12341_v0, 5  ;;  %v3640_v27 = vunpack.c.l.b16 %v3539_v57  ;;  %v3965_v1 = vsel %vm12993_vm12, %v10245_v24, %v3964_v38  ;;  %v11901_v38 = vld [vmem:[%s12756_s25 + $0xa0] sm:$0xff] }
 0x274   : >> { %4294 = vst.msk [vmem:[#allocation4] sm:$0xff] %vm402_vm0, %v4278_v22  ;;  %v4183_v42 = vadd.f32 %v4110_v10, %v3809_v43  ;;  %v4216_v22 = vadd.f32 %v13932_v4, %v4180_v61  ;;  %v3807_v43 = vadd.f32 %v13912_v52, %v3193_v44  ;;  %v2907_v46 = vadd.f32 %v2837_v23, %v13351_v16 }
 0x275   : >> { %v3125_v53 = vpop.f32.mrf.mxu2  ;;  %v3968_v52 = vsel %vm12993_vm12, %v3966_v56, %v3967_v48  ;;  %v3562_v58 = vrot.slane %v3560_v7, 4  ;;  %v2694_v15 = vrot.slane %v2692_v51, 4  ;;  %v3660_v9 = vpack.c.b16 %v3641_v11, %v3640_v27 }
 0x276   : >> { %v4219_v14 = vadd.f32 %v13932_v4, %v4183_v42  ;;  %10226 = vmatmul.msk.bf16.gmra.mxu3 %vm936_vm8, %v3659_v29  ;;  %v3196_v13 = vadd.f32 %v3125_v53, %v2906_v18  ;;  %v3552_v42 = vrot.slane %v3550_v30, 4  ;;  %v14024_v53 = vrot.slane %v3556_v54, 5 }
 0x277   : >> { %v4113_v25 = vpop.f32.mrf.mxu0  ;;  %v4181_v61 = vadd.f32 %v13904_v19, %v3807_v43  ;;  %v4014_v57 = vunpack.c.l.b16 %v3965_v1  ;;  %v4015_v45 = vunpack.c.l.b16 %v3968_v52  ;;  %v2693_v19 = vsel %vm12993_vm12, %v2691_v36, %v2692_v51  ;;  %v14048_v43 = vld [vmem:[%s12756_s25 + $0xb8] sm:$0xf] }
 0x278   : >> { %v4251_v10 = vmax.f32 %v4219_v14, 0.0  ;;  %v14030_v14 = vld [vmem:[%s12756_s25 + $0xb0] sm:$0x1]  ;;  %v3553_v20 = vor.u32 %v3552_v42, %v13982_v21  ;;  %v2738_v11 = vunpack.c.l.b16 %v2693_v19 }
 0x279   : >> { %v3739_v35 = vpop.f32.mrf.mxu3  ;;  %v3566_v24 = vshll.u32 %v14030_v14, 16  ;;  %v4217_v7 = vadd.f32 %v13932_v4, %v4181_v61  ;;  %v4034_v42 = vpack.c.b16 %v4015_v45, %v4014_v57  ;;  %v3973_v57 = vrot.slane %v14030_v14, 5 }
 0x27a   : >> { %v4279_v12 = vmax.f32 %v4247_v8, %v4251_v10  ;;  %10259 = vmatmul.msk.bf16.gmra.mxu0 %vm936_vm8, %v4033_v28  ;;  %v3810_v26 = vadd.f32 %v3739_v35, %v3196_v13  ;;  %v2695_v8 = vrot.slane %v12342_v59, 5  ;;  %v4248_v28 = vmax.f32 %v4216_v22, 0.0  ;;  %v10209_v22 = vld [vmem:[%s12756_s25 + $0xb4] sm:$0xf] }
 0x27b   : >> { %v14008_v29 = vpop.f32.mrf.mxu1  ;;  %v3563_v10 = vor.u32 %v3562_v58, %v14024_v53  ;;  %v3554_v0 = vrot.slane %v3553_v20, 4  ;;  %v3571_v36 = vshrl.u32 %v10209_v22, 16  ;;  %v3574_v58 = vshll.u32 %v10209_v22, 16 }
 0x27c   : >> { %4295 = vst.msk [vmem:[#allocation4 + $0x8] sm:$0xff] %vm402_vm0, %v4279_v12  ;;  %v4184_v3 = vadd.f32 %v4113_v25, %v3810_v26  ;;  %v2696_v21 = vsel %vm12993_vm12, %v2694_v15, %v2695_v8  ;;  %v3969_v20 = vrot.slane %v3967_v48, 4  ;;  %v14086_v48 = vld [vmem:[%s12756_s25 + $0xbc] sm:$0xf] }
 0x27d   : >> { %v3127_v18 = vpop.f32.mrf.mxu2  ;;  %v2739_v51 = vunpack.c.l.b16 %v2696_v21  ;;  %v3573_v45 = vrot.slane %v3571_v36, 4 }
 0x27e   : >> { %10055 = vmatmul.msk.bf16.gmra.mxu1 %vm936_vm8, %v2756_v62  ;;  %v4220_v16 = vadd.f32 %v13932_v4, %v4184_v3  ;;  %v3197_v23 = vadd.f32 %v3127_v18, %v2907_v46  ;;  %v3564_v3 = vrot.slane %v3563_v10, 4  ;;  %v3568_v46 = vrot.slane %v3566_v24, 5 }
 0x27f   : >> { %v4115_v13 = vpop.f32.mrf.mxu0  ;;  %v3970_v18 = vrot.slane %v13993_v41, 5  ;;  %v2757_v8 = vpack.c.b16 %v2739_v51, %v2738_v11  ;;  %v3576_v10 = vrot.slane %v3574_v58, 5  ;;  %v3590_v51 = vshll.u32 %v14086_v48, 16 }
 0x280   : >> { %v4252_v44 = vmax.f32 %v4220_v16, 0.0  ;;  %v3580_v16 = vshll.u32 %v14048_v43, 16  ;;  %v3569_v41 = vsel %vm12782_vm9, %v3564_v3, %v3568_v46 }
 0x281   : >> { %v3741_v25 = vpop.f32.mrf.mxu3  ;;  %v3643_v14 = vunpack.c.l.b16 %v3569_v41  ;;  %v3577_v22 = vor.u32 %v3576_v10, %v3573_v45 }
 0x282   : >> { %v4280_v56 = vmax.f32 %v4248_v28, %v4252_v44  ;;  %v3811_v30 = vadd.f32 %v3741_v25, %v3197_v23  ;;  %10170 = vmatmul.msk.bf16.gmra.mxu2 %vm936_vm8, %v11901_v38  ;;  %v3584_v23 = vshrl.u32 %v14048_v43, 16  ;;  %v4249_v38 = vmax.f32 %v4217_v7, 0.0 }
 0x283   : >> { %v14038_v35 = vpop.f32.mrf.mxu1  ;;  %v4310_v62 = vld [vmem:[#allocation4] ss:$2 sm:$0xff]  ;;  %v4326_v54 = vld [vmem:[#allocation4 + $0x1] ss:$2 sm:$0xff]  ;;  %v3559_v28 = vsel %vm12782_vm9, %v3554_v0, %v14024_v53  ;;  %v3972_v25 = vrot.slane %v3970_v18, 4  ;;  %v3582_v24 = vrot.slane %v3580_v16, 5 }
 0x284   : >> { %v4341_v12 = vmax.f32 %v4310_v62, %v4326_v54  ;;  %4296 = vst.msk [vmem:[#allocation4 + $0x10] sm:$0xff] %vm402_vm0, %v4280_v56  ;;  %v4185_v26 = vadd.f32 %v4115_v13, %v3811_v30  ;;  %v12343_v13 = vld [vmem:[%s12756_s25 + $0xa4] sm:$0xf]  ;;  %v10033_v53 = vld [vmem:[%s12756_s25 + $0xa0] sm:$0xe]  ;;  %v3586_v56 = vrot.slane %v3584_v23, 4  ;;  %v3642_v7 = vunpack.c.l.b16 %v3559_v28 }
 0x285   : >> { %v14050_v27 = vpop.f32.mrf.mxu2  ;;  %v2699_v61 = vrot.slane %v12343_v13, 5  ;;  %v10041_v19 = vrot.slane %v10033_v53, 9  ;;  %v2702_v62 = vrot.slane %v12344_v32, 5  ;;  %v11902_v54 = vld [vmem:[%s12756_s25 + $0xa8] sm:$0xff]  ;;  %v3974_v0 = vsel %vm12993_vm12, %v3972_v25, %v3973_v57  ;;  %v14113_v57 = vld [vmem:[%s12756_s25 + $0xc0] sm:$0xf] }
 0x286   : >> { %10266 = vst.msk [vmem:[%s14054_s24 + $0x19] sm:$0xff] %vm402_vm0, %v4341_v12  ;;  %v4221_v1 = vadd.f32 %v13932_v4, %v4185_v26  ;;  %10227 = vmatmul.msk.bf16.gmra.mxu3 %vm936_vm8, %v3660_v9  ;;  %v3971_v26 = vsel %vm12993_vm12, %v3969_v20, %v3970_v18  ;;  %v3587_v11 = vor.u32 %v3586_v56, %v3582_v24  ;;  %v4017_v36 = vunpack.c.l.b16 %v3974_v0 }
 0x287   : >> { %v14061_v52 = vpop.f32.mrf.mxu0  ;;  %v2701_v21 = vrot.slane %v2699_v61, 4  ;;  %v2700_v46 = vsel %vm12993_vm12, %v10041_v19, %v2699_v61  ;;  %v4016_v18 = vunpack.c.l.b16 %v3971_v26  ;;  %v3592_v13 = vrot.slane %v3590_v51, 5  ;;  %v12345_v26 = vld [vmem:[%s12756_s25 + $0xac] sm:$0xf] }
 0x288   : >> { %v4253_v15 = vmax.f32 %v4221_v1, 0.0  ;;  %v2740_v28 = vunpack.c.l.b16 %v2700_v46  ;;  %v3977_v20 = vrot.slane %v14048_v43, 5  ;;  %v3980_v32 = vrot.slane %v14086_v48, 5 }
 0x289   : >> { %v14065_v59 = vpop.f32.mrf.mxu3  ;;  %v2703_v1 = vsel %vm12993_vm12, %v2701_v21, %v2702_v62  ;;  %v4035_v25 = vpack.c.b16 %v4017_v36, %v4016_v18  ;;  %v3604_v0 = vshrl.u32 %v14113_v57, 16  ;;  %v11903_v36 = vld [vmem:[%s12756_s25 + $0xb4] sm:$0xff] }
 0x28a   : >> { %v4281_v44 = vmax.f32 %v4249_v38, %v4253_v15  ;;  %10260 = vmatmul.msk.bf16.gmra.mxu0 %vm936_vm8, %v4034_v42  ;;  %v3661_v42 = vpack.c.b16 %v3643_v14, %v3642_v7  ;;  %v3578_v38 = vrot.slane %v3577_v22, 4  ;;  %v3588_v15 = vrot.slane %v3587_v11, 4 }
 0x28b   : >> { %v14074_v9 = vpop.f32.mrf.mxu1  ;;  %v2741_v41 = vunpack.c.l.b16 %v2703_v1  ;;  %v3979_v43 = vrot.slane %v3977_v20, 4  ;;  %v3600_v7 = vshll.u32 %v14113_v57, 16  ;;  %v2908_v22 = vadd.f32 %v14008_v29, %v13363_v63 }
 0x28c   : >> { %4297 = vst.msk [vmem:[#allocation4 + $0x18] sm:$0xff] %vm402_vm0, %v4281_v44  ;;  %v10238_v44 = vld [vmem:[%s12756_s25 + $0xb4] sm:$0xe]  ;;  %v3583_v10 = vsel %vm12782_vm9, %v3578_v38, %v3582_v24  ;;  %v3593_v56 = vsel %vm12782_vm9, %v3588_v15, %v3592_v13  ;;  %v2705_v24 = vrot.slane %v12345_v26, 5  ;;  %v12346_v38 = vld [vmem:[%s12756_s25 + $0xb0] sm:$0x1] }
 0x28d   : >> { %v14081_v30 = vpop.f32.mrf.mxu2  ;;  %v2758_v45 = vpack.c.b16 %v2741_v41, %v2740_v28  ;;  %v10246_v19 = vrot.slane %v10238_v44, 9  ;;  %v3644_v11 = vunpack.c.l.b16 %v3583_v10  ;;  %v3645_v51 = vunpack.c.l.b16 %v3593_v56 }
 0x28e   : >> { %10056 = vmatmul.msk.bf16.gmra.mxu1 %vm936_vm8, %v2757_v8  ;;  %v3981_v1 = vsel %vm12993_vm12, %v3979_v43, %v3980_v32  ;;  %v3602_v18 = vrot.slane %v3600_v7, 5  ;;  %v2708_v63 = vrot.slane %v12346_v38, 5  ;;  %v3606_v29 = vrot.slane %v3604_v0, 4 }
 0x28f   : >> { %v14089_v12 = vpop.f32.mrf.mxu0  ;;  %v3198_v28 = vadd.f32 %v14050_v27, %v2908_v22  ;;  %v3662_v44 = vpack.c.b16 %v3645_v51, %v3644_v11  ;;  %v2909_v7 = vadd.f32 %v14038_v35, %v13377_v55  ;;  %v3982_v38 = vrot.slane %v3980_v32, 4 }
 0x291   : >> { %v14096_v3 = vpop.f32.mrf.mxu3 }
 0x292   : >> { %10171 = vmatmul.msk.bf16.gmra.mxu2 %vm936_vm8, %v11902_v54  ;;  %v3594_v54 = vshrl.u32 %v14086_v48, 16  ;;  %v3978_v48 = vsel %vm12993_vm12, %v10246_v19, %v3977_v20  ;;  %v3607_v19 = vor.u32 %v3606_v29, %v3602_v18 }
 0x293   : >> { %v14103_v58 = vpop.f32.mrf.mxu1  ;;  %v4312_v16 = vld [vmem:[#allocation4 + $0x10] ss:$2 sm:$0xff]  ;;  %v4328_v23 = vld [vmem:[#allocation4 + $0x11] ss:$2 sm:$0xff]  ;;  %v4018_v20 = vunpack.c.l.b16 %v3978_v48 }
 0x294   : >> { %v4342_v8 = vmax.f32 %v4312_v16, %v4328_v23  ;;  %v2704_v16 = vrot.slane %v2702_v62, 4  ;;  %v2707_v23 = vrot.slane %v2705_v24, 4  ;;  %v3608_v51 = vrot.slane %v3607_v19, 4 }
 0x295   : >> { %v14105_v61 = vpop.f32.mrf.mxu2 }
 0x296   : >> { %10267 = vst.msk [vmem:[%s14054_s24 + $0x21] sm:$0xff] %vm402_vm0, %v4342_v8  ;;  %10228 = vmatmul.msk.bf16.gmra.mxu3 %vm936_vm8, %v3661_v42  ;;  %v3596_v42 = vrot.slane %v3594_v54, 4  ;;  %v10213_v8 = vld [vmem:[%s12756_s25 + $0xc4] sm:$0x1]  ;;  %v2706_v62 = vsel %vm12993_vm12, %v2704_v16, %v2705_v24  ;;  %v2709_v56 = vsel %vm12993_vm12, %v2707_v23, %v2708_v63  ;;  %v3812_v54 = vadd.f32 %v14065_v59, %v3198_v28 }
 0x297   : >> { %v14115_v53 = vpop.f32.mrf.mxu0  ;;  %v3610_v43 = vshll.u32 %v10213_v8, 16  ;;  %v2742_v0 = vunpack.c.l.b16 %v2706_v62  ;;  %v2743_v22 = vunpack.c.l.b16 %v2709_v56  ;;  %v11904_v62 = vld [vmem:[%s12756_s25 + $0xbc] sm:$0xff]  ;;  %s9634_s25 = sshll.u32 (%p482_p0), %s12727_s13, 4  ;;  %s9635_s25 = int_to_ptr.vmem [resolvable:$true] %s9634_s25 }
 0x298   : >> { %v4186_v59 = vadd.f32 %v14061_v52, %v3812_v54 }
 0x299   : >> { %v14121_v21 = vpop.f32.mrf.mxu3  ;;  %v3612_v48 = vrot.slane %v3610_v43, 5 }
 0x29a   : >> { %10261 = vmatmul.msk.bf16.gmra.mxu0 %vm936_vm8, %v4035_v25  ;;  %v4019_v25 = vunpack.c.l.b16 %v3981_v1  ;;  %v4222_v52 = vadd.f32 %v13932_v4, %v4186_v59 }
 0x29b   : >> { %v2850_v14 = vpop.f32.mrf.mxu1  ;;  %v3613_v23 = vsel %vm12782_vm9, %v3608_v51, %v3612_v48 }
 0x29c   : >> { %v2912_v27 = vadd.f32 %v2850_v14, %v13438_v50  ;;  %v4036_v26 = vpack.c.b16 %v4019_v25, %v4018_v20  ;;  %v3199_v50 = vadd.f32 %v14081_v30, %v2909_v7  ;;  %v3647_v25 = vunpack.c.l.b16 %v3613_v23 }
 0x29d   : >> { %v14131_v46 = vpop.f32.mrf.mxu2 }
 0x29e   : >> { %10057 = vmatmul.msk.bf16.gmra.mxu1 %vm936_vm8, %v2758_v45  ;;  %v3597_v45 = vor.u32 %v3596_v42, %v3592_v13  ;;  %v3983_v42 = vrot.slane %v14113_v57, 5  ;;  %v3986_v57 = vrot.slane %v10213_v8, 5  ;;  %v3813_v30 = vadd.f32 %v14096_v3, %v3199_v50 }
 0x29f   : >> { %v14140_v15 = vpop.f32.mrf.mxu0 }
 0x2a0   : >> { %v3598_v24 = vrot.slane %v3597_v45, 4  ;;  %v3985_v63 = vrot.slane %v3983_v42, 4  ;;  %v3984_v56 = vsel %vm12993_vm12, %v3982_v38, %v3983_v42 }
 0x2a1   : >> { %v14144_v41 = vpop.f32.mrf.mxu3 }
 0x2a2   : >> { %10172 = vmatmul.msk.bf16.gmra.mxu2 %vm936_vm8, %v11903_v36  ;;  %v2759_v36 = vpack.c.b16 %v2743_v22, %v2742_v0  ;;  %v3603_v16 = vsel %vm12782_vm9, %v3598_v24, %v3602_v18  ;;  %v15742_v18 = vld [vmem:[#allocation13_spill] sm:$0xff]  ;;  %v3987_v3 = vsel %vm12993_vm12, %v3985_v63, %v3986_v57  ;;  %v2911_v24 = vadd.f32 %v14103_v58, %v13426_v47 }
 0x2a3   : >> { %v2852_v10 = vpop.f32.mrf.mxu1  ;;  %v3646_v20 = vunpack.c.l.b16 %v3603_v16  ;;  %v2910_v40 = vadd.f32 %v14074_v9, %v15742_v18 }
 0x2a4   : >> { %v2913_v28 = vadd.f32 %v2852_v10, %v13466_v6  ;;  %v4254_v6 = vmax.f32 %v4222_v52, 0.0  ;;  %v4187_v10 = vadd.f32 %v14089_v12, %v3813_v30 }
 0x2a5   : >> { %v3140_v13 = vpop.f32.mrf.mxu2  ;;  %v3200_v19 = vadd.f32 %v14105_v61, %v2910_v40 }
 0x2a6   : >> { %10229 = vmatmul.msk.bf16.gmra.mxu3 %vm936_vm8, %v3662_v44  ;;  %v3202_v11 = vadd.f32 %v3140_v13, %v2912_v27  ;;  %v3663_v27 = vpack.c.b16 %v3647_v25, %v3646_v20  ;;  %v4021_v13 = vunpack.c.l.b16 %v3987_v3  ;;  %v4223_v22 = vadd.f32 %v13932_v4, %v4187_v10 }
 0x2a7   : >> { %v4128_v1 = vpop.f32.mrf.mxu0  ;;  %v3814_v34 = vadd.f32 %v14121_v21, %v3200_v19  ;;  %v3201_v21 = vadd.f32 %v14131_v46, %v2911_v24 }
 0x2a8   : >> { %v4255_v59 = vmax.f32 %v4223_v22, 0.0 }
 0x2a9   : >> { %v3754_v14 = vpop.f32.mrf.mxu3  ;;  %v4188_v50 = vadd.f32 %v14115_v53, %v3814_v34  ;;  %v3815_v58 = vadd.f32 %v14144_v41, %v3201_v21 }
 0x2aa   : >> { %10262 = vmatmul.msk.bf16.gmra.mxu0 %vm936_vm8, %v4036_v26  ;;  %v3816_v55 = vadd.f32 %v3754_v14, %v3202_v11  ;;  %v4020_v26 = vunpack.c.l.b16 %v3984_v56 }
 0x2ab   : >> { %v2855_v35 = vpop.f32.mrf.mxu1  ;;  %v4224_v47 = vadd.f32 %v13932_v4, %v4188_v50  ;;  %v4189_v52 = vadd.f32 %v14140_v15, %v3815_v58 }
 0x2ac   : >> { %v4190_v29 = vadd.f32 %v4128_v1, %v3816_v55  ;;  %v2914_v12 = vadd.f32 %v2855_v35, %v13481_v33  ;;  %v4037_v48 = vpack.c.b16 %v4021_v13, %v4020_v26 }
 0x2ad   : >> { %v3142_v44 = vpop.f32.mrf.mxu2  ;;  %v4256_v57 = vmax.f32 %v4224_v47, 0.0  ;;  %v4225_v18 = vadd.f32 %v13932_v4, %v4189_v52 }
 0x2ae   : >> { %10058 = vmatmul.msk.bf16.gmra.mxu1 %vm936_vm8, %v2759_v36  ;;  %v4226_v45 = vadd.f32 %v13932_v4, %v4190_v29  ;;  %v3203_v32 = vadd.f32 %v3142_v44, %v2913_v28 }
 0x2af   : >> { %v4130_v8 = vpop.f32.mrf.mxu0 }
 0x2b0   : >> { %v4258_v43 = vmax.f32 %v4226_v45, 0.0 }
 0x2b1   : >> { %v3756_v54 = vpop.f32.mrf.mxu3 }
 0x2b2   : >> { %v4282_v9 = vmax.f32 %v4254_v6, %v4258_v43  ;;  %v3817_v7 = vadd.f32 %v3756_v54, %v3203_v32  ;;  %10173 = vmatmul.msk.bf16.gmra.mxu2 %vm936_vm8, %v11904_v62  ;;  %v4257_v62 = vmax.f32 %v4225_v18, 0.0 }
 0x2b3   : >> { %v2857_v0 = vpop.f32.mrf.mxu1 }
 0x2b4   : >> { %4298 = vst.msk [vmem:[#allocation4 + $0x20] sm:$0xff] %vm402_vm0, %v4282_v9  ;;  %v4191_v11 = vadd.f32 %v4130_v8, %v3817_v7  ;;  %v2915_v23 = vadd.f32 %v2857_v0, %v13498_v60 }
 0x2b5   : >> { %v3145_v61 = vpop.f32.mrf.mxu2 }
 0x2b6   : >> { %v4227_v51 = vadd.f32 %v13932_v4, %v4191_v11  ;;  %10230 = vmatmul.msk.bf16.gmra.mxu3 %vm936_vm8, %v3663_v27  ;;  %v3204_v1 = vadd.f32 %v3145_v61, %v2914_v12 }
 0x2b7   : >> { %v4133_v42 = vpop.f32.mrf.mxu0 }
 0x2b8   : >> { %v4259_v14 = vmax.f32 %v4227_v51, 0.0 }
 0x2b9   : >> { %v3759_v36 = vpop.f32.mrf.mxu3 }
 0x2ba   : >> { %v4283_v55 = vmax.f32 %v4255_v59, %v4259_v14  ;;  %10263 = vmatmul.msk.bf16.gmra.mxu0 %vm936_vm8, %v4037_v48  ;;  %v3818_v33 = vadd.f32 %v3759_v36, %v3204_v1 }
 0x2bb   : >> { %v2860_v35 = vpop.f32.mrf.mxu1 }
 0x2bc   : >> { %4299 = vst.msk [vmem:[#allocation4 + $0x28] sm:$0xff] %vm402_vm0, %v4283_v55  ;;  %v4192_v16 = vadd.f32 %v4133_v42, %v3818_v33  ;;  %v2916_v11 = vadd.f32 %v2860_v35, %v13511_v37 }
 0x2bd   : >> { %v3147_v38 = vpop.f32.mrf.mxu2 }
 0x2be   : >> { %v4228_v53 = vadd.f32 %v13932_v4, %v4192_v16  ;;  %v3205_v46 = vadd.f32 %v3147_v38, %v2915_v23 }
 0x2bf   : >> { %v4135_v63 = vpop.f32.mrf.mxu0 }
 0x2c0   : >> { %v4260_v30 = vmax.f32 %v4228_v53, 0.0 }
 0x2c1   : >> { %v3761_v29 = vpop.f32.mrf.mxu3 }
 0x2c2   : >> { %v4284_v28 = vmax.f32 %v4256_v57, %v4260_v30  ;;  %v3819_v44 = vadd.f32 %v3761_v29, %v3205_v46 }
 0x2c3   : >> { %v2862_v20 = vpop.f32.mrf.mxu1  ;;  %v4314_v41 = vld [vmem:[#allocation4 + $0x20] ss:$2 sm:$0xff]  ;;  %v4330_v25 = vld [vmem:[#allocation4 + $0x21] ss:$2 sm:$0xff] }
 0x2c4   : >> { %v4343_v40 = vmax.f32 %v4314_v41, %v4330_v25  ;;  %4300 = vst.msk [vmem:[#allocation4 + $0x30] sm:$0xff] %vm402_vm0, %v4284_v28  ;;  %v4193_v60 = vadd.f32 %v4135_v63, %v3819_v44  ;;  %v2917_v59 = vadd.f32 %v2862_v20, %v13539_v39 }
 0x2c5   : >> { %v3150_v45 = vpop.f32.mrf.mxu2 }
 0x2c6   : >> { %10268 = vst.msk [vmem:[%s14054_s24 + $0x31] sm:$0xff] %vm402_vm0, %v4343_v40  ;;  %v4229_v32 = vadd.f32 %v13932_v4, %v4193_v60  ;;  %v3206_v61 = vadd.f32 %v3150_v45, %v2916_v11 }
 0x2c7   : >> { %v4138_v15 = vpop.f32.mrf.mxu0 }
 0x2c8   : >> { %v4261_v8 = vmax.f32 %v4229_v32, 0.0 }
 0x2c9   : >> { %v3764_v56 = vpop.f32.mrf.mxu3 }
 0x2ca   : >> { %v4285_v3 = vmax.f32 %v4257_v62, %v4261_v8  ;;  %v3820_v48 = vadd.f32 %v3764_v56, %v3206_v61 }
 0x2cb   : >> { %v2865_v6 = vpop.f32.mrf.mxu1 }
 0x2cc   : >> { %4301 = vst.msk [vmem:[#allocation4 + $0x38] sm:$0xff] %vm402_vm0, %v4285_v3  ;;  %v4194_v14 = vadd.f32 %v4138_v15, %v3820_v48  ;;  %v2918_v38 = vadd.f32 %v2865_v6, %v13554_v31 }
 0x2cd   : >> { %v3152_v10 = vpop.f32.mrf.mxu2 }
 0x2ce   : >> { %v3207_v36 = vadd.f32 %v3152_v10, %v2917_v59  ;;  %v4230_v58 = vadd.f32 %v13932_v4, %v4194_v14 }
 0x2cf   : >> { %v4140_v19 = vpop.f32.mrf.mxu0 }
 0x2d0   : >> { %v4262_v46 = vmax.f32 %v4230_v58, 0.0 }
 0x2d1   : >> { %v3766_v43 = vpop.f32.mrf.mxu3 }
 0x2d2   : >> { %v3821_v37 = vadd.f32 %v3766_v43, %v3207_v36 }
 0x2d3   : >> { %v2867_v54 = vpop.f32.mrf.mxu1  ;;  %v4316_v27 = vld [vmem:[#allocation4 + $0x30] ss:$2 sm:$0xff]  ;;  %v4332_v9 = vld [vmem:[#allocation4 + $0x31] ss:$2 sm:$0xff] }
 0x2d4   : >> { %v4344_v7 = vmax.f32 %v4316_v27, %v4332_v9  ;;  %v4195_v63 = vadd.f32 %v4140_v19, %v3821_v37  ;;  %v2919_v18 = vadd.f32 %v2867_v54, %v13578_v5  ;;  %v15743_v27 = vld [vmem:[#allocation14_spill] sm:$0xff] }
 0x2d5   : >> { %v3155_v26 = vpop.f32.mrf.mxu2 }
 0x2d6   : >> { %10269 = vst.msk [vmem:[%s14054_s24 + $0x39] sm:$0xff] %vm402_vm0, %v4344_v7  ;;  %v3208_v57 = vadd.f32 %v3155_v26, %v2918_v38  ;;  %v4231_v20 = vadd.f32 %v13932_v4, %v4195_v63 }
 0x2d7   : >> { %v4143_v13 = vpop.f32.mrf.mxu0 }
 0x2d8   : >> { %v4263_v32 = vmax.f32 %v4231_v20, 0.0 }
 0x2d9   : >> { %v3769_v0 = vpop.f32.mrf.mxu3 }
 0x2da   : >> { %v3822_v41 = vadd.f32 %v3769_v0, %v3208_v57 }
 0x2db   : >> { %v2870_v22 = vpop.f32.mrf.mxu1 }
 0x2dc   : >> { %v2920_v1 = vadd.f32 %v2870_v22, %v13592_v17  ;;  %v4196_v15 = vadd.f32 %v4143_v13, %v3822_v41  ;;  %v15745_v41 = vld [vmem:[#allocation19_spill] sm:$0xff] }
 0x2dd   : >> { %v3157_v34 = vpop.f32.mrf.mxu2 }
 0x2de   : >> { %v3209_v62 = vadd.f32 %v3157_v34, %v2919_v18  ;;  %v4232_v19 = vadd.f32 %v13932_v4, %v4196_v15  ;;  %v15746_v18 = vld [vmem:[#allocation16_spill] sm:$0xff] }
 0x2df   : >> { %v4145_v12 = vpop.f32.mrf.mxu0 }
 0x2e0   : >> { %v4264_v13 = vmax.f32 %v4232_v19, 0.0 }
 0x2e1   : >> { %v3771_v24 = vpop.f32.mrf.mxu3 }
 0x2e2   : >> { %v3823_v43 = vadd.f32 %v3771_v24, %v3209_v62 }
 0x2e3   : >> { %v2872_v51 = vpop.f32.mrf.mxu1 }
 0x2e4   : >> { %v2921_v16 = vadd.f32 %v2872_v51, %v13619_v2  ;;  %v4197_v0 = vadd.f32 %v4145_v12, %v3823_v43 }
 0x2e5   : >> { %v3160_v42 = vpop.f32.mrf.mxu2 }
 0x2e6   : >> { %v3210_v50 = vadd.f32 %v3160_v42, %v2920_v1  ;;  %v4233_v1 = vadd.f32 %v13932_v4, %v4197_v0 }
 0x2e7   : >> { %v4148_v21 = vpop.f32.mrf.mxu0 }
 0x2e8   : >> { %v4265_v14 = vmax.f32 %v4233_v1, 0.0  ;;  %v15749_v1 = vld [vmem:[#allocation21_spill] sm:$0xff] }
 0x2e9   : >> { %v3774_v55 = vpop.f32.mrf.mxu3 }
 0x2ea   : >> { %v3824_v33 = vadd.f32 %v3774_v55, %v3210_v50 }
 0x2eb   : >> { %v2875_v47 = vpop.f32.mrf.mxu1 }
 0x2ec   : >> { %v4198_v35 = vadd.f32 %v4148_v21, %v3824_v33  ;;  %v2922_v31 = vadd.f32 %v2875_v47, %v13634_v49 }
 0x2ed   : >> { %v3162_v23 = vpop.f32.mrf.mxu2 }
 0x2ee   : >> { %v4234_v17 = vadd.f32 %v13932_v4, %v4198_v35  ;;  %v3211_v53 = vadd.f32 %v3162_v23, %v2921_v16 }
 0x2ef   : >> { %v4150_v39 = vpop.f32.mrf.mxu0 }
 0x2f0   : >> { %v4266_v52 = vmax.f32 %v4234_v17, 0.0 }
 0x2f1   : >> { %v3776_v30 = vpop.f32.mrf.mxu3 }
 0x2f2   : >> { %v4286_v29 = vmax.f32 %v4262_v46, %v4266_v52  ;;  %v3825_v28 = vadd.f32 %v3776_v30, %v3211_v53  ;;  %v15744_v52 = vld [vmem:[#allocation15_spill] sm:$0xff] }
 0x2f3   : >> { %v2877_v44 = vpop.f32.mrf.mxu1 }
 0x2f4   : >> { %4302 = vst.msk [vmem:[#allocation4 + $0x40] sm:$0xff] %vm402_vm0, %v4286_v29  ;;  %v4199_v2 = vadd.f32 %v4150_v39, %v3825_v28  ;;  %v2923_v5 = vadd.f32 %v2877_v44, %v15743_v27 }
 0x2f5   : >> { %v3165_v25 = vpop.f32.mrf.mxu2 }
 0x2f6   : >> { %v4235_v40 = vadd.f32 %v13932_v4, %v4199_v2  ;;  %v3212_v60 = vadd.f32 %v3165_v25, %v2922_v31 }
 0x2f7   : >> { %v4153_v45 = vpop.f32.mrf.mxu0 }
 0x2f8   : >> { %v4267_v8 = vmax.f32 %v4235_v40, 0.0 }
 0x2f9   : >> { %v3779_v56 = vpop.f32.mrf.mxu3 }
 0x2fa   : >> { %v4287_v3 = vmax.f32 %v4263_v32, %v4267_v8  ;;  %v3826_v6 = vadd.f32 %v3779_v56, %v3212_v60 }
 0x2fb   : >> { %v2880_v10 = vpop.f32.mrf.mxu1 }
 0x2fc   : >> { %4303 = vst.msk [vmem:[#allocation4 + $0x48] sm:$0xff] %vm402_vm0, %v4287_v3  ;;  %v4200_v49 = vadd.f32 %v4153_v45, %v3826_v6  ;;  %v2924_v30 = vadd.f32 %v2880_v10, %v15744_v52  ;;  %v15747_v10 = vld [vmem:[#allocation20_spill] sm:$0xff] }
 0x2fd   : >> { %v3167_v54 = vpop.f32.mrf.mxu2 }
 0x2fe   : >> { %v4236_v9 = vadd.f32 %v13932_v4, %v4200_v49  ;;  %v3213_v7 = vadd.f32 %v3167_v54, %v2923_v5  ;;  %v15748_v49 = vld [vmem:[#allocation17_spill] sm:$0xff] }
 0x2ff   : >> { %v4155_v26 = vpop.f32.mrf.mxu0 }
 0x300   : >> { %v4268_v22 = vmax.f32 %v4236_v9, 0.0 }
 0x301   : >> { %v3781_v34 = vpop.f32.mrf.mxu3 }
 0x302   : >> { %v4288_v11 = vmax.f32 %v4264_v13, %v4268_v22  ;;  %v3827_v61 = vadd.f32 %v3781_v34, %v3213_v7 }
 0x303   : >> { %v2882_v51 = vpop.f32.mrf.mxu1  ;;  %v4318_v48 = vld [vmem:[#allocation4 + $0x40] ss:$2 sm:$0xff]  ;;  %v4334_v24 = vld [vmem:[#allocation4 + $0x41] ss:$2 sm:$0xff] }
 0x304   : >> { %v4345_v42 = vmax.f32 %v4318_v48, %v4334_v24  ;;  %4304 = vst.msk [vmem:[#allocation4 + $0x50] sm:$0xff] %vm402_vm0, %v4288_v11  ;;  %v4201_v59 = vadd.f32 %v4155_v26, %v3827_v61  ;;  %v2925_v40 = vadd.f32 %v2882_v51, %v15746_v18 }
 0x305   : >> { %v3170_v50 = vpop.f32.mrf.mxu2 }
 0x306   : >> { %10270 = vst.msk [vmem:[%s14054_s24 + $0x49] sm:$0xff] %vm402_vm0, %v4345_v42  ;;  %v4237_v21 = vadd.f32 %v13932_v4, %v4201_v59  ;;  %v3214_v28 = vadd.f32 %v3170_v50, %v2924_v30  ;;  %v15750_v50 = vld [vmem:[#allocation18_spill] sm:$0xff] }
 0x307   : >> { %v4158_v12 = vpop.f32.mrf.mxu0 }
 0x308   : >> { %v4269_v36 = vmax.f32 %v4237_v21, 0.0 }
 0x309   : >> { %v3784_v55 = vpop.f32.mrf.mxu3 }
 0x30a   : >> { %v4289_v33 = vmax.f32 %v4265_v14, %v4269_v36  ;;  %v3828_v20 = vadd.f32 %v3784_v55, %v3214_v28 }
 0x30b   : >> { %v2885_v47 = vpop.f32.mrf.mxu1 }
 0x30c   : >> { %4305 = vst.msk [vmem:[#allocation4 + $0x58] sm:$0xff] %vm402_vm0, %v4289_v33  ;;  %v4202_v32 = vadd.f32 %v4158_v12, %v3828_v20  ;;  %v2926_v27 = vadd.f32 %v2885_v47, %v15748_v49  ;;  %v12347_v12 = vld [vmem:[%s15695_s2] ss:$0 sm:$0xff]  ;;  %v11907_v49 = vld [vmem:[%s15696_s3 + $0x10] sm:$0xff] (%p482_p0) }
 0x30d   : >> { %v3172_v58 = vpop.f32.mrf.mxu2 }
 0x30e   : >> { %v3215_v15 = vadd.f32 %v3172_v58, %v2925_v40  ;;  %v4238_v56 = vadd.f32 %v13932_v4, %v4202_v32 }
 0x30f   : >> { %v4160_v37 = vpop.f32.mrf.mxu0 }
 0x310   : >> { %v4270_v26 = vmax.f32 %v4238_v56, 0.0 }
 0x311   : >> { %v3786_v35 = vpop.f32.mrf.mxu3 }
 0x312   : >> { %v3829_v3 = vadd.f32 %v3786_v35, %v3215_v15 }
 0x313   : >> { %v2887_v16 = vpop.f32.mrf.mxu1  ;;  %v4320_v23 = vld [vmem:[#allocation4 + $0x50] ss:$2 sm:$0xff]  ;;  %v4336_v38 = vld [vmem:[#allocation4 + $0x51] ss:$2 sm:$0xff] }
 0x314   : >> { %v4346_v17 = vmax.f32 %v4320_v23, %v4336_v38  ;;  %v4203_v13 = vadd.f32 %v4160_v37, %v3829_v3  ;;  %v2927_v21 = vadd.f32 %v2887_v16, %v15750_v50 }
 0x315   : >> { %v3175_v53 = vpop.f32.mrf.mxu2 }
 0x316   : >> { %10271 = vst.msk [vmem:[%s14054_s24 + $0x51] sm:$0xff] %vm402_vm0, %v4346_v17  ;;  %v3216_v0 = vadd.f32 %v3175_v53, %v2926_v27  ;;  %v4239_v51 = vadd.f32 %v13932_v4, %v4203_v13  ;;  %v11905_v27 = vld [vmem:[%s15696_s3] sm:$0xff] (%p482_p0) }
 0x317   : >> { %v4163_v39 = vpop.f32.mrf.mxu0 }
 0x318   : >> { %v4271_v55 = vmax.f32 %v4239_v51, 0.0 }
 0x319   : >> { %v3789_v46 = vpop.f32.mrf.mxu3 }
 0x31a   : >> { %v3830_v48 = vadd.f32 %v3789_v46, %v3216_v0  ;;  %v15751_v46 = vld [vmem:[#allocation22_spill] sm:$0xff] }
 0x31b   : >> { %v2890_v63 = vpop.f32.mrf.mxu1 }
 0x31c   : >> { %v2928_v2 = vadd.f32 %v2890_v63, %v15745_v41  ;;  %v4204_v33 = vadd.f32 %v4163_v39, %v3830_v48 }
 0x31d   : >> { %v3177_v57 = vpop.f32.mrf.mxu2 }
 0x31e   : >> { %v3217_v47 = vadd.f32 %v3177_v57, %v2927_v21  ;;  %v4240_v17 = vadd.f32 %v12347_v12, %v4204_v33 }
 0x31f   : >> { %v4165_v29 = vpop.f32.mrf.mxu0 }
 0x320   : >> { %v4272_v20 = vmax.f32 %v4240_v17, 0.0 }
 0x321   : >> { %v3791_v44 = vpop.f32.mrf.mxu3 }
 0x322   : >> { %v3831_v53 = vadd.f32 %v3791_v44, %v3217_v47 }
 0x323   : >> { %v2892_v31 = vpop.f32.mrf.mxu1 }
 0x324   : >> { %v2929_v19 = vadd.f32 %v2892_v31, %v15747_v10  ;;  %v4205_v39 = vadd.f32 %v4165_v29, %v3831_v53  ;;  %v11906_v10 = vld [vmem:[%s15696_s3 + $0x8] sm:$0xff] (%p482_p0) }
 0x325   : >> { %v3180_v25 = vpop.f32.mrf.mxu2  ;;  %4681 = vmatpush.bf16.msra.mxu1 (%p482_p0), %v11906_v10  ;;  %v11914_v53 = vld [vmem:[%s15696_s3 + $0x48] sm:$0xff] (%p482_p0) }
 0x326   : >> { %v3218_v60 = vadd.f32 %v3180_v25, %v2928_v2  ;;  %v4241_v44 = vadd.f32 %v12347_v12, %v4205_v39 }
 0x327   : >> { %v4168_v45 = vpop.f32.mrf.mxu0 }
 0x328   : >> { %v4273_v15 = vmax.f32 %v4241_v44, 0.0 }
 0x329   : >> { %v3794_v62 = vpop.f32.mrf.mxu3  ;;  %4682 = vmatpush.bf16.msra.mxu1 (%p482_p0), %v11905_v27 }
 0x32a   : >> { %v3832_v8 = vadd.f32 %v3794_v62, %v3218_v60 }
 0x32b   : >> { %v2895_v9 = vpop.f32.mrf.mxu1 }
 0x32c   : >> { %v4206_v6 = vadd.f32 %v4168_v45, %v3832_v8  ;;  %v2930_v42 = vadd.f32 %v2895_v9, %v15749_v1 }
 0x32d   : >> { %v3182_v43 = vpop.f32.mrf.mxu2 }
 0x32e   : >> { %v4242_v5 = vadd.f32 %v13932_v4, %v4206_v6  ;;  %v3219_v54 = vadd.f32 %v3182_v43, %v2929_v19  ;;  %v11908_v6 = vld [vmem:[%s15696_s3 + $0x18] sm:$0xff] (%p482_p0)  ;;  %v11910_v19 = vld [vmem:[%s15696_s3 + $0x28] sm:$0xff] (%p482_p0) }
 0x32f   : >> { %v4170_v7 = vpop.f32.mrf.mxu0  ;;  %v11912_v43 = vld [vmem:[%s15696_s3 + $0x38] sm:$0xff] (%p482_p0)  ;;  %4532 = vmatpush.bf16.msra.mxu0 (%p482_p0), %v11908_v6  ;;  %4883 = vmatpush.bf16.msra.mxu2 (%p482_p0), %v11910_v19 }
 0x330   : >> { %v4274_v22 = vmax.f32 %v4242_v5, 0.0  ;;  %v11909_v5 = vld [vmem:[%s15696_s3 + $0x20] sm:$0xff] (%p482_p0)  ;;  %5118 = vmatpush.bf16.msra.mxu3 (%p482_p0), %v11912_v43 }
 0x331   : >> { %v3796_v34 = vpop.f32.mrf.mxu3 }
 0x332   : >> { %v4290_v11 = vmax.f32 %v4270_v26, %v4274_v22  ;;  %v3833_v61 = vadd.f32 %v3796_v34, %v3219_v54  ;;  %v11911_v54 = vld [vmem:[%s15696_s3 + $0x30] sm:$0xff] (%p482_p0) }
 0x333   : >> { %v2897_v4 = vpop.f32.mrf.mxu1  ;;  %4533 = vmatpush.bf16.msra.mxu0 (%p482_p0), %v11907_v49  ;;  %4884 = vmatpush.bf16.msra.mxu2 (%p482_p0), %v11909_v5 }
 0x334   : >> { %4306 = vst.msk [vmem:[#allocation4 + $0x60] sm:$0xff] %vm402_vm0, %v4290_v11  ;;  %v4207_v24 = vadd.f32 %v4170_v7, %v3833_v61  ;;  %v2931_v63 = vadd.f32 %v2897_v4, %v15751_v46  ;;  %5119 = vmatpush.bf16.msra.mxu3 (%p482_p0), %v11911_v54 }
 0x335   : >> { %v3185_v59 = vpop.f32.mrf.mxu2 }
 0x336   : >> { %v4243_v14 = vadd.f32 %v12347_v12, %v4207_v24  ;;  %v3220_v36 = vadd.f32 %v3185_v59, %v2930_v42 }
 0x337   : >> { %v4173_v37 = vpop.f32.mrf.mxu0  ;;  %5352 = vmatpush.bf16.msrb.mxu0 (%p482_p0), %v11914_v53 }
 0x338   : >> { %v4275_v58 = vmax.f32 %v4243_v14, 0.0 }
 0x339   : >> { %v3799_v35 = vpop.f32.mrf.mxu3 }
 0x33a   : >> { %v4291_v23 = vmax.f32 %v4271_v55, %v4275_v58  ;;  %v3834_v38 = vadd.f32 %v3799_v35, %v3220_v36 }
 0x33c   : >> { %4307 = vst.msk [vmem:[#allocation4 + $0x68] sm:$0xff] %vm402_vm0, %v4291_v23  ;;  %v4208_v16 = vadd.f32 %v4173_v37, %v3834_v38 }
 0x33d   : >> { %v3187_v52 = vpop.f32.mrf.mxu2 }
 0x33e   : >> { %v4244_v30 = vadd.f32 %v12347_v12, %v4208_v16  ;;  %v3221_v28 = vadd.f32 %v3187_v52, %v2931_v63 }
 0x33f   : >> { %v4175_v40 = vpop.f32.mrf.mxu0 }
 0x340   : >> { %v4276_v57 = vmax.f32 %v4244_v30, 0.0 }
 0x341   : >> { %v3801_v41 = vpop.f32.mrf.mxu3 }
 0x342   : >> { %v4292_v2 = vmax.f32 %v4272_v20, %v4276_v57  ;;  %v3835_v31 = vadd.f32 %v3801_v41, %v3221_v28 }
 0x343   : >> { %v4322_v25 = vld [vmem:[#allocation4 + $0x60] ss:$2 sm:$0xff]  ;;  %v4338_v18 = vld [vmem:[#allocation4 + $0x61] ss:$2 sm:$0xff] }
 0x344   : >> { %v4347_v60 = vmax.f32 %v4322_v25, %v4338_v18  ;;  %4308 = vst.msk [vmem:[#allocation4 + $0x70] sm:$0xff] %vm402_vm0, %v4292_v2  ;;  %v4209_v45 = vadd.f32 %v4175_v40, %v3835_v31 }
 0x346   : >> { %10272 = vst.msk [vmem:[%s14054_s24 + $0x61] sm:$0xff] %vm402_vm0, %v4347_v60  ;;  %v4245_v32 = vadd.f32 %v12347_v12, %v4209_v45 }
 0x348   : >> { %v4277_v62 = vmax.f32 %v4245_v32, 0.0 }
 0x34a   : >> { %v4293_v8 = vmax.f32 %v4273_v15, %v4277_v62 }
 0x34c   : >> { %4309 = vst.msk [vmem:[#allocation4 + $0x78] sm:$0xff] %vm402_vm0, %v4293_v8 }
 0x352   : > { %484 = sbr.rel (!%p482_p0) target bundleno = 101 (0x65), region = 191 }
 0x353   : >> { %v4324_v29 = vld [vmem:[#allocation4 + $0x70] ss:$2 sm:$0xff]  ;;  %v4340_v56 = vld [vmem:[#allocation4 + $0x71] ss:$2 sm:$0xff] }
 0x354   : >> { %v4348_v3 = vmax.f32 %v4324_v29, %v4340_v56 }
 0x356   : >> { %10273 = vst.msk [vmem:[%s14054_s24 + $0x69] sm:$0xff] %vm402_vm0, %v4348_v3  ;;  %s9636_s24 = sshll.u32 (%p482_p0), %s9632_s1, 4  ;;  %s9637_s24 = int_to_ptr.hbm [resolvable:$true] %s9636_s24 }
 0x357   : > { %s12394_s14 = sshra.s32 %s9637_s24, 4  ;;  %s12395_s14 = int_to_ptr.hbm [resolvable:$true] %s12394_s14 }
 0x358   : > { %s12396_s30 = scalar_lea.hbm %s12395_s14, 1  ;;  %p12401_p4 = scmp.lt.s32.totalorder %s12395_s14, %s15704_s11 }
 0x359   : > { %p12397_p1 = scmp.ne.s32.totalorder %s12395_s14, %s12396_s30  ;;  %p12402_p7 = scmp.lt.s32.totalorder %s12400_s16, %s12396_s30 }
 0x35b   : > { %p12398_p2 = pnand %p12397_p1, %p12559_p5  ;;  %p12403_p8 = por %p12402_p7, %p12401_p4 }
 0x35d   : > { %v4413_v9 = vld [vmem:[#allocation2 + $0x1] sm:$0xff]  ;;  %v4414_v7 = vld [vmem:[#allocation2 + $0x9] sm:$0xff]  ;;  %v4999_v34 = vld [vmem:[#allocation2 + $0x18] sm:$0xff]  ;;  %p12399_p3 = pneg %p12398_p2 }
 0x35e   : > { %v4361_v26 = vld [vmem:[#allocation2] sm:$0xff]  ;;  %v4362_v13 = vld [vmem:[#allocation2 + $0x8] sm:$0xff]  ;;  %v4445_v11 = vpack.c.bf16 %v4414_v7, %v4413_v9  ;;  %v5001_v21 = vld [vmem:[#allocation2 + $0x30] sm:$0xff] }
 0x35f   : > { %v4764_v0 = vld [vmem:[#allocation2 + $0x2] sm:$0xff]  ;;  %v4765_v22 = vld [vmem:[#allocation2 + $0xa] sm:$0xff]  ;;  %v4393_v61 = vpack.c.bf16 %v4362_v13, %v4361_v26  ;;  %v4415_v1 = vld [vmem:[#allocation2 + $0x19] sm:$0xff]  ;;  %p12404_p9 = pnand %p12403_p8, %p12399_p3 }
 0x360   : > { %v5000_v51 = vld [vmem:[#allocation2 + $0x20] sm:$0xff]  ;;  %v4796_v48 = vpack.c.bf16 %v4765_v22, %v4764_v0  ;;  %10286 = vmatmul.msk.bf16.vlgmr.msra.gmra.mxu0 %vm402_vm0, %v4445_v11  ;;  %v5002_v12 = vld [vmem:[#allocation2 + $0x38] sm:$0xff]  ;;  %v5003_v37 = vld [vmem:[#allocation2 + $0x48] sm:$0xff] }
 0x361   : > { %v5031_v24 = vpack.c.bf16 %v5000_v51, %v4999_v34  ;;  %10310 = vmatmul.msk.bf16.vlgmr.msra.gmra.mxu1 %vm402_vm0, %v4393_v61  ;;  %v4416_v42 = vld [vmem:[#allocation2 + $0x21] sm:$0xff]  ;;  %v14285_v55 = vpack.c.bf16 %v5002_v12, %v5001_v21  ;;  %v4417_v33 = vld [vmem:[#allocation2 + $0x31] sm:$0xff]  ;;  %v4418_v47 = vld [vmem:[#allocation2 + $0x39] sm:$0xff] }
 0x362   : > { %10338 = vmatmul.msk.bf16.vlgmr.msra.gmra.mxu2 %vm402_vm0, %v4796_v48  ;;  %v4766_v59 = vld [vmem:[#allocation2 + $0x1a] sm:$0xff]  ;;  %v4767_v50 = vld [vmem:[#allocation2 + $0x22] sm:$0xff]  ;;  %v14281_v14 = vpack.c.bf16 %v4416_v42, %v4415_v1  ;;  %v4768_v58 = vld [vmem:[#allocation2 + $0x32] sm:$0xff]  ;;  %v14294_v23 = vpack.c.bf16 %v4418_v47, %v4417_v33 }
 0x363   : > { %10366 = vmatmul.msk.bf16.vlgmr.msra.gmra.mxu3 %vm402_vm0, %v5031_v24  ;;  %v14283_v36 = vpack.c.bf16 %v4767_v50, %v4766_v59  ;;  %v4769_v4 = vld [vmem:[#allocation2 + $0x3a] sm:$0xff]  ;;  %v5004_v35 = vld [vmem:[#allocation2 + $0x50] sm:$0xff]  ;;  %v5006_v28 = vld [vmem:[#allocation2 + $0x68] sm:$0xff] }
 0x364   : > { %v14296_v38 = vpack.c.bf16 %v4769_v4, %v4768_v58  ;;  %v14298_v17 = vpack.c.bf16 %v5004_v35, %v5003_v37  ;;  %v4419_v16 = vld [vmem:[#allocation2 + $0x49] sm:$0xff]  ;;  %v4420_v46 = vld [vmem:[#allocation2 + $0x51] sm:$0xff]  ;;  %v5005_v30 = vld [vmem:[#allocation2 + $0x60] sm:$0xff] }
 0x365   : > { %v4770_v63 = vld [vmem:[#allocation2 + $0x4a] sm:$0xff]  ;;  %v4771_v52 = vld [vmem:[#allocation2 + $0x52] sm:$0xff]  ;;  %v14311_v20 = vpack.c.bf16 %v4420_v46, %v4419_v16  ;;  %v14315_v57 = vpack.c.bf16 %v5006_v28, %v5005_v30  ;;  %v4421_v41 = vld [vmem:[#allocation2 + $0x61] sm:$0xff] }
 0x366   : > { %v14313_v39 = vpack.c.bf16 %v4771_v52, %v4770_v63  ;;  %v4422_v2 = vld [vmem:[#allocation2 + $0x69] sm:$0xff]  ;;  %v5007_v18 = vld [vmem:[#allocation2 + $0x78] sm:$0xff]  ;;  %v5008_v40 = vld [vmem:[#allocation2 + $0x80] sm:$0xff] }
 0x367   : > { %v4772_v31 = vld [vmem:[#allocation2 + $0x62] sm:$0xff]  ;;  %v4773_v25 = vld [vmem:[#allocation2 + $0x6a] sm:$0xff]  ;;  %v14325_v44 = vpack.c.bf16 %v4422_v2, %v4421_v41  ;;  %v14329_v45 = vpack.c.bf16 %v5008_v40, %v5007_v18  ;;  %v4423_v32 = vld [vmem:[#allocation2 + $0x79] sm:$0xff] }
 0x368   : > { %v14327_v60 = vpack.c.bf16 %v4773_v25, %v4772_v31  ;;  %v4424_v15 = vld [vmem:[#allocation2 + $0x81] sm:$0xff]  ;;  %v5009_v29 = vld [vmem:[#allocation2 + $0x90] sm:$0xff]  ;;  %v5010_v56 = vld [vmem:[#allocation2 + $0x98] sm:$0xff] }
 0x369   : > { %v4774_v62 = vld [vmem:[#allocation2 + $0x7a] sm:$0xff]  ;;  %v4775_v8 = vld [vmem:[#allocation2 + $0x82] sm:$0xff]  ;;  %v14339_v3 = vpack.c.bf16 %v4424_v15, %v4423_v32  ;;  %v14343_v10 = vpack.c.bf16 %v5010_v56, %v5009_v29  ;;  %v4425_v19 = vld [vmem:[#allocation2 + $0x91] sm:$0xff] }
 0x36a   : > { %v14341_v6 = vpack.c.bf16 %v4775_v8, %v4774_v62  ;;  %v4426_v43 = vld [vmem:[#allocation2 + $0x99] sm:$0xff]  ;;  %v5011_v5 = vld [vmem:[#allocation2 + $0xa8] sm:$0xff]  ;;  %v5012_v54 = vld [vmem:[#allocation2 + $0xb0] sm:$0xff] }
 0x36b   : > { %v4776_v49 = vld [vmem:[#allocation2 + $0x92] sm:$0xff]  ;;  %v4777_v27 = vld [vmem:[#allocation2 + $0x9a] sm:$0xff]  ;;  %v14353_v9 = vpack.c.bf16 %v4426_v43, %v4425_v19  ;;  %v14357_v26 = vpack.c.bf16 %v5012_v54, %v5011_v5  ;;  %v4427_v13 = vld [vmem:[#allocation2 + $0xa9] sm:$0xff] }
 0x36c   : > { %v14355_v7 = vpack.c.bf16 %v4777_v27, %v4776_v49  ;;  %v4428_v0 = vld [vmem:[#allocation2 + $0xb1] sm:$0xff]  ;;  %v5013_v11 = vld [vmem:[#allocation2 + $0xc0] sm:$0xff]  ;;  %v5014_v61 = vld [vmem:[#allocation2 + $0xc8] sm:$0xff] }
 0x36d   : > { %v4778_v22 = vld [vmem:[#allocation2 + $0xaa] sm:$0xff]  ;;  %v4779_v34 = vld [vmem:[#allocation2 + $0xb2] sm:$0xff]  ;;  %v14367_v51 = vpack.c.bf16 %v4428_v0, %v4427_v13  ;;  %v4429_v1 = vld [vmem:[#allocation2 + $0xc1] sm:$0xff] }
 0x36e   : > { %v14369_v48 = vpack.c.bf16 %v4779_v34, %v4778_v22  ;;  %v4430_v42 = vld [vmem:[#allocation2 + $0xc9] sm:$0xff]  ;;  %v5015_v21 = vld [vmem:[#allocation2 + $0xd8] sm:$0xff]  ;;  %v5016_v12 = vld [vmem:[#allocation2 + $0xe0] sm:$0xff] }
 0x36f   : > { %v4780_v59 = vld [vmem:[#allocation2 + $0xc2] sm:$0xff]  ;;  %v4781_v50 = vld [vmem:[#allocation2 + $0xca] sm:$0xff]  ;;  %v14381_v33 = vpack.c.bf16 %v4430_v42, %v4429_v1  ;;  %v14385_v37 = vpack.c.bf16 %v5016_v12, %v5015_v21  ;;  %v4431_v41 = vld [vmem:[#allocation2 + $0xd9] sm:$0xff] }
 0x370   : > { %10287 = vmatmul.msk.bf16.gmra.mxu0 %vm402_vm0, %v14281_v14  ;;  %v14383_v4 = vpack.c.bf16 %v4781_v50, %v4780_v59  ;;  %v4432_v2 = vld [vmem:[#allocation2 + $0xe1] sm:$0xff]  ;;  %v5017_v18 = vld [vmem:[#allocation2 + $0xf0] sm:$0xff]  ;;  %v5018_v40 = vld [vmem:[#allocation2 + $0xf8] sm:$0xff] }
 0x371   : > { %10311 = vmatmul.msk.bf16.gmra.mxu1 %vm402_vm0, %v5031_v24  ;;  %v14371_v24 = vpack.c.bf16 %v5014_v61, %v5013_v11  ;;  %v4782_v31 = vld [vmem:[#allocation2 + $0xda] sm:$0xff]  ;;  %v4783_v25 = vld [vmem:[#allocation2 + $0xe2] sm:$0xff]  ;;  %v14397_v62 = vpack.c.bf16 %v4432_v2, %v4431_v41  ;;  %v14401_v43 = vpack.c.bf16 %v5018_v40, %v5017_v18  ;;  %v4433_v61 = vld [vmem:[#allocation2 + $0xf1] sm:$0xff] }
 0x372   : > { %10339 = vmatmul.msk.bf16.gmra.mxu2 %vm402_vm0, %v14283_v36  ;;  %v14399_v19 = vpack.c.bf16 %v4783_v25, %v4782_v31  ;;  %v4434_v1 = vld [vmem:[#allocation2 + $0xf9] sm:$0xff]  ;;  %v5019_v50 = vld [vmem:[#allocation2 + $0x108] sm:$0xff]  ;;  %v5020_v21 = vld [vmem:[#allocation2 + $0x110] sm:$0xff] }
 0x373   : > { %10367 = vmatmul.msk.bf16.gmra.mxu3 %vm402_vm0, %v14285_v55  ;;  %v4784_v42 = vld [vmem:[#allocation2 + $0xf2] sm:$0xff]  ;;  %v4785_v59 = vld [vmem:[#allocation2 + $0xfa] sm:$0xff] }
 0x380   : > { %10288 = vmatmul.msk.bf16.gmra.mxu0 %vm402_vm0, %v14294_v23 }
 0x381   : > { %10312 = vmatmul.msk.bf16.gmra.mxu1 %vm402_vm0, %v14285_v55 }
 0x382   : > { %10340 = vmatmul.msk.bf16.gmra.mxu2 %vm402_vm0, %v14296_v38 }
 0x383   : > { %10368 = vmatmul.msk.bf16.gmra.mxu3 %vm402_vm0, %v14298_v17 }
 0x390   : > { %10289 = vmatmul.msk.bf16.gmra.mxu0 %vm402_vm0, %v14311_v20 }
 0x391   : > { %10313 = vmatmul.msk.bf16.gmra.mxu1 %vm402_vm0, %v14298_v17 }
 0x392   : > { %10341 = vmatmul.msk.bf16.gmra.mxu2 %vm402_vm0, %v14313_v39 }
 0x393   : > { %10369 = vmatmul.msk.bf16.gmra.mxu3 %vm402_vm0, %v14315_v57 }
 0x3a0   : > { %10290 = vmatmul.msk.bf16.gmra.mxu0 %vm402_vm0, %v14325_v44 }
 0x3a1   : > { %10314 = vmatmul.msk.bf16.gmra.mxu1 %vm402_vm0, %v14315_v57 }
 0x3a2   : > { %10342 = vmatmul.msk.bf16.gmra.mxu2 %vm402_vm0, %v14327_v60 }
 0x3a3   : > { %10370 = vmatmul.msk.bf16.gmra.mxu3 %vm402_vm0, %v14329_v45 }
 0x3b0   : > { %10291 = vmatmul.msk.bf16.gmra.mxu0 %vm402_vm0, %v14339_v3 }
 0x3b1   : > { %10315 = vmatmul.msk.bf16.gmra.mxu1 %vm402_vm0, %v14329_v45 }
 0x3b2   : > { %10343 = vmatmul.msk.bf16.gmra.mxu2 %vm402_vm0, %v14341_v6 }
 0x3b3   : > { %10371 = vmatmul.msk.bf16.gmra.mxu3 %vm402_vm0, %v14343_v10 }
 0x3c0   : > { %10292 = vmatmul.msk.bf16.gmra.mxu0 %vm402_vm0, %v14353_v9 }
 0x3c1   : > { %10316 = vmatmul.msk.bf16.gmra.mxu1 %vm402_vm0, %v14343_v10 }
 0x3c2   : > { %10344 = vmatmul.msk.bf16.gmra.mxu2 %vm402_vm0, %v14355_v7 }
 0x3c3   : > { %10372 = vmatmul.msk.bf16.gmra.mxu3 %vm402_vm0, %v14357_v26 }
 0x3d0   : > { %10293 = vmatmul.msk.bf16.gmra.mxu0 %vm402_vm0, %v14367_v51 }
 0x3d1   : > { %10317 = vmatmul.msk.bf16.gmra.mxu1 %vm402_vm0, %v14357_v26 }
 0x3d2   : > { %10345 = vmatmul.msk.bf16.gmra.mxu2 %vm402_vm0, %v14369_v48 }
 0x3d3   : > { %10373 = vmatmul.msk.bf16.gmra.mxu3 %vm402_vm0, %v14371_v24 }
 0x3dd   : > { %v4535_v47 = vpop.f32.mrf.mxu0 }
 0x3de   : > { %v4684_v58 = vpop.f32.mrf.mxu1 }
 0x3df   : > { %v4685_v35 = vadd.f32 %v4684_v58, %v4535_v47  ;;  %v14415_v58 = vpack.c.bf16 %v4434_v1, %v4433_v61 }
 0x3e0   : > { %10294 = vmatmul.msk.bf16.gmra.mxu0 %vm402_vm0, %v14381_v33 }
 0x3e1   : > { %10318 = vmatmul.msk.bf16.gmra.mxu1 %vm402_vm0, %v14371_v24 }
 0x3e2   : > { %10346 = vmatmul.msk.bf16.gmra.mxu2 %vm402_vm0, %v14383_v4 }
 0x3e3   : > { %10374 = vmatmul.msk.bf16.gmra.mxu3 %vm402_vm0, %v14385_v37 }
 0x3e5   : > { %v4886_v53 = vpop.f32.mrf.mxu2  ;;  %v4537_v63 = vpop.f32.mrf.mxu0 }
 0x3e6   : > { %v5121_v16 = vpop.f32.mrf.mxu3  ;;  %v4966_v46 = vadd.f32 %v4886_v53, %v4685_v35  ;;  %v4686_v52 = vpop.f32.mrf.mxu1 }
 0x3e7   : > { %v4687_v30 = vadd.f32 %v4686_v52, %v4537_v63  ;;  %v14419_v63 = vpack.c.bf16 %v5020_v21, %v5019_v50  ;;  %v11913_v21 = vld [vmem:[%s15696_s3 + $0x40] sm:$0xff] }
 0x3e8   : > { %v14395_v28 = vadd.f32 %v5121_v16, %v4966_v46  ;;  %v14417_v46 = vpack.c.bf16 %v4785_v59, %v4784_v42  ;;  %5353 = vmatpush.bf16.msrb.mxu0 %v11913_v21 }
 0x3ed   : > { %v4888_v32 = vpop.f32.mrf.mxu2  ;;  %v4540_v29 = vpop.f32.mrf.mxu0 }
 0x3ee   : > { %v5123_v15 = vpop.f32.mrf.mxu3  ;;  %v4967_v8 = vadd.f32 %v4888_v32, %v4687_v30  ;;  %v4689_v56 = vpop.f32.mrf.mxu1 }
 0x3ef   : > { %v4690_v49 = vadd.f32 %v4689_v56, %v4540_v29  ;;  %v4786_v29 = vld [vmem:[#allocation2 + $0x10a] sm:$0xff]  ;;  %v4787_v56 = vld [vmem:[#allocation2 + $0x112] sm:$0xff] }
 0x3f0   : > { %v14403_v27 = vadd.f32 %v5123_v15, %v4967_v8  ;;  %10295 = vmatmul.msk.bf16.gmra.mxu0 %vm402_vm0, %v14397_v62  ;;  %v4435_v15 = vld [vmem:[#allocation2 + $0x109] sm:$0xff]  ;;  %v4436_v8 = vld [vmem:[#allocation2 + $0x111] sm:$0xff]  ;;  %v14435_v1 = vpack.c.bf16 %v4787_v56, %v4786_v29 }
 0x3f1   : > { %10319 = vmatmul.msk.bf16.gmra.mxu1 %vm402_vm0, %v14385_v37 }
 0x3f2   : > { %10347 = vmatmul.msk.bf16.gmra.mxu2 %vm402_vm0, %v14399_v19 }
 0x3f3   : > { %10375 = vmatmul.msk.bf16.gmra.mxu3 %vm402_vm0, %v14401_v43 }
 0x3f5   : > { %v4891_v5 = vpop.f32.mrf.mxu2  ;;  %v4542_v0 = vpop.f32.mrf.mxu0 }
 0x3f6   : > { %v5126_v54 = vpop.f32.mrf.mxu3  ;;  %v4968_v13 = vadd.f32 %v4891_v5, %v4690_v49  ;;  %v4691_v22 = vpop.f32.mrf.mxu1  ;;  %v5021_v49 = vld [vmem:[#allocation2 + $0x120] sm:$0xff]  ;;  %v5022_v5 = vld [vmem:[#allocation2 + $0x128] sm:$0xff] }
 0x3f7   : > { %v4692_v34 = vadd.f32 %v4691_v22, %v4542_v0  ;;  %v14433_v0 = vpack.c.bf16 %v4436_v8, %v4435_v15  ;;  %v14437_v42 = vpack.c.bf16 %v5022_v5, %v5021_v49  ;;  %v5024_v15 = vld [vmem:[#allocation2 + $0x140] sm:$0xff] }
 0x3f8   : > { %v14413_v11 = vadd.f32 %v5126_v54, %v4968_v13 }
 0x3fd   : > { %v4893_v12 = vpop.f32.mrf.mxu2  ;;  %v4545_v53 = vpop.f32.mrf.mxu0 }
 0x3fe   : > { %v5128_v47 = vpop.f32.mrf.mxu3  ;;  %v4969_v35 = vadd.f32 %v4893_v12, %v4692_v34  ;;  %v4694_v16 = vpop.f32.mrf.mxu1 }
 0x3ff   : > { %v4695_v52 = vadd.f32 %v4694_v16, %v4545_v53 }
 0x400   : > { %v14421_v30 = vadd.f32 %v5128_v47, %v4969_v35  ;;  %10296 = vmatmul.msk.bf16.gmra.mxu0 %vm402_vm0, %v14415_v58 }
 0x401   : > { %10320 = vmatmul.msk.bf16.gmra.mxu1 %vm402_vm0, %v14401_v43 }
 0x402   : > { %10348 = vmatmul.msk.bf16.gmra.mxu2 %vm402_vm0, %v14417_v46 }
 0x403   : > { %10376 = vmatmul.msk.bf16.gmra.mxu3 %vm402_vm0, %v14419_v63 }
 0x405   : > { %v4896_v41 = vpop.f32.mrf.mxu2  ;;  %v4547_v25 = vpop.f32.mrf.mxu0 }
 0x406   : > { %v5131_v2 = vpop.f32.mrf.mxu3  ;;  %v4970_v31 = vadd.f32 %v4896_v41, %v4695_v52  ;;  %v4696_v18 = vpop.f32.mrf.mxu1 }
 0x407   : > { %v4697_v40 = vadd.f32 %v4696_v18, %v4547_v25  ;;  %v4788_v25 = vld [vmem:[#allocation2 + $0x122] sm:$0xff]  ;;  %v4789_v18 = vld [vmem:[#allocation2 + $0x12a] sm:$0xff] }
 0x408   : > { %v14431_v32 = vadd.f32 %v5131_v2, %v4970_v31  ;;  %v4437_v2 = vld [vmem:[#allocation2 + $0x121] sm:$0xff]  ;;  %v4438_v31 = vld [vmem:[#allocation2 + $0x129] sm:$0xff] }
 0x409   : > { %v14454_v56 = vpack.c.bf16 %v4438_v31, %v4437_v2  ;;  %v4440_v2 = vld [vmem:[#allocation2 + $0x141] sm:$0xff] }
 0x40a   : > { %v4790_v31 = vld [vmem:[#allocation2 + $0x13a] sm:$0xff] }
 0x40d   : > { %v4898_v54 = vpop.f32.mrf.mxu2  ;;  %v4550_v34 = vpop.f32.mrf.mxu0 }
 0x40e   : > { %v5133_v13 = vpop.f32.mrf.mxu3  ;;  %v4971_v22 = vadd.f32 %v4898_v54, %v4697_v40  ;;  %v4699_v61 = vpop.f32.mrf.mxu1  ;;  %v5023_v40 = vld [vmem:[#allocation2 + $0x138] sm:$0xff] }
 0x40f   : > { %v4700_v59 = vadd.f32 %v4699_v61, %v4550_v34 }
 0x410   : > { %v14439_v50 = vadd.f32 %v5133_v13, %v4971_v22  ;;  %10297 = vmatmul.msk.bf16.gmra.mxu0 %vm402_vm0, %v14433_v0  ;;  %v14456_v13 = vpack.c.bf16 %v4789_v18, %v4788_v25  ;;  %v14458_v22 = vpack.c.bf16 %v5024_v15, %v5023_v40  ;;  %v4791_v25 = vld [vmem:[#allocation2 + $0x142] sm:$0xff]  ;;  %v5025_v18 = vld [vmem:[#allocation2 + $0x150] sm:$0xff]  ;;  %v5026_v40 = vld [vmem:[#allocation2 + $0x158] sm:$0xff] }
 0x411   : > { %10321 = vmatmul.msk.bf16.gmra.mxu1 %vm402_vm0, %v14419_v63 }
 0x412   : > { %10349 = vmatmul.msk.bf16.gmra.mxu2 %vm402_vm0, %v14435_v1  ;;  %15752 = vst [vmem:[#allocation23_spill] sm:$0xff] %v14458_v22 }
 0x413   : > { %10377 = vmatmul.msk.bf16.gmra.mxu3 %vm402_vm0, %v14437_v42 }
 0x415   : > { %v4901_v12 = vpop.f32.mrf.mxu2  ;;  %v4552_v53 = vpop.f32.mrf.mxu0 }
 0x416   : > { %v5136_v47 = vpop.f32.mrf.mxu3  ;;  %v4972_v35 = vadd.f32 %v4901_v12, %v4700_v59  ;;  %v4701_v16 = vpop.f32.mrf.mxu1 }
 0x417   : > { %v4702_v52 = vadd.f32 %v4701_v16, %v4552_v53 }
 0x418   : > { %v14452_v41 = vadd.f32 %v5136_v47, %v4972_v35 }
 0x41d   : > { %v4903_v8 = vpop.f32.mrf.mxu2  ;;  %v4555_v5 = vpop.f32.mrf.mxu0 }
 0x41e   : > { %v5138_v29 = vpop.f32.mrf.mxu3  ;;  %v4973_v49 = vadd.f32 %v4903_v8, %v4702_v52  ;;  %v4704_v54 = vpop.f32.mrf.mxu1  ;;  %v4439_v52 = vld [vmem:[#allocation2 + $0x139] sm:$0xff] }
 0x41f   : > { %v4705_v34 = vadd.f32 %v4704_v54, %v4555_v5 }
 0x420   : > { %v14460_v61 = vadd.f32 %v5138_v29, %v4973_v49  ;;  %10298 = vmatmul.msk.bf16.gmra.mxu0 %vm402_vm0, %v14454_v56  ;;  %v14472_v29 = vpack.c.bf16 %v4440_v2, %v4439_v52 }
 0x421   : > { %10322 = vmatmul.msk.bf16.gmra.mxu1 %vm402_vm0, %v14437_v42 }
 0x422   : > { %15753 = vst [vmem:[#allocation24_spill] sm:$0xff] %v14460_v61  ;;  %10350 = vmatmul.msk.bf16.gmra.mxu2 %vm402_vm0, %v14456_v13  ;;  %v14474_v61 = vpack.c.bf16 %v4791_v25, %v4790_v31  ;;  %v11918_v25 = vld [vmem:[%s15696_s3 + $0x68] sm:$0xff] }
 0x423   : > { %10378 = vmatmul.msk.bf16.gmra.mxu3 %vm402_vm0, %v14458_v22  ;;  %15755 = vst [vmem:[#allocation26_spill] sm:$0xff] %v14472_v29  ;;  %5821 = vmatpush.bf16.msrb.mxu2 %v11918_v25 }
 0x424   : > { %15756 = vst [vmem:[#allocation27_spill] sm:$0xff] %v14474_v61 }
 0x425   : > { %v4906_v59 = vpop.f32.mrf.mxu2  ;;  %v4557_v47 = vpop.f32.mrf.mxu0 }
 0x426   : > { %v5141_v21 = vpop.f32.mrf.mxu3  ;;  %v4974_v12 = vadd.f32 %v4906_v59, %v4705_v34  ;;  %v4706_v35 = vpop.f32.mrf.mxu1  ;;  %v14476_v34 = vpack.c.bf16 %v5026_v40, %v5025_v18  ;;  %v4441_v18 = vld [vmem:[#allocation2 + $0x151] sm:$0xff]  ;;  %v4442_v40 = vld [vmem:[#allocation2 + $0x159] sm:$0xff] }
 0x427   : > { %v4707_v53 = vadd.f32 %v4706_v35, %v4557_v47 }
 0x428   : > { %v14470_v16 = vadd.f32 %v5141_v21, %v4974_v12  ;;  %15757 = vst [vmem:[#allocation28_spill] sm:$0xff] %v14476_v34 }
 0x42a   : > { %15754 = vst [vmem:[#allocation25_spill] sm:$0xff] %v14470_v16 }
 0x42d   : > { %v4908_v15 = vpop.f32.mrf.mxu2  ;;  %v4560_v5 = vpop.f32.mrf.mxu0 }
 0x42e   : > { %v5143_v8 = vpop.f32.mrf.mxu3  ;;  %v4975_v49 = vadd.f32 %v4908_v15, %v4707_v53  ;;  %v4709_v54 = vpop.f32.mrf.mxu1  ;;  %v4792_v15 = vld [vmem:[#allocation2 + $0x152] sm:$0xff] }
 0x42f   : > { %v4710_v59 = vadd.f32 %v4709_v54, %v4560_v5  ;;  %v5028_v5 = vld [vmem:[#allocation2 + $0x170] sm:$0xff]  ;;  %v11916_v54 = vld [vmem:[%s15696_s3 + $0x58] sm:$0xff] }
 0x430   : > { %v14478_v21 = vadd.f32 %v5143_v8, %v4975_v49  ;;  %10299 = vmatmul.msk.bf16.gmra.mxu0 %vm402_vm0, %v14472_v29  ;;  %v4793_v8 = vld [vmem:[#allocation2 + $0x15a] sm:$0xff]  ;;  %v5027_v49 = vld [vmem:[#allocation2 + $0x168] sm:$0xff]  ;;  %5586 = vmatpush.bf16.msrb.mxu1 %v11916_v54 }
 0x431   : > { %10323 = vmatmul.msk.bf16.gmra.mxu1 %vm402_vm0, %v14458_v22 }
 0x432   : > { %15758 = vst [vmem:[#allocation29_spill] sm:$0xff] %v14478_v21  ;;  %10351 = vmatmul.msk.bf16.gmra.mxu2 %vm402_vm0, %v14474_v61  ;;  %v14504_v21 = vpack.c.bf16 %v4793_v8, %v4792_v15  ;;  %v14506_v61 = vpack.c.bf16 %v5028_v5, %v5027_v49 }
 0x433   : > { %10379 = vmatmul.msk.bf16.gmra.mxu3 %vm402_vm0, %v14476_v34 }
 0x434   : > { %15761 = vst [vmem:[#allocation32_spill] sm:$0xff] %v14504_v21 }
 0x435   : > { %v4911_v12 = vpop.f32.mrf.mxu2  ;;  %v4562_v53 = vpop.f32.mrf.mxu0 }
 0x436   : > { %v5146_v47 = vpop.f32.mrf.mxu3  ;;  %v4976_v35 = vadd.f32 %v4911_v12, %v4710_v59  ;;  %v4711_v52 = vpop.f32.mrf.mxu1  ;;  %v11920_v59 = vld [vmem:[%s15696_s3 + $0x78] sm:$0xff] }
 0x437   : > { %v4712_v2 = vadd.f32 %v4711_v52, %v4562_v53  ;;  %6055 = vmatpush.bf16.msrb.mxu3 %v11920_v59  ;;  %v11917_v53 = vld [vmem:[%s15696_s3 + $0x60] sm:$0xff] }
 0x438   : > { %v14488_v31 = vadd.f32 %v5146_v47, %v4976_v35  ;;  %v14499_v35 = vpack.c.bf16 %v4442_v40, %v4441_v18  ;;  %5822 = vmatpush.bf16.msrb.mxu2 %v11917_v53  ;;  %v11915_v18 = vld [vmem:[%s15696_s3 + $0x50] sm:$0xff] }
 0x439   : > { %v11919_v40 = vld [vmem:[%s15696_s3 + $0x70] sm:$0xff]  ;;  %5587 = vmatpush.bf16.msrb.mxu1 %v11915_v18 }
 0x43a   : > { %15759 = vst [vmem:[#allocation30_spill] sm:$0xff] %v14488_v31  ;;  %v4794_v53 = vld [vmem:[#allocation2 + $0x16a] sm:$0xff] }
 0x43b   : > { %15760 = vst [vmem:[#allocation31_spill] sm:$0xff] %v14499_v35  ;;  %6056 = vmatpush.bf16.msrb.mxu3 %v11919_v40 }
 0x43d   : > { %v4913_v12 = vpop.f32.mrf.mxu2  ;;  %v4565_v25 = vpop.f32.mrf.mxu0 }
 0x43e   : > { %v5148_v47 = vpop.f32.mrf.mxu3  ;;  %v4977_v52 = vadd.f32 %v4913_v12, %v4712_v2  ;;  %v4714_v31 = vpop.f32.mrf.mxu1  ;;  %v4443_v12 = vld [vmem:[#allocation2 + $0x169] sm:$0xff] }
 0x43f   : > { %v4715_v16 = vadd.f32 %v4714_v31, %v4565_v25  ;;  %v5029_v25 = vld [vmem:[#allocation2 + $0x180] sm:$0xff] }
 0x440   : > { %v14514_v54 = vadd.f32 %v5148_v47, %v4977_v52  ;;  %10300 = vmatmul.msk.bf16.gmra.mxu0 %vm402_vm0, %v14499_v35  ;;  %v4444_v47 = vld [vmem:[#allocation2 + $0x171] sm:$0xff] }
 0x441   : > { %10324 = vmatmul.msk.bf16.gmra.mxu1 %vm402_vm0, %v14476_v34  ;;  %v4795_v52 = vld [vmem:[#allocation2 + $0x172] sm:$0xff]  ;;  %v14526_v34 = vpack.c.bf16 %v4444_v47, %v4443_v12 }
 0x442   : > { %15762 = vst [vmem:[#allocation33_spill] sm:$0xff] %v14514_v54  ;;  %10352 = vmatmul.msk.bf16.gmra.mxu2 %vm402_vm0, %v14504_v21  ;;  %v5030_v54 = vld [vmem:[#allocation2 + $0x188] sm:$0xff]  ;;  %v14528_v22 = vpack.c.bf16 %v4795_v52, %v4794_v53 }
 0x443   : > { %10380 = vmatmul.msk.bf16.gmra.mxu3 %vm402_vm0, %v14506_v61 }
 0x445   : > { %v4916_v2 = vpop.f32.mrf.mxu2  ;;  %v4567_v8 = vpop.f32.mrf.mxu0 }
 0x446   : > { %v5151_v31 = vpop.f32.mrf.mxu3  ;;  %v4978_v15 = vadd.f32 %v4916_v2, %v4715_v16  ;;  %v4716_v49 = vpop.f32.mrf.mxu1  ;;  %v14530_v16 = vpack.c.bf16 %v5030_v54, %v5029_v25 }
 0x447   : > { %v4717_v5 = vadd.f32 %v4716_v49, %v4567_v8 }
 0x448   : > { %v14524_v59 = vadd.f32 %v5151_v31, %v4978_v15 }
 0x44d   : > { %v4918_v21 = vpop.f32.mrf.mxu2  ;;  %v4570_v40 = vpop.f32.mrf.mxu0 }
 0x44e   : > { %v5153_v35 = vpop.f32.mrf.mxu3  ;;  %v4979_v18 = vadd.f32 %v4918_v21, %v4717_v5  ;;  %v4719_v29 = vpop.f32.mrf.mxu1 }
 0x44f   : > { %v4720_v2 = vadd.f32 %v4719_v29, %v4570_v40 }
 0x450   : > { %v14532_v31 = vadd.f32 %v5153_v35, %v4979_v18  ;;  %10301 = vmatmul.msk.bf16.gmra.mxu0 %vm402_vm0, %v14526_v34 }
 0x451   : > { %10325 = vmatmul.msk.bf16.gmra.mxu1 %vm402_vm0, %v14506_v61 }
 0x452   : > { %10353 = vmatmul.msk.bf16.gmra.mxu2 %vm402_vm0, %v14528_v22 }
 0x453   : > { %10381 = vmatmul.msk.bf16.gmra.mxu3 %vm402_vm0, %v14530_v16 }
 0x455   : > { %v4921_v21 = vpop.f32.mrf.mxu2  ;;  %v4572_v54 = vpop.f32.mrf.mxu0 }
 0x456   : > { %v5156_v15 = vpop.f32.mrf.mxu3  ;;  %v4980_v8 = vadd.f32 %v4921_v21, %v4720_v2  ;;  %v4721_v49 = vpop.f32.mrf.mxu1 }
 0x457   : > { %v4722_v29 = vadd.f32 %v4721_v49, %v4572_v54 }
 0x458   : > { %v14542_v35 = vadd.f32 %v5156_v15, %v4980_v8 }
 0x45d   : > { %v4923_v5 = vpop.f32.mrf.mxu2  ;;  %v4575_v53 = vpop.f32.mrf.mxu0 }
 0x45e   : > { %v5158_v12 = vpop.f32.mrf.mxu3  ;;  %v4981_v47 = vadd.f32 %v4923_v5, %v4722_v29  ;;  %v4724_v52 = vpop.f32.mrf.mxu1 }
 0x45f   : > { %v4725_v25 = vadd.f32 %v4724_v52, %v4575_v53 }
 0x460   : > { %v14544_v18 = vadd.f32 %v5158_v12, %v4981_v47  ;;  %10394 = vmatmul.msk.bf16.vlgmr.msrb.gmra.mxu0 %vm402_vm0, %v14281_v14 }
 0x461   : > { %10422 = vmatmul.msk.bf16.vlgmr.msrb.gmra.mxu1 %vm402_vm0, %v14283_v36 }
 0x462   : > { %10450 = vmatmul.msk.bf16.vlgmr.msrb.gmra.mxu2 %vm402_vm0, %v14285_v55 }
 0x463   : > { %10478 = vmatmul.msk.bf16.vlgmr.msrb.gmra.mxu3 %vm402_vm0, %v14294_v23 }
 0x465   : > { %v4926_v40 = vpop.f32.mrf.mxu2  ;;  %v4577_v15 = vpop.f32.mrf.mxu0 }
 0x466   : > { %v5161_v2 = vpop.f32.mrf.mxu3  ;;  %v4982_v21 = vadd.f32 %v4926_v40, %v4725_v25  ;;  %v4726_v8 = vpop.f32.mrf.mxu1 }
 0x467   : > { %v4727_v54 = vadd.f32 %v4726_v8, %v4577_v15 }
 0x468   : > { %v14554_v49 = vadd.f32 %v5161_v2, %v4982_v21 }
 0x46d   : > { %v4928_v29 = vpop.f32.mrf.mxu2  ;;  %v4580_v12 = vpop.f32.mrf.mxu0 }
 0x46e   : > { %v5163_v5 = vpop.f32.mrf.mxu3  ;;  %v4983_v14 = vadd.f32 %v4928_v29, %v4727_v54  ;;  %v4729_v47 = vpop.f32.mrf.mxu1 }
 0x46f   : > { %v4730_v36 = vadd.f32 %v4729_v47, %v4580_v12 }
 0x470   : > { %v14556_v53 = vadd.f32 %v5163_v5, %v4983_v14  ;;  %10395 = vmatmul.msk.bf16.gmra.mxu0 %vm402_vm0, %v14294_v23 }
 0x471   : > { %10423 = vmatmul.msk.bf16.gmra.mxu1 %vm402_vm0, %v14296_v38 }
 0x472   : > { %10451 = vmatmul.msk.bf16.gmra.mxu2 %vm402_vm0, %v14298_v17 }
 0x473   : > { %10479 = vmatmul.msk.bf16.gmra.mxu3 %vm402_vm0, %v14311_v20 }
 0x475   : > { %v4931_v55 = vpop.f32.mrf.mxu2  ;;  %v4582_v40 = vpop.f32.mrf.mxu0 }
 0x476   : > { %v5166_v52 = vpop.f32.mrf.mxu3  ;;  %v4984_v25 = vadd.f32 %v4931_v55, %v4730_v36  ;;  %v4731_v2 = vpop.f32.mrf.mxu1 }
 0x477   : > { %v4732_v21 = vadd.f32 %v4731_v2, %v4582_v40 }
 0x478   : > { %v14566_v15 = vadd.f32 %v5166_v52, %v4984_v25 }
 0x47d   : > { %v4933_v8 = vpop.f32.mrf.mxu2  ;;  %v4585_v29 = vpop.f32.mrf.mxu0 }
 0x47e   : > { %v5168_v54 = vpop.f32.mrf.mxu3  ;;  %v4985_v23 = vadd.f32 %v4933_v8, %v4732_v21  ;;  %v4734_v5 = vpop.f32.mrf.mxu1 }
 0x47f   : > { %v4735_v38 = vadd.f32 %v4734_v5, %v4585_v29 }
 0x480   : > { %v14568_v14 = vadd.f32 %v5168_v54, %v4985_v23  ;;  %10396 = vmatmul.msk.bf16.gmra.mxu0 %vm402_vm0, %v14311_v20 }
 0x481   : > { %10424 = vmatmul.msk.bf16.gmra.mxu1 %vm402_vm0, %v14313_v39 }
 0x482   : > { %10452 = vmatmul.msk.bf16.gmra.mxu2 %vm402_vm0, %v14315_v57  ;;  %v11922_v57 = vld [vmem:[%s15696_s3 + $0x88] sm:$0xff] }
 0x483   : > { %10480 = vmatmul.msk.bf16.gmra.mxu3 %vm402_vm0, %v14325_v44  ;;  %6289 = vmatpush.bf16.msra.mxu0 %v11922_v57 }
 0x485   : > { %v4936_v17 = vpop.f32.mrf.mxu2  ;;  %v4587_v36 = vpop.f32.mrf.mxu0 }
 0x486   : > { %v5171_v12 = vpop.f32.mrf.mxu3  ;;  %v4986_v47 = vadd.f32 %v4936_v17, %v4735_v38  ;;  %v4736_v55 = vpop.f32.mrf.mxu1 }
 0x487   : > { %v4737_v52 = vadd.f32 %v4736_v55, %v4587_v36 }
 0x488   : > { %v14578_v25 = vadd.f32 %v5171_v12, %v4986_v47 }
 0x48d   : > { %v4938_v40 = vpop.f32.mrf.mxu2  ;;  %v4590_v21 = vpop.f32.mrf.mxu0 }
 0x48e   : > { %v5173_v2 = vpop.f32.mrf.mxu3  ;;  %v4987_v20 = vadd.f32 %v4938_v40, %v4737_v52  ;;  %v4739_v8 = vpop.f32.mrf.mxu1 }
 0x48f   : > { %v4740_v39 = vadd.f32 %v4739_v8, %v4590_v21 }
 0x490   : > { %v14580_v54 = vadd.f32 %v5173_v2, %v4987_v20  ;;  %10397 = vmatmul.msk.bf16.gmra.mxu0 %vm402_vm0, %v14325_v44 }
 0x491   : > { %10425 = vmatmul.msk.bf16.gmra.mxu1 %vm402_vm0, %v14327_v60 }
 0x492   : > { %10453 = vmatmul.msk.bf16.gmra.mxu2 %vm402_vm0, %v14329_v45 }
 0x493   : > { %10481 = vmatmul.msk.bf16.gmra.mxu3 %vm402_vm0, %v14339_v3 }
 0x495   : > { %v4941_v23 = vpop.f32.mrf.mxu2  ;;  %v4592_v38 = vpop.f32.mrf.mxu0 }
 0x496   : > { %v5176_v29 = vpop.f32.mrf.mxu3  ;;  %v4988_v5 = vadd.f32 %v4941_v23, %v4740_v39  ;;  %v4741_v17 = vpop.f32.mrf.mxu1 }
 0x497   : > { %v4742_v12 = vadd.f32 %v4741_v17, %v4592_v38 }
 0x498   : > { %v14593_v47 = vadd.f32 %v5176_v29, %v4988_v5 }
 0x49d   : > { %v4943_v36 = vpop.f32.mrf.mxu2  ;;  %v4595_v52 = vpop.f32.mrf.mxu0 }
 0x49e   : > { %v5178_v44 = vpop.f32.mrf.mxu3  ;;  %v4989_v55 = vadd.f32 %v4943_v36, %v4742_v12  ;;  %v4744_v60 = vpop.f32.mrf.mxu1 }
 0x49f   : > { %v4745_v40 = vadd.f32 %v4744_v60, %v4595_v52 }
 0x4a0   : > { %v14595_v2 = vadd.f32 %v5178_v44, %v4989_v55  ;;  %10398 = vmatmul.msk.bf16.gmra.mxu0 %vm402_vm0, %v14339_v3 }
 0x4a1   : > { %10426 = vmatmul.msk.bf16.gmra.mxu1 %vm402_vm0, %v14341_v6 }
 0x4a2   : > { %10454 = vmatmul.msk.bf16.gmra.mxu2 %vm402_vm0, %v14343_v10 }
 0x4a3   : > { %10482 = vmatmul.msk.bf16.gmra.mxu3 %vm402_vm0, %v14353_v9 }
 0x4a5   : > { %v4946_v45 = vpop.f32.mrf.mxu2  ;;  %v4597_v8 = vpop.f32.mrf.mxu0 }
 0x4a6   : > { %v5181_v20 = vpop.f32.mrf.mxu3  ;;  %v4990_v21 = vadd.f32 %v4946_v45, %v4745_v40  ;;  %v4746_v39 = vpop.f32.mrf.mxu1 }
 0x4a7   : > { %v4747_v57 = vadd.f32 %v4746_v39, %v4597_v8 }
 0x4a8   : > { %v14605_v23 = vadd.f32 %v5181_v20, %v4990_v21 }
 0x4ad   : > { %v4948_v29 = vpop.f32.mrf.mxu2  ;;  %v4600_v38 = vpop.f32.mrf.mxu0 }
 0x4ae   : > { %v5183_v5 = vpop.f32.mrf.mxu3  ;;  %v4991_v3 = vadd.f32 %v4948_v29, %v4747_v57  ;;  %v4749_v17 = vpop.f32.mrf.mxu1 }
 0x4af   : > { %v4750_v6 = vadd.f32 %v4749_v17, %v4600_v38 }
 0x4b0   : > { %v14607_v12 = vadd.f32 %v5183_v5, %v4991_v3  ;;  %10399 = vmatmul.msk.bf16.gmra.mxu0 %vm402_vm0, %v14353_v9 }
 0x4b1   : > { %10427 = vmatmul.msk.bf16.gmra.mxu1 %vm402_vm0, %v14355_v7 }
 0x4b2   : > { %10455 = vmatmul.msk.bf16.gmra.mxu2 %vm402_vm0, %v14357_v26 }
 0x4b3   : > { %10483 = vmatmul.msk.bf16.gmra.mxu3 %vm402_vm0, %v14367_v51 }
 0x4b5   : > { %v4951_v10 = vpop.f32.mrf.mxu2  ;;  %v4602_v55 = vpop.f32.mrf.mxu0 }
 0x4b6   : > { %v5186_v36 = vpop.f32.mrf.mxu3  ;;  %v4992_v44 = vadd.f32 %v4951_v10, %v4750_v6  ;;  %v4751_v52 = vpop.f32.mrf.mxu1 }
 0x4b7   : > { %v4752_v60 = vadd.f32 %v4751_v52, %v4602_v55 }
 0x4b8   : > { %v14617_v40 = vadd.f32 %v5186_v36, %v4992_v44 }
 0x4bd   : > { %v4953_v45 = vpop.f32.mrf.mxu2  ;;  %v4605_v21 = vpop.f32.mrf.mxu0 }
 0x4be   : > { %v5188_v20 = vpop.f32.mrf.mxu3  ;;  %v4993_v9 = vadd.f32 %v4953_v45, %v4752_v60  ;;  %v4754_v8 = vpop.f32.mrf.mxu1 }
 0x4bf   : > { %v4755_v7 = vadd.f32 %v4754_v8, %v4605_v21 }
 0x4c0   : > { %v14619_v39 = vadd.f32 %v5188_v20, %v4993_v9  ;;  %10400 = vmatmul.msk.bf16.gmra.mxu0 %vm402_vm0, %v14367_v51 }
 0x4c1   : > { %10428 = vmatmul.msk.bf16.gmra.mxu1 %vm402_vm0, %v14369_v48 }
 0x4c2   : > { %10456 = vmatmul.msk.bf16.gmra.mxu2 %vm402_vm0, %v14371_v24 }
 0x4c3   : > { %10484 = vmatmul.msk.bf16.gmra.mxu3 %vm402_vm0, %v14381_v33 }
 0x4c5   : > { %v4956_v26 = vpop.f32.mrf.mxu2  ;;  %v4607_v5 = vpop.f32.mrf.mxu0 }
 0x4c6   : > { %v5191_v57 = vpop.f32.mrf.mxu3  ;;  %v4994_v29 = vadd.f32 %v4956_v26, %v4755_v7  ;;  %v4756_v3 = vpop.f32.mrf.mxu1 }
 0x4c7   : > { %v4757_v38 = vadd.f32 %v4756_v3, %v4607_v5 }
 0x4c8   : > { %v14629_v17 = vadd.f32 %v5191_v57, %v4994_v29 }
 0x4cd   : > { %v4958_v6 = vpop.f32.mrf.mxu2  ;;  %v4610_v36 = vpop.f32.mrf.mxu0 }
 0x4ce   : > { %v5193_v10 = vpop.f32.mrf.mxu3  ;;  %v4995_v51 = vadd.f32 %v4958_v6, %v4757_v38  ;;  %v4759_v44 = vpop.f32.mrf.mxu1 }
 0x4cf   : > { %v4760_v48 = vadd.f32 %v4759_v44, %v4610_v36 }
 0x4d0   : > { %v14631_v55 = vadd.f32 %v5193_v10, %v4995_v51  ;;  %10401 = vmatmul.msk.bf16.gmra.mxu0 %vm402_vm0, %v14381_v33 }
 0x4d1   : > { %10429 = vmatmul.msk.bf16.gmra.mxu1 %vm402_vm0, %v14383_v4 }
 0x4d2   : > { %10457 = vmatmul.msk.bf16.gmra.mxu2 %vm402_vm0, %v14385_v37 }
 0x4d3   : > { %10485 = vmatmul.msk.bf16.gmra.mxu3 %vm402_vm0, %v14397_v62 }
 0x4d5   : > { %v4961_v24 = vpop.f32.mrf.mxu2  ;;  %v4612_v45 = vpop.f32.mrf.mxu0 }
 0x4d6   : > { %v5196_v52 = vpop.f32.mrf.mxu3  ;;  %v4996_v60 = vadd.f32 %v4961_v24, %v4760_v48  ;;  %v4761_v20 = vpop.f32.mrf.mxu1 }
 0x4d7   : > { %v4762_v9 = vadd.f32 %v4761_v20, %v4612_v45 }
 0x4d8   : > { %v14641_v21 = vadd.f32 %v5196_v52, %v4996_v60 }
 0x4dd   : > { %v4963_v8 = vpop.f32.mrf.mxu2  ;;  %v5355_v26 = vpop.f32.mrf.mxu0 }
 0x4de   : > { %v5198_v7 = vpop.f32.mrf.mxu3  ;;  %v4997_v33 = vadd.f32 %v4963_v8, %v4762_v9  ;;  %v5589_v57 = vpop.f32.mrf.mxu1  ;;  %v5435_v4 = vadd.f32 %v5355_v26, %v14395_v28 }
 0x4e0   : > { %v14644_v29 = vadd.f32 %v5198_v7, %v4997_v33  ;;  %v5669_v37 = vadd.f32 %v5589_v57, %v5435_v4  ;;  %10402 = vmatmul.msk.bf16.gmra.mxu0 %vm402_vm0, %v14397_v62 }
 0x4e1   : > { %10430 = vmatmul.msk.bf16.gmra.mxu1 %vm402_vm0, %v14399_v19 }
 0x4e2   : > { %10458 = vmatmul.msk.bf16.gmra.mxu2 %vm402_vm0, %v14401_v43 }
 0x4e3   : > { %10486 = vmatmul.msk.bf16.gmra.mxu3 %vm402_vm0, %v14415_v58 }
 0x4e5   : > { %v5824_v5 = vpop.f32.mrf.mxu2  ;;  %v5357_v6 = vpop.f32.mrf.mxu0 }
 0x4e6   : > { %v6058_v3 = vpop.f32.mrf.mxu3  ;;  %v5904_v38 = vadd.f32 %v5824_v5, %v5669_v37  ;;  %v5591_v28 = vpop.f32.mrf.mxu1  ;;  %v5436_v10 = vadd.f32 %v5357_v6, %v14403_v27 }
 0x4e8   : > { %v14655_v51 = vadd.f32 %v6058_v3, %v5904_v38  ;;  %v5670_v36 = vadd.f32 %v5591_v28, %v5436_v10 }
 0x4ed   : > { %v5826_v62 = vpop.f32.mrf.mxu2  ;;  %v5360_v19 = vpop.f32.mrf.mxu0 }
 0x4ee   : > { %v6060_v44 = vpop.f32.mrf.mxu3  ;;  %v5905_v48 = vadd.f32 %v5826_v62, %v5670_v36  ;;  %v5594_v24 = vpop.f32.mrf.mxu1  ;;  %v5437_v43 = vadd.f32 %v5360_v19, %v14413_v11 }
 0x4f0   : > { %v14658_v52 = vadd.f32 %v6060_v44, %v5905_v48  ;;  %v5671_v60 = vadd.f32 %v5594_v24, %v5437_v43  ;;  %10403 = vmatmul.msk.bf16.gmra.mxu0 %vm402_vm0, %v14415_v58  ;;  %v11921_v24 = vld [vmem:[%s15696_s3 + $0x80] sm:$0xff] }
 0x4f1   : > { %10431 = vmatmul.msk.bf16.gmra.mxu1 %vm402_vm0, %v14417_v46  ;;  %6290 = vmatpush.bf16.msra.mxu0 %v11921_v24  ;;  %v5965_v24 = vld [vmem:[#allocation2 + $0x189] sm:$0xff] }
 0x4f2   : > { %10459 = vmatmul.msk.bf16.gmra.mxu2 %vm402_vm0, %v14419_v63 }
 0x4f3   : > { %10487 = vmatmul.msk.bf16.gmra.mxu3 %vm402_vm0, %v14433_v0 }
 0x4f5   : > { %v5829_v27 = vpop.f32.mrf.mxu2  ;;  %v5362_v9 = vpop.f32.mrf.mxu0 }
 0x4f6   : > { %v6063_v45 = vpop.f32.mrf.mxu3  ;;  %v5906_v20 = vadd.f32 %v5829_v27, %v5671_v60  ;;  %v5596_v11 = vpop.f32.mrf.mxu1  ;;  %v5438_v8 = vadd.f32 %v5362_v9, %v14421_v30  ;;  %v15764_v60 = vld [vmem:[#allocation26_spill] sm:$0xff] }
 0x4f8   : > { %v14669_v7 = vadd.f32 %v6063_v45, %v5906_v20  ;;  %v5672_v33 = vadd.f32 %v5596_v11, %v5438_v8  ;;  %v15765_v11 = vld [vmem:[#allocation24_spill] sm:$0xff] }
 0x4fd   : > { %v5831_v58 = vpop.f32.mrf.mxu2  ;;  %v5365_v46 = vpop.f32.mrf.mxu0 }
 0x4fe   : > { %v6065_v26 = vpop.f32.mrf.mxu3  ;;  %v5907_v57 = vadd.f32 %v5831_v58, %v5672_v33  ;;  %v5599_v4 = vpop.f32.mrf.mxu1  ;;  %v5439_v63 = vadd.f32 %v5365_v46, %v14431_v32  ;;  %v15766_v46 = vld [vmem:[#allocation25_spill] sm:$0xff] }
 0x500   : > { %v14672_v37 = vadd.f32 %v6065_v26, %v5907_v57  ;;  %v5673_v5 = vadd.f32 %v5599_v4, %v5439_v63  ;;  %10404 = vmatmul.msk.bf16.gmra.mxu0 %vm402_vm0, %v14433_v0 }
 0x501   : > { %10432 = vmatmul.msk.bf16.gmra.mxu1 %vm402_vm0, %v14435_v1 }
 0x502   : > { %10460 = vmatmul.msk.bf16.gmra.mxu2 %vm402_vm0, %v14437_v42 }
 0x503   : > { %10488 = vmatmul.msk.bf16.gmra.mxu3 %vm402_vm0, %v14454_v56 }
 0x505   : > { %v5834_v30 = vpop.f32.mrf.mxu2  ;;  %v5367_v6 = vpop.f32.mrf.mxu0 }
 0x506   : > { %v6068_v3 = vpop.f32.mrf.mxu3  ;;  %v5908_v38 = vadd.f32 %v5834_v30, %v5673_v5  ;;  %v5601_v32 = vpop.f32.mrf.mxu1  ;;  %v5440_v28 = vadd.f32 %v5367_v6, %v14439_v50  ;;  %v15763_v50 = vld [vmem:[#allocation23_spill] sm:$0xff]  ;;  %v15768_v30 = vld [vmem:[#allocation28_spill] sm:$0xff]  ;;  %v15770_v6 = vld [vmem:[#allocation29_spill] sm:$0xff] }
 0x507   : > { %v15767_v5 = vld [vmem:[#allocation27_spill] sm:$0xff] }
 0x508   : > { %v14683_v10 = vadd.f32 %v6068_v3, %v5908_v38  ;;  %v5674_v36 = vadd.f32 %v5601_v32, %v5440_v28  ;;  %v15769_v3 = vld [vmem:[#allocation31_spill] sm:$0xff] }
 0x50d   : > { %v5836_v0 = vpop.f32.mrf.mxu2  ;;  %v5370_v1 = vpop.f32.mrf.mxu0 }
 0x50e   : > { %v6070_v62 = vpop.f32.mrf.mxu3  ;;  %v5909_v44 = vadd.f32 %v5836_v0, %v5674_v36  ;;  %v5604_v48 = vpop.f32.mrf.mxu1  ;;  %v5441_v42 = vadd.f32 %v5370_v1, %v14452_v41  ;;  %v15771_v36 = vld [vmem:[#allocation30_spill] sm:$0xff]  ;;  %v15773_v1 = vld [vmem:[#allocation33_spill] sm:$0xff] }
 0x510   : > { %v14686_v19 = vadd.f32 %v6070_v62, %v5909_v44  ;;  %v5675_v43 = vadd.f32 %v5604_v48, %v5441_v42  ;;  %10405 = vmatmul.msk.bf16.gmra.mxu0 %vm402_vm0, %v14454_v56  ;;  %v15772_v62 = vld [vmem:[#allocation32_spill] sm:$0xff] }
 0x511   : > { %10433 = vmatmul.msk.bf16.gmra.mxu1 %vm402_vm0, %v14456_v13  ;;  %v5964_v42 = vld [vmem:[#allocation2 + $0x181] sm:$0xff] }
 0x512   : > { %10461 = vmatmul.msk.bf16.gmra.mxu2 %vm402_vm0, %v15763_v50  ;;  %v5982_v50 = vpack.c.bf16 %v5965_v24, %v5964_v42 }
 0x513   : > { %10489 = vmatmul.msk.bf16.gmra.mxu3 %vm402_vm0, %v15764_v60 }
 0x515   : > { %v5839_v41 = vpop.f32.mrf.mxu2  ;;  %v5372_v20 = vpop.f32.mrf.mxu0 }
 0x516   : > { %v6073_v27 = vpop.f32.mrf.mxu3  ;;  %v5910_v45 = vadd.f32 %v5839_v41, %v5675_v43  ;;  %v5606_v9 = vpop.f32.mrf.mxu1  ;;  %v5442_v8 = vadd.f32 %v5372_v20, %v15765_v11  ;;  %v5498_v20 = vld [vmem:[#allocation2 + $0x18a] sm:$0xff]  ;;  %v5967_v11 = vld [vmem:[#allocation2 + $0x1a1] sm:$0xff] }
 0x518   : > { %v14700_v33 = vadd.f32 %v6073_v27, %v5910_v45  ;;  %v5676_v56 = vadd.f32 %v5606_v9, %v5442_v8  ;;  %v5732_v27 = vld [vmem:[#allocation2 + $0x198] sm:$0xff]  ;;  %v5497_v45 = vld [vmem:[#allocation2 + $0x182] sm:$0xff] }
 0x519   : > { %v5966_v9 = vld [vmem:[#allocation2 + $0x199] sm:$0xff]  ;;  %v14745_v8 = vpack.c.bf16 %v5498_v20, %v5497_v45 }
 0x51d   : > { %v5841_v58 = vpop.f32.mrf.mxu2  ;;  %v5375_v57 = vpop.f32.mrf.mxu0 }
 0x51e   : > { %v6075_v26 = vpop.f32.mrf.mxu3  ;;  %v5911_v13 = vadd.f32 %v5841_v58, %v5676_v56  ;;  %v14703_v4 = vadd.f32 %v5375_v57, %v15766_v46 }
 0x520   : > { %v14705_v63 = vadd.f32 %v6075_v26, %v5911_v13  ;;  %10406 = vmatmul.msk.bf16.gmra.mxu0 %vm402_vm0, %v15764_v60  ;;  %v6170_v26 = vld [vmem:[#allocation2 + $0x32] sm:$0xff]  ;;  %v6171_v13 = vld [vmem:[#allocation2 + $0x3a] sm:$0xff] }
 0x521   : > { %10434 = vmatmul.msk.bf16.gmra.mxu1 %vm402_vm0, %v15767_v5  ;;  %v6202_v57 = vpack.c.bf16 %v6171_v13, %v6170_v26  ;;  %v6181_v26 = vld [vmem:[#allocation2 + $0xb2] sm:$0xff] }
 0x522   : > { %10462 = vmatmul.msk.bf16.gmra.mxu2 %vm402_vm0, %v15768_v30 }
 0x523   : > { %10490 = vmatmul.msk.bf16.gmra.mxu3 %vm402_vm0, %v15769_v3 }
 0x525   : > { %v5377_v38 = vpop.f32.mrf.mxu0 }
 0x526   : > { %v14716_v32 = vadd.f32 %v5377_v38, %v15770_v6  ;;  %v6173_v38 = vld [vmem:[#allocation2 + $0x52] sm:$0xff] }
 0x52d   : > { %v5380_v28 = vpop.f32.mrf.mxu0 }
 0x52e   : > { %v14719_v0 = vadd.f32 %v5380_v28, %v15771_v36 }
 0x530   : > { %10407 = vmatmul.msk.bf16.gmra.mxu0 %vm402_vm0, %v15769_v3  ;;  %v6172_v3 = vld [vmem:[#allocation2 + $0x4a] sm:$0xff] }
 0x531   : > { %10435 = vmatmul.msk.bf16.gmra.mxu1 %vm402_vm0, %v15772_v62  ;;  %v6203_v6 = vpack.c.bf16 %v6173_v38, %v6172_v3 }
 0x532   : > { %10463 = vmatmul.msk.bf16.gmra.mxu2 %vm402_vm0, %v14506_v61 }
 0x533   : > { %10491 = vmatmul.msk.bf16.gmra.mxu3 %vm402_vm0, %v14526_v34 }
 0x535   : > { %v5382_v44 = vpop.f32.mrf.mxu0 }
 0x536   : > { %v14730_v48 = vadd.f32 %v5382_v44, %v15773_v1  ;;  %v6175_v44 = vld [vmem:[#allocation2 + $0x6a] sm:$0xff] }
 0x53d   : > { %v5385_v43 = vpop.f32.mrf.mxu0 }
 0x53e   : > { %v14733_v60 = vadd.f32 %v5385_v43, %v14524_v59  ;;  %v5733_v59 = vld [vmem:[#allocation2 + $0x1a0] sm:$0xff] }
 0x53f   : > { %v5749_v56 = vpack.c.bf16 %v5733_v59, %v5732_v27  ;;  %v6179_v59 = vld [vmem:[#allocation2 + $0x9a] sm:$0xff] }
 0x540   : > { %10408 = vmatmul.msk.bf16.gmra.mxu0 %vm402_vm0, %v14526_v34 }
 0x541   : > { %10436 = vmatmul.msk.bf16.gmra.mxu1 %vm402_vm0, %v14528_v22  ;;  %v5983_v22 = vpack.c.bf16 %v5967_v11, %v5966_v9 }
 0x542   : > { %10464 = vmatmul.msk.bf16.gmra.mxu2 %vm402_vm0, %v14530_v16 }
 0x543   : > { %10492 = vmatmul.msk.bf16.gmra.mxu3 %vm402_vm0, %v5982_v50 }
 0x545   : > { %v5387_v61 = vpop.f32.mrf.mxu0 }
 0x546   : > { %v14743_v41 = vadd.f32 %v5387_v61, %v14532_v31 }
 0x54d   : > { %v5390_v34 = vpop.f32.mrf.mxu0 }
 0x54e   : > { %v14748_v58 = vadd.f32 %v5390_v34, %v14542_v35 }
 0x550   : > { %10409 = vmatmul.msk.bf16.gmra.mxu0 %vm402_vm0, %v5982_v50  ;;  %v6177_v50 = vld [vmem:[#allocation2 + $0x82] sm:$0xff] }
 0x551   : > { %10437 = vmatmul.msk.bf16.gmra.mxu1 %vm402_vm0, %v14745_v8 }
 0x552   : > { %10465 = vmatmul.msk.bf16.gmra.mxu2 %vm402_vm0, %v5749_v56  ;;  %v14790_v56 = vpop.f32.mrf.mxu1 }
 0x553   : > { %10493 = vmatmul.msk.bf16.gmra.mxu3 %vm402_vm0, %v5983_v22  ;;  %v14795_v22 = vpop.f32.mrf.mxu2 }
 0x555   : > { %v5392_v16 = vpop.f32.mrf.mxu0 }
 0x556   : > { %v14756_v31 = vadd.f32 %v5392_v16, %v14544_v18  ;;  %v14797_v16 = vpop.f32.mrf.mxu3 }
 0x55d   : > { %v5395_v46 = vpop.f32.mrf.mxu0 }
 0x55e   : > { %v14759_v35 = vadd.f32 %v5395_v46, %v14554_v49  ;;  %v6174_v49 = vld [vmem:[#allocation2 + $0x62] sm:$0xff]  ;;  %v14807_v3 = vpop.f32.mrf.mxu3 }
 0x55f   : > { %v6204_v1 = vpack.c.bf16 %v6175_v44, %v6174_v49 }
 0x560   : > { %10506 = vmatmul.msk.bf16.vlgmr.msra.gmra.mxu0 %vm402_vm0, %v6202_v57 }
 0x565   : > { %v5397_v5 = vpop.f32.mrf.mxu0 }
 0x566   : > { %v14763_v30 = vadd.f32 %v5397_v5, %v14556_v53  ;;  %v14805_v5 = vpop.f32.mrf.mxu2  ;;  %v14816_v44 = vpop.f32.mrf.mxu3 }
 0x56d   : > { %v5400_v28 = vpop.f32.mrf.mxu0 }
 0x56e   : > { %v14766_v18 = vadd.f32 %v5400_v28, %v14566_v15  ;;  %v6176_v15 = vld [vmem:[#allocation2 + $0x7a] sm:$0xff]  ;;  %v6183_v28 = vld [vmem:[#allocation2 + $0xca] sm:$0xff]  ;;  %v14814_v49 = vpop.f32.mrf.mxu2 }
 0x56f   : > { %v6205_v61 = vpack.c.bf16 %v6177_v50, %v6176_v15 }
 0x570   : > { %10507 = vmatmul.msk.bf16.gmra.mxu0 %vm402_vm0, %v6203_v6  ;;  %v6182_v6 = vld [vmem:[#allocation2 + $0xc2] sm:$0xff] }
 0x575   : > { %v5402_v36 = vpop.f32.mrf.mxu0 }
 0x576   : > { %v14770_v62 = vadd.f32 %v5402_v36, %v14568_v14  ;;  %v14824_v15 = vpop.f32.mrf.mxu2 }
 0x578   : > { %15774 = vst [vmem:[#allocation23_spill] sm:$0xff] %v14770_v62 }
 0x57d   : > { %v5405_v42 = vpop.f32.mrf.mxu0 }
 0x57e   : > { %v14773_v53 = vadd.f32 %v5405_v42, %v14578_v25  ;;  %v6178_v25 = vld [vmem:[#allocation2 + $0x92] sm:$0xff] }
 0x57f   : > { %v6206_v9 = vpack.c.bf16 %v6179_v59, %v6178_v25 }
 0x580   : > { %15775 = vst [vmem:[#allocation26_spill] sm:$0xff] %v14773_v53  ;;  %10508 = vmatmul.msk.bf16.gmra.mxu0 %vm402_vm0, %v6204_v1  ;;  %v6723_v53 = vld [vmem:[#allocation3 + $0x2] sm:$0xff] }
 0x585   : > { %v5407_v24 = vpop.f32.mrf.mxu0 }
 0x586   : > { %v14777_v43 = vadd.f32 %v5407_v24, %v14580_v54 }
 0x588   : > { %15776 = vst [vmem:[#allocation24_spill] sm:$0xff] %v14777_v43  ;;  %v6572_v43 = vld [vmem:[#allocation3 + $0x1] sm:$0xff] }
 0x58d   : > { %v5410_v27 = vpop.f32.mrf.mxu0 }
 0x58e   : > { %v14780_v14 = vadd.f32 %v5410_v27, %v14593_v47  ;;  %v6184_v27 = vld [vmem:[#allocation2 + $0xda] sm:$0xff] }
 0x590   : > { %15777 = vst [vmem:[#allocation25_spill] sm:$0xff] %v14780_v14  ;;  %10509 = vmatmul.msk.bf16.gmra.mxu0 %vm402_vm0, %v6205_v61  ;;  %v14829_v61 = vpop.f32.mrf.mxu3  ;;  %v6552_v14 = vld [vmem:[#allocation3] sm:$0xff] }
 0x595   : > { %v5412_v45 = vpop.f32.mrf.mxu0 }
 0x596   : > { %v14784_v20 = vadd.f32 %v5412_v45, %v14595_v2  ;;  %v6180_v2 = vld [vmem:[#allocation2 + $0xaa] sm:$0xff]  ;;  %v6185_v45 = vld [vmem:[#allocation2 + $0xe2] sm:$0xff] }
 0x597   : > { %v6207_v13 = vpack.c.bf16 %v6181_v26, %v6180_v2  ;;  %v6209_v25 = vpack.c.bf16 %v6185_v45, %v6184_v27  ;;  %v11926_v26 = vld [vmem:[%s15698_s5 + $0x18] sm:$0xff] }
 0x598   : > { %15778 = vst [vmem:[#allocation27_spill] sm:$0xff] %v14784_v20  ;;  %6698 = vmatpush.bf16.msra.mxu2 %v11926_v26  ;;  %v11933_v26 = vld [vmem:[%s15698_s5 + $0x50] sm:$0xff] }
 0x59d   : > { %v5415_v11 = vpop.f32.mrf.mxu0 }
 0x59e   : > { %v14787_v54 = vadd.f32 %v5415_v11, %v14605_v23  ;;  %v14802_v23 = vpop.f32.mrf.mxu1  ;;  %v14836_v11 = vpop.f32.mrf.mxu2 }
 0x5a0   : > { %15779 = vst [vmem:[#allocation28_spill] sm:$0xff] %v14787_v54  ;;  %10510 = vmatmul.msk.bf16.gmra.mxu0 %vm402_vm0, %v6206_v9 }
 0x5a5   : > { %v5417_v34 = vpop.f32.mrf.mxu0 }
 0x5a6   : > { %v14793_v47 = vadd.f32 %v5417_v34, %v14607_v12  ;;  %v14812_v36 = vpop.f32.mrf.mxu1  ;;  %v14839_v34 = vpop.f32.mrf.mxu3 }
 0x5a8   : > { %15780 = vst [vmem:[#allocation31_spill] sm:$0xff] %v14793_v47 }
 0x5ad   : > { %v5420_v57 = vpop.f32.mrf.mxu0 }
 0x5ae   : > { %v14800_v46 = vadd.f32 %v5420_v57, %v14617_v40  ;;  %v6208_v40 = vpack.c.bf16 %v6183_v28, %v6182_v6  ;;  %v14822_v24 = vpop.f32.mrf.mxu1  ;;  %v6187_v6 = vld [vmem:[#allocation2 + $0xfa] sm:$0xff]  ;;  %v14857_v28 = vpop.f32.mrf.mxu3 }
 0x5b0   : > { %15781 = vst [vmem:[#allocation29_spill] sm:$0xff] %v14800_v46  ;;  %10511 = vmatmul.msk.bf16.gmra.mxu0 %vm402_vm0, %v6207_v13  ;;  %v11934_v13 = vld [vmem:[%s15698_s5 + $0x58] sm:$0xff] }
 0x5b1   : > { %6784 = vmatpush.bf16.msra.mxu3 %v11934_v13  ;;  %v14878_v13 = vld [vmem:[%s15697_s4] ss:$0 sm:$0xff] }
 0x5b5   : > { %v5422_v12 = vpop.f32.mrf.mxu0  ;;  %6785 = vmatpush.bf16.msra.mxu3 %v11933_v26 }
 0x5b6   : > { %v14810_v38 = vadd.f32 %v5422_v12, %v14619_v39  ;;  %v14831_v9 = vpop.f32.mrf.mxu1  ;;  %v14855_v12 = vpop.f32.mrf.mxu2 }
 0x5b7   : > { %v14864_v45 = vpop.f32.mrf.mxu3 }
 0x5b8   : > { %15782 = vst [vmem:[#allocation30_spill] sm:$0xff] %v14810_v38  ;;  %v11923_v38 = vld [vmem:[%s15698_s5] sm:$0xff] }
 0x5bd   : > { %v5425_v1 = vpop.f32.mrf.mxu0 }
 0x5be   : > { %v14819_v42 = vadd.f32 %v5425_v1, %v14629_v17  ;;  %v14853_v57 = vpop.f32.mrf.mxu1  ;;  %v14862_v27 = vpop.f32.mrf.mxu2 }
 0x5c0   : > { %15783 = vst [vmem:[#allocation32_spill] sm:$0xff] %v14819_v42  ;;  %10512 = vmatmul.msk.bf16.gmra.mxu0 %vm402_vm0, %v6208_v40  ;;  %v11927_v42 = vld [vmem:[%s15698_s5 + $0x20] sm:$0xff] }
 0x5c5   : > { %v5427_v39 = vpop.f32.mrf.mxu0 }
 0x5c6   : > { %v14827_v50 = vadd.f32 %v5427_v39, %v14631_v55  ;;  %v14860_v39 = vpop.f32.mrf.mxu1  ;;  %v14892_v26 = vpop.f32.mrf.mxu2 }
 0x5c8   : > { %15784 = vst [vmem:[#allocation33_spill] sm:$0xff] %v14827_v50 }
 0x5cd   : > { %v5430_v59 = vpop.f32.mrf.mxu0 }
 0x5ce   : > { %v14834_v17 = vadd.f32 %v5430_v59, %v14641_v21  ;;  %v11930_v21 = vld [vmem:[%s15698_s5 + $0x38] sm:$0xff]  ;;  %v11929_v59 = vld [vmem:[%s15698_s5 + $0x30] sm:$0xff] }
 0x5cf   : > { %6633 = vmatpush.bf16.msra.mxu1 %v11930_v21  ;;  %v6188_v21 = vld [vmem:[#allocation2 + $0x10a] sm:$0xff] }
 0x5d0   : > { %15785 = vst [vmem:[#allocation34_spill] sm:$0xff] %v14834_v17  ;;  %10513 = vmatmul.msk.bf16.gmra.mxu0 %vm402_vm0, %v6209_v25 }
 0x5d3   : > { %6634 = vmatpush.bf16.msra.mxu1 %v11929_v59  ;;  %v11932_v59 = vld [vmem:[%s15698_s5 + $0x48] sm:$0xff] }
 0x5d4   : > { %6786 = vmatpush.bf16.msra.mxu3 %v11932_v59 }
 0x5d5   : > { %v5432_v2 = vpop.f32.mrf.mxu0 }
 0x5d6   : > { %v14842_v55 = vadd.f32 %v5432_v2, %v14644_v29  ;;  %v6186_v29 = vld [vmem:[#allocation2 + $0xf2] sm:$0xff] }
 0x5d7   : > { %v6210_v40 = vpack.c.bf16 %v6187_v6, %v6186_v29  ;;  %v11925_v2 = vld [vmem:[%s15698_s5 + $0x10] sm:$0xff] }
 0x5d8   : > { %15786 = vst [vmem:[#allocation35_spill] sm:$0xff] %v14842_v55  ;;  %6699 = vmatpush.bf16.msra.mxu2 %v11925_v2  ;;  %v6189_v29 = vld [vmem:[#allocation2 + $0x112] sm:$0xff]  ;;  %v11924_v55 = vld [vmem:[%s15698_s5 + $0x8] sm:$0xff]  ;;  %v14890_v2 = vpop.f32.mrf.mxu1 }
 0x5d9   : > { %v6211_v50 = vpack.c.bf16 %v6189_v29, %v6188_v21  ;;  %v14905_v21 = vpop.f32.mrf.mxu3 }
 0x5dc   : > { %6700 = vmatpush.bf16.msra.mxu2 %v11924_v55  ;;  %v11931_v55 = vld [vmem:[%s15698_s5 + $0x40] sm:$0xff] }
 0x5dd   : > { %v6292_v1 = vpop.f32.mrf.mxu0  ;;  %6787 = vmatpush.bf16.msra.mxu3 %v11931_v55 }
 0x5de   : > { %v6372_v6 = vadd.f32 %v6292_v1, %v14655_v51 }
 0x5e0   : > { %10514 = vmatmul.msk.bf16.gmra.mxu0 %vm402_vm0, %v6210_v40  ;;  %v11928_v40 = vld [vmem:[%s15698_s5 + $0x28] sm:$0xff]  ;;  %v6408_v1 = vadd.f32 %v14878_v13, %v6372_v6  ;;  %6701 = vmatpush.bf16.msra.mxu2 %v11923_v38  ;;  %v14910_v47 = vpop.f32.mrf.mxu1 }
 0x5e1   : > { %6635 = vmatpush.bf16.msra.mxu1 %v11928_v40  ;;  %v14918_v38 = vpop.f32.mrf.mxu3 }
 0x5e5   : > { %v6294_v25 = vpop.f32.mrf.mxu0  ;;  %6636 = vmatpush.bf16.msra.mxu1 %v11927_v42 }
 0x5e6   : > { %v6373_v6 = vadd.f32 %v6294_v25, %v14658_v52 }
 0x5e8   : > { %v6409_v46 = vadd.f32 %v14878_v13, %v6373_v6  ;;  %v14921_v6 = vpop.f32.mrf.mxu1 }
 0x5ea   : > { %v6441_v52 = vmax.f32 %v6409_v46, 0.0  ;;  %v6192_v46 = vld [vmem:[#allocation2 + $0x13a] sm:$0xff] }
 0x5ed   : > { %v6297_v51 = vpop.f32.mrf.mxu0 }
 0x5ee   : > { %v6374_v17 = vadd.f32 %v6297_v51, %v14669_v7  ;;  %v6440_v7 = vmax.f32 %v6408_v1, 0.0  ;;  %v6191_v1 = vld [vmem:[#allocation2 + $0x12a] sm:$0xff] }
 0x5f0   : > { %v6410_v29 = vadd.f32 %v14878_v13, %v6374_v17  ;;  %10515 = vmatmul.msk.bf16.gmra.mxu0 %vm402_vm0, %v6211_v50  ;;  %v14915_v17 = vpop.f32.mrf.mxu2  ;;  %v6190_v50 = vld [vmem:[#allocation2 + $0x122] sm:$0xff] }
 0x5f2   : > { %v6442_v40 = vmax.f32 %v6410_v29, 0.0  ;;  %v6212_v29 = vpack.c.bf16 %v6191_v1, %v6190_v50  ;;  %v14929_v50 = vpop.f32.mrf.mxu1 }
 0x5f4   : > { %v6472_v59 = vmax.f32 %v6440_v7, %v6442_v40  ;;  %v14926_v40 = vpop.f32.mrf.mxu3 }
 0x5f5   : > { %v6299_v51 = vpop.f32.mrf.mxu0  ;;  %15787 = vst [vmem:[#allocation36_spill] sm:$0xff] %v14926_v40 }
 0x5f6   : > { %6488 = vst.msk [vmem:[#allocation5] sm:$0xff] %vm458_vm2, %v6472_v59  ;;  %v6375_v54 = vadd.f32 %v6299_v51, %v14672_v37 }
 0x5f8   : > { %v6411_v42 = vadd.f32 %v14878_v13, %v6375_v54  ;;  %v14924_v37 = vpop.f32.mrf.mxu2 }
 0x5fa   : > { %v6443_v25 = vmax.f32 %v6411_v42, 0.0  ;;  %v6193_v42 = vld [vmem:[#allocation2 + $0x142] sm:$0xff] }
 0x5fc   : > { %v6473_v55 = vmax.f32 %v6441_v52, %v6443_v25  ;;  %v6213_v25 = vpack.c.bf16 %v6193_v42, %v6192_v46 }
 0x5fd   : > { %v6302_v7 = vpop.f32.mrf.mxu0 }
 0x5fe   : > { %6489 = vst.msk [vmem:[#allocation5 + $0x8] sm:$0xff] %vm458_vm2, %v6473_v55  ;;  %v6376_v1 = vadd.f32 %v6302_v7, %v14683_v10  ;;  %v14934_v55 = vpop.f32.mrf.mxu3 }
 0x5ff   : > { %15788 = vst [vmem:[#allocation37_spill] sm:$0xff] %v14934_v55 }
 0x600   : > { %10516 = vmatmul.msk.bf16.gmra.mxu0 %vm402_vm0, %v6212_v29  ;;  %v14932_v52 = vpop.f32.mrf.mxu2  ;;  %v6412_v40 = vadd.f32 %v14878_v13, %v6376_v1 }
 0x602   : > { %v6444_v55 = vmax.f32 %v6412_v40, 0.0 }
 0x605   : > { %v6504_v54 = vld [vmem:[#allocation5] ss:$2 sm:$0xff]  ;;  %v6520_v59 = vld [vmem:[#allocation5 + $0x1] ss:$2 sm:$0xff]  ;;  %v6304_v51 = vpop.f32.mrf.mxu0 }
 0x606   : > { %v6535_v20 = vmax.f32 %v6504_v54, %v6520_v59  ;;  %v6377_v1 = vadd.f32 %v6304_v51, %v14686_v19  ;;  %v14960_v19 = vpop.f32.mrf.mxu3  ;;  %v6194_v51 = vld [vmem:[#allocation2 + $0x152] sm:$0xff] }
 0x608   : > { %6544 = vst.msk [vmem:[#allocation3 + $0x11] sm:$0xff] %vm458_vm2, %v6535_v20 }
 0x60d   : > { %v6307_v29 = vpop.f32.mrf.mxu0 }
 0x60e   : > { %v6378_v54 = vadd.f32 %v6307_v29, %v14700_v33  ;;  %v14953_v29 = vpop.f32.mrf.mxu1 }
 0x60f   : > { %v14938_v20 = vld [vmem:[#allocation3 + $0x11] sm:$0xff]  ;;  %15789 = vst [vmem:[#allocation38_spill] sm:$0xff] %v14953_v29 }
 0x610   : > { %v14940_v59 = vld [vmem:[#allocation3 + $0x10] sm:$0xff]  ;;  %v6414_v10 = vadd.f32 %v14878_v13, %v6378_v54  ;;  %10517 = vmatmul.msk.bf16.gmra.mxu0 %vm402_vm0, %v6213_v25  ;;  %v6580_v7 = vpack.c.bf16 %v14938_v20, %v6572_v43  ;;  %v14955_v25 = vpop.f32.mrf.mxu2 }
 0x611   : > { %v14942_v62 = vld [vmem:[#allocation3 + $0x12] sm:$0xff]  ;;  %v6560_v46 = vpack.c.bf16 %v14940_v59, %v6552_v14  ;;  %v6413_v14 = vadd.f32 %v14878_v13, %v6377_v1 }
 0x612   : > { %v6731_v42 = vpack.c.bf16 %v14942_v62, %v6723_v53  ;;  %v6446_v33 = vmax.f32 %v6414_v10, 0.0  ;;  %10546 = vmatmul.msk.bf16.vlgmr.msra.gmra.mxu1 %vm458_vm2, %v6580_v7  ;;  %v6195_v10 = vld [vmem:[#allocation2 + $0x15a] sm:$0xff] }
 0x613   : > { %10566 = vmatmul.msk.bf16.vlgmr.msra.gmra.mxu2 %vm458_vm2, %v6560_v46  ;;  %v6445_v7 = vmax.f32 %v6413_v14, 0.0  ;;  %v6214_v29 = vpack.c.bf16 %v6195_v10, %v6194_v51  ;;  %v5679_v51 = vadd.f32 %v14812_v36, %v14719_v0 }
 0x614   : > { %10594 = vmatmul.msk.bf16.vlgmr.msra.gmra.mxu3 %vm458_vm2, %v6731_v42  ;;  %v6474_v54 = vmax.f32 %v6444_v55, %v6446_v33 }
 0x615   : > { %v6309_v43 = vpop.f32.mrf.mxu0 }
 0x616   : > { %6490 = vst.msk [vmem:[#allocation5 + $0x10] sm:$0xff] %vm458_vm2, %v6474_v54  ;;  %v6379_v53 = vadd.f32 %v6309_v43, %v14705_v63  ;;  %v14963_v33 = vpop.f32.mrf.mxu1  ;;  %v14969_v63 = vpop.f32.mrf.mxu3  ;;  %v5677_v54 = vadd.f32 %v14790_v56, %v14703_v4  ;;  %v5678_v4 = vadd.f32 %v14802_v23, %v14716_v32 }
 0x617   : > { %15790 = vst [vmem:[#allocation39_spill] sm:$0xff] %v14969_v63 }
 0x618   : > { %v6415_v40 = vadd.f32 %v14878_v13, %v6379_v53  ;;  %v14966_v1 = vpop.f32.mrf.mxu2  ;;  %v5912_v43 = vadd.f32 %v14795_v22, %v5677_v54  ;;  %v6196_v22 = vld [vmem:[#allocation2 + $0x16a] sm:$0xff]  ;;  %v5913_v63 = vadd.f32 %v14805_v5, %v5678_v4 }
 0x61a   : > { %v6447_v46 = vmax.f32 %v6415_v40, 0.0  ;;  %v6147_v32 = vadd.f32 %v14807_v3, %v5913_v63 }
 0x61c   : > { %v6475_v42 = vmax.f32 %v6445_v7, %v6447_v46  ;;  %v6146_v7 = vadd.f32 %v14797_v16, %v5912_v43  ;;  %v5914_v46 = vadd.f32 %v14814_v49, %v5679_v51  ;;  %v5680_v49 = vadd.f32 %v14822_v24, %v14730_v48  ;;  %v15799_v48 = vld [vmem:[#allocation27_spill] sm:$0xff] }
 0x61d   : > { %v6312_v55 = vpop.f32.mrf.mxu0 }
 0x61e   : > { %6491 = vst.msk [vmem:[#allocation5 + $0x18] sm:$0xff] %vm458_vm2, %v6475_v42  ;;  %v14978_v42 = vpop.f32.mrf.mxu1  ;;  %v6380_v54 = vadd.f32 %v6312_v55, %v6146_v7  ;;  %v14986_v0 = vpop.f32.mrf.mxu3  ;;  %v6148_v16 = vadd.f32 %v14816_v44, %v5914_v46  ;;  %v5915_v23 = vadd.f32 %v14824_v15, %v5680_v49 }
 0x620   : > { %10518 = vmatmul.msk.bf16.gmra.mxu0 %vm402_vm0, %v6214_v29  ;;  %v14983_v56 = vpop.f32.mrf.mxu2  ;;  %v6197_v29 = vld [vmem:[#allocation2 + $0x172] sm:$0xff]  ;;  %v6149_v4 = vadd.f32 %v14829_v61, %v5915_v23  ;;  %v5681_v23 = vadd.f32 %v14831_v9, %v14733_v60  ;;  %v5682_v60 = vadd.f32 %v14853_v57, %v14743_v41 }
 0x621   : > { %v6215_v36 = vpack.c.bf16 %v6197_v29, %v6196_v22 }
 0x625   : > { %v6314_v14 = vpop.f32.mrf.mxu0  ;;  %v6506_v53 = vld [vmem:[#allocation5 + $0x10] ss:$2 sm:$0xff]  ;;  %v6522_v40 = vld [vmem:[#allocation5 + $0x11] ss:$2 sm:$0xff] }
 0x626   : > { %v6536_v10 = vmax.f32 %v6506_v53, %v6522_v40  ;;  %v6416_v53 = vadd.f32 %v14878_v13, %v6380_v54  ;;  %v15008_v15 = vpop.f32.mrf.mxu1  ;;  %v15013_v29 = vpop.f32.mrf.mxu3 }
 0x628   : > { %6545 = vst.msk [vmem:[#allocation3 + $0x21] sm:$0xff] %vm458_vm2, %v6536_v10  ;;  %v6448_v63 = vmax.f32 %v6416_v53, 0.0  ;;  %v6381_v10 = vadd.f32 %v6314_v14, %v6147_v32  ;;  %v15010_v46 = vpop.f32.mrf.mxu2 }
 0x62d   : > { %v6317_v43 = vpop.f32.mrf.mxu0 }
 0x62e   : > { %v6382_v40 = vadd.f32 %v6317_v43, %v6148_v16  ;;  %v6417_v16 = vadd.f32 %v14878_v13, %v6381_v10  ;;  %v15018_v53 = vpop.f32.mrf.mxu1  ;;  %v15023_v61 = vpop.f32.mrf.mxu3 }
 0x62f   : > { %v14994_v51 = vld [vmem:[#allocation3 + $0x21] sm:$0xff] }
 0x630   : > { %v14996_v55 = vld [vmem:[#allocation3 + $0x20] sm:$0xff]  ;;  %v6418_v44 = vadd.f32 %v14878_v13, %v6382_v40  ;;  %10519 = vmatmul.msk.bf16.gmra.mxu0 %vm402_vm0, %v6215_v36  ;;  %v6449_v43 = vmax.f32 %v6417_v16, 0.0  ;;  %v15020_v32 = vpop.f32.mrf.mxu2 }
 0x631   : > { %v14998_v5 = vld [vmem:[#allocation3 + $0x22] sm:$0xff] }
 0x632   : > { %v6450_v7 = vmax.f32 %v6418_v44, 0.0 }
 0x634   : > { %v6476_v22 = vmax.f32 %v6448_v63, %v6450_v7  ;;  %v5916_v63 = vadd.f32 %v14836_v11, %v5681_v23  ;;  %v6200_v11 = vld [vmem:[#allocation2 + $0x19a] sm:$0xff] }
 0x635   : > { %v6319_v54 = vpop.f32.mrf.mxu0 }
 0x636   : > { %6492 = vst.msk [vmem:[#allocation5 + $0x20] sm:$0xff] %vm458_vm2, %v6476_v22  ;;  %v6383_v36 = vadd.f32 %v6319_v54, %v6149_v4  ;;  %v5683_v22 = vadd.f32 %v14860_v39, %v14748_v58  ;;  %v15032_v54 = vpop.f32.mrf.mxu1  ;;  %v15041_v9 = vpop.f32.mrf.mxu3  ;;  %v5917_v58 = vadd.f32 %v14855_v12, %v5682_v60 }
 0x638   : > { %v6419_v49 = vadd.f32 %v14878_v13, %v6383_v36  ;;  %v15034_v36 = vpop.f32.mrf.mxu2 }
 0x63a   : > { %v6451_v40 = vmax.f32 %v6419_v49, 0.0  ;;  %v6150_v49 = vadd.f32 %v14839_v34, %v5916_v63  ;;  %v5684_v34 = vadd.f32 %v14890_v2, %v14756_v31 }
 0x63c   : > { %v6477_v14 = vmax.f32 %v6449_v43, %v6451_v40  ;;  %v6201_v43 = vld [vmem:[#allocation2 + $0x1a2] sm:$0xff]  ;;  %v5919_v41 = vadd.f32 %v14892_v26, %v5684_v34 }
 0x63d   : > { %v6322_v44 = vpop.f32.mrf.mxu0 }
 0x63e   : > { %6493 = vst.msk [vmem:[#allocation5 + $0x28] sm:$0xff] %vm458_vm2, %v6477_v14  ;;  %v6384_v40 = vadd.f32 %v6322_v44, %v6150_v49  ;;  %v6217_v14 = vpack.c.bf16 %v6201_v43, %v6200_v11  ;;  %v15056_v12 = vpop.f32.mrf.mxu1  ;;  %v6153_v60 = vadd.f32 %v14905_v21, %v5919_v41  ;;  %v5685_v21 = vadd.f32 %v14910_v47, %v14759_v35 }
 0x63f   : > { %v5686_v35 = vadd.f32 %v14921_v6, %v14763_v30 }
 0x640   : > { %10520 = vmatmul.msk.bf16.gmra.mxu0 %vm402_vm0, %v14745_v8  ;;  %v5918_v8 = vadd.f32 %v14862_v27, %v5683_v22  ;;  %v6420_v27 = vadd.f32 %v14878_v13, %v6384_v40  ;;  %v15072_v26 = vpop.f32.mrf.mxu2  ;;  %v5920_v41 = vadd.f32 %v14915_v17, %v5685_v21  ;;  %v15793_v21 = vld [vmem:[#allocation38_spill] sm:$0xff] }
 0x641   : > { %v5921_v17 = vadd.f32 %v14924_v37, %v5686_v35 }
 0x642   : > { %v6152_v39 = vadd.f32 %v14864_v45, %v5918_v8  ;;  %v6452_v22 = vmax.f32 %v6420_v27, 0.0  ;;  %v15078_v8 = vpop.f32.mrf.mxu3 }
 0x645   : > { %v6324_v10 = vpop.f32.mrf.mxu0  ;;  %v6508_v7 = vld [vmem:[#allocation5 + $0x20] ss:$2 sm:$0xff]  ;;  %v6524_v4 = vld [vmem:[#allocation5 + $0x21] ss:$2 sm:$0xff] }
 0x646   : > { %v6537_v16 = vmax.f32 %v6508_v7, %v6524_v4  ;;  %v6151_v7 = vadd.f32 %v14857_v28, %v5917_v58 }
 0x648   : > { %6546 = vst.msk [vmem:[#allocation3 + $0x31] sm:$0xff] %vm458_vm2, %v6537_v16  ;;  %v6385_v16 = vadd.f32 %v6324_v10, %v6151_v7 }
 0x64a   : > { %v6421_v40 = vadd.f32 %v14878_v13, %v6385_v16 }
 0x64d   : > { %v6327_v23 = vpop.f32.mrf.mxu0 }
 0x64e   : > { %v6386_v63 = vadd.f32 %v6327_v23, %v6152_v39  ;;  %v15086_v39 = vpop.f32.mrf.mxu1  ;;  %v15088_v23 = vpop.f32.mrf.mxu2 }
 0x64f   : > { %v15050_v57 = vld [vmem:[#allocation3 + $0x31] sm:$0xff] }
 0x650   : > { %v15052_v4 = vld [vmem:[#allocation3 + $0x30] sm:$0xff]  ;;  %v6422_v45 = vadd.f32 %v14878_v13, %v6386_v63  ;;  %10521 = vmatmul.msk.bf16.gmra.mxu0 %vm402_vm0, %v6217_v14  ;;  %v15062_v31 = vpack.c.bf16 %v15050_v57, %v14994_v51  ;;  %v6453_v14 = vmax.f32 %v6421_v40, 0.0  ;;  %v15090_v63 = vpop.f32.mrf.mxu3 }
 0x651   : > { %v15054_v44 = vld [vmem:[#allocation3 + $0x32] sm:$0xff]  ;;  %v15066_v28 = vpack.c.bf16 %v15052_v4, %v14996_v55 }
 0x652   : > { %v15070_v2 = vpack.c.bf16 %v15054_v44, %v14998_v5  ;;  %v6454_v49 = vmax.f32 %v6422_v45, 0.0  ;;  %10547 = vmatmul.msk.bf16.gmra.mxu1 %vm458_vm2, %v15062_v31 }
 0x653   : > { %10567 = vmatmul.msk.bf16.gmra.mxu2 %vm458_vm2, %v15066_v28 }
 0x654   : > { %10595 = vmatmul.msk.bf16.gmra.mxu3 %vm458_vm2, %v15070_v2  ;;  %v6478_v11 = vmax.f32 %v6452_v22, %v6454_v49 }
 0x655   : > { %v6329_v43 = vpop.f32.mrf.mxu0 }
 0x656   : > { %6494 = vst.msk [vmem:[#allocation5 + $0x30] sm:$0xff] %vm458_vm2, %v6478_v11  ;;  %v6387_v10 = vadd.f32 %v6329_v43, %v6153_v60  ;;  %v15096_v45 = vpop.f32.mrf.mxu1  ;;  %v15098_v22 = vpop.f32.mrf.mxu2  ;;  %v5687_v11 = vadd.f32 %v14929_v50, %v14766_v18 }
 0x658   : > { %v6423_v58 = vadd.f32 %v14878_v13, %v6387_v10  ;;  %v15102_v40 = vpop.f32.mrf.mxu3  ;;  %v6154_v10 = vadd.f32 %v14918_v38, %v5920_v41 }
 0x65a   : > { %v6455_v34 = vmax.f32 %v6423_v58, 0.0  ;;  %v5922_v58 = vadd.f32 %v14932_v52, %v5687_v11  ;;  %v15794_v52 = vld [vmem:[#allocation36_spill] sm:$0xff] }
 0x65c   : > { %v6479_v27 = vmax.f32 %v6453_v14, %v6455_v34  ;;  %v15791_v14 = vld [vmem:[#allocation37_spill] sm:$0xff] }
 0x65d   : > { %v6332_v7 = vpop.f32.mrf.mxu0  ;;  %v6156_v34 = vadd.f32 %v15791_v14, %v5922_v58 }
 0x65e   : > { %6495 = vst.msk [vmem:[#allocation5 + $0x38] sm:$0xff] %vm458_vm2, %v6479_v27  ;;  %v6388_v47 = vadd.f32 %v6332_v7, %v6154_v10  ;;  %v15792_v27 = vld [vmem:[#allocation23_spill] sm:$0xff] }
 0x65f   : > { %v5688_v18 = vadd.f32 %v15793_v21, %v15792_v27 }
 0x660   : > { %v6424_v38 = vadd.f32 %v14878_v13, %v6388_v47 }
 0x661   : > { %v5923_v11 = vadd.f32 %v14955_v25, %v5688_v18  ;;  %v15133_v25 = vpop.f32.mrf.mxu3 }
 0x662   : > { %v6456_v47 = vmax.f32 %v6424_v38, 0.0 }
 0x665   : > { %v6334_v16 = vpop.f32.mrf.mxu0  ;;  %v6510_v49 = vld [vmem:[#allocation5 + $0x30] ss:$2 sm:$0xff]  ;;  %v6526_v60 = vld [vmem:[#allocation5 + $0x31] ss:$2 sm:$0xff] }
 0x666   : > { %v6538_v43 = vmax.f32 %v6510_v49, %v6526_v60  ;;  %v15113_v49 = vpop.f32.mrf.mxu1  ;;  %v6155_v60 = vadd.f32 %v15794_v52, %v5921_v17 }
 0x668   : > { %6547 = vst.msk [vmem:[#allocation3 + $0x41] sm:$0xff] %vm458_vm2, %v6538_v43  ;;  %v15118_v43 = vpop.f32.mrf.mxu2  ;;  %v6389_v17 = vadd.f32 %v6334_v16, %v6155_v60 }
 0x669   : > { %v15143_v38 = vpop.f32.mrf.mxu3 }
 0x66a   : > { %v6425_v18 = vadd.f32 %v14878_v13, %v6389_v17 }
 0x66c   : > { %v6457_v35 = vmax.f32 %v6425_v18, 0.0  ;;  %v15796_v18 = vld [vmem:[#allocation25_spill] sm:$0xff] }
 0x66d   : > { %v6337_v50 = vpop.f32.mrf.mxu0 }
 0x66e   : > { %v6390_v41 = vadd.f32 %v6337_v50, %v6156_v34  ;;  %v6157_v34 = vadd.f32 %v14960_v19, %v5923_v11  ;;  %v15795_v19 = vld [vmem:[#allocation26_spill] sm:$0xff] }
 0x66f   : > { %v15120_v30 = vld [vmem:[#allocation3 + $0x41] sm:$0xff]  ;;  %v5689_v11 = vadd.f32 %v14963_v33, %v15795_v19  ;;  %v15798_v33 = vld [vmem:[#allocation24_spill] sm:$0xff] }
 0x670   : > { %v15122_v6 = vld [vmem:[#allocation3 + $0x40] sm:$0xff]  ;;  %v6426_v7 = vadd.f32 %v14878_v13, %v6390_v41  ;;  %v15138_v41 = vpop.f32.mrf.mxu1  ;;  %v15141_v58 = vpop.f32.mrf.mxu2  ;;  %v5690_v19 = vadd.f32 %v14978_v42, %v15798_v33 }
 0x671   : > { %v15124_v37 = vld [vmem:[#allocation3 + $0x42] sm:$0xff]  ;;  %v5924_v17 = vadd.f32 %v14966_v1, %v5689_v11 }
 0x672   : > { %v6458_v14 = vmax.f32 %v6426_v7, 0.0  ;;  %v5925_v1 = vadd.f32 %v14983_v56, %v5690_v19 }
 0x674   : > { %v6480_v27 = vmax.f32 %v6456_v47, %v6458_v14  ;;  %v15153_v14 = vpop.f32.mrf.mxu3 }
 0x675   : > { %v6339_v21 = vpop.f32.mrf.mxu0 }
 0x676   : > { %6496 = vst.msk [vmem:[#allocation5 + $0x40] sm:$0xff] %vm458_vm2, %v6480_v27  ;;  %v6391_v50 = vadd.f32 %v6339_v21, %v6157_v34 }
 0x678   : > { %v6427_v52 = vadd.f32 %v14878_v13, %v6391_v50  ;;  %v15148_v7 = vpop.f32.mrf.mxu1  ;;  %v15150_v47 = vpop.f32.mrf.mxu2  ;;  %v15797_v50 = vld [vmem:[#allocation39_spill] sm:$0xff] }
 0x67a   : > { %v6459_v10 = vmax.f32 %v6427_v52, 0.0  ;;  %v6158_v52 = vadd.f32 %v15797_v50, %v5924_v17 }
 0x67c   : > { %v6481_v16 = vmax.f32 %v6457_v35, %v6459_v10  ;;  %v5691_v10 = vadd.f32 %v15008_v15, %v15796_v18  ;;  %v5692_v15 = vadd.f32 %v15018_v53, %v15799_v48  ;;  %v6159_v18 = vadd.f32 %v14986_v0, %v5925_v1 }
 0x67d   : > { %v6342_v60 = vpop.f32.mrf.mxu0 }
 0x67e   : > { %6497 = vst.msk [vmem:[#allocation5 + $0x48] sm:$0xff] %vm458_vm2, %v6481_v16  ;;  %v5926_v16 = vadd.f32 %v15010_v46, %v5691_v10  ;;  %v6392_v3 = vadd.f32 %v6342_v60, %v6158_v52  ;;  %v5927_v42 = vadd.f32 %v15020_v32, %v5692_v15  ;;  %v15173_v60 = vpop.f32.mrf.mxu3 }
 0x680   : > { %v6160_v11 = vadd.f32 %v15013_v29, %v5926_v16  ;;  %v15164_v24 = vpop.f32.mrf.mxu1  ;;  %v6428_v46 = vadd.f32 %v14878_v13, %v6392_v3  ;;  %v6161_v52 = vadd.f32 %v15023_v61, %v5927_v42  ;;  %v15802_v61 = vld [vmem:[#allocation28_spill] sm:$0xff] }
 0x681   : > { %v5693_v42 = vadd.f32 %v15032_v54, %v15802_v61 }
 0x682   : > { %v6460_v32 = vmax.f32 %v6428_v46, 0.0 }
 0x685   : > { %v6344_v34 = vpop.f32.mrf.mxu0  ;;  %v6512_v27 = vld [vmem:[#allocation5 + $0x40] ss:$2 sm:$0xff]  ;;  %v6528_v21 = vld [vmem:[#allocation5 + $0x41] ss:$2 sm:$0xff] }
 0x686   : > { %v6539_v35 = vmax.f32 %v6512_v27, %v6528_v21  ;;  %v15168_v27 = vpop.f32.mrf.mxu2 }
 0x688   : > { %6548 = vst.msk [vmem:[#allocation3 + $0x51] sm:$0xff] %vm458_vm2, %v6539_v35  ;;  %v6393_v35 = vadd.f32 %v6344_v34, %v6159_v18 }
 0x68d   : > { %v6347_v17 = vpop.f32.mrf.mxu0 }
 0x68e   : > { %v6394_v21 = vadd.f32 %v6347_v17, %v6160_v11  ;;  %v6429_v11 = vadd.f32 %v14878_v13, %v6393_v35 }
 0x68f   : > { %v15175_v56 = vld [vmem:[#allocation3 + $0x51] sm:$0xff]  ;;  %v6638_v33 = vpop.f32.mrf.mxu1 }
 0x690   : > { %v15177_v29 = vld [vmem:[#allocation3 + $0x50] sm:$0xff]  ;;  %v6430_v48 = vadd.f32 %v14878_v13, %v6394_v21  ;;  %v15184_v53 = vpack.c.bf16 %v15175_v56, %v15120_v30  ;;  %v6461_v18 = vmax.f32 %v6429_v11, 0.0 }
 0x691   : > { %v15179_v10 = vld [vmem:[#allocation3 + $0x52] sm:$0xff]  ;;  %v15188_v3 = vpack.c.bf16 %v15177_v29, %v15122_v6 }
 0x692   : > { %15800 = vst [vmem:[#allocation37_spill] sm:$0xff] %v15184_v53  ;;  %v15192_v0 = vpack.c.bf16 %v15179_v10, %v15124_v37  ;;  %v6462_v50 = vmax.f32 %v6430_v48, 0.0  ;;  %10548 = vmatmul.msk.bf16.gmra.mxu1 %vm458_vm2, %v15184_v53 }
 0x693   : > { %10568 = vmatmul.msk.bf16.gmra.mxu2 %vm458_vm2, %v15188_v3 }
 0x694   : > { %15801 = vst [vmem:[#allocation23_spill] sm:$0xff] %v15192_v0  ;;  %10596 = vmatmul.msk.bf16.gmra.mxu3 %vm458_vm2, %v15192_v0  ;;  %v6482_v16 = vmax.f32 %v6460_v32, %v6462_v50  ;;  %v5928_v32 = vadd.f32 %v15034_v36, %v5693_v42 }
 0x695   : > { %v6349_v19 = vpop.f32.mrf.mxu0 }
 0x696   : > { %v6703_v1 = vpop.f32.mrf.mxu2  ;;  %6498 = vst.msk [vmem:[#allocation5 + $0x50] sm:$0xff] %vm458_vm2, %v6482_v16  ;;  %v6395_v34 = vadd.f32 %v6349_v19, %v6161_v52  ;;  %v15803_v16 = vld [vmem:[#allocation29_spill] sm:$0xff] }
 0x697   : > { %v6704_v15 = vadd.f32 %v6703_v1, %v6638_v33  ;;  %v6789_v17 = vpop.f32.mrf.mxu3  ;;  %v5695_v33 = vadd.f32 %v15086_v39, %v15803_v16  ;;  %v6162_v1 = vadd.f32 %v15041_v9, %v5928_v32  ;;  %v11941_v16 = vld [vmem:[%s15698_s5 + $0x90] sm:$0xff] }
 0x698   : > { %v6431_v46 = vadd.f32 %v14878_v13, %v6395_v34  ;;  %v15804_v34 = vld [vmem:[#allocation31_spill] sm:$0xff] }
 0x699   : > { %v15204_v21 = vadd.f32 %v6789_v17, %v6704_v15  ;;  %v5930_v11 = vadd.f32 %v15088_v23, %v5695_v33 }
 0x69a   : > { %v6463_v48 = vmax.f32 %v6431_v46, 0.0  ;;  %v15805_v46 = vld [vmem:[#allocation30_spill] sm:$0xff] }
 0x69b   : > { %v6164_v36 = vadd.f32 %v15090_v63, %v5930_v11  ;;  %v11942_v63 = vld [vmem:[%s15698_s5 + $0x98] sm:$0xff]  ;;  %v11936_v11 = vld [vmem:[%s15698_s5 + $0x68] sm:$0xff] }
 0x69c   : > { %v6483_v0 = vmax.f32 %v6461_v18, %v6463_v48  ;;  %v5696_v18 = vadd.f32 %v15096_v45, %v15805_v46  ;;  %v11946_v45 = vld [vmem:[%s15698_s5 + $0xb8] sm:$0xff]  ;;  %6972 = vmatpush.bf16.msrb.mxu2 %v11942_v63  ;;  %v11943_v46 = vld [vmem:[%s15698_s5 + $0xa0] sm:$0xff] }
 0x69d   : > { %v6352_v53 = vpop.f32.mrf.mxu0  ;;  %7066 = vmatpush.bf16.msrb.mxu3 %v11946_v45  ;;  %v15808_v45 = vld [vmem:[#allocation33_spill] sm:$0xff] }
 0x69e   : > { %6499 = vst.msk [vmem:[#allocation5 + $0x58] sm:$0xff] %vm458_vm2, %v6483_v0  ;;  %v5694_v0 = vadd.f32 %v15056_v12, %v15804_v34  ;;  %v6396_v15 = vadd.f32 %v6352_v53, %v6162_v1  ;;  %v5931_v23 = vadd.f32 %v15098_v22, %v5696_v18  ;;  %v11940_v34 = vld [vmem:[%s15698_s5 + $0x88] sm:$0xff]  ;;  %v15806_v18 = vld [vmem:[#allocation32_spill] sm:$0xff] }
 0x6a0   : > { %v5929_v54 = vadd.f32 %v15072_v26, %v5694_v0  ;;  %v6432_v39 = vadd.f32 %v14878_v13, %v6396_v15  ;;  %v11938_v26 = vld [vmem:[%s15698_s5 + $0x78] sm:$0xff]  ;;  %6973 = vmatpush.bf16.msrb.mxu2 %v11941_v16  ;;  %v11944_v0 = vld [vmem:[%s15698_s5 + $0xa8] sm:$0xff] }
 0x6a1   : > { %6878 = vmatpush.bf16.msrb.mxu1 %v11938_v26 }
 0x6a2   : > { %v6163_v9 = vadd.f32 %v15078_v8, %v5929_v54  ;;  %v6464_v42 = vmax.f32 %v6432_v39, 0.0  ;;  %v6165_v8 = vadd.f32 %v15102_v40, %v5931_v23  ;;  %v11945_v40 = vld [vmem:[%s15698_s5 + $0xb0] sm:$0xff]  ;;  %v5697_v39 = vadd.f32 %v15113_v49, %v15806_v18 }
 0x6a3   : > { %7067 = vmatpush.bf16.msrb.mxu3 %v11945_v40 }
 0x6a4   : > { %6974 = vmatpush.bf16.msrb.mxu2 %v11940_v34 }
 0x6a5   : > { %v6514_v35 = vld [vmem:[#allocation5 + $0x50] ss:$2 sm:$0xff]  ;;  %v6530_v50 = vld [vmem:[#allocation5 + $0x51] ss:$2 sm:$0xff]  ;;  %v6354_v52 = vpop.f32.mrf.mxu0 }
 0x6a6   : > { %v6540_v19 = vmax.f32 %v6514_v35, %v6530_v50  ;;  %v6397_v12 = vadd.f32 %v6354_v52, %v6163_v9  ;;  %v11937_v52 = vld [vmem:[%s15698_s5 + $0x70] sm:$0xff] }
 0x6a7   : > { %6879 = vmatpush.bf16.msrb.mxu1 %v11937_v52  ;;  %7068 = vmatpush.bf16.msrb.mxu3 %v11944_v0 }
 0x6a8   : > { %6549 = vst.msk [vmem:[#allocation3 + $0x61] sm:$0xff] %vm458_vm2, %v6540_v19  ;;  %v6433_v35 = vadd.f32 %v14878_v13, %v6397_v12 }
 0x6aa   : > { %v6465_v19 = vmax.f32 %v6433_v35, 0.0  ;;  %v15809_v35 = vld [vmem:[#allocation35_spill] sm:$0xff] }
 0x6ab   : > { %6880 = vmatpush.bf16.msrb.mxu1 %v11936_v11  ;;  %7069 = vmatpush.bf16.msrb.mxu3 %v11943_v46 }
 0x6ad   : > { %v6357_v17 = vpop.f32.mrf.mxu0 }
 0x6ae   : > { %v6398_v48 = vadd.f32 %v6357_v17, %v6164_v36  ;;  %v11935_v36 = vld [vmem:[%s15698_s5 + $0x60] sm:$0xff] }
 0x6af   : > { %v11939_v17 = vld [vmem:[%s15698_s5 + $0x80] sm:$0xff]  ;;  %6881 = vmatpush.bf16.msrb.mxu1 %v11935_v36  ;;  %v15285_v16 = vld [vmem:[#allocation3 + $0x61] sm:$0xff] }
 0x6b0   : > { %v6434_v61 = vadd.f32 %v14878_v13, %v6398_v48  ;;  %6975 = vmatpush.bf16.msrb.mxu2 %v11939_v17  ;;  %v5932_v48 = vadd.f32 %v15118_v43, %v5697_v39  ;;  %v15287_v40 = vld [vmem:[#allocation3 + $0x60] sm:$0xff] }
 0x6b2   : > { %v6466_v53 = vmax.f32 %v6434_v61, 0.0  ;;  %v6166_v26 = vadd.f32 %v15133_v25, %v5932_v48 }
 0x6b4   : > { %v6484_v22 = vmax.f32 %v6464_v42, %v6466_v53  ;;  %v15807_v42 = vld [vmem:[#allocation34_spill] sm:$0xff] }
 0x6b5   : > { %v6359_v32 = vpop.f32.mrf.mxu0  ;;  %v5699_v12 = vadd.f32 %v15148_v7, %v15807_v42  ;;  %v5700_v7 = vadd.f32 %v15164_v24, %v15809_v35  ;;  %v11951_v35 = vld [vmem:[%s15698_s5 + $0xe0] sm:$0xff] }
 0x6b6   : > { %6500 = vst.msk [vmem:[#allocation5 + $0x60] sm:$0xff] %vm458_vm2, %v6484_v22  ;;  %v6399_v50 = vadd.f32 %v6359_v32, %v6165_v8  ;;  %v5698_v8 = vadd.f32 %v15138_v41, %v15808_v45  ;;  %v15278_v32 = vpop.f32.mrf.mxu1  ;;  %v15289_v41 = vld [vmem:[#allocation3 + $0x62] sm:$0xff]  ;;  %v15811_v45 = vpack.c.bf16 %v14994_v51, %v14938_v20  ;;  %v15814_v20 = vpack.c.bf16 %v15120_v30, %v15050_v57 }
 0x6b7   : > { %v5934_v63 = vadd.f32 %v15150_v47, %v5699_v12  ;;  %v11954_v51 = vld [vmem:[%s15698_s5 + $0xf8] sm:$0xff]  ;;  %v11949_v57 = vld [vmem:[%s15698_s5 + $0xd0] sm:$0xff] }
 0x6b8   : > { %v6435_v33 = vadd.f32 %v14878_v13, %v6399_v50  ;;  %v5933_v49 = vadd.f32 %v15141_v58, %v5698_v8  ;;  %v15282_v50 = vpop.f32.mrf.mxu2  ;;  %7255 = vmatpush.bf16.msra.mxu2 %v11954_v51  ;;  %v11957_v30 = vld [vmem:[%s15698_s5 + $0x110] sm:$0xff] }
 0x6b9   : > { %v6168_v43 = vadd.f32 %v15153_v14, %v5934_v63  ;;  %v5935_v14 = vadd.f32 %v15168_v27, %v5700_v7  ;;  %v11955_v7 = vld [vmem:[%s15698_s5 + $0x100] sm:$0xff] }
 0x6ba   : > { %v6467_v1 = vmax.f32 %v6435_v33, 0.0  ;;  %v6167_v58 = vadd.f32 %v15143_v38, %v5933_v49  ;;  %v15293_v33 = vpop.f32.mrf.mxu3 }
 0x6bb   : > { %v6169_v36 = vadd.f32 %v15173_v60, %v5935_v14  ;;  %v15810_v60 = vpack.c.bf16 %v14996_v55, %v14940_v59  ;;  %v15813_v59 = vpack.c.bf16 %v15122_v6, %v15052_v4  ;;  %v11958_v55 = vld [vmem:[%s15698_s5 + $0x118] sm:$0xff]  ;;  %v11953_v4 = vld [vmem:[%s15698_s5 + $0xf0] sm:$0xff]  ;;  %v11952_v6 = vld [vmem:[%s15698_s5 + $0xe8] sm:$0xff] }
 0x6bc   : > { %v6485_v15 = vmax.f32 %v6465_v19, %v6467_v1  ;;  %7349 = vmatpush.bf16.msra.mxu3 %v11958_v55  ;;  %7256 = vmatpush.bf16.msra.mxu2 %v11953_v4 }
 0x6bd   : > { %v6362_v54 = vpop.f32.mrf.mxu0 }
 0x6be   : > { %6501 = vst.msk [vmem:[#allocation5 + $0x68] sm:$0xff] %vm458_vm2, %v6485_v15  ;;  %v6400_v22 = vadd.f32 %v6362_v54, %v6166_v26 }
 0x6c0   : > { %v6436_v47 = vadd.f32 %v14878_v13, %v6400_v22  ;;  %7350 = vmatpush.bf16.msra.mxu3 %v11957_v30  ;;  %7257 = vmatpush.bf16.msra.mxu2 %v11952_v6 }
 0x6c2   : > { %v6468_v27 = vmax.f32 %v6436_v47, 0.0  ;;  %v6921_v47 = vpack.c.bf16 %v15285_v16, %v15175_v56 }
 0x6c4   : > { %7258 = vmatpush.bf16.msra.mxu2 %v11951_v35 }
 0x6c5   : > { %v6516_v9 = vld [vmem:[#allocation5 + $0x60] ss:$2 sm:$0xff]  ;;  %v6532_v23 = vld [vmem:[#allocation5 + $0x61] ss:$2 sm:$0xff]  ;;  %v6364_v61 = vpop.f32.mrf.mxu0 }
 0x6c6   : > { %v6541_v53 = vmax.f32 %v6516_v9, %v6532_v23  ;;  %v6401_v15 = vadd.f32 %v6364_v61, %v6167_v58 }
 0x6c8   : > { %6550 = vst.msk [vmem:[#allocation3 + $0x71] sm:$0xff] %vm458_vm2, %v6541_v53  ;;  %v6437_v48 = vadd.f32 %v14878_v13, %v6401_v15 }
 0x6ca   : > { %v6469_v53 = vmax.f32 %v6437_v48, 0.0  ;;  %v7107_v48 = vld [vmem:[#allocation3 + $0x90] sm:$0xff] }
 0x6cd   : > { %v6367_v25 = vpop.f32.mrf.mxu0 }
 0x6ce   : > { %v6402_v52 = vadd.f32 %v6367_v25, %v6168_v43  ;;  %v11947_v43 = vld [vmem:[%s15698_s5 + $0xc0] sm:$0xff]  ;;  %v6827_v25 = vpack.c.bf16 %v15287_v40, %v15177_v29 }
 0x6cf   : > { %v15295_v19 = vld [vmem:[#allocation3 + $0x71] sm:$0xff]  ;;  %v6643_v46 = vpop.f32.mrf.mxu1 }
 0x6d0   : > { %v15297_v24 = vld [vmem:[#allocation3 + $0x70] sm:$0xff]  ;;  %v6438_v11 = vadd.f32 %v14878_v13, %v6402_v52  ;;  %v15304_v34 = vpack.c.bf16 %v15295_v19, %v15285_v16  ;;  %v7015_v52 = vpack.c.bf16 %v15289_v41, %v15179_v10 }
 0x6d1   : > { %v15299_v1 = vld [vmem:[#allocation3 + $0x72] sm:$0xff]  ;;  %v15308_v0 = vpack.c.bf16 %v15297_v24, %v15287_v40 }
 0x6d2   : > { %v15312_v38 = vpack.c.bf16 %v15299_v1, %v15289_v41  ;;  %v6470_v54 = vmax.f32 %v6438_v11, 0.0  ;;  %10549 = vmatmul.msk.bf16.gmra.mxu1 %vm458_vm2, %v15304_v34 }
 0x6d3   : > { %10569 = vmatmul.msk.bf16.gmra.mxu2 %vm458_vm2, %v15308_v0 }
 0x6d4   : > { %10597 = vmatmul.msk.bf16.gmra.mxu3 %vm458_vm2, %v15312_v38  ;;  %v6486_v17 = vmax.f32 %v6468_v27, %v6470_v54 }
 0x6d5   : > { %v6369_v18 = vpop.f32.mrf.mxu0 }
 0x6d6   : > { %v6708_v39 = vpop.f32.mrf.mxu2  ;;  %6502 = vst.msk [vmem:[#allocation5 + $0x70] sm:$0xff] %vm458_vm2, %v6486_v17  ;;  %v6403_v9 = vadd.f32 %v6369_v18, %v6169_v36  ;;  %v15817_v18 = vld [vmem:[#allocation23_spill] sm:$0xff] }
 0x6d7   : > { %v6709_v23 = vadd.f32 %v6708_v39, %v6643_v46  ;;  %v6794_v61 = vpop.f32.mrf.mxu3  ;;  %v15397_v58 = vpop.f32.mrf.mxu1  ;;  %v15816_v46 = vld [vmem:[#allocation37_spill] sm:$0xff] }
 0x6d8   : > { %v6439_v42 = vadd.f32 %v14878_v13, %v6403_v9  ;;  %v15812_v13 = vpack.c.bf16 %v14998_v5, %v14942_v62  ;;  %v11950_v62 = vld [vmem:[%s15698_s5 + $0xd8] sm:$0xff]  ;;  %v15815_v5 = vpack.c.bf16 %v15124_v37, %v15054_v44  ;;  %v11948_v44 = vld [vmem:[%s15698_s5 + $0xc8] sm:$0xff] }
 0x6d9   : > { %v15324_v12 = vadd.f32 %v6794_v61, %v6709_v23  ;;  %7161 = vmatpush.bf16.msra.mxu1 %v11950_v62  ;;  %v11956_v37 = vld [vmem:[%s15698_s5 + $0x108] sm:$0xff] }
 0x6da   : > { %v6471_v26 = vmax.f32 %v6439_v42, 0.0  ;;  %7351 = vmatpush.bf16.msra.mxu3 %v11956_v37  ;;  %v7201_v9 = vld [vmem:[#allocation3 + $0x91] sm:$0xff] }
 0x6db   : > { %v7295_v61 = vld [vmem:[#allocation3 + $0x92] sm:$0xff] }
 0x6dc   : > { %v6487_v63 = vmax.f32 %v6469_v53, %v6471_v26 }
 0x6dd   : > { %7162 = vmatpush.bf16.msra.mxu1 %v11949_v57  ;;  %v12018_v57 = vld [vmem:[#allocation7 + $0x1d4] sm:$0xf0] }
 0x6de   : > { %6503 = vst.msk [vmem:[#allocation5 + $0x78] sm:$0xff] %vm458_vm2, %v6487_v63  ;;  %7352 = vmatpush.bf16.msra.mxu3 %v11955_v7  ;;  %v15399_v14 = vpop.f32.mrf.mxu2 }
 0x6df   : > { %v15401_v56 = vpop.f32.mrf.mxu3 }
 0x6e1   : > { %7163 = vmatpush.bf16.msra.mxu1 %v11948_v44 }
 0x6e2   : > { %10622 = vmatmul.msk.bf16.vlgmr.msrb.gmra.mxu1 %vm458_vm2, %v15810_v60 }
 0x6e3   : > { %10650 = vmatmul.msk.bf16.vlgmr.msrb.gmra.mxu2 %vm458_vm2, %v15811_v45 }
 0x6e4   : > { %10678 = vmatmul.msk.bf16.vlgmr.msrb.gmra.mxu3 %vm458_vm2, %v15812_v13 }
 0x6e5   : > { %v6518_v8 = vld [vmem:[#allocation5 + $0x70] ss:$2 sm:$0xff]  ;;  %v6534_v22 = vld [vmem:[#allocation5 + $0x71] ss:$2 sm:$0xff]  ;;  %7164 = vmatpush.bf16.msra.mxu1 %v11947_v43 }
 0x6e6   : > { %v6542_v49 = vmax.f32 %v6518_v8, %v6534_v22 }
 0x6e8   : > { %6551 = vst.msk [vmem:[#allocation3 + $0x81] sm:$0xff] %vm458_vm2, %v6542_v49 }
 0x6ef   : > { %v6824_v29 = vld [vmem:[#allocation3 + $0x80] sm:$0xff] }
 0x6f0   : > { %v6918_v40 = vld [vmem:[#allocation3 + $0x81] sm:$0xff]  ;;  %v6828_v16 = vpack.c.bf16 %v6824_v29, %v15297_v24  ;;  %v12022_v24 = vld [vmem:[#allocation7 + $0x1f4] sm:$0xf0]  ;;  %v7111_v42 = vpack.c.bf16 %v7107_v48, %v6824_v29 }
 0x6f1   : > { %v7012_v11 = vld [vmem:[#allocation3 + $0x82] sm:$0xff]  ;;  %v6922_v10 = vpack.c.bf16 %v6918_v40, %v15295_v19  ;;  %v11016_v19 = vld [vmem:[#allocation7 + $0x1f0] sm:$0xf]  ;;  %v7205_v53 = vpack.c.bf16 %v7201_v9, %v6918_v40  ;;  %v10818_v9 = vld [vmem:[#allocation7 + $0xe8] sm:$0xf0] }
 0x6f2   : > { %10623 = vmatmul.msk.bf16.gmra.mxu1 %vm458_vm2, %v15813_v59  ;;  %v7016_v41 = vpack.c.bf16 %v7012_v11, %v15299_v1  ;;  %v11017_v1 = vor.u32 %v12022_v24, %v11016_v19  ;;  %v10880_v40 = vld [vmem:[#allocation7 + $0x60] sm:$0xf]  ;;  %v10826_v19 = vld [vmem:[#allocation7 + $0xf8] sm:$0xf0]  ;;  %v11987_v48 = vld [vmem:[#allocation7 + $0xe4] sm:$0xf] }
 0x6f3   : > { %10651 = vmatmul.msk.bf16.gmra.mxu2 %vm458_vm2, %v15814_v20 }
 0x6f4   : > { %10679 = vmatmul.msk.bf16.gmra.mxu3 %vm458_vm2, %v15815_v5  ;;  %7899 = vmatpush.bf16.msrb.mxu0 %v11017_v1  ;;  %v11000_v5 = vld [vmem:[#allocation7 + $0x1d0] sm:$0xf] }
 0x6f5   : > { %v11001_v4 = vor.u32 %v12018_v57, %v11000_v5 }
 0x702   : > { %10624 = vmatmul.msk.bf16.gmra.mxu1 %vm458_vm2, %v6827_v25 }
 0x703   : > { %10652 = vmatmul.msk.bf16.gmra.mxu2 %vm458_vm2, %v6921_v47  ;;  %v10888_v47 = vld [vmem:[#allocation7 + $0x70] sm:$0xf] }
 0x704   : > { %10680 = vmatmul.msk.bf16.gmra.mxu3 %vm458_vm2, %v7015_v52  ;;  %v11974_v52 = vld [vmem:[#allocation7 + $0x74] sm:$0xf0] }
 0x705   : > { %v10889_v29 = vor.u32 %v11974_v52, %v10888_v47  ;;  %v10802_v52 = vld [vmem:[#allocation7 + $0xc8] sm:$0xf0] }
 0x707   : > { %7647 = vmatpush.bf16.msrb.mxu3 %v10889_v29  ;;  %v10992_v29 = vld [vmem:[#allocation7 + $0x1c0] sm:$0xf] }
 0x70f   : > { %v6648_v27 = vpop.f32.mrf.mxu1 }
 0x712   : > { %10625 = vmatmul.msk.bf16.gmra.mxu1 %vm458_vm2, %v6828_v16 }
 0x713   : > { %10653 = vmatmul.msk.bf16.gmra.mxu2 %vm458_vm2, %v6922_v10 }
 0x714   : > { %10681 = vmatmul.msk.bf16.gmra.mxu3 %vm458_vm2, %v7016_v41 }
 0x716   : > { %v6713_v15 = vpop.f32.mrf.mxu2 }
 0x717   : > { %v6714_v54 = vadd.f32 %v6713_v15, %v6648_v27  ;;  %v6799_v36 = vpop.f32.mrf.mxu3  ;;  %v10824_v27 = vld [vmem:[#allocation7 + $0xf0] sm:$0xf]  ;;  %v11989_v15 = vld [vmem:[#allocation7 + $0xf4] sm:$0xf] }
 0x718   : > { %v10829_v1 = vor.u32 %v11989_v15, %v10826_v19  ;;  %v11964_v15 = vld [vmem:[#allocation7 + $0x24] sm:$0xf0]  ;;  %v10792_v19 = vld [vmem:[#allocation7 + $0xb0] sm:$0xf] }
 0x719   : > { %v15409_v17 = vadd.f32 %v6799_v36, %v6714_v54 }
 0x71a   : > { %7554 = vmatpush.bf16.msrb.mxu2 %v10829_v1  ;;  %v11981_v1 = vld [vmem:[#allocation7 + $0xb4] sm:$0xf] }
 0x71e   : > { %v15431_v39 = vpop.f32.mrf.mxu2 }
 0x71f   : > { %v15433_v23 = vpop.f32.mrf.mxu3 }
 0x722   : > { %10706 = vmatmul.msk.bf16.vlgmr.msra.gmra.mxu1 %vm458_vm2, %v15066_v28  ;;  %v11008_v28 = vld [vmem:[#allocation7 + $0x1e0] sm:$0xf] }
 0x723   : > { %10734 = vmatmul.msk.bf16.vlgmr.msra.gmra.mxu2 %vm458_vm2, %v15062_v31  ;;  %v15429_v31 = vpop.f32.mrf.mxu1 }
 0x724   : > { %10762 = vmatmul.msk.bf16.vlgmr.msra.gmra.mxu3 %vm458_vm2, %v15070_v2  ;;  %v12020_v2 = vld [vmem:[#allocation7 + $0x1e4] sm:$0xf0] }
 0x732   : > { %10707 = vmatmul.msk.bf16.gmra.mxu1 %vm458_vm2, %v15188_v3  ;;  %v11009_v3 = vor.u32 %v12020_v2, %v11008_v28  ;;  %v10816_v28 = vld [vmem:[#allocation7 + $0xe0] sm:$0xf] }
 0x733   : > { %10735 = vmatmul.msk.bf16.gmra.mxu2 %vm458_vm2, %v15816_v46  ;;  %v10872_v46 = vld [vmem:[#allocation7 + $0x50] sm:$0xf] }
 0x734   : > { %10763 = vmatmul.msk.bf16.gmra.mxu3 %vm458_vm2, %v15817_v18  ;;  %7900 = vmatpush.bf16.msrb.mxu0 %v11009_v3  ;;  %v11970_v18 = vld [vmem:[#allocation7 + $0x54] sm:$0xf0]  ;;  %v11988_v3 = vld [vmem:[#allocation7 + $0xe4] sm:$0xf0] }
 0x735   : > { %v10873_v2 = vor.u32 %v11970_v18, %v10872_v46 }
 0x738   : > { %7901 = vmatpush.bf16.msrb.mxu0 %v11001_v4  ;;  %v10856_v4 = vld [vmem:[#allocation7 + $0x30] sm:$0xf] }
 0x742   : > { %10708 = vmatmul.msk.bf16.gmra.mxu1 %vm458_vm2, %v15308_v0 }
 0x743   : > { %10736 = vmatmul.msk.bf16.gmra.mxu2 %vm458_vm2, %v15304_v34  ;;  %v7299_v34 = vpack.c.bf16 %v7295_v61, %v7012_v11  ;;  %v11972_v11 = vld [vmem:[#allocation7 + $0x64] sm:$0xf0]  ;;  %v10817_v61 = vor.u32 %v11988_v3, %v10816_v28  ;;  %v10794_v28 = vld [vmem:[#allocation7 + $0xb8] sm:$0xf0] }
 0x744   : > { %10764 = vmatmul.msk.bf16.gmra.mxu3 %vm458_vm2, %v15312_v38  ;;  %v10881_v10 = vor.u32 %v11972_v11, %v10880_v40  ;;  %v12016_v40 = vld [vmem:[#allocation7 + $0x1c4] sm:$0xf0]  ;;  %v10797_v3 = vor.u32 %v11981_v1, %v10794_v28 }
 0x746   : > { %7648 = vmatpush.bf16.msrb.mxu3 %v10881_v10  ;;  %v10848_v10 = vld [vmem:[#allocation7 + $0x20] sm:$0xf] }
 0x74a   : > { %7649 = vmatpush.bf16.msrb.mxu3 %v10873_v2 }
 0x74f   : > { %v6653_v0 = vpop.f32.mrf.mxu1 }
 0x752   : > { %10709 = vmatmul.msk.bf16.gmra.mxu1 %vm458_vm2, %v7111_v42  ;;  %v10864_v42 = vld [vmem:[#allocation7 + $0x40] sm:$0xf] }
 0x753   : > { %10737 = vmatmul.msk.bf16.gmra.mxu2 %vm458_vm2, %v7205_v53  ;;  %v11968_v53 = vld [vmem:[#allocation7 + $0x44] sm:$0xf0] }
 0x754   : > { %10765 = vmatmul.msk.bf16.gmra.mxu3 %vm458_vm2, %v7299_v34 }
 0x756   : > { %v6718_v38 = vpop.f32.mrf.mxu2 }
 0x757   : > { %v6719_v26 = vadd.f32 %v6718_v38, %v6653_v0  ;;  %v6804_v63 = vpop.f32.mrf.mxu3  ;;  %v15438_v60 = vpop.f32.mrf.mxu1  ;;  %v10821_v0 = vor.u32 %v11987_v48, %v10818_v9  ;;  %v10865_v38 = vor.u32 %v11968_v53, %v10864_v42  ;;  %v10840_v48 = vld [vmem:[#allocation7 + $0x10] sm:$0xf]  ;;  %v11962_v9 = vld [vmem:[#allocation7 + $0x14] sm:$0xf0] }
 0x758   : > { %v12014_v42 = vld [vmem:[#allocation7 + $0x1b4] sm:$0xf0] }
 0x759   : > { %v15440_v45 = vadd.f32 %v6804_v63, %v6719_v26  ;;  %7555 = vmatpush.bf16.msrb.mxu2 %v10821_v0  ;;  %v10808_v63 = vld [vmem:[#allocation7 + $0xd0] sm:$0xf]  ;;  %7650 = vmatpush.bf16.msrb.mxu3 %v10865_v38  ;;  %v10841_v0 = vor.u32 %v11962_v9, %v10840_v48  ;;  %v11980_v38 = vld [vmem:[#allocation7 + $0xa4] sm:$0xf0]  ;;  %v11975_v48 = vld [vmem:[#allocation7 + $0x84] sm:$0xf] }
 0x75e   : > { %v15442_v13 = vpop.f32.mrf.mxu2 }
 0x75f   : > { %v15444_v8 = vpop.f32.mrf.mxu3  ;;  %v6883_v22 = vpop.f32.mrf.mxu1 }
 0x760   : > { %v6903_v49 = vadd.f32 %v6883_v22, %v15204_v21  ;;  %v11986_v22 = vld [vmem:[#allocation7 + $0xd4] sm:$0xf0] }
 0x766   : > { %v6977_v59 = vpop.f32.mrf.mxu2 }
 0x767   : > { %v6997_v20 = vadd.f32 %v6977_v59, %v6903_v49  ;;  %v7071_v62 = vpop.f32.mrf.mxu3  ;;  %v15447_v51 = vpop.f32.mrf.mxu1  ;;  %v11985_v49 = vld [vmem:[#allocation7 + $0xd4] sm:$0xf] }
 0x769   : > { %v15449_v55 = vadd.f32 %v7071_v62, %v6997_v20  ;;  %v10809_v20 = vor.u32 %v11986_v22, %v10808_v63  ;;  %v10810_v62 = vld [vmem:[#allocation7 + $0xd8] sm:$0xf0]  ;;  %v10786_v63 = vld [vmem:[#allocation7 + $0xa8] sm:$0xf0] }
 0x76a   : > { %v10813_v57 = vor.u32 %v11985_v49, %v10810_v62  ;;  %v10832_v49 = vld [vmem:[#allocation7] sm:$0xf] }
 0x76c   : > { %7556 = vmatpush.bf16.msrb.mxu2 %v10813_v57 }
 0x76e   : > { %v15451_v30 = vpop.f32.mrf.mxu2 }
 0x76f   : > { %v15453_v44 = vpop.f32.mrf.mxu3  ;;  %v6888_v6 = vpop.f32.mrf.mxu1 }
 0x770   : > { %v6905_v37 = vadd.f32 %v6888_v6, %v15324_v12  ;;  %v11990_v12 = vld [vmem:[#allocation7 + $0xf4] sm:$0xf0] }
 0x771   : > { %v10825_v36 = vor.u32 %v11990_v12, %v10824_v27  ;;  %v11966_v6 = vld [vmem:[#allocation7 + $0x34] sm:$0xf0]  ;;  %v10993_v12 = vor.u32 %v12016_v40, %v10992_v29  ;;  %v11977_v40 = vld [vmem:[#allocation7 + $0x94] sm:$0xf] }
 0x772   : > { %v11978_v29 = vld [vmem:[#allocation7 + $0x94] sm:$0xf0] }
 0x773   : > { %7541 = vmatpush.bf16.msrb.mxu1 %v10825_v36  ;;  %v10849_v36 = vor.u32 %v11964_v15, %v10848_v10  ;;  %7902 = vmatpush.bf16.msrb.mxu0 %v10993_v12  ;;  %v10778_v12 = vld [vmem:[#allocation7 + $0x98] sm:$0xf0] }
 0x776   : > { %v6982_v43 = vpop.f32.mrf.mxu2 }
 0x777   : > { %v6999_v21 = vadd.f32 %v6982_v43, %v6905_v37  ;;  %v7076_v35 = vpop.f32.mrf.mxu3  ;;  %v15456_v7 = vpop.f32.mrf.mxu1  ;;  %7542 = vmatpush.bf16.msrb.mxu1 %v10817_v61  ;;  %v10857_v37 = vor.u32 %v11966_v6, %v10856_v4  ;;  %v10800_v43 = vld [vmem:[#allocation7 + $0xc0] sm:$0xf]  ;;  %v10984_v61 = vld [vmem:[#allocation7 + $0x1b0] sm:$0xf]  ;;  %v12012_v4 = vld [vmem:[#allocation7 + $0x1a4] sm:$0xf0] }
 0x778   : > { %v10985_v53 = vor.u32 %v12014_v42, %v10984_v61  ;;  %v12005_v6 = vld [vmem:[#allocation7 + $0x174] sm:$0xf]  ;;  %v10770_v61 = vld [vmem:[#allocation7 + $0x88] sm:$0xf0]  ;;  %v10890_v42 = vld [vmem:[#allocation7 + $0x78] sm:$0xf0] }
 0x779   : > { %v15458_v25 = vadd.f32 %v7076_v35, %v6999_v21  ;;  %v11984_v21 = vld [vmem:[#allocation7 + $0xc4] sm:$0xf0]  ;;  %v11983_v35 = vld [vmem:[#allocation7 + $0xc4] sm:$0xf]  ;;  %7651 = vmatpush.bf16.msrb.mxu3 %v10857_v37  ;;  %v10954_v37 = vld [vmem:[#allocation7 + $0x178] sm:$0xf0] }
 0x77a   : > { %v10801_v47 = vor.u32 %v11984_v21, %v10800_v43  ;;  %v10805_v11 = vor.u32 %v11983_v35, %v10802_v52  ;;  %7903 = vmatpush.bf16.msrb.mxu0 %v10985_v53  ;;  %v10776_v52 = vld [vmem:[#allocation7 + $0x90] sm:$0xf]  ;;  %v10773_v53 = vor.u32 %v11975_v48, %v10770_v61 }
 0x77b   : > { %7543 = vmatpush.bf16.msrb.mxu1 %v10809_v20  ;;  %v10976_v20 = vld [vmem:[#allocation7 + $0x1a0] sm:$0xf]  ;;  %v10777_v10 = vor.u32 %v11978_v29, %v10776_v52  ;;  %v10882_v52 = vld [vmem:[#allocation7 + $0x68] sm:$0xf0] }
 0x77c   : > { %7557 = vmatpush.bf16.msrb.mxu2 %v10805_v11  ;;  %v10977_v35 = vor.u32 %v12012_v4, %v10976_v20  ;;  %v10938_v20 = vld [vmem:[#allocation7 + $0x158] sm:$0xf0]  ;;  %v10944_v29 = vld [vmem:[#allocation7 + $0x160] sm:$0xf] }
 0x77d   : > { %7652 = vmatpush.bf16.msrb.mxu3 %v10849_v36  ;;  %v10781_v36 = vor.u32 %v11977_v40, %v10778_v12  ;;  %v10930_v12 = vld [vmem:[#allocation7 + $0x148] sm:$0xf0] }
 0x77e   : > { %v15460_v16 = vpop.f32.mrf.mxu2  ;;  %7904 = vmatpush.bf16.msrb.mxu0 %v10977_v35 }
 0x77f   : > { %v15462_v41 = vpop.f32.mrf.mxu3  ;;  %v6893_v54 = vpop.f32.mrf.mxu1  ;;  %7544 = vmatpush.bf16.msrb.mxu1 %v10801_v47  ;;  %v10957_v47 = vor.u32 %v12005_v6, %v10954_v37  ;;  %v11144_v37 = vld [vmem:[#allocation7 + $0x2f0] sm:$0xf] }
 0x780   : > { %v6907_v24 = vadd.f32 %v6893_v54, %v15409_v17  ;;  %7558 = vmatpush.bf16.msrb.mxu2 %v10797_v3  ;;  %v11976_v3 = vld [vmem:[#allocation7 + $0x84] sm:$0xf0] }
 0x781   : > { %7653 = vmatpush.bf16.msrb.mxu3 %v10841_v0  ;;  %v11973_v0 = vld [vmem:[#allocation7 + $0x74] sm:$0xf] }
 0x786   : > { %v6987_v34 = vpop.f32.mrf.mxu2 }
 0x787   : > { %v7001_v26 = vadd.f32 %v6987_v34, %v6907_v24  ;;  %v7081_v17 = vpop.f32.mrf.mxu3  ;;  %v15465_v59 = vpop.f32.mrf.mxu1  ;;  %v11982_v24 = vld [vmem:[#allocation7 + $0xb4] sm:$0xf0]  ;;  %v10784_v34 = vld [vmem:[#allocation7 + $0xa0] sm:$0xf] }
 0x788   : > { %v10793_v18 = vor.u32 %v11982_v24, %v10792_v19  ;;  %v10968_v19 = vld [vmem:[#allocation7 + $0x190] sm:$0xf]  ;;  %v12010_v24 = vld [vmem:[#allocation7 + $0x194] sm:$0xf0] }
 0x789   : > { %v15467_v5 = vadd.f32 %v7081_v17, %v7001_v26  ;;  %v11979_v26 = vld [vmem:[#allocation7 + $0xa4] sm:$0xf]  ;;  %v10785_v17 = vor.u32 %v11980_v38, %v10784_v34  ;;  %v10969_v1 = vor.u32 %v12010_v24, %v10968_v19  ;;  %v10893_v34 = vor.u32 %v11973_v0, %v10890_v42  ;;  %v10952_v38 = vld [vmem:[#allocation7 + $0x170] sm:$0xf]  ;;  %v11997_v42 = vld [vmem:[#allocation7 + $0x134] sm:$0xf] }
 0x78a   : > { %7545 = vmatpush.bf16.msrb.mxu1 %v10793_v18  ;;  %v10789_v22 = vor.u32 %v11979_v26, %v10786_v63  ;;  %v10946_v18 = vld [vmem:[#allocation7 + $0x168] sm:$0xf0]  ;;  %v12006_v26 = vld [vmem:[#allocation7 + $0x174] sm:$0xf0] }
 0x78b   : > { %7905 = vmatpush.bf16.msrb.mxu0 %v10969_v1  ;;  %v12052_v1 = vld [vmem:[#allocation7 + $0x2e4] sm:$0xf0] }
 0x78c   : > { %7559 = vmatpush.bf16.msrb.mxu2 %v10789_v22  ;;  %v10953_v22 = vor.u32 %v12006_v26, %v10952_v38 }
 0x78e   : > { %v15469_v27 = vpop.f32.mrf.mxu2  ;;  %7546 = vmatpush.bf16.msrb.mxu1 %v10785_v17  ;;  %v10960_v17 = vld [vmem:[#allocation7 + $0x180] sm:$0xf] }
 0x78f   : > { %v15471_v54 = vpop.f32.mrf.mxu3  ;;  %v6898_v46 = vpop.f32.mrf.mxu1 }
 0x790   : > { %v6909_v2 = vadd.f32 %v6898_v46, %v15440_v45  ;;  %v11960_v45 = vld [vmem:[#allocation7 + $0x4] sm:$0xf0]  ;;  %v12003_v46 = vld [vmem:[#allocation7 + $0x164] sm:$0xf]  ;;  %7560 = vmatpush.bf16.msrb.mxu2 %v10781_v36  ;;  %v11136_v36 = vld [vmem:[#allocation7 + $0x2e0] sm:$0xf] }
 0x791   : > { %v10833_v57 = vor.u32 %v11960_v45, %v10832_v49  ;;  %v10949_v28 = vor.u32 %v12003_v46, %v10946_v18  ;;  %v12008_v49 = vld [vmem:[#allocation7 + $0x184] sm:$0xf0]  ;;  %v12001_v45 = vld [vmem:[#allocation7 + $0x154] sm:$0xf]  ;;  %v11137_v46 = vor.u32 %v12052_v1, %v11136_v36 }
 0x792   : > { %7547 = vmatpush.bf16.msrb.mxu1 %v10777_v10  ;;  %v10961_v4 = vor.u32 %v12008_v49, %v10960_v17  ;;  %v10941_v6 = vor.u32 %v12001_v45, %v10938_v20  ;;  %v12004_v10 = vld [vmem:[#allocation7 + $0x164] sm:$0xf0]  ;;  %v11969_v18 = vld [vmem:[#allocation7 + $0x54] sm:$0xf]  ;;  %v11967_v45 = vld [vmem:[#allocation7 + $0x44] sm:$0xf] }
 0x793   : > { %7654 = vmatpush.bf16.msrb.mxu3 %v10833_v57  ;;  %v10866_v20 = vld [vmem:[#allocation7 + $0x48] sm:$0xf0] }
 0x794   : > { %7561 = vmatpush.bf16.msrb.mxu2 %v10773_v53  ;;  %7906 = vmatpush.bf16.msrb.mxu0 %v10961_v4  ;;  %v10922_v53 = vld [vmem:[#allocation7 + $0x138] sm:$0xf0] }
 0x795   : > { %v10925_v17 = vor.u32 %v11997_v42, %v10922_v53  ;;  %v11963_v53 = vld [vmem:[#allocation7 + $0x24] sm:$0xf] }
 0x796   : > { %v6992_v62 = vpop.f32.mrf.mxu2 }
 0x797   : > { %v7003_v43 = vadd.f32 %v6992_v62, %v6909_v2  ;;  %v7086_v21 = vpop.f32.mrf.mxu3  ;;  %v15474_v11 = vpop.f32.mrf.mxu1  ;;  %7785 = vmatpush.bf16.msra.mxu3 %v10957_v47  ;;  %v10768_v2 = vld [vmem:[#allocation7 + $0x80] sm:$0xf]  ;;  %v6706_v62 = vadd.f32 %v15282_v50, %v15278_v32  ;;  %v11971_v47 = vld [vmem:[#allocation7 + $0x64] sm:$0xf]  ;;  %v10945_v32 = vor.u32 %v12004_v10, %v10944_v29  ;;  %v10858_v10 = vld [vmem:[#allocation7 + $0x38] sm:$0xf0] }
 0x798   : > { %v10769_v9 = vor.u32 %v11976_v3, %v10768_v2  ;;  %7772 = vmatpush.bf16.msra.mxu2 %v10953_v22  ;;  %v10885_v40 = vor.u32 %v11971_v47, %v10882_v52  ;;  %v11999_v50 = vld [vmem:[#allocation7 + $0x144] sm:$0xf]  ;;  %v10936_v2 = vld [vmem:[#allocation7 + $0x150] sm:$0xf]  ;;  %v12050_v22 = vld [vmem:[#allocation7 + $0x2d4] sm:$0xf0] }
 0x799   : > { %v15476_v15 = vadd.f32 %v7086_v21, %v7003_v43  ;;  %v12054_v43 = vld [vmem:[#allocation7 + $0x2f4] sm:$0xf0]  ;;  %v6810_v19 = vadd.f32 %v15293_v33, %v6706_v62  ;;  %v10933_v24 = vor.u32 %v11999_v50, %v10930_v12  ;;  %v10928_v62 = vld [vmem:[#allocation7 + $0x140] sm:$0xf]  ;;  %v12048_v52 = vld [vmem:[#allocation7 + $0x2c4] sm:$0xf0] }
 0x79a   : > { %7548 = vmatpush.bf16.msrb.mxu1 %v10769_v9  ;;  %v11145_v35 = vor.u32 %v12054_v43, %v11144_v37  ;;  %v12002_v9 = vld [vmem:[#allocation7 + $0x154] sm:$0xf0]  ;;  %v12000_v37 = vld [vmem:[#allocation7 + $0x144] sm:$0xf0]  ;;  %v11120_v47 = vld [vmem:[#allocation7 + $0x2c0] sm:$0xf] }
 0x79b   : > { %7786 = vmatpush.bf16.msra.mxu3 %v10949_v28  ;;  %v10874_v28 = vld [vmem:[#allocation7 + $0x58] sm:$0xf0]  ;;  %v6904_v3 = vadd.f32 %v15447_v51, %v6810_v19  ;;  %v10937_v0 = vor.u32 %v12002_v9, %v10936_v2  ;;  %v10929_v43 = vor.u32 %v12000_v37, %v10928_v62  ;;  %v11121_v29 = vor.u32 %v12048_v52, %v11120_v47  ;;  %v15492_v12 = vld [vmem:[%s15699_s6] ss:$0 sm:$0xff]  ;;  %v11961_v37 = vld [vmem:[#allocation7 + $0x14] sm:$0xf] }
 0x79c   : > { %8153 = vmatpush.bf16.msra.mxu0 %v11145_v35  ;;  %7773 = vmatpush.bf16.msra.mxu2 %v10945_v32  ;;  %v10877_v48 = vor.u32 %v11969_v18, %v10874_v28  ;;  %v11995_v35 = vld [vmem:[#allocation7 + $0x124] sm:$0xf]  ;;  %v10920_v32 = vld [vmem:[#allocation7 + $0x130] sm:$0xf]  ;;  %v10906_v18 = vld [vmem:[#allocation7 + $0x118] sm:$0xf0]  ;;  %v6711_v2 = vadd.f32 %v15399_v14, %v15397_v58 }
 0x79d   : > { %v6998_v33 = vadd.f32 %v15451_v30, %v6904_v3  ;;  %v10914_v30 = vld [vmem:[#allocation7 + $0x128] sm:$0xf0]  ;;  %v11112_v28 = vld [vmem:[#allocation7 + $0x2b0] sm:$0xf]  ;;  %v11991_v58 = vld [vmem:[#allocation7 + $0x104] sm:$0xf] }
 0x79e   : > { %v15478_v63 = vpop.f32.mrf.mxu2  ;;  %7660 = vmatpush.bf16.msra.mxu1 %v10893_v34  ;;  %v11128_v34 = vld [vmem:[#allocation7 + $0x2d0] sm:$0xf]  ;;  %v10898_v14 = vld [vmem:[#allocation7 + $0x108] sm:$0xf0]  ;;  %v11994_v52 = vld [vmem:[#allocation7 + $0x114] sm:$0xf0] }
 0x79f   : > { %v15482_v57 = vpop.f32.mrf.mxu3  ;;  %v7166_v21 = vpop.f32.mrf.mxu1  ;;  %7787 = vmatpush.bf16.msra.mxu3 %v10941_v6  ;;  %v11129_v51 = vor.u32 %v12050_v22, %v11128_v34  ;;  %v10869_v6 = vor.u32 %v11967_v45, %v10866_v20  ;;  %v10850_v34 = vld [vmem:[#allocation7 + $0x28] sm:$0xf0]  ;;  %v11996_v22 = vld [vmem:[#allocation7 + $0x124] sm:$0xf0]  ;;  %v6812_v45 = vadd.f32 %v15401_v56, %v6711_v2  ;;  %v10901_v62 = vor.u32 %v11991_v58, %v10898_v14 }
 0x7a0   : > { %8154 = vmatpush.bf16.msra.mxu0 %v11137_v46  ;;  %v7186_v38 = vadd.f32 %v7166_v21, %v15449_v55  ;;  %7774 = vmatpush.bf16.msra.mxu2 %v10937_v0  ;;  %v7092_v55 = vadd.f32 %v15453_v44, %v6998_v33  ;;  %v10917_v21 = vor.u32 %v11995_v35, %v10914_v30  ;;  %v11993_v46 = vld [vmem:[#allocation7 + $0x114] sm:$0xf]  ;;  %v10912_v33 = vld [vmem:[#allocation7 + $0x120] sm:$0xf]  ;;  %v10904_v35 = vld [vmem:[#allocation7 + $0x110] sm:$0xf] }
 0x7a1   : > { %v10909_v9 = vor.u32 %v11993_v46, %v10906_v18  ;;  %v6906_v30 = vadd.f32 %v15456_v7, %v6812_v45  ;;  %v10905_v56 = vor.u32 %v11994_v52, %v10904_v35  ;;  %v11959_v7 = vld [vmem:[#allocation7 + $0x4] sm:$0xf]  ;;  %v10896_v46 = vld [vmem:[#allocation7 + $0x100] sm:$0xf]  ;;  %v11992_v2 = vld [vmem:[#allocation7 + $0x104] sm:$0xf0] }
 0x7a2   : > { %7661 = vmatpush.bf16.msra.mxu1 %v10885_v40  ;;  %v11965_v40 = vld [vmem:[#allocation7 + $0x34] sm:$0xf] }
 0x7a3   : > { %7788 = vmatpush.bf16.msra.mxu3 %v10933_v24  ;;  %v10861_v19 = vor.u32 %v11965_v40, %v10858_v10  ;;  %v11998_v24 = vld [vmem:[#allocation7 + $0x134] sm:$0xf0]  ;;  %v11096_v40 = vld [vmem:[#allocation7 + $0x290] sm:$0xf] }
 0x7a4   : > { %8155 = vmatpush.bf16.msra.mxu0 %v11129_v51  ;;  %7775 = vmatpush.bf16.msra.mxu2 %v10929_v43  ;;  %v10921_v44 = vor.u32 %v11998_v24, %v10920_v32  ;;  %v11104_v51 = vld [vmem:[#allocation7 + $0x2a0] sm:$0xf]  ;;  %v10842_v43 = vld [vmem:[#allocation7 + $0x18] sm:$0xf0]  ;;  %v12042_v10 = vld [vmem:[#allocation7 + $0x294] sm:$0xf0]  ;;  %v7000_v32 = vadd.f32 %v15460_v16, %v6906_v30 }
 0x7a5   : > { %v11097_v24 = vor.u32 %v12042_v10, %v11096_v40  ;;  %v11088_v16 = vld [vmem:[#allocation7 + $0x280] sm:$0xf] }
 0x7a6   : > { %v7260_v61 = vpop.f32.mrf.mxu2  ;;  %7662 = vmatpush.bf16.msra.mxu1 %v10877_v48 }
 0x7a7   : > { %v7354_v26 = vpop.f32.mrf.mxu3  ;;  %v7168_v49 = vpop.f32.mrf.mxu1  ;;  %v7280_v4 = vadd.f32 %v7260_v61, %v7186_v38  ;;  %7789 = vmatpush.bf16.msra.mxu3 %v10925_v17  ;;  %v12046_v61 = vld [vmem:[#allocation7 + $0x2b4] sm:$0xf0]  ;;  %v10853_v17 = vor.u32 %v11963_v53, %v10850_v34  ;;  %v6716_v53 = vadd.f32 %v15431_v39, %v15429_v31 }
 0x7a8   : > { %v7187_v36 = vadd.f32 %v7168_v49, %v7092_v55  ;;  %8156 = vmatpush.bf16.msra.mxu0 %v11121_v29  ;;  %7776 = vmatpush.bf16.msra.mxu2 %v10921_v44  ;;  %v11113_v42 = vor.u32 %v12046_v61, %v11112_v28  ;;  %v10913_v49 = vor.u32 %v11996_v22, %v10912_v33  ;;  %v10834_v44 = vld [vmem:[#allocation7 + $0x8] sm:$0xf0] }
 0x7a9   : > { %v7374_v50 = vadd.f32 %v7354_v26, %v7280_v4  ;;  %v12044_v4 = vld [vmem:[#allocation7 + $0x2a4] sm:$0xf0]  ;;  %v10837_v28 = vor.u32 %v11959_v7, %v10834_v44  ;;  %v11080_v44 = vld [vmem:[#allocation7 + $0x270] sm:$0xf] }
 0x7aa   : > { %7663 = vmatpush.bf16.msra.mxu1 %v10869_v6  ;;  %v11105_v6 = vor.u32 %v12044_v4, %v11104_v51 }
 0x7ab   : > { %7790 = vmatpush.bf16.msra.mxu3 %v10917_v21  ;;  %v7386_v38 = vadd.f32 %v15492_v12, %v7374_v50  ;;  %v10845_v21 = vor.u32 %v11961_v37, %v10842_v43 }
 0x7ac   : > { %8157 = vmatpush.bf16.msra.mxu0 %v11113_v42  ;;  %7777 = vmatpush.bf16.msra.mxu2 %v10913_v49 }
 0x7ad   : > { %v7394_v47 = vmax.f32 %v7386_v38, 0.0 }
 0x7ae   : > { %v7262_v1 = vpop.f32.mrf.mxu2  ;;  %7664 = vmatpush.bf16.msra.mxu1 %v10861_v19 }
 0x7af   : > { %v7281_v3 = vadd.f32 %v7262_v1, %v7187_v36  ;;  %v7356_v48 = vpop.f32.mrf.mxu3  ;;  %v7171_v0 = vpop.f32.mrf.mxu1  ;;  %7791 = vmatpush.bf16.msra.mxu3 %v10909_v9  ;;  %v12040_v9 = vld [vmem:[#allocation7 + $0x284] sm:$0xf0] }
 0x7b0   : > { %8158 = vmatpush.bf16.msra.mxu0 %v11105_v6  ;;  %v7188_v36 = vadd.f32 %v7171_v0, %v15458_v25  ;;  %7778 = vmatpush.bf16.msra.mxu2 %v10905_v56  ;;  %v11089_v25 = vor.u32 %v12040_v9, %v11088_v16  ;;  %v11066_v9 = vld [vmem:[#allocation7 + $0x258] sm:$0xf0] }
 0x7b1   : > { %v7375_v26 = vadd.f32 %v7356_v48, %v7281_v3  ;;  %v10897_v3 = vor.u32 %v11992_v2, %v10896_v46  ;;  %v7094_v48 = vadd.f32 %v15462_v41, %v7000_v32  ;;  %v6814_v41 = vadd.f32 %v15433_v23, %v6716_v53  ;;  %v12038_v46 = vld [vmem:[#allocation7 + $0x274] sm:$0xf0]  ;;  %v12019_v53 = vld [vmem:[#allocation7 + $0x1e4] sm:$0xf] }
 0x7b2   : > { %7665 = vmatpush.bf16.msra.mxu1 %v10853_v17 }
 0x7b3   : > { %v7387_v20 = vadd.f32 %v15492_v12, %v7375_v26  ;;  %7792 = vmatpush.bf16.msra.mxu3 %v10901_v62  ;;  %v6908_v49 = vadd.f32 %v15465_v59, %v6814_v41  ;;  %v6721_v59 = vadd.f32 %v15442_v13, %v15438_v60  ;;  %v11074_v60 = vld [vmem:[#allocation7 + $0x268] sm:$0xf0]  ;;  %v12021_v13 = vld [vmem:[#allocation7 + $0x1f4] sm:$0xf] }
 0x7b4   : > { %8159 = vmatpush.bf16.msra.mxu0 %v11097_v24  ;;  %7779 = vmatpush.bf16.msra.mxu2 %v10897_v3 }
 0x7b5   : > { %v7395_v55 = vmax.f32 %v7387_v20, 0.0  ;;  %v7002_v45 = vadd.f32 %v15469_v27, %v6908_v49  ;;  %v11058_v49 = vld [vmem:[#allocation7 + $0x248] sm:$0xf0] }
 0x7b6   : > { %v7265_v29 = vpop.f32.mrf.mxu2  ;;  %7666 = vmatpush.bf16.msra.mxu1 %v10845_v21 }
 0x7b7   : > { %v7402_v50 = vmax.f32 %v7394_v47, %v7395_v55  ;;  %v7359_v19 = vpop.f32.mrf.mxu3  ;;  %v7173_v1 = vpop.f32.mrf.mxu1  ;;  %v7282_v18 = vadd.f32 %v7265_v29, %v7188_v36  ;;  %v7096_v6 = vadd.f32 %v15471_v54, %v7002_v45  ;;  %v12037_v47 = vld [vmem:[#allocation7 + $0x274] sm:$0xf]  ;;  %v11082_v55 = vld [vmem:[#allocation7 + $0x278] sm:$0xf0]  ;;  %v6816_v54 = vadd.f32 %v15444_v8, %v6721_v59  ;;  %v12084_v45 = vld [vmem:[#allocation7 + $0x3e4] sm:$0xf0] }
 0x7b8   : > { %v7189_v0 = vadd.f32 %v7173_v1, %v7094_v48  ;;  %8160 = vmatpush.bf16.msra.mxu0 %v11089_v25  ;;  %v11085_v40 = vor.u32 %v12037_v47, %v11082_v55  ;;  %v11018_v36 = vld [vmem:[#allocation7 + $0x1f8] sm:$0xf0]  ;;  %v11272_v25 = vld [vmem:[#allocation7 + $0x3f0] sm:$0xf] }
 0x7b9   : > { %7406 = vst [vmem:[#allocation6] sm:$0xff] %v7402_v50  ;;  %v7376_v61 = vadd.f32 %v7359_v19, %v7282_v18  ;;  %v12035_v50 = vld [vmem:[#allocation7 + $0x264] sm:$0xf]  ;;  %v6910_v19 = vadd.f32 %v15474_v11, %v6816_v54  ;;  %v11050_v47 = vld [vmem:[#allocation7 + $0x238] sm:$0xf0] }
 0x7ba   : > { %7667 = vmatpush.bf16.msra.mxu1 %v10837_v28  ;;  %v11077_v18 = vor.u32 %v12035_v50, %v11074_v60  ;;  %v12033_v28 = vld [vmem:[#allocation7 + $0x254] sm:$0xf]  ;;  %v11256_v55 = vld [vmem:[#allocation7 + $0x3d0] sm:$0xf]  ;;  %v10994_v54 = vld [vmem:[#allocation7 + $0x1c8] sm:$0xf0] }
 0x7bb   : > { %v7388_v26 = vadd.f32 %v15492_v12, %v7376_v61  ;;  %v7004_v2 = vadd.f32 %v15478_v63, %v6910_v19  ;;  %v12086_v61 = vld [vmem:[#allocation7 + $0x3f4] sm:$0xf0]  ;;  %v12036_v63 = vld [vmem:[#allocation7 + $0x264] sm:$0xf0]  ;;  %v11042_v19 = vld [vmem:[#allocation7 + $0x228] sm:$0xf0] }
 0x7bc   : > { %v11273_v41 = vor.u32 %v12086_v61, %v11272_v25  ;;  %v12032_v50 = vld [vmem:[#allocation7 + $0x244] sm:$0xf0] }
 0x7bd   : > { %v7396_v58 = vmax.f32 %v7388_v26, 0.0  ;;  %v11072_v26 = vld [vmem:[#allocation7 + $0x260] sm:$0xf] }
 0x7be   : > { %v7267_v42 = vpop.f32.mrf.mxu2 }
 0x7bf   : > { %v7283_v34 = vadd.f32 %v7267_v42, %v7189_v0  ;;  %v7361_v33 = vpop.f32.mrf.mxu3  ;;  %v7176_v38 = vpop.f32.mrf.mxu1  ;;  %v11021_v0 = vor.u32 %v12021_v13, %v11018_v36  ;;  %v11081_v42 = vor.u32 %v12038_v46, %v11080_v44  ;;  %v12027_v36 = vld [vmem:[#allocation7 + $0x224] sm:$0xf]  ;;  %v12080_v44 = vld [vmem:[#allocation7 + $0x3c4] sm:$0xf0] }
 0x7c0   : > { %v7190_v31 = vadd.f32 %v7176_v38, %v15467_v5 }
 0x7c1   : > { %v7377_v17 = vadd.f32 %v7361_v33, %v7283_v34  ;;  %v11010_v34 = vld [vmem:[#allocation7 + $0x1e8] sm:$0xf0] }
 0x7c3   : > { %v7389_v22 = vadd.f32 %v15492_v12, %v7377_v17 }
 0x7c5   : > { %v7397_v14 = vmax.f32 %v7389_v22, 0.0  ;;  %v12031_v22 = vld [vmem:[#allocation7 + $0x244] sm:$0xf] }
 0x7c6   : > { %v7270_v51 = vpop.f32.mrf.mxu2 }
 0x7c7   : > { %v7403_v20 = vmax.f32 %v7396_v58, %v7397_v14  ;;  %v7364_v39 = vpop.f32.mrf.mxu3  ;;  %v7178_v62 = vpop.f32.mrf.mxu1  ;;  %v7284_v4 = vadd.f32 %v7270_v51, %v7190_v31  ;;  %v7098_v58 = vadd.f32 %v15482_v57, %v7004_v2  ;;  %v11264_v51 = vld [vmem:[#allocation7 + $0x3e0] sm:$0xf]  ;;  %v11073_v31 = vor.u32 %v12036_v63, %v11072_v26  ;;  %v11064_v57 = vld [vmem:[#allocation7 + $0x250] sm:$0xf]  ;;  %v12011_v26 = vld [vmem:[#allocation7 + $0x1a4] sm:$0xf] }
 0x7c8   : > { %v7191_v23 = vadd.f32 %v7178_v62, %v7096_v6  ;;  %v11002_v6 = vld [vmem:[#allocation7 + $0x1d8] sm:$0xf0]  ;;  %v11265_v59 = vor.u32 %v12084_v45, %v11264_v51  ;;  %v10978_v63 = vld [vmem:[#allocation7 + $0x1a8] sm:$0xf0]  ;;  %v11232_v45 = vld [vmem:[#allocation7 + $0x3a0] sm:$0xf] }
 0x7c9   : > { %7407 = vst [vmem:[#allocation6 + $0x8] sm:$0xff] %v7403_v20  ;;  %v7378_v37 = vadd.f32 %v7364_v39, %v7284_v4  ;;  %v11013_v20 = vor.u32 %v12019_v53, %v11010_v34  ;;  %v12017_v39 = vld [vmem:[#allocation7 + $0x1d4] sm:$0xf]  ;;  %v12078_v53 = vld [vmem:[#allocation7 + $0x3b4] sm:$0xf0] }
 0x7cb   : > { %v7390_v5 = vadd.f32 %v15492_v12, %v7378_v37  ;;  %v12034_v37 = vld [vmem:[#allocation7 + $0x254] sm:$0xf0] }
 0x7cd   : > { %v7398_v24 = vmax.f32 %v7390_v5, 0.0  ;;  %v11065_v5 = vor.u32 %v12034_v37, %v11064_v57  ;;  %v10970_v57 = vld [vmem:[#allocation7 + $0x198] sm:$0xf0]  ;;  %v11032_v37 = vld [vmem:[#allocation7 + $0x210] sm:$0xf] }
 0x7ce   : > { %v7272_v43 = vpop.f32.mrf.mxu2 }
 0x7cf   : > { %v7285_v35 = vadd.f32 %v7272_v43, %v7191_v23  ;;  %v7366_v30 = vpop.f32.mrf.mxu3  ;;  %v7181_v27 = vpop.f32.mrf.mxu1  ;;  %v11061_v43 = vor.u32 %v12031_v22, %v11058_v49  ;;  %v12023_v49 = vld [vmem:[#allocation7 + $0x204] sm:$0xf] }
 0x7d0   : > { %v7410_v21 = vld [vmem:[#allocation6] ss:$2 sm:$0xff]  ;;  %v7414_v52 = vld [vmem:[#allocation6 + $0x1] ss:$2 sm:$0xff]  ;;  %v7192_v48 = vadd.f32 %v7181_v27, %v15476_v15  ;;  %v11069_v15 = vor.u32 %v12033_v28, %v11066_v9  ;;  %v12082_v27 = vld [vmem:[#allocation7 + $0x3d4] sm:$0xf0]  ;;  %v11045_v9 = vor.u32 %v12027_v36, %v11042_v19 }
 0x7d1   : > { %v7379_v29 = vadd.f32 %v7366_v30, %v7285_v35  ;;  %v7417_v56 = vmax.f32 %v7410_v21, %v7414_v52  ;;  %v12029_v35 = vld [vmem:[#allocation7 + $0x234] sm:$0xf]  ;;  %v11005_v52 = vor.u32 %v12017_v39, %v11002_v6  ;;  %v11257_v13 = vor.u32 %v12082_v27, %v11256_v55  ;;  %v10986_v28 = vld [vmem:[#allocation7 + $0x1b8] sm:$0xf0]  ;;  %v11202_v55 = vld [vmem:[#allocation7 + $0x368] sm:$0xf0] }
 0x7d2   : > { %v11053_v60 = vor.u32 %v12029_v35, %v11050_v47  ;;  %v12009_v6 = vld [vmem:[#allocation7 + $0x194] sm:$0xf]  ;;  %v12067_v47 = vld [vmem:[#allocation7 + $0x364] sm:$0xf] }
 0x7d3   : > { %v7391_v10 = vadd.f32 %v15492_v12, %v7379_v29  ;;  %v15517_v32 = vpack.c.bf16 %v7417_v56, %v7417_v56  ;;  %v12015_v29 = vld [vmem:[#allocation7 + $0x1c4] sm:$0xf]  ;;  %v10973_v27 = vor.u32 %v12009_v6, %v10970_v57  ;;  %v11205_v19 = vor.u32 %v12067_v47, %v11202_v55  ;;  %v11122_v57 = vld [vmem:[#allocation7 + $0x2c8] sm:$0xf0] }
 0x7d4   : > { %v10997_v46 = vor.u32 %v12015_v29, %v10994_v54  ;;  %v11024_v29 = vld [vmem:[#allocation7 + $0x200] sm:$0xf]  ;;  %v11146_v54 = vld [vmem:[#allocation7 + $0x2f8] sm:$0xf0]  ;;  %v12047_v6 = vld [vmem:[#allocation7 + $0x2c4] sm:$0xf] }
 0x7d5   : > { %v7399_v1 = vmax.f32 %v7391_v10, 0.0  ;;  %v7455_v7 = vunpack.c.l.b16 %v15517_v32  ;;  %7655 = vmatmul.bf16.vlgmr.msrb.gmra.mxu3 %v15517_v32  ;;  %v11056_v10 = vld [vmem:[#allocation7 + $0x240] sm:$0xf]  ;;  %v11125_v47 = vor.u32 %v12047_v6, %v11122_v57  ;;  %v11274_v57 = vld [vmem:[#allocation7 + $0x3f8] sm:$0xf0] }
 0x7d6   : > { %8039 = vmatpush.bf16.msrb.mxu3 %v11085_v40  ;;  %v7275_v8 = vpop.f32.mrf.mxu2 }
 0x7d7   : > { %v7404_v3 = vmax.f32 %v7398_v24, %v7399_v1  ;;  %v15524_v16 = vpack.c.b16 %v7455_v7, %v7455_v7  ;;  %v7369_v11 = vpop.f32.mrf.mxu3  ;;  %v7286_v33 = vadd.f32 %v7275_v8, %v7192_v48  ;;  %v7183_v17 = vpop.f32.mrf.mxu1  ;;  %v11248_v7 = vld [vmem:[#allocation7 + $0x3c0] sm:$0xf]  ;;  %v11057_v8 = vor.u32 %v12032_v50, %v11056_v10  ;;  %v11048_v48 = vld [vmem:[#allocation7 + $0x230] sm:$0xf] }
 0x7d8   : > { %v7193_v4 = vadd.f32 %v7183_v17, %v7098_v58  ;;  %v11249_v25 = vor.u32 %v12080_v44, %v11248_v7  ;;  %v11040_v17 = vld [vmem:[#allocation7 + $0x220] sm:$0xf]  ;;  %v11026_v58 = vld [vmem:[#allocation7 + $0x208] sm:$0xf0]  ;;  %v11208_v50 = vld [vmem:[#allocation7 + $0x370] sm:$0xf] }
 0x7d9   : > { %7408 = vst [vmem:[#allocation6 + $0x10] sm:$0xff] %v7404_v3  ;;  %v15527_v38 = vshrl.u32 %v15524_v16, 16  ;;  %v7380_v62 = vadd.f32 %v7369_v11, %v7286_v33  ;;  %v7690_v1 = vrot.slane %v15524_v16, 1  ;;  %v12030_v11 = vld [vmem:[#allocation7 + $0x234] sm:$0xf0]  ;;  %v7944_v36 = vrot.slane %v15524_v16, 2 }
 0x7da   : > { %8040 = vmatpush.bf16.msrb.mxu3 %v11077_v18  ;;  %v12013_v18 = vld [vmem:[#allocation7 + $0x1b4] sm:$0xf]  ;;  %v11049_v33 = vor.u32 %v12030_v11, %v11048_v48  ;;  %v11138_v11 = vld [vmem:[#allocation7 + $0x2e8] sm:$0xf0] }
 0x7db   : > { %7549 = vmatmul.bf16.vlgmr.msrb.gmra.mxu1 %v15527_v38  ;;  %7562 = vmatmul.bf16.vlgmr.msrb.gmra.mxu2 %v15527_v38  ;;  %v7817_v14 = vrot.slane %v15527_v38, 1  ;;  %v7392_v56 = vadd.f32 %v15492_v12, %v7380_v62  ;;  %v10989_v34 = vor.u32 %v12013_v18, %v10986_v28  ;;  %v8071_v51 = vrot.slane %v15527_v38, 2  ;;  %v12069_v62 = vld [vmem:[#allocation7 + $0x374] sm:$0xf]  ;;  %v12118_v18 = vld [vmem:[#allocation7 + $0x4f4] sm:$0xf0] }
 0x7dc   : > { %7912 = vmatpush.bf16.msrb.mxu1 %v11021_v0  ;;  %8026 = vmatpush.bf16.msrb.mxu2 %v11081_v42  ;;  %v11034_v0 = vld [vmem:[#allocation7 + $0x218] sm:$0xf0]  ;;  %v11240_v42 = vld [vmem:[#allocation7 + $0x3b0] sm:$0xf] }
 0x7dd   : > { %7907 = vmatmul.bf16.vlgmr.msrb.gmra.mxu0 %v7817_v14  ;;  %v7400_v2 = vmax.f32 %v7392_v56, 0.0  ;;  %v11241_v22 = vor.u32 %v12078_v53, %v11240_v42  ;;  %v12024_v56 = vld [vmem:[#allocation7 + $0x204] sm:$0xf0]  ;;  %v11186_v42 = vld [vmem:[#allocation7 + $0x348] sm:$0xf0] }
 0x7de   : > { %8041 = vmatpush.bf16.msrb.mxu3 %v11069_v15  ;;  %8407 = vmatpush.bf16.msrb.mxu0 %v11273_v41  ;;  %v7277_v23 = vpop.f32.mrf.mxu2  ;;  %v12028_v15 = vld [vmem:[#allocation7 + $0x224] sm:$0xf0]  ;;  %v11025_v44 = vor.u32 %v12024_v56, %v11024_v29  ;;  %v11392_v53 = vld [vmem:[#allocation7 + $0x4e0] sm:$0xf] }
 0x7df   : > { %v7287_v30 = vadd.f32 %v7277_v23, %v7193_v4  ;;  %v7371_v21 = vpop.f32.mrf.mxu3  ;;  %v11041_v39 = vor.u32 %v12028_v15, %v11040_v17  ;;  %v11210_v4 = vld [vmem:[#allocation7 + $0x378] sm:$0xf0]  ;;  %v12026_v23 = vld [vmem:[#allocation7 + $0x214] sm:$0xf0]  ;;  %v11192_v15 = vld [vmem:[#allocation7 + $0x350] sm:$0xf] }
 0x7e0   : > { %7913 = vmatpush.bf16.msrb.mxu1 %v11013_v20  ;;  %8027 = vmatpush.bf16.msrb.mxu2 %v11073_v31  ;;  %v12076_v20 = vld [vmem:[#allocation7 + $0x3a4] sm:$0xf0]  ;;  %v10981_v31 = vor.u32 %v12011_v26, %v10978_v63  ;;  %v11213_v35 = vor.u32 %v12069_v62, %v11210_v4  ;;  %v12049_v63 = vld [vmem:[#allocation7 + $0x2d4] sm:$0xf]  ;;  %v11130_v17 = vld [vmem:[#allocation7 + $0x2d8] sm:$0xf0] }
 0x7e1   : > { %v7381_v40 = vadd.f32 %v7371_v21, %v7287_v30  ;;  %v12074_v30 = vld [vmem:[#allocation7 + $0x394] sm:$0xf0]  ;;  %v11033_v21 = vor.u32 %v12026_v23, %v11032_v37  ;;  %v11133_v62 = vor.u32 %v12049_v63, %v11130_v17  ;;  %v11184_v37 = vld [vmem:[#allocation7 + $0x340] sm:$0xf]  ;;  %v12064_v23 = vld [vmem:[#allocation7 + $0x344] sm:$0xf0] }
 0x7e2   : > { %8042 = vmatpush.bf16.msrb.mxu3 %v11061_v43  ;;  %8408 = vmatpush.bf16.msrb.mxu0 %v11265_v59  ;;  %v11233_v43 = vor.u32 %v12076_v20, %v11232_v45  ;;  %v11224_v59 = vld [vmem:[#allocation7 + $0x390] sm:$0xf]  ;;  %v12061_v45 = vld [vmem:[#allocation7 + $0x334] sm:$0xf]  ;;  %v11178_v20 = vld [vmem:[#allocation7 + $0x338] sm:$0xf0]  ;;  %v11185_v55 = vor.u32 %v12064_v23, %v11184_v37 }
 0x7e3   : > { %v7393_v24 = vadd.f32 %v15492_v12, %v7381_v40  ;;  %v12025_v12 = vld [vmem:[#allocation7 + $0x214] sm:$0xf]  ;;  %v11225_v10 = vor.u32 %v12074_v30, %v11224_v59  ;;  %v11170_v59 = vld [vmem:[#allocation7 + $0x328] sm:$0xf0]  ;;  %v12112_v30 = vld [vmem:[#allocation7 + $0x4c4] sm:$0xf0] }
 0x7e4   : > { %7914 = vmatpush.bf16.msrb.mxu1 %v11005_v52  ;;  %8028 = vmatpush.bf16.msrb.mxu2 %v11065_v5  ;;  %v11037_v41 = vor.u32 %v12025_v12, %v11034_v0  ;;  %v12007_v52 = vld [vmem:[#allocation7 + $0x184] sm:$0xf]  ;;  %v10962_v5 = vld [vmem:[#allocation7 + $0x188] sm:$0xf0]  ;;  %v12053_v40 = vld [vmem:[#allocation7 + $0x2f4] sm:$0xf] }
 0x7e5   : > { %v7401_v3 = vmax.f32 %v7393_v24, 0.0  ;;  %7793 = vmatmul.bf16.vlgmr.msra.gmra.mxu3 %v7690_v1  ;;  %v12072_v24 = vld [vmem:[#allocation7 + $0x384] sm:$0xf0]  ;;  %v10965_v7 = vor.u32 %v12007_v52, %v10962_v5  ;;  %v11149_v28 = vor.u32 %v12053_v40, %v11146_v54  ;;  %v12063_v0 = vld [vmem:[#allocation7 + $0x344] sm:$0xf] }
 0x7e6   : > { %8043 = vmatpush.bf16.msrb.mxu3 %v11053_v60  ;;  %8409 = vmatpush.bf16.msrb.mxu0 %v11257_v13  ;;  %v12070_v60 = vld [vmem:[#allocation7 + $0x374] sm:$0xf0]  ;;  %v11216_v13 = vld [vmem:[#allocation7 + $0x380] sm:$0xf]  ;;  %v11176_v52 = vld [vmem:[#allocation7 + $0x330] sm:$0xf] }
 0x7e7   : > { %v7405_v61 = vmax.f32 %v7400_v2, %v7401_v3  ;;  %v11209_v2 = vor.u32 %v12070_v60, %v11208_v50  ;;  %v12051_v3 = vld [vmem:[#allocation7 + $0x2e4] sm:$0xf]  ;;  %v11217_v48 = vor.u32 %v12072_v24, %v11216_v13  ;;  %v12062_v5 = vld [vmem:[#allocation7 + $0x334] sm:$0xf0]  ;;  %v12057_v40 = vld [vmem:[#allocation7 + $0x314] sm:$0xf] }
 0x7e8   : > { %7915 = vmatpush.bf16.msrb.mxu1 %v10997_v46  ;;  %8029 = vmatpush.bf16.msrb.mxu2 %v11057_v8  ;;  %v11194_v46 = vld [vmem:[#allocation7 + $0x358] sm:$0xf0]  ;;  %v11400_v8 = vld [vmem:[#allocation7 + $0x4f0] sm:$0xf]  ;;  %v12110_v50 = vld [vmem:[#allocation7 + $0x4b4] sm:$0xf0]  ;;  %v11177_v13 = vor.u32 %v12062_v5, %v11176_v52 }
 0x7e9   : > { %7409 = vst [vmem:[#allocation6 + $0x18] sm:$0xff] %v7405_v61  ;;  %v11401_v61 = vor.u32 %v12118_v18, %v11400_v8  ;;  %v11162_v54 = vld [vmem:[#allocation7 + $0x318] sm:$0xf0]  ;;  %v11168_v24 = vld [vmem:[#allocation7 + $0x320] sm:$0xf] }
 0x7ea   : > { %8044 = vmatpush.bf16.msrb.mxu3 %v11045_v9  ;;  %8410 = vmatpush.bf16.msrb.mxu0 %v11249_v25  ;;  %v11200_v9 = vld [vmem:[#allocation7 + $0x360] sm:$0xf]  ;;  %v12068_v25 = vld [vmem:[#allocation7 + $0x364] sm:$0xf0]  ;;  %v12055_v18 = vld [vmem:[#allocation7 + $0x304] sm:$0xf] }
 0x7eb   : > { %7668 = vmatmul.bf16.vlgmr.msra.gmra.mxu1 %v15517_v32  ;;  %7780 = vmatmul.bf16.vlgmr.msra.gmra.mxu2 %v7690_v1  ;;  %v11029_v32 = vor.u32 %v12023_v49, %v11026_v58  ;;  %v12065_v1 = vld [vmem:[#allocation7 + $0x354] sm:$0xf]  ;;  %v11201_v26 = vor.u32 %v12068_v25, %v11200_v9  ;;  %v11189_v49 = vor.u32 %v12063_v0, %v11186_v42  ;;  %v11338_v25 = vld [vmem:[#allocation7 + $0x478] sm:$0xf0]  ;;  %v11160_v42 = vld [vmem:[#allocation7 + $0x310] sm:$0xf] }
 0x7ec   : > { %7916 = vmatpush.bf16.msrb.mxu1 %v10989_v34  ;;  %8030 = vmatpush.bf16.msrb.mxu2 %v11049_v33  ;;  %v11197_v12 = vor.u32 %v12065_v1, %v11194_v46  ;;  %v12116_v34 = vld [vmem:[#allocation7 + $0x4e4] sm:$0xf0]  ;;  %v11141_v33 = vor.u32 %v12051_v3, %v11138_v11  ;;  %v11165_v46 = vor.u32 %v12057_v40, %v11162_v54  ;;  %v12101_v9 = vld [vmem:[#allocation7 + $0x474] sm:$0xf]  ;;  %v11098_v0 = vld [vmem:[#allocation7 + $0x298] sm:$0xf0] }
 0x7ed   : > { %8161 = vmatmul.bf16.vlgmr.msra.gmra.mxu0 %v8071_v51  ;;  %v11393_v58 = vor.u32 %v12116_v34, %v11392_v53  ;;  %v12060_v1 = vld [vmem:[#allocation7 + $0x324] sm:$0xf0]  ;;  %v12058_v53 = vld [vmem:[#allocation7 + $0x314] sm:$0xf0]  ;;  %v11352_v63 = vld [vmem:[#allocation7 + $0x490] sm:$0xf] }
 0x7ee   : > { %8045 = vmatpush.bf16.msrb.mxu3 %v11037_v41  ;;  %8411 = vmatpush.bf16.msrb.mxu0 %v11241_v22  ;;  %v12066_v41 = vld [vmem:[#allocation7 + $0x354] sm:$0xf0]  ;;  %v8325_v22 = vrot.slane %v15527_v38, 3  ;;  %v12108_v3 = vld [vmem:[#allocation7 + $0x4a4] sm:$0xf0]  ;;  %v11169_v11 = vor.u32 %v12060_v1, %v11168_v24 }
 0x7ef   : > { %v11193_v4 = vor.u32 %v12066_v41, %v11192_v15  ;;  %v12106_v17 = vld [vmem:[#allocation7 + $0x494] sm:$0xf0]  ;;  %v12099_v15 = vld [vmem:[#allocation7 + $0x464] sm:$0xf]  ;;  %v11336_v37 = vld [vmem:[#allocation7 + $0x470] sm:$0xf] }
 0x7f0   : > { %7917 = vmatpush.bf16.msrb.mxu1 %v10981_v31  ;;  %8031 = vmatpush.bf16.msrb.mxu2 %v11041_v39  ;;  %v11384_v31 = vld [vmem:[#allocation7 + $0x4d0] sm:$0xf]  ;;  %v12114_v39 = vld [vmem:[#allocation7 + $0x4d4] sm:$0xf0]  ;;  %v11353_v6 = vor.u32 %v12106_v17, %v11352_v63  ;;  %v11328_v54 = vld [vmem:[#allocation7 + $0x460] sm:$0xf] }
 0x7f1   : > { %v12102_v23 = vld [vmem:[#allocation7 + $0x474] sm:$0xf0]  ;;  %v11528_v5 = vld [vmem:[#allocation7 + $0x5f0] sm:$0xf]  ;;  %v12091_v63 = vld [vmem:[#allocation7 + $0x424] sm:$0xf] }
 0x7f2   : > { %8046 = vmatpush.bf16.msrb.mxu3 %v11029_v32  ;;  %8412 = vmatpush.bf16.msrb.mxu0 %v11233_v43  ;;  %v11181_v32 = vor.u32 %v12061_v45, %v11178_v20  ;;  %v11385_v43 = vor.u32 %v12114_v39, %v11384_v31  ;;  %v12039_v45 = vld [vmem:[#allocation7 + $0x284] sm:$0xf]  ;;  %v11090_v20 = vld [vmem:[#allocation7 + $0x288] sm:$0xf0]  ;;  %v11152_v39 = vld [vmem:[#allocation7 + $0x300] sm:$0xf]  ;;  %v11337_v52 = vor.u32 %v12102_v23, %v11336_v37 }
 0x7f3   : > { %v11298_v17 = vld [vmem:[#allocation7 + $0x428] sm:$0xf0]  ;;  %v11290_v37 = vld [vmem:[#allocation7 + $0x418] sm:$0xf0] }
 0x7f4   : > { %7918 = vmatpush.bf16.msrb.mxu1 %v10973_v27  ;;  %8032 = vmatpush.bf16.msrb.mxu2 %v11033_v21  ;;  %v12045_v27 = vld [vmem:[#allocation7 + $0x2b4] sm:$0xf]  ;;  %v11114_v21 = vld [vmem:[#allocation7 + $0x2b8] sm:$0xf0] }
 0x7f5   : > { %8047 = vmatmul.bf16.vlgmr.msrb.gmra.mxu3 %v7944_v36  ;;  %v11117_v60 = vor.u32 %v12045_v27, %v11114_v21 }
 0x7f6   : > { %8293 = vmatpush.bf16.msra.mxu3 %v11213_v35  ;;  %8413 = vmatpush.bf16.msrb.mxu0 %v11225_v10  ;;  %v11376_v35 = vld [vmem:[#allocation7 + $0x4c0] sm:$0xf]  ;;  %v11368_v10 = vld [vmem:[#allocation7 + $0x4b0] sm:$0xf] }
 0x7f7   : > { %v11377_v56 = vor.u32 %v12112_v30, %v11376_v35  ;;  %v11369_v8 = vor.u32 %v12110_v50, %v11368_v10  ;;  %v11093_v35 = vor.u32 %v12039_v45, %v11090_v20  ;;  %v12100_v10 = vld [vmem:[#allocation7 + $0x464] sm:$0xf0]  ;;  %v12077_v45 = vld [vmem:[#allocation7 + $0x3b4] sm:$0xf]  ;;  %v11242_v20 = vld [vmem:[#allocation7 + $0x3b8] sm:$0xf0] }
 0x7f8   : > { %7919 = vmatpush.bf16.msrb.mxu1 %v10965_v7  ;;  %8033 = vmatpush.bf16.msrb.mxu2 %v11025_v44  ;;  %v7412_v7 = vld [vmem:[#allocation6 + $0x10] ss:$2 sm:$0xff]  ;;  %v7416_v44 = vld [vmem:[#allocation6 + $0x11] ss:$2 sm:$0xff]  ;;  %v11329_v1 = vor.u32 %v12100_v10, %v11328_v54  ;;  %v11245_v23 = vor.u32 %v12077_v45, %v11242_v20  ;;  %v12115_v45 = vld [vmem:[#allocation7 + $0x4e4] sm:$0xf] }
 0x7f9   : > { %v11466_v54 = vld [vmem:[#allocation7 + $0x578] sm:$0xf0]  ;;  %v12073_v10 = vld [vmem:[#allocation7 + $0x394] sm:$0xf]  ;;  %v11394_v20 = vld [vmem:[#allocation7 + $0x4e8] sm:$0xf0] }
 0x7fa   : > { %8294 = vmatpush.bf16.msra.mxu3 %v11205_v19  ;;  %8414 = vmatpush.bf16.msrb.mxu0 %v11217_v48  ;;  %v11106_v19 = vld [vmem:[#allocation7 + $0x2a8] sm:$0xf0] }
 0x7fb   : > { %7920 = vmatmul.bf16.vlgmr.msrb.gmra.mxu1 %v7817_v14  ;;  %8034 = vmatmul.bf16.vlgmr.msrb.gmra.mxu2 %v7944_v36  ;;  %v12059_v14 = vld [vmem:[#allocation7 + $0x324] sm:$0xf] }
 0x7fc   : > { %8166 = vmatpush.bf16.msra.mxu1 %v11149_v28  ;;  %8280 = vmatpush.bf16.msra.mxu2 %v11209_v2  ;;  %v11173_v29 = vor.u32 %v12059_v14, %v11170_v59  ;;  %v12043_v36 = vld [vmem:[#allocation7 + $0x2a4] sm:$0xf]  ;;  %v11154_v28 = vld [vmem:[#allocation7 + $0x308] sm:$0xf0]  ;;  %v11360_v2 = vld [vmem:[#allocation7 + $0x4a0] sm:$0xf] }
 0x7fd   : > { %8415 = vmatmul.bf16.vlgmr.msrb.gmra.mxu0 %v8325_v22  ;;  %v11109_v48 = vor.u32 %v12043_v36, %v11106_v19  ;;  %v11157_v34 = vor.u32 %v12055_v18, %v11154_v28  ;;  %v11344_v14 = vld [vmem:[#allocation7 + $0x480] sm:$0xf]  ;;  %v12104_v59 = vld [vmem:[#allocation7 + $0x484] sm:$0xf0]  ;;  %v12095_v36 = vld [vmem:[#allocation7 + $0x444] sm:$0xf] }
 0x7fe   : > { %8295 = vmatpush.bf16.msra.mxu3 %v11197_v12  ;;  %8664 = vmatpush.bf16.msra.mxu0 %v11401_v61  ;;  %v12041_v12 = vld [vmem:[#allocation7 + $0x294] sm:$0xf]  ;;  %v7418_v61 = vmax.f32 %v7412_v7, %v7416_v44  ;;  %v11345_v40 = vor.u32 %v12104_v59, %v11344_v14  ;;  %v11314_v19 = vld [vmem:[#allocation7 + $0x448] sm:$0xf0]  ;;  %v11520_v7 = vld [vmem:[#allocation7 + $0x5e0] sm:$0xf] }
 0x7ff   : > { %v11101_v41 = vor.u32 %v12041_v12, %v11098_v0  ;;  %v12148_v44 = vld [vmem:[#allocation7 + $0x5e4] sm:$0xf0]  ;;  %v11320_v18 = vld [vmem:[#allocation7 + $0x450] sm:$0xf]  ;;  %v12098_v28 = vld [vmem:[#allocation7 + $0x454] sm:$0xf0] }
 0x800   : > { %8167 = vmatpush.bf16.msra.mxu1 %v11141_v33  ;;  %8281 = vmatpush.bf16.msra.mxu2 %v11201_v26  ;;  %v11361_v33 = vor.u32 %v12108_v3, %v11360_v2  ;;  %v11341_v26 = vor.u32 %v12101_v9, %v11338_v25  ;;  %v15548_v31 = vpack.c.bf16 %v7418_v61, %v7418_v61  ;;  %v11306_v9 = vld [vmem:[#allocation7 + $0x438] sm:$0xf0]  ;;  %v11512_v61 = vld [vmem:[#allocation7 + $0x5d0] sm:$0xf]  ;;  %v12146_v0 = vld [vmem:[#allocation7 + $0x5d4] sm:$0xf0] }
 0x801   : > { %v11317_v3 = vor.u32 %v12095_v36, %v11314_v19  ;;  %v11321_v12 = vor.u32 %v12098_v28, %v11320_v18  ;;  %v12142_v14 = vld [vmem:[#allocation7 + $0x5b4] sm:$0xf0]  ;;  %v12075_v59 = vld [vmem:[#allocation7 + $0x3a4] sm:$0xf]  ;;  %v11458_v18 = vld [vmem:[#allocation7 + $0x568] sm:$0xf0] }
 0x802   : > { %8296 = vmatpush.bf16.msra.mxu3 %v11189_v49  ;;  %8665 = vmatpush.bf16.msra.mxu0 %v11393_v58  ;;  %v11161_v49 = vor.u32 %v12058_v53, %v11160_v42  ;;  %v11330_v58 = vld [vmem:[#allocation7 + $0x468] sm:$0xf0]  ;;  %v8578_v27 = vunpack.c.l.b16 %v15548_v31  ;;  %v12079_v42 = vld [vmem:[#allocation7 + $0x3c4] sm:$0xf]  ;;  %v11312_v53 = vld [vmem:[#allocation7 + $0x440] sm:$0xf] }
 0x803   : > { %v12090_v36 = vld [vmem:[#allocation7 + $0x414] sm:$0xf0] }
 0x804   : > { %8168 = vmatpush.bf16.msra.mxu1 %v11133_v62  ;;  %8282 = vmatpush.bf16.msra.mxu2 %v11193_v4  ;;  %v12056_v62 = vld [vmem:[#allocation7 + $0x304] sm:$0xf0]  ;;  %v12085_v4 = vld [vmem:[#allocation7 + $0x3f4] sm:$0xf] }
 0x805   : > { %v11153_v30 = vor.u32 %v12056_v62, %v11152_v39  ;;  %v11277_v21 = vor.u32 %v12085_v4, %v11274_v57  ;;  %v11304_v39 = vld [vmem:[#allocation7 + $0x430] sm:$0xf]  ;;  %v12094_v62 = vld [vmem:[#allocation7 + $0x434] sm:$0xf0]  ;;  %v11301_v4 = vor.u32 %v12091_v63, %v11298_v17  ;;  %v12089_v57 = vld [vmem:[#allocation7 + $0x414] sm:$0xf] }
 0x806   : > { %8297 = vmatpush.bf16.msra.mxu3 %v11181_v32  ;;  %8666 = vmatpush.bf16.msra.mxu0 %v11385_v43  ;;  %v8198_v32 = vrot.slane %v15524_v16, 3  ;;  %v11333_v43 = vor.u32 %v12099_v15, %v11330_v58  ;;  %v11266_v16 = vld [vmem:[#allocation7 + $0x3e8] sm:$0xf0]  ;;  %v12144_v58 = vld [vmem:[#allocation7 + $0x5c4] sm:$0xf0] }
 0x807   : > { %v12129_v17 = vld [vmem:[#allocation7 + $0x554] sm:$0xf] }
 0x808   : > { %8169 = vmatpush.bf16.msra.mxu1 %v11125_v47  ;;  %8283 = vmatpush.bf16.msra.mxu2 %v11185_v55  ;;  %v12097_v47 = vld [vmem:[#allocation7 + $0x454] sm:$0xf]  ;;  %v11322_v55 = vld [vmem:[#allocation7 + $0x458] sm:$0xf0] }
 0x809   : > { %v11325_v50 = vor.u32 %v12097_v47, %v11322_v55  ;;  %v12092_v47 = vld [vmem:[#allocation7 + $0x424] sm:$0xf0]  ;;  %v11293_v55 = vor.u32 %v12089_v57, %v11290_v37  ;;  %v11397_v37 = vor.u32 %v12115_v45, %v11394_v20  ;;  %v12165_v45 = vld [vmem:[#allocation7 + $0x674] sm:$0xf]  ;;  %v11594_v20 = vld [vmem:[#allocation7 + $0x678] sm:$0xf0] }
 0x80a   : > { %8298 = vmatpush.bf16.msra.mxu3 %v11173_v29  ;;  %8667 = vmatpush.bf16.msra.mxu0 %v11377_v56  ;;  %v12150_v29 = vld [vmem:[#allocation7 + $0x5f4] sm:$0xf0]  ;;  %v12083_v56 = vld [vmem:[#allocation7 + $0x3e4] sm:$0xf] }
 0x80b   : > { %v11269_v24 = vor.u32 %v12083_v56, %v11266_v16  ;;  %v11488_v56 = vld [vmem:[#allocation7 + $0x5a0] sm:$0xf]  ;;  %v12133_v16 = vld [vmem:[#allocation7 + $0x574] sm:$0xf] }
 0x80c   : > { %8170 = vmatpush.bf16.msra.mxu1 %v11117_v60  ;;  %8284 = vmatpush.bf16.msra.mxu2 %v11177_v13  ;;  %v11529_v60 = vor.u32 %v12150_v29, %v11528_v5  ;;  %v15552_v13 = vpack.c.b16 %v8578_v27, %v8578_v27 }
 0x80e   : > { %8299 = vmatpush.bf16.msra.mxu3 %v11165_v46  ;;  %8668 = vmatpush.bf16.msra.mxu0 %v11369_v8  ;;  %v12081_v46 = vld [vmem:[#allocation7 + $0x3d4] sm:$0xf]  ;;  %v11258_v8 = vld [vmem:[#allocation7 + $0x3d8] sm:$0xf0]  ;;  %v15557_v2 = vshrl.u32 %v15552_v13, 16 }
 0x80f   : > { %v11261_v25 = vor.u32 %v12081_v46, %v11258_v8  ;;  %v12138_v46 = vld [vmem:[#allocation7 + $0x594] sm:$0xf0]  ;;  %v12131_v8 = vld [vmem:[#allocation7 + $0x564] sm:$0xf] }
 0x810   : > { %8171 = vmatpush.bf16.msra.mxu1 %v11109_v48  ;;  %8285 = vmatpush.bf16.msra.mxu2 %v11169_v11  ;;  %v11521_v48 = vor.u32 %v12148_v44, %v11520_v7  ;;  %v12093_v11 = vld [vmem:[#allocation7 + $0x434] sm:$0xf]  ;;  %v11469_v7 = vor.u32 %v12133_v16, %v11466_v54  ;;  %v12111_v16 = vld [vmem:[#allocation7 + $0x4c4] sm:$0xf]  ;;  %v11378_v54 = vld [vmem:[#allocation7 + $0x4c8] sm:$0xf0] }
 0x812   : > { %8300 = vmatpush.bf16.msra.mxu3 %v11157_v34  ;;  %8669 = vmatpush.bf16.msra.mxu0 %v11361_v33  ;;  %v12096_v34 = vld [vmem:[#allocation7 + $0x444] sm:$0xf0]  ;;  %v11309_v33 = vor.u32 %v12093_v11, %v11306_v9  ;;  %v11280_v11 = vld [vmem:[#allocation7 + $0x400] sm:$0xf] }
 0x813   : > { %v12088_v9 = vld [vmem:[#allocation7 + $0x404] sm:$0xf0] }
 0x814   : > { %8172 = vmatpush.bf16.msra.mxu1 %v11101_v41  ;;  %8286 = vmatpush.bf16.msra.mxu2 %v11161_v49  ;;  %v11313_v41 = vor.u32 %v12096_v34, %v11312_v53  ;;  %v11504_v49 = vld [vmem:[#allocation7 + $0x5c0] sm:$0xf] }
 0x815   : > { %8301 = vmatmul.bf16.vlgmr.msra.gmra.mxu3 %v8198_v32  ;;  %v11472_v34 = vld [vmem:[#allocation7 + $0x580] sm:$0xf] }
 0x816   : > { %8545 = vmatpush.bf16.msrb.mxu3 %v11341_v26  ;;  %8670 = vmatpush.bf16.msra.mxu0 %v11353_v6  ;;  %v11513_v26 = vor.u32 %v12146_v0, %v11512_v61  ;;  %v11505_v6 = vor.u32 %v12144_v58, %v11504_v49  ;;  %v11464_v0 = vld [vmem:[#allocation7 + $0x570] sm:$0xf]  ;;  %v12182_v58 = vld [vmem:[#allocation7 + $0x6f4] sm:$0xf0] }
 0x818   : > { %8173 = vmatpush.bf16.msra.mxu1 %v11093_v35  ;;  %8287 = vmatpush.bf16.msra.mxu2 %v11153_v30  ;;  %v11234_v35 = vld [vmem:[#allocation7 + $0x3a8] sm:$0xf0]  ;;  %v11296_v30 = vld [vmem:[#allocation7 + $0x420] sm:$0xf] }
 0x819   : > { %v11237_v5 = vor.u32 %v12075_v59, %v11234_v35  ;;  %v11297_v29 = vor.u32 %v12092_v47, %v11296_v30  ;;  %v12180_v59 = vld [vmem:[#allocation7 + $0x6e4] sm:$0xf0]  ;;  %v12113_v35 = vld [vmem:[#allocation7 + $0x4d4] sm:$0xf]  ;;  %v11386_v30 = vld [vmem:[#allocation7 + $0x4d8] sm:$0xf0] }
 0x81a   : > { %8546 = vmatpush.bf16.msrb.mxu3 %v11333_v43  ;;  %8671 = vmatpush.bf16.msra.mxu0 %v11345_v40  ;;  %v11496_v43 = vld [vmem:[#allocation7 + $0x5b0] sm:$0xf]  ;;  %v12140_v40 = vld [vmem:[#allocation7 + $0x5a4] sm:$0xf0] }
 0x81b   : > { %8174 = vmatmul.bf16.vlgmr.msra.gmra.mxu1 %v8071_v51  ;;  %8288 = vmatmul.bf16.vlgmr.msra.gmra.mxu2 %v8198_v32  ;;  %v11250_v51 = vld [vmem:[#allocation7 + $0x3c8] sm:$0xf0]  ;;  %v11305_v32 = vor.u32 %v12094_v62, %v11304_v39  ;;  %v11497_v27 = vor.u32 %v12142_v14, %v11496_v43  ;;  %v11456_v62 = vld [vmem:[#allocation7 + $0x560] sm:$0xf]  ;;  %v11448_v47 = vld [vmem:[#allocation7 + $0x550] sm:$0xf] }
 0x81c   : > { %8420 = vmatpush.bf16.msrb.mxu1 %v11277_v21  ;;  %8532 = vmatpush.bf16.msrb.mxu2 %v11337_v52  ;;  %v11253_v15 = vor.u32 %v12079_v42, %v11250_v51  ;;  %v12087_v21 = vld [vmem:[#allocation7 + $0x404] sm:$0xf]  ;;  %v11282_v52 = vld [vmem:[#allocation7 + $0x408] sm:$0xf0]  ;;  %v12134_v42 = vld [vmem:[#allocation7 + $0x574] sm:$0xf0]  ;;  %v11461_v51 = vor.u32 %v12131_v8, %v11458_v18 }
 0x81d   : > { %8672 = vmatmul.bf16.vlgmr.msra.gmra.mxu0 %v15557_v2  ;;  %v11285_v19 = vor.u32 %v12087_v21, %v11282_v52  ;;  %v11465_v49 = vor.u32 %v12134_v42, %v11464_v0  ;;  %v11648_v43 = vld [vmem:[#allocation7 + $0x6e0] sm:$0xf]  ;;  %v11370_v8 = vld [vmem:[#allocation7 + $0x4b8] sm:$0xf0]  ;;  %v11432_v18 = vld [vmem:[#allocation7 + $0x530] sm:$0xf] }
 0x81e   : > { %8547 = vmatpush.bf16.msrb.mxu3 %v11325_v50  ;;  %8918 = vmatpush.bf16.msrb.mxu0 %v11529_v60  ;;  %v11226_v50 = vld [vmem:[#allocation7 + $0x398] sm:$0xf0]  ;;  %v11288_v60 = vld [vmem:[#allocation7 + $0x410] sm:$0xf]  ;;  %v11649_v52 = vor.u32 %v12180_v59, %v11648_v43  ;;  %v12174_v0 = vld [vmem:[#allocation7 + $0x6b4] sm:$0xf0] }
 0x81f   : > { %v11229_v44 = vor.u32 %v12073_v10, %v11226_v50  ;;  %v11289_v28 = vor.u32 %v12090_v36, %v11288_v60  ;;  %v12128_v10 = vld [vmem:[#allocation7 + $0x544] sm:$0xf0]  ;;  %v11381_v36 = vor.u32 %v12111_v16, %v11378_v54  ;;  %v12107_v42 = vld [vmem:[#allocation7 + $0x4a4] sm:$0xf]  ;;  %v12170_v43 = vld [vmem:[#allocation7 + $0x694] sm:$0xf0] }
 0x820   : > { %8421 = vmatpush.bf16.msrb.mxu1 %v11269_v24  ;;  %8533 = vmatpush.bf16.msrb.mxu2 %v11329_v1  ;;  %v11489_v24 = vor.u32 %v12140_v40, %v11488_v56  ;;  %v11480_v1 = vld [vmem:[#allocation7 + $0x590] sm:$0xf]  ;;  %v11434_v56 = vld [vmem:[#allocation7 + $0x538] sm:$0xf0] }
 0x821   : > { %v11481_v61 = vor.u32 %v12138_v46, %v11480_v1  ;;  %v11640_v40 = vld [vmem:[#allocation7 + $0x6d0] sm:$0xf]  ;;  %v11632_v1 = vld [vmem:[#allocation7 + $0x6c0] sm:$0xf]  ;;  %v12109_v46 = vld [vmem:[#allocation7 + $0x4b4] sm:$0xf] }
 0x822   : > { %8548 = vmatpush.bf16.msrb.mxu3 %v11317_v3  ;;  %8919 = vmatpush.bf16.msrb.mxu0 %v11521_v48  ;;  %v12071_v3 = vld [vmem:[#allocation7 + $0x384] sm:$0xf]  ;;  %v11218_v48 = vld [vmem:[#allocation7 + $0x388] sm:$0xf0] }
 0x823   : > { %v11221_v53 = vor.u32 %v12071_v3, %v11218_v48 }
 0x824   : > { %8422 = vmatpush.bf16.msrb.mxu1 %v11261_v25  ;;  %8534 = vmatpush.bf16.msrb.mxu2 %v11321_v12  ;;  %v12117_v25 = vld [vmem:[#allocation7 + $0x4f4] sm:$0xf]  ;;  %v11402_v12 = vld [vmem:[#allocation7 + $0x4f8] sm:$0xf0] }
 0x825   : > { %v11405_v63 = vor.u32 %v12117_v25, %v11402_v12  ;;  %v11418_v25 = vld [vmem:[#allocation7 + $0x518] sm:$0xf0]  ;;  %v11624_v12 = vld [vmem:[#allocation7 + $0x6b0] sm:$0xf] }
 0x826   : > { %8549 = vmatpush.bf16.msrb.mxu3 %v11309_v33  ;;  %8920 = vmatpush.bf16.msrb.mxu0 %v11513_v26  ;;  %v12136_v33 = vld [vmem:[#allocation7 + $0x584] sm:$0xf0]  ;;  %v11281_v26 = vor.u32 %v12088_v9, %v11280_v11  ;;  %v11373_v11 = vor.u32 %v12109_v46, %v11370_v8  ;;  %v12121_v9 = vld [vmem:[#allocation7 + $0x514] sm:$0xf]  ;;  %v11522_v46 = vld [vmem:[#allocation7 + $0x5e8] sm:$0xf0] }
 0x827   : > { %v11473_v39 = vor.u32 %v12136_v33, %v11472_v34  ;;  %v12124_v34 = vld [vmem:[#allocation7 + $0x524] sm:$0xf0]  ;;  %v11421_v33 = vor.u32 %v12121_v9, %v11418_v25  ;;  %v12159_v9 = vld [vmem:[#allocation7 + $0x644] sm:$0xf]  ;;  %v11570_v25 = vld [vmem:[#allocation7 + $0x648] sm:$0xf0] }
 0x828   : > { %8423 = vmatpush.bf16.msrb.mxu1 %v11253_v15  ;;  %8535 = vmatpush.bf16.msrb.mxu2 %v11313_v41  ;;  %v11450_v15 = vld [vmem:[#allocation7 + $0x558] sm:$0xf0]  ;;  %v11656_v41 = vld [vmem:[#allocation7 + $0x6f0] sm:$0xf] }
 0x829   : > { %v11657_v57 = vor.u32 %v12182_v58, %v11656_v41  ;;  %v11616_v41 = vld [vmem:[#allocation7 + $0x6a0] sm:$0xf] }
 0x82a   : > { %8550 = vmatpush.bf16.msrb.mxu3 %v11301_v4  ;;  %8921 = vmatpush.bf16.msrb.mxu0 %v11505_v6  ;;  %v12132_v4 = vld [vmem:[#allocation7 + $0x564] sm:$0xf0]  ;;  %v11453_v6 = vor.u32 %v12129_v17, %v11450_v15  ;;  %v11410_v15 = vld [vmem:[#allocation7 + $0x508] sm:$0xf0] }
 0x82b   : > { %v11457_v14 = vor.u32 %v12132_v4, %v11456_v62  ;;  %v11354_v62 = vld [vmem:[#allocation7 + $0x498] sm:$0xf0]  ;;  %v11416_v4 = vld [vmem:[#allocation7 + $0x510] sm:$0xf] }
 0x82c   : > { %8424 = vmatpush.bf16.msrb.mxu1 %v11245_v23  ;;  %8536 = vmatpush.bf16.msrb.mxu2 %v11305_v32  ;;  %v12127_v23 = vld [vmem:[#allocation7 + $0x544] sm:$0xf]  ;;  %v11442_v32 = vld [vmem:[#allocation7 + $0x548] sm:$0xf0] }
 0x82d   : > { %v11445_v21 = vor.u32 %v12127_v23, %v11442_v32  ;;  %v11597_v23 = vor.u32 %v12165_v45, %v11594_v20  ;;  %v11608_v32 = vld [vmem:[#allocation7 + $0x690] sm:$0xf]  ;;  %v12210_v45 = vld [vmem:[#allocation7 + $0x7d4] sm:$0xf0]  ;;  %v12143_v20 = vld [vmem:[#allocation7 + $0x5c4] sm:$0xf] }
 0x82e   : > { %8551 = vmatpush.bf16.msrb.mxu3 %v11293_v55  ;;  %8922 = vmatpush.bf16.msrb.mxu0 %v11497_v27  ;;  %v12130_v55 = vld [vmem:[#allocation7 + $0x554] sm:$0xf0]  ;;  %v8836_v27 = vrot.slane %v15557_v2, 1 }
 0x82f   : > { %v11449_v38 = vor.u32 %v12130_v55, %v11448_v47  ;;  %v12103_v47 = vld [vmem:[#allocation7 + $0x484] sm:$0xf]  ;;  %v11346_v55 = vld [vmem:[#allocation7 + $0x488] sm:$0xf0] }
 0x830   : > { %8425 = vmatpush.bf16.msrb.mxu1 %v11237_v5  ;;  %8537 = vmatpush.bf16.msrb.mxu2 %v11297_v29  ;;  %v11389_v5 = vor.u32 %v12113_v35, %v11386_v30  ;;  %v12125_v29 = vld [vmem:[#allocation7 + $0x534] sm:$0xf]  ;;  %v11586_v30 = vld [vmem:[#allocation7 + $0x668] sm:$0xf0]  ;;  %v11349_v54 = vor.u32 %v12103_v47, %v11346_v55  ;;  %v12208_v55 = vld [vmem:[#allocation7 + $0x7c4] sm:$0xf0] }
 0x831   : > { %v11437_v50 = vor.u32 %v12125_v29, %v11434_v56  ;;  %v11530_v29 = vld [vmem:[#allocation7 + $0x5f8] sm:$0xf0]  ;;  %v11592_v56 = vld [vmem:[#allocation7 + $0x670] sm:$0xf] }
 0x832   : > { %8552 = vmatpush.bf16.msrb.mxu3 %v11285_v19  ;;  %8923 = vmatpush.bf16.msrb.mxu0 %v11489_v24  ;;  %v12123_v19 = vld [vmem:[#allocation7 + $0x524] sm:$0xf]  ;;  %v11426_v24 = vld [vmem:[#allocation7 + $0x528] sm:$0xf0] }
 0x833   : > { %v11429_v3 = vor.u32 %v12123_v19, %v11426_v24  ;;  %v12161_v19 = vld [vmem:[#allocation7 + $0x654] sm:$0xf]  ;;  %v11578_v24 = vld [vmem:[#allocation7 + $0x658] sm:$0xf0] }
 0x834   : > { %8426 = vmatpush.bf16.msrb.mxu1 %v11229_v44  ;;  %8538 = vmatpush.bf16.msrb.mxu2 %v11289_v28  ;;  %v12176_v44 = vld [vmem:[#allocation7 + $0x6c4] sm:$0xf0]  ;;  %v12126_v28 = vld [vmem:[#allocation7 + $0x534] sm:$0xf0] }
 0x835   : > { %8553 = vmatmul.bf16.vlgmr.msrb.gmra.mxu3 %v15548_v31  ;;  %v11633_v48 = vor.u32 %v12176_v44, %v11632_v1  ;;  %v11784_v1 = vld [vmem:[#allocation7 + $0x7f0] sm:$0xf]  ;;  %v12147_v44 = vld [vmem:[#allocation7 + $0x5e4] sm:$0xf] }
 0x836   : > { %8804 = vmatpush.bf16.msra.mxu3 %v11469_v7  ;;  %8924 = vmatpush.bf16.msrb.mxu0 %v11481_v61  ;;  %v11433_v61 = vor.u32 %v12126_v28, %v11432_v18  ;;  %v11584_v18 = vld [vmem:[#allocation7 + $0x660] sm:$0xf]  ;;  %v12164_v28 = vld [vmem:[#allocation7 + $0x664] sm:$0xf0] }
 0x838   : > { %8427 = vmatpush.bf16.msrb.mxu1 %v11221_v53  ;;  %8539 = vmatpush.bf16.msrb.mxu2 %v11281_v26  ;;  %v11424_v53 = vld [vmem:[#allocation7 + $0x520] sm:$0xf]  ;;  %v12119_v26 = vld [vmem:[#allocation7 + $0x504] sm:$0xf] }
 0x839   : > { %v11425_v58 = vor.u32 %v12124_v34, %v11424_v53  ;;  %v11576_v53 = vld [vmem:[#allocation7 + $0x650] sm:$0xf]  ;;  %v12162_v34 = vld [vmem:[#allocation7 + $0x654] sm:$0xf0] }
 0x83a   : > { %8805 = vmatpush.bf16.msra.mxu3 %v11461_v51  ;;  %8925 = vmatpush.bf16.msrb.mxu0 %v11473_v39  ;;  %v11362_v51 = vld [vmem:[#allocation7 + $0x4a8] sm:$0xf0]  ;;  %v12105_v39 = vld [vmem:[#allocation7 + $0x494] sm:$0xf] }
 0x83b   : > { %8428 = vmatmul.bf16.vlgmr.msrb.gmra.mxu1 %v8325_v22  ;;  %8540 = vmatmul.bf16.vlgmr.msrb.gmra.mxu2 %v15548_v31  ;;  %v12178_v22 = vld [vmem:[#allocation7 + $0x6d4] sm:$0xf0]  ;;  %v11440_v31 = vld [vmem:[#allocation7 + $0x540] sm:$0xf]  ;;  %v11365_v17 = vor.u32 %v12107_v42, %v11362_v51  ;;  %v11357_v59 = vor.u32 %v12105_v39, %v11354_v62  ;;  %v12145_v42 = vld [vmem:[#allocation7 + $0x5d4] sm:$0xf] }
 0x83c   : > { %8677 = vmatpush.bf16.msra.mxu1 %v11405_v63  ;;  %8791 = vmatpush.bf16.msra.mxu2 %v11465_v49  ;;  %v11641_v60 = vor.u32 %v12178_v22, %v11640_v40  ;;  %v11441_v7 = vor.u32 %v12128_v10, %v11440_v31  ;;  %v11625_v63 = vor.u32 %v12174_v0, %v11624_v12  ;;  %v12172_v49 = vld [vmem:[#allocation7 + $0x6a4] sm:$0xf0]  ;;  %v12166_v40 = vld [vmem:[#allocation7 + $0x674] sm:$0xf0]  ;;  %v11600_v10 = vld [vmem:[#allocation7 + $0x680] sm:$0xf] }
 0x83d   : > { %8926 = vmatmul.bf16.vlgmr.msrb.gmra.mxu0 %v8836_v27  ;;  %v11609_v22 = vor.u32 %v12170_v43, %v11608_v32  ;;  %v11776_v12 = vld [vmem:[#allocation7 + $0x7e0] sm:$0xf]  ;;  %v12212_v0 = vld [vmem:[#allocation7 + $0x7e4] sm:$0xf0]  ;;  %v11514_v51 = vld [vmem:[#allocation7 + $0x5d8] sm:$0xf0] }
 0x83e   : > { %8806 = vmatpush.bf16.msra.mxu3 %v11453_v6  ;;  %9172 = vmatpush.bf16.msra.mxu0 %v11657_v57  ;;  %v12122_v6 = vld [vmem:[#allocation7 + $0x514] sm:$0xf0]  ;;  %v11413_v57 = vor.u32 %v12119_v26, %v11410_v15  ;;  %v11573_v26 = vor.u32 %v12159_v9, %v11570_v25  ;;  %v12157_v15 = vld [vmem:[#allocation7 + $0x634] sm:$0xf]  ;;  %v11506_v39 = vld [vmem:[#allocation7 + $0x5c8] sm:$0xf0] }
 0x83f   : > { %v11417_v35 = vor.u32 %v12122_v6, %v11416_v4  ;;  %v11568_v62 = vld [vmem:[#allocation7 + $0x640] sm:$0xf]  ;;  %v12160_v4 = vld [vmem:[#allocation7 + $0x644] sm:$0xf0]  ;;  %v11509_v43 = vor.u32 %v12143_v20, %v11506_v39  ;;  %v12197_v25 = vld [vmem:[#allocation7 + $0x774] sm:$0xf] }
 0x840   : > { %8678 = vmatpush.bf16.msra.mxu1 %v11397_v37  ;;  %8792 = vmatpush.bf16.msra.mxu2 %v11457_v14  ;;  %v11617_v37 = vor.u32 %v12172_v49, %v11616_v41  ;;  %v12163_v14 = vld [vmem:[#allocation7 + $0x664] sm:$0xf]  ;;  %v11562_v41 = vld [vmem:[#allocation7 + $0x638] sm:$0xf0]  ;;  %v11768_v49 = vld [vmem:[#allocation7 + $0x7d0] sm:$0xf]  ;;  %v11569_v47 = vor.u32 %v12160_v4, %v11568_v62 }
 0x841   : > { %v11589_v16 = vor.u32 %v12163_v14, %v11586_v30  ;;  %v11769_v32 = vor.u32 %v12210_v45, %v11768_v49  ;;  %v12155_v14 = vld [vmem:[#allocation7 + $0x624] sm:$0xf]  ;;  %v11714_v45 = vld [vmem:[#allocation7 + $0x768] sm:$0xf0]  ;;  %v11536_v62 = vld [vmem:[#allocation7 + $0x600] sm:$0xf] }
 0x842   : > { %8807 = vmatpush.bf16.msra.mxu3 %v11445_v21  ;;  %9173 = vmatpush.bf16.msra.mxu0 %v11649_v52  ;;  %v11408_v21 = vld [vmem:[#allocation7 + $0x500] sm:$0xf]  ;;  %v12120_v52 = vld [vmem:[#allocation7 + $0x504] sm:$0xf0]  ;;  %v12135_v20 = vld [vmem:[#allocation7 + $0x584] sm:$0xf] }
 0x843   : > { %v11409_v31 = vor.u32 %v12120_v52, %v11408_v21  ;;  %v12141_v21 = vld [vmem:[#allocation7 + $0x5b4] sm:$0xf]  ;;  %v11498_v52 = vld [vmem:[#allocation7 + $0x5b8] sm:$0xf0]  ;;  %v11474_v39 = vld [vmem:[#allocation7 + $0x588] sm:$0xf0] }
 0x844   : > { %8679 = vmatpush.bf16.msra.mxu1 %v11389_v5  ;;  %8793 = vmatpush.bf16.msra.mxu2 %v11449_v38  ;;  %v12149_v5 = vld [vmem:[#allocation7 + $0x5f4] sm:$0xf]  ;;  %v8709_v38 = vrot.slane %v15552_v13, 1  ;;  %v12152_v4 = vld [vmem:[#allocation7 + $0x604] sm:$0xf0] }
 0x846   : > { %8808 = vmatpush.bf16.msra.mxu3 %v11437_v50  ;;  %9174 = vmatpush.bf16.msra.mxu0 %v11641_v60  ;;  %v12168_v50 = vld [vmem:[#allocation7 + $0x684] sm:$0xf0]  ;;  %v11533_v60 = vor.u32 %v12149_v5, %v11530_v29  ;;  %v11560_v5 = vld [vmem:[#allocation7 + $0x630] sm:$0xf]  ;;  %v12158_v29 = vld [vmem:[#allocation7 + $0x634] sm:$0xf0] }
 0x847   : > { %v11601_v8 = vor.u32 %v12168_v50, %v11600_v10  ;;  %v11561_v10 = vor.u32 %v12158_v29, %v11560_v5  ;;  %v12206_v50 = vld [vmem:[#allocation7 + $0x7b4] sm:$0xf0]  ;;  %v11537_v5 = vor.u32 %v12152_v4, %v11536_v62  ;;  %v11728_v29 = vld [vmem:[#allocation7 + $0x780] sm:$0xf]  ;;  %v11688_v62 = vld [vmem:[#allocation7 + $0x730] sm:$0xf] }
 0x848   : > { %8680 = vmatpush.bf16.msra.mxu1 %v11381_v36  ;;  %8794 = vmatpush.bf16.msra.mxu2 %v11441_v7  ;;  %v11593_v36 = vor.u32 %v12166_v40, %v11592_v56  ;;  %v12214_v7 = vld [vmem:[#allocation7 + $0x7f4] sm:$0xf0] }
 0x849   : > { %v12190_v4 = vld [vmem:[#allocation7 + $0x734] sm:$0xf0] }
 0x84a   : > { %8809 = vmatpush.bf16.msra.mxu3 %v11429_v3  ;;  %9175 = vmatpush.bf16.msra.mxu0 %v11633_v48  ;;  %v11581_v3 = vor.u32 %v12161_v19, %v11578_v24  ;;  %v11785_v48 = vor.u32 %v12214_v7, %v11784_v1  ;;  %v11552_v19 = vld [vmem:[#allocation7 + $0x620] sm:$0xf]  ;;  %v12156_v24 = vld [vmem:[#allocation7 + $0x624] sm:$0xf0] }
 0x84b   : > { %v11553_v9 = vor.u32 %v12156_v24, %v11552_v19 }
 0x84c   : > { %8681 = vmatpush.bf16.msra.mxu1 %v11373_v11  ;;  %8795 = vmatpush.bf16.msra.mxu2 %v11433_v61  ;;  %v11525_v11 = vor.u32 %v12147_v44, %v11522_v46  ;;  %v11585_v61 = vor.u32 %v12164_v28, %v11584_v18  ;;  %v12151_v46 = vld [vmem:[#allocation7 + $0x604] sm:$0xf]  ;;  %v11538_v28 = vld [vmem:[#allocation7 + $0x608] sm:$0xf0] }
 0x84e   : > { %8810 = vmatpush.bf16.msra.mxu3 %v11421_v33  ;;  %9176 = vmatpush.bf16.msra.mxu0 %v11625_v63  ;;  %v9090_v33 = vrot.slane %v15557_v2, 2  ;;  %v11777_v63 = vor.u32 %v12212_v0, %v11776_v12  ;;  %v11722_v12 = vld [vmem:[#allocation7 + $0x778] sm:$0xf0] }
 0x84f   : > { %v11482_v0 = vld [vmem:[#allocation7 + $0x598] sm:$0xf0] }
 0x850   : > { %8682 = vmatpush.bf16.msra.mxu1 %v11365_v17  ;;  %8796 = vmatpush.bf16.msra.mxu2 %v11425_v58  ;;  %v11517_v17 = vor.u32 %v12145_v42, %v11514_v51  ;;  %v11577_v58 = vor.u32 %v12162_v34, %v11576_v53  ;;  %v11544_v42 = vld [vmem:[#allocation7 + $0x610] sm:$0xf]  ;;  %v12154_v51 = vld [vmem:[#allocation7 + $0x614] sm:$0xf0]  ;;  %v11541_v53 = vor.u32 %v12151_v46, %v11538_v28  ;;  %v12191_v46 = vld [vmem:[#allocation7 + $0x744] sm:$0xf] }
 0x852   : > { %8811 = vmatpush.bf16.msra.mxu3 %v11413_v57  ;;  %9177 = vmatpush.bf16.msra.mxu0 %v11617_v37  ;;  %v11565_v37 = vor.u32 %v12157_v15, %v11562_v41  ;;  %v12195_v15 = vld [vmem:[#allocation7 + $0x764] sm:$0xf] }
 0x854   : > { %8683 = vmatpush.bf16.msra.mxu1 %v11357_v59  ;;  %8797 = vmatpush.bf16.msra.mxu2 %v11417_v35  ;;  %v11554_v59 = vld [vmem:[#allocation7 + $0x628] sm:$0xf0]  ;;  %v11760_v35 = vld [vmem:[#allocation7 + $0x7c0] sm:$0xf] }
 0x855   : > { %8812 = vmatmul.bf16.vlgmr.msra.gmra.mxu3 %v8709_v38  ;;  %v11557_v56 = vor.u32 %v12155_v14, %v11554_v59  ;;  %v11761_v40 = vor.u32 %v12208_v55, %v11760_v35  ;;  %v12198_v14 = vld [vmem:[#allocation7 + $0x774] sm:$0xf0]  ;;  %v8963_v35 = vrot.slane %v15552_v13, 2  ;;  %v11717_v55 = vor.u32 %v12195_v15, %v11714_v45  ;;  %v12173_v45 = vld [vmem:[#allocation7 + $0x6b4] sm:$0xf] }
 0x856   : > { %9058 = vmatpush.bf16.msrb.mxu3 %v11597_v23  ;;  %9178 = vmatpush.bf16.msra.mxu0 %v11609_v22  ;;  %v12153_v22 = vld [vmem:[#allocation7 + $0x614] sm:$0xf] }
 0x858   : > { %8684 = vmatpush.bf16.msra.mxu1 %v11349_v54  ;;  %8798 = vmatpush.bf16.msra.mxu2 %v11409_v31  ;;  %v7550_v6 = vpop.f32.mrf.mxu1  ;;  %v7656_v57 = vpop.f32.mrf.mxu3  ;;  %v11752_v54 = vld [vmem:[#allocation7 + $0x7b0] sm:$0xf] }
 0x859   : > { %v15572_v23 = vadd.f32 %v7656_v57, %v7550_v6  ;;  %v12181_v6 = vld [vmem:[#allocation7 + $0x6f4] sm:$0xf] }
 0x85a   : > { %9059 = vmatpush.bf16.msrb.mxu3 %v11589_v16  ;;  %9179 = vmatpush.bf16.msra.mxu0 %v11601_v8  ;;  %v15574_v30 = vpop.f32.mrf.mxu0  ;;  %v11546_v16 = vld [vmem:[#allocation7 + $0x618] sm:$0xf0]  ;;  %v11753_v8 = vor.u32 %v12206_v50, %v11752_v54  ;;  %v11712_v50 = vld [vmem:[#allocation7 + $0x760] sm:$0xf] }
 0x85b   : > { %8685 = vmatmul.bf16.vlgmr.msra.gmra.mxu1 %v15557_v2  ;;  %8799 = vmatmul.bf16.vlgmr.msra.gmra.mxu2 %v8709_v38  ;;  %v11501_v38 = vor.u32 %v12141_v21, %v11498_v52  ;;  %v11549_v44 = vor.u32 %v12153_v22, %v11546_v16  ;;  %v11477_v52 = vor.u32 %v12135_v20, %v11474_v39  ;;  %v12193_v16 = vld [vmem:[#allocation7 + $0x754] sm:$0xf]  ;;  %v11706_v54 = vld [vmem:[#allocation7 + $0x758] sm:$0xf0] }
 0x85c   : > { %8931 = vmatpush.bf16.msrb.mxu1 %v11533_v60  ;;  %9045 = vmatpush.bf16.msrb.mxu2 %v11593_v36  ;;  %v12139_v60 = vld [vmem:[#allocation7 + $0x5a4] sm:$0xf]  ;;  %v11490_v36 = vld [vmem:[#allocation7 + $0x5a8] sm:$0xf0]  ;;  %v11709_v24 = vor.u32 %v12193_v16, %v11706_v54  ;;  %v11626_v39 = vld [vmem:[#allocation7 + $0x6b8] sm:$0xf0] }
 0x85d   : > { %9180 = vmatmul.bf16.vlgmr.msra.gmra.mxu0 %v9090_v33  ;;  %v11493_v18 = vor.u32 %v12139_v60, %v11490_v36  ;;  %v12196_v60 = vld [vmem:[#allocation7 + $0x764] sm:$0xf0]  ;;  %v12183_v16 = vld [vmem:[#allocation7 + $0x704] sm:$0xf]  ;;  %v11666_v54 = vld [vmem:[#allocation7 + $0x708] sm:$0xf0] }
 0x85e   : > { %9060 = vmatpush.bf16.msrb.mxu3 %v11581_v3  ;;  %9426 = vmatpush.bf16.msrb.mxu0 %v11785_v48  ;;  %v7563_v31 = vpop.f32.mrf.mxu2  ;;  %v11744_v3 = vld [vmem:[#allocation7 + $0x7a0] sm:$0xf]  ;;  %v12204_v48 = vld [vmem:[#allocation7 + $0x7a4] sm:$0xf0] }
 0x85f   : > { %v11745_v34 = vor.u32 %v12204_v48, %v11744_v3  ;;  %v11642_v48 = vld [vmem:[#allocation7 + $0x6d8] sm:$0xf0] }
 0x860   : > { %8932 = vmatpush.bf16.msrb.mxu1 %v11525_v11  ;;  %9046 = vmatpush.bf16.msrb.mxu2 %v11585_v61  ;;  %v7552_v1 = vpop.f32.mrf.mxu1  ;;  %v7658_v7 = vpop.f32.mrf.mxu3  ;;  %v12137_v61 = vld [vmem:[#allocation7 + $0x594] sm:$0xf] }
 0x861   : > { %v11485_v49 = vor.u32 %v12137_v61, %v11482_v0 }
 0x862   : > { %9061 = vmatpush.bf16.msrb.mxu3 %v11573_v26  ;;  %9427 = vmatpush.bf16.msrb.mxu0 %v11777_v63  ;;  %v7910_v11 = vpop.f32.mrf.mxu0  ;;  %v11725_v26 = vor.u32 %v12197_v25, %v11722_v12  ;;  %v11736_v63 = vld [vmem:[#allocation7 + $0x790] sm:$0xf] }
 0x863   : > { %v11704_v11 = vld [vmem:[#allocation7 + $0x750] sm:$0xf] }
 0x864   : > { %8933 = vmatpush.bf16.msrb.mxu1 %v11517_v17  ;;  %9047 = vmatpush.bf16.msrb.mxu2 %v11577_v58  ;;  %v12202_v17 = vld [vmem:[#allocation7 + $0x794] sm:$0xf0]  ;;  %v11545_v58 = vor.u32 %v12154_v51, %v11544_v42  ;;  %v12189_v51 = vld [vmem:[#allocation7 + $0x734] sm:$0xf] }
 0x866   : > { %9062 = vmatpush.bf16.msrb.mxu3 %v11565_v37  ;;  %9428 = vmatpush.bf16.msrb.mxu0 %v11769_v32  ;;  %v7565_v41 = vpop.f32.mrf.mxu2  ;;  %v11658_v32 = vld [vmem:[#allocation7 + $0x6f8] sm:$0xf0] }
 0x868   : > { %8934 = vmatpush.bf16.msrb.mxu1 %v11509_v43  ;;  %9048 = vmatpush.bf16.msrb.mxu2 %v11569_v47  ;;  %v7669_v57 = vpop.f32.mrf.mxu1  ;;  %v7794_v37 = vpop.f32.mrf.mxu3  ;;  %v11720_v43 = vld [vmem:[#allocation7 + $0x770] sm:$0xf]  ;;  %v11737_v47 = vor.u32 %v12202_v17, %v11736_v63  ;;  %v12192_v63 = vld [vmem:[#allocation7 + $0x744] sm:$0xf0] }
 0x869   : > { %v7670_v59 = vadd.f32 %v7669_v57, %v7563_v31  ;;  %v11721_v22 = vor.u32 %v12198_v14, %v11720_v43  ;;  %v12179_v31 = vld [vmem:[#allocation7 + $0x6e4] sm:$0xf]  ;;  %v11629_v43 = vor.u32 %v12173_v45, %v11626_v39  ;;  %v11689_v14 = vor.u32 %v12190_v4, %v11688_v62  ;;  %v11746_v4 = vld [vmem:[#allocation7 + $0x7a8] sm:$0xf0] }
 0x86a   : > { %9063 = vmatpush.bf16.msrb.mxu3 %v11557_v56  ;;  %9429 = vmatpush.bf16.msrb.mxu0 %v11761_v40  ;;  %v15577_v21 = vpop.f32.mrf.mxu0  ;;  %v12200_v56 = vld [vmem:[#allocation7 + $0x784] sm:$0xf0]  ;;  %v12203_v62 = vld [vmem:[#allocation7 + $0x7a4] sm:$0xf] }
 0x86b   : > { %v15579_v40 = vadd.f32 %v7794_v37, %v7670_v59  ;;  %v11729_v36 = vor.u32 %v12200_v56, %v11728_v29  ;;  %v12185_v59 = vld [vmem:[#allocation7 + $0x714] sm:$0xf]  ;;  %v12188_v29 = vld [vmem:[#allocation7 + $0x724] sm:$0xf0] }
 0x86c   : > { %8935 = vmatpush.bf16.msrb.mxu1 %v11501_v38  ;;  %9049 = vmatpush.bf16.msrb.mxu2 %v11561_v10  ;;  %v11661_v38 = vor.u32 %v12181_v6, %v11658_v32  ;;  %v11650_v10 = vld [vmem:[#allocation7 + $0x6e8] sm:$0xf0] }
 0x86d   : > { %v11653_v7 = vor.u32 %v12179_v31, %v11650_v10  ;;  %v12169_v31 = vld [vmem:[#allocation7 + $0x694] sm:$0xf] }
 0x86e   : > { %9064 = vmatpush.bf16.msrb.mxu3 %v11549_v44  ;;  %9430 = vmatpush.bf16.msrb.mxu0 %v11753_v8  ;;  %v7781_v19 = vpop.f32.mrf.mxu2  ;;  %v11713_v44 = vor.u32 %v12196_v60, %v11712_v50  ;;  %v11698_v8 = vld [vmem:[#allocation7 + $0x748] sm:$0xf0]  ;;  %v11610_v60 = vld [vmem:[#allocation7 + $0x698] sm:$0xf0] }
 0x86f   : > { %v7798_v1 = vadd.f32 %v7781_v19, %v15572_v23  ;;  %v9344_v23 = vrot.slane %v15557_v2, 3  ;;  %v11701_v61 = vor.u32 %v12191_v46, %v11698_v8  ;;  %v12186_v19 = vld [vmem:[#allocation7 + $0x714] sm:$0xf0]  ;;  %v11613_v46 = vor.u32 %v12169_v31, %v11610_v60 }
 0x870   : > { %8936 = vmatpush.bf16.msrb.mxu1 %v11493_v18  ;;  %9050 = vmatpush.bf16.msrb.mxu2 %v11553_v9  ;;  %v12177_v18 = vld [vmem:[#allocation7 + $0x6d4] sm:$0xf]  ;;  %v7671_v28 = vpop.f32.mrf.mxu1  ;;  %v7796_v3 = vpop.f32.mrf.mxu3  ;;  %v12194_v9 = vld [vmem:[#allocation7 + $0x754] sm:$0xf0] }
 0x871   : > { %v7925_v25 = vadd.f32 %v15574_v30, %v7798_v1  ;;  %v11645_v0 = vor.u32 %v12177_v18, %v11642_v48  ;;  %v11705_v42 = vor.u32 %v12194_v9, %v11704_v11  ;;  %v11669_v1 = vor.u32 %v12183_v16, %v11666_v54  ;;  %v12167_v18 = vld [vmem:[#allocation7 + $0x684] sm:$0xf]  ;;  %v11602_v28 = vld [vmem:[#allocation7 + $0x688] sm:$0xf0]  ;;  %v11664_v3 = vld [vmem:[#allocation7 + $0x700] sm:$0xf] }
 0x872   : > { %9065 = vmatpush.bf16.msrb.mxu3 %v11541_v53  ;;  %9431 = vmatpush.bf16.msrb.mxu0 %v11745_v34  ;;  %v8164_v12 = vpop.f32.mrf.mxu0  ;;  %v11690_v53 = vld [vmem:[#allocation7 + $0x738] sm:$0xf0]  ;;  %v12175_v34 = vld [vmem:[#allocation7 + $0x6c4] sm:$0xf]  ;;  %v12184_v48 = vld [vmem:[#allocation7 + $0x704] sm:$0xf0] }
 0x873   : > { %v11693_v17 = vor.u32 %v12189_v51, %v11690_v53  ;;  %v12213_v11 = vld [vmem:[#allocation7 + $0x7f4] sm:$0xf]  ;;  %v11786_v9 = vld [vmem:[#allocation7 + $0x7f8] sm:$0xf0]  ;;  %v11778_v51 = vld [vmem:[#allocation7 + $0x7e8] sm:$0xf0] }
 0x874   : > { %8937 = vmatpush.bf16.msrb.mxu1 %v11485_v49  ;;  %9051 = vmatpush.bf16.msrb.mxu2 %v11545_v58  ;;  %v12187_v49 = vld [vmem:[#allocation7 + $0x724] sm:$0xf]  ;;  %v11682_v58 = vld [vmem:[#allocation7 + $0x728] sm:$0xf0] }
 0x875   : > { %9066 = vmatmul.bf16.vlgmr.msrb.gmra.mxu3 %v8963_v35  ;;  %v11685_v37 = vor.u32 %v12187_v49, %v11682_v58  ;;  %v11754_v49 = vld [vmem:[#allocation7 + $0x7b8] sm:$0xf0] }
 0x876   : > { %9312 = vmatpush.bf16.msra.mxu3 %v11725_v26  ;;  %9432 = vmatpush.bf16.msrb.mxu0 %v11737_v47  ;;  %v11634_v26 = vld [vmem:[#allocation7 + $0x6c8] sm:$0xf0]  ;;  %v7783_v30 = vpop.f32.mrf.mxu2  ;;  %v12171_v47 = vld [vmem:[#allocation7 + $0x6a4] sm:$0xf] }
 0x877   : > { %v11637_v15 = vor.u32 %v12175_v34, %v11634_v26  ;;  %v12209_v34 = vld [vmem:[#allocation7 + $0x7d4] sm:$0xf]  ;;  %v11770_v26 = vld [vmem:[#allocation7 + $0x7d8] sm:$0xf0] }
 0x878   : > { %8938 = vmatpush.bf16.msrb.mxu1 %v11477_v52  ;;  %9052 = vmatpush.bf16.msrb.mxu2 %v11537_v5  ;;  %v8048_v20 = vpop.f32.mrf.mxu3  ;;  %v7921_v6 = vpop.f32.mrf.mxu1  ;;  %v11618_v52 = vld [vmem:[#allocation7 + $0x6a8] sm:$0xf0]  ;;  %v11680_v5 = vld [vmem:[#allocation7 + $0x720] sm:$0xf] }
 0x879   : > { %v7926_v57 = vadd.f32 %v7921_v6, %v15579_v40 }
 0x87a   : > { %9313 = vmatpush.bf16.msra.mxu3 %v11717_v55  ;;  %9433 = vmatpush.bf16.msrb.mxu0 %v11729_v36  ;;  %v15589_v32 = vpop.f32.mrf.mxu0  ;;  %v11672_v36 = vld [vmem:[#allocation7 + $0x710] sm:$0xf] }
 0x87b   : > { %8939 = vmatmul.bf16.vlgmr.msrb.gmra.mxu1 %v8836_v27  ;;  %9053 = vmatmul.bf16.vlgmr.msrb.gmra.mxu2 %v8963_v35  ;;  %v11696_v27 = vld [vmem:[#allocation7 + $0x740] sm:$0xf]  ;;  %v11674_v35 = vld [vmem:[#allocation7 + $0x718] sm:$0xf0]  ;;  %v15591_v55 = vadd.f32 %v8048_v20, %v7926_v57  ;;  %v11673_v8 = vor.u32 %v12186_v19, %v11672_v36  ;;  %v11749_v57 = vor.u32 %v12203_v62, %v11746_v4 }
 0x87c   : > { %9185 = vmatpush.bf16.msra.mxu1 %v11661_v38  ;;  %9299 = vmatpush.bf16.msra.mxu2 %v11721_v22  ;;  %v11697_v41 = vor.u32 %v12192_v63, %v11696_v27  ;;  %v11677_v56 = vor.u32 %v12185_v59, %v11674_v35  ;;  %v11621_v38 = vor.u32 %v12171_v47, %v11618_v52  ;;  %v11762_v63 = vld [vmem:[#allocation7 + $0x7c8] sm:$0xf0]  ;;  %v11738_v59 = vld [vmem:[#allocation7 + $0x798] sm:$0xf0] }
 0x87d   : > { %9434 = vmatmul.bf16.vlgmr.msrb.gmra.mxu0 %v9344_v23  ;;  %v11681_v22 = vor.u32 %v12188_v29, %v11680_v5  ;;  %v11773_v27 = vor.u32 %v12209_v34, %v11770_v26  ;;  %v11730_v5 = vld [vmem:[#allocation7 + $0x788] sm:$0xf0]  ;;  %v12216_v34 = vld [vmem:[%s15702_s9 + $0x8] sm:$0xff] }
 0x87e   : > { %9314 = vmatpush.bf16.msra.mxu3 %v11709_v24  ;;  %v8035_v40 = vpop.f32.mrf.mxu2 }
 0x87f   : > { %v8052_v10 = vadd.f32 %v8035_v40, %v7925_v25  ;;  %v9217_v25 = vrot.slane %v15552_v13, 3  ;;  %v12207_v13 = vld [vmem:[#allocation7 + $0x7c4] sm:$0xf] }
 0x880   : > { %9186 = vmatpush.bf16.msra.mxu1 %v11653_v7  ;;  %9300 = vmatpush.bf16.msra.mxu2 %v11713_v44  ;;  %v8050_v50 = vpop.f32.mrf.mxu3  ;;  %v7923_v24 = vpop.f32.mrf.mxu1  ;;  %v11765_v30 = vor.u32 %v12207_v13, %v11762_v63 }
 0x881   : > { %v8179_v7 = vadd.f32 %v15577_v21, %v8052_v10  ;;  %v11789_v21 = vor.u32 %v12213_v11, %v11786_v9  ;;  %v12221_v11 = vld [vmem:[%s15702_s9 + $0x30] sm:$0xff] }
 0x882   : > { %9315 = vmatpush.bf16.msra.mxu3 %v11701_v61  ;;  %v8418_v44 = vpop.f32.mrf.mxu0  ;;  %v11605_v61 = vor.u32 %v12167_v18, %v11602_v28 }
 0x884   : > { %9187 = vmatpush.bf16.msra.mxu1 %v11645_v0  ;;  %9301 = vmatpush.bf16.msra.mxu2 %v11705_v42  ;;  %v11665_v0 = vor.u32 %v12184_v48, %v11664_v3  ;;  %v12211_v42 = vld [vmem:[#allocation7 + $0x7e4] sm:$0xf]  ;;  %v12222_v48 = vld [vmem:[%s15702_s9 + $0x38] sm:$0xff] }
 0x885   : > { %v11781_v53 = vor.u32 %v12211_v42, %v11778_v51  ;;  %v12217_v42 = vld [vmem:[%s15702_s9 + $0x10] sm:$0xff] }
 0x886   : > { %9316 = vmatpush.bf16.msra.mxu3 %v11693_v17  ;;  %v8037_v12 = vpop.f32.mrf.mxu2 }
 0x887   : > { %v12219_v12 = vld [vmem:[%s15702_s9 + $0x20] sm:$0xff] }
 0x888   : > { %9188 = vmatpush.bf16.msra.mxu1 %v11637_v15  ;;  %9302 = vmatpush.bf16.msra.mxu2 %v11697_v41  ;;  %v12205_v41 = vld [vmem:[#allocation7 + $0x7b4] sm:$0xf] }
 0x889   : > { %v11757_v39 = vor.u32 %v12205_v41, %v11754_v49  ;;  %v12227_v41 = vld [vmem:[%s15702_s9 + $0x60] sm:$0xff] }
 0x88a   : > { %9317 = vmatpush.bf16.msra.mxu3 %v11685_v37 }
 0x88c   : > { %9189 = vmatpush.bf16.msra.mxu1 %v11629_v43  ;;  %9303 = vmatpush.bf16.msra.mxu2 %v11689_v14  ;;  %v12201_v14 = vld [vmem:[#allocation7 + $0x794] sm:$0xf] }
 0x88d   : > { %v11741_v52 = vor.u32 %v12201_v14, %v11738_v59 }
 0x88e   : > { %9318 = vmatpush.bf16.msra.mxu3 %v11677_v56 }
 0x890   : > { %9190 = vmatpush.bf16.msra.mxu1 %v11621_v38  ;;  %9304 = vmatpush.bf16.msra.mxu2 %v11681_v22 }
 0x892   : > { %9319 = vmatpush.bf16.msra.mxu3 %v11669_v1 }
 0x894   : > { %9191 = vmatpush.bf16.msra.mxu1 %v11613_v46  ;;  %9305 = vmatpush.bf16.msra.mxu2 %v11673_v8 }
 0x895   : > { %9320 = vmatmul.bf16.vlgmr.msra.gmra.mxu3 %v9217_v25 }
 0x898   : > { %9192 = vmatpush.bf16.msra.mxu1 %v11605_v61  ;;  %9306 = vmatpush.bf16.msra.mxu2 %v11665_v0  ;;  %v8175_v17 = vpop.f32.mrf.mxu1  ;;  %v8302_v15 = vpop.f32.mrf.mxu3  ;;  %v12218_v61 = vld [vmem:[%s15702_s9 + $0x18] sm:$0xff] }
 0x899   : > { %v8180_v58 = vadd.f32 %v8175_v17, %v15591_v55  ;;  %v12199_v55 = vld [vmem:[#allocation7 + $0x784] sm:$0xf] }
 0x89a   : > { %v8673_v20 = vpop.f32.mrf.mxu0  ;;  %v11733_v56 = vor.u32 %v12199_v55, %v11730_v5 }
 0x89b   : > { %9193 = vmatmul.bf16.vlgmr.msra.gmra.mxu1 %v9090_v33  ;;  %9307 = vmatmul.bf16.vlgmr.msra.gmra.mxu2 %v9217_v25  ;;  %v8307_v45 = vadd.f32 %v8302_v15, %v8180_v58  ;;  %v12220_v25 = vld [vmem:[%s15702_s9 + $0x28] sm:$0xff]  ;;  %v12226_v58 = vld [vmem:[%s15702_s9 + $0x58] sm:$0xff] }
 0x89c   : > { %9439 = vmatpush.bf16.msrb.mxu1 %v11789_v21  ;;  %9595 = vmatpush.bf16.msrb.mxu2 %v12222_v48  ;;  %v12228_v15 = vld [vmem:[%s15702_s9 + $0x68] sm:$0xff] }
 0x89e   : > { %v8289_v33 = vpop.f32.mrf.mxu2 }
 0x89f   : > { %v8306_v6 = vadd.f32 %v8289_v33, %v8179_v7  ;;  %v12223_v33 = vld [vmem:[%s15702_s9 + $0x40] sm:$0xff] }
 0x8a0   : > { %9440 = vmatpush.bf16.msrb.mxu1 %v11781_v53  ;;  %v8177_v37 = vpop.f32.mrf.mxu1  ;;  %v8304_v43 = vpop.f32.mrf.mxu3  ;;  %9596 = vmatpush.bf16.msrb.mxu2 %v12221_v11  ;;  %v12230_v53 = vld [vmem:[%s15702_s9 + $0x78] sm:$0xff] }
 0x8a1   : > { %v8433_v35 = vadd.f32 %v15589_v32, %v8306_v6  ;;  %9608 = vmatpush.bf16.msrb.mxu3 %v12230_v53  ;;  %v9454_v6 = vld [vmem:[%s15701_s8] sm:$0x3] }
 0x8a2   : > { %v8675_v47 = vpop.f32.mrf.mxu0  ;;  %v9456_v14 = vperm.slane %v9454_v6, 0 }
 0x8a4   : > { %9441 = vmatpush.bf16.msrb.mxu1 %v11773_v27  ;;  %9597 = vmatpush.bf16.msrb.mxu2 %v12220_v25  ;;  %v12229_v27 = vld [vmem:[%s15702_s9 + $0x70] sm:$0xff] }
 0x8a5   : > { %9609 = vmatpush.bf16.msrb.mxu3 %v12229_v27 }
 0x8a6   : > { %v8291_v29 = vpop.f32.mrf.mxu2 }
 0x8a8   : > { %9442 = vmatpush.bf16.msrb.mxu1 %v11765_v30  ;;  %9598 = vmatpush.bf16.msrb.mxu2 %v12219_v12  ;;  %v12215_v30 = vld [vmem:[%s15702_s9] sm:$0xff] }
 0x8a9   : > { %9610 = vmatpush.bf16.msrb.mxu3 %v12228_v15 }
 0x8ac   : > { %9443 = vmatpush.bf16.msrb.mxu1 %v11757_v39  ;;  %9599 = vmatpush.bf16.msrb.mxu2 %v12218_v61 }
 0x8ad   : > { %9611 = vmatpush.bf16.msrb.mxu3 %v12227_v41 }
 0x8b0   : > { %9444 = vmatpush.bf16.msrb.mxu1 %v11749_v57  ;;  %9600 = vmatpush.bf16.msrb.mxu2 %v12217_v42 }
 0x8b1   : > { %9612 = vmatpush.bf16.msrb.mxu3 %v12226_v58 }
 0x8b4   : > { %9445 = vmatpush.bf16.msrb.mxu1 %v11741_v52  ;;  %9601 = vmatpush.bf16.msrb.mxu2 %v12216_v34 }
 0x8b8   : > { %9446 = vmatpush.bf16.msrb.mxu1 %v11733_v56  ;;  %v8429_v40 = vpop.f32.mrf.mxu1  ;;  %v8554_v22 = vpop.f32.mrf.mxu3  ;;  %9602 = vmatpush.bf16.msrb.mxu2 %v12215_v30 }
 0x8b9   : > { %v8434_v38 = vadd.f32 %v8429_v40, %v8307_v45  ;;  %v12225_v45 = vld [vmem:[%s15702_s9 + $0x50] sm:$0xff] }
 0x8ba   : > { %v8927_v54 = vpop.f32.mrf.mxu0  ;;  %9613 = vmatpush.bf16.msrb.mxu3 %v12225_v45 }
 0x8bb   : > { %9447 = vmatmul.bf16.vlgmr.msrb.gmra.mxu1 %v9344_v23  ;;  %v8559_v16 = vadd.f32 %v8554_v22, %v8434_v38 }
 0x8be   : > { %v8541_v31 = vpop.f32.mrf.mxu2 }
 0x8bf   : > { %v8558_v10 = vadd.f32 %v8541_v31, %v8433_v35 }
 0x8c0   : > { %v8431_v32 = vpop.f32.mrf.mxu1  ;;  %v8556_v50 = vpop.f32.mrf.mxu3 }
 0x8c1   : > { %v8690_v60 = vadd.f32 %v8673_v20, %v8558_v10  ;;  %v12224_v20 = vld [vmem:[%s15702_s9 + $0x48] sm:$0xff] }
 0x8c2   : > { %v8929_v36 = vpop.f32.mrf.mxu0  ;;  %9614 = vmatpush.bf16.msrb.mxu3 %v12224_v20 }
 0x8c6   : > { %v8543_v19 = vpop.f32.mrf.mxu2  ;;  %9615 = vmatpush.bf16.msrb.mxu3 %v12223_v33 }
 0x8d8   : > { %v8686_v24 = vpop.f32.mrf.mxu1  ;;  %v8813_v1 = vpop.f32.mrf.mxu3 }
 0x8d9   : > { %v8691_v7 = vadd.f32 %v8686_v24, %v8559_v16  ;;  %v9457_v16 = vperm.slane %v9454_v6, 1  ;;  %v9498_v24 = vld [vmem:[%s15703_s10] sm:$0x1] }
 0x8da   : > { %v9181_v46 = vpop.f32.mrf.mxu0 }
 0x8db   : > { %v15601_v44 = vadd.f32 %v8813_v1, %v8691_v7 }
 0x8de   : > { %v8800_v2 = vpop.f32.mrf.mxu2 }
 0x8df   : > { %v8817_v23 = vadd.f32 %v8800_v2, %v8690_v60 }
 0x8e0   : > { %v8688_v8 = vpop.f32.mrf.mxu1  ;;  %v8815_v18 = vpop.f32.mrf.mxu3 }
 0x8e1   : > { %v8944_v28 = vadd.f32 %v8927_v54, %v8817_v23 }
 0x8e2   : > { %v9183_v3 = vpop.f32.mrf.mxu0 }
 0x8e6   : > { %v8802_v9 = vpop.f32.mrf.mxu2 }
 0x8f8   : > { %v8940_v0 = vpop.f32.mrf.mxu1  ;;  %v9067_v21 = vpop.f32.mrf.mxu3 }
 0x8f9   : > { %v8945_v56 = vadd.f32 %v8940_v0, %v15601_v44 }
 0x8fa   : > { %v9435_v51 = vpop.f32.mrf.mxu0 }
 0x8fb   : > { %v9072_v40 = vadd.f32 %v9067_v21, %v8945_v56 }
 0x8fe   : > { %v9054_v26 = vpop.f32.mrf.mxu2 }
 0x8ff   : > { %v9071_v62 = vadd.f32 %v9054_v26, %v8944_v28 }
 0x900   : > { %v8942_v13 = vpop.f32.mrf.mxu1  ;;  %v9069_v63 = vpop.f32.mrf.mxu3 }
 0x901   : > { %v9198_v57 = vadd.f32 %v9181_v46, %v9071_v62 }
 0x902   : > { %v9437_v17 = vpop.f32.mrf.mxu0 }
 0x906   : > { %v9056_v49 = vpop.f32.mrf.mxu2 }
 0x918   : > { %v9194_v39 = vpop.f32.mrf.mxu1  ;;  %v9321_v4 = vpop.f32.mrf.mxu3 }
 0x919   : > { %v9199_v38 = vadd.f32 %v9194_v39, %v9072_v40 }
 0x91b   : > { %v9326_v22 = vadd.f32 %v9321_v4, %v9199_v38 }
 0x91e   : > { %v9308_v37 = vpop.f32.mrf.mxu2 }
 0x91f   : > { %v9325_v43 = vadd.f32 %v9308_v37, %v9198_v57 }
 0x920   : > { %v9196_v59 = vpop.f32.mrf.mxu1  ;;  %v9323_v47 = vpop.f32.mrf.mxu3 }
 0x921   : > { %v9452_v35 = vadd.f32 %v9435_v51, %v9325_v43 }
 0x923   : > { %v9460_v52 = vadd.f32 %v9456_v14, %v9452_v35 }
 0x925   : > { %v9462_v55 = vmax.f32 %v9460_v52, 0.0 }
 0x926   : > { %v9310_v5 = vpop.f32.mrf.mxu2 }
 0x927   : > { %v9464_v29 = vpack.c.bf16 %v9462_v55, %v9462_v55 }
 0x929   : > { %9603 = vmatmul.bf16.vlgmr.msrb.gmra.mxu2 %v9464_v29 }
 0x938   : > { %v9448_v54 = vpop.f32.mrf.mxu1 }
 0x939   : > { %v9453_v31 = vadd.f32 %v9448_v54, %v9326_v22 }
 0x93b   : > { %v9461_v10 = vadd.f32 %v9457_v16, %v9453_v31 }
 0x93d   : > { %v9463_v32 = vmax.f32 %v9461_v10, 0.0 }
 0x93f   : > { %v9465_v50 = vpack.c.bf16 %v9463_v32, %v9463_v32 }
 0x940   : > { %v9450_v60 = vpop.f32.mrf.mxu1 }
 0x941   : > { %9616 = vmatmul.bf16.vlgmr.msrb.gmra.mxu3 %v9465_v50 }
 0x9ac   : > { %v9604_v36 = vpop.f32.mrf.mxu2 }
 0x9ad   : > { %v9605_v1 = vadd.f32 %v9604_v36, %v9498_v24 }
 0x9b4   : > { %v9606_v19 = vpop.f32.mrf.mxu2 }
 0x9c4   : > { %v9617_v7 = vpop.f32.mrf.mxu3 }
 0x9c5   : > { %v9618_v44 = vadd.f32 %v9617_v7, %v9605_v1 }
 0x9c7   : > { %9622 = vst.msk [vmem:[%s12727_s13] sm:$0x1] %vm9621_vm13, %v9618_v44 }
 0x9c8   : > { %12407 = shalt.err (!%p12404_p9)
}
 0x9c9   : > { %12239 = dma.vmem_to_hbm [thread:$0]  (%p12559_p5), %s9635_s25, 16, %s9637_s24, %s9624_s12  }
 0x9cc   : > { %v9619_v46 = vpop.f32.mrf.mxu3 }
 0x9cd PF: > { %p12251_p10 = scmp.ge.s32.totalorder %s12450_s20, 2  ;;  %s9648_s13 = sand.u32 1, %s12438_s17  }
 0x9ce   : > { %s9649_s7 = scalar_lea.sflag [#allocation9], %s9648_s13 }
 0x9cf   : > { %p12246_p11 = pnand %p12251_p10, %p12563_p6 }
 0x9d1   : > { %p12247_p12 = pneg %p12246_p11 }
 0x9d3   : > { %12433 = dma.done.wait (%p12247_p12), %s9649_s7, 16  }
 0x9d4   : > { %12435 = vsyncadd (%p12247_p12), %s9649_s7, 4294967280  ;;  %p22_p13 = scmp.ge.s32.totalorder %s12546_s23, 4   ;;  %s15819_s17 = smov %s12442_s18 }
 0x9d5   : > { %s15820_s18 = smov %s12446_s19  ;;  %s15821_s19 = smov %s12557_s26 }
 0x9d6   : > { %s15822_s20 = smov %s12546_s23  ;;  %24 = sbr.rel (!%p22_p13) target bundleno = 8 (0x8), region = 202 }
 0x9db   :  { %9654 = vsyncpa [#allocation8], 1 }
 0x9dc   :  { %9656 = vsyncpa [#allocation8 + $0x1], 1 }
 0x9dd   :  { %9657 = vsyncpa [#allocation9], 1 }
 0x9de   :  { %9659 = vsyncpa [#allocation9 + $0x1], 1 }

</bundles_post_ra>
